<compile_context>
chip_gen: v6e
topology: v6e:2x2x1
jax: 0.10.0
libtpu: 0.0.40
codegen_flags: <defaults>
</compile_context>

<pallas_src>
import jax
import jax.numpy as jnp
from jax import lax
from jax.experimental import pallas as pl
from jax.experimental.pallas import tpu as pltpu

HIDDEN = 128
NUM_LAYERS = 2  # hard-coded as layer-0 / layer-1 below (matches nn.LSTM(..., 2))


def _lstm_kernel(x_ref,      # (T, B, 1)  f32
                 wih0_ref,   # (1, 4H)    f32  w_ih_l0^T, cols [i,f,o,g], i/f/o *0.5
                 whh0_ref,   # (H, 4H)    f32  w_hh_l0^T, cols [i,f,o,g], i/f/o *0.5
                 b0_ref,     # (1, 4H)    f32  b_ih_l0 + b_hh_l0, same treatment
                 wih1_ref,   # (H, 4H)    f32  w_ih_l1^T, same treatment
                 whh1_ref,   # (H, 4H)    f32  w_hh_l1^T, same treatment
                 b1_ref,     # (1, 4H)    f32  b_ih_l1 + b_hh_l1, same treatment
                 wfc_ref,    # (1, H)     f32  fc.weight (row vector)
                 bfc_ref,    # (1, 1)     f32
                 out_ref):   # (B, 1)     f32
    T, B, _ = x_ref.shape
    H = whh0_ref.shape[0]

    # Hoist the small broadcasts above the loop (JAX does not CSE them).
    wih0b = jnp.broadcast_to(wih0_ref[...], (B, 4 * H))
    b0b = jnp.broadcast_to(b0_ref[...], (B, 4 * H))
    b1b = jnp.broadcast_to(b1_ref[...], (B, 4 * H))

    def cell(gates, c_prev):
        # Gate column order is [i, f, o, g].  The i/f/o columns were pre-scaled
        # by 0.5 in the wrapper, so sigmoid(z) = 0.5*tanh(0.5 z)+0.5 becomes a
        # bare tanh + affine here (no multiply between MXU pop and EUP tanh).
        s = 0.5 * jnp.tanh(gates[:, : 3 * H]) + 0.5
        i = s[:, 0 * H:1 * H]
        f = s[:, 1 * H:2 * H]
        o = s[:, 2 * H:3 * H]
        g = jnp.tanh(gates[:, 3 * H:4 * H])
        c = f * c_prev + i * g
        h = o * jnp.tanh(c)
        return h, c

    def step(t, carry):
        h0, c0, h1, c1 = carry

        # ---- layer-1 recurrent partial: depends only on last step's h1, so it
        # overlaps layer-0's matmul/cell under the unrolled loop. ------------
        g1_rec = jnp.dot(h1, whh1_ref[...],
                         preferred_element_type=jnp.float32) + b1b

        # ---- layer 0: input FMA (off critical path) + recurrent matmul -----
        gates0 = (x_ref[t] * wih0b + b0b
                  + jnp.dot(h0, whh0_ref[...],
                            preferred_element_type=jnp.float32))
        h0, c0 = cell(gates0, c0)

        # ---- layer 1 critical path: single K=H matmul on the fresh h0 ------
        gates1 = jnp.dot(h0, wih1_ref[...],
                         preferred_element_type=jnp.float32) + g1_rec
        h1, c1 = cell(gates1, c1)
        return (h0, c0, h1, c1)

    # States stay in vregs as loop carries (zero-initialized, PyTorch default).
    z = jnp.zeros((B, H), jnp.float32)
    # Unroll for LLO overlap; back off if B grows (vreg-pressure guard).
    unroll = True if T <= 32 else (8 if B <= 16 else 2)
    _, _, h1, _ = lax.fori_loop(0, T, step, (z, z, z, z), unroll=unroll)

    # fc on the last timestep's top-layer hidden state: VPU mul + lane reduce
    # (no MXU push/drain in the tail).
    out_ref[...] = (jnp.sum(h1 * wfc_ref[...], axis=-1, keepdims=True)
                    + bfc_ref[...])


def _prep_gate_cols(w):
    """Permute the last (4H) axis from PyTorch [i,f,g,o] to [i,f,o,g] and fold
    the sigmoid pre-scale (0.5) into the i/f/o columns (exact power-of-two
    scaling of trace-time constants)."""
    H = HIDDEN
    return jnp.concatenate(
        [0.5 * w[..., :2 * H],            # i, f
         0.5 * w[..., 3 * H:4 * H],       # o
         w[..., 2 * H:3 * H]],            # g (tanh gate, unscaled)
        axis=-1)


def lstm_forward(x, params):
    """x: (B, T, 1) float32.  Returns (B, 1) float32."""
    B, T, D_in = x.shape
    assert D_in == 1
    H = HIDDEN

    x_tb = jnp.transpose(x, (1, 0, 2))                                   # (T, B, 1)

    wih0 = _prep_gate_cols(params["w_ih0"].T)                            # (1, 4H)
    whh0 = _prep_gate_cols(params["w_hh0"].T)                            # (H, 4H)
    b0 = _prep_gate_cols((params["b_ih0"] + params["b_hh0"])[None, :])   # (1, 4H)
    wih1 = _prep_gate_cols(params["w_ih1"].T)                            # (H, 4H)
    whh1 = _prep_gate_cols(params["w_hh1"].T)                            # (H, 4H)
    b1 = _prep_gate_cols((params["b_ih1"] + params["b_hh1"])[None, :])   # (1, 4H)

    ins = (
        x_tb,
        wih0, whh0, b0,
        wih1, whh1, b1,
        params["w_fc"],            # (1, H) row vector for the VPU tail
        params["b_fc"][None, :],   # (1, 1)
    )

    vmem = pl.BlockSpec(memory_space=pltpu.MemorySpace.VMEM)
    out = pl.pallas_call(
        _lstm_kernel,
        out_shape=jax.ShapeDtypeStruct((B, 1), jnp.float32),
        in_specs=[vmem] * len(ins),
        out_specs=vmem,
    )(*ins)
    return out


def _ref_forward(x, params):
    """Pure-JAX reference identical to PyTorch nn.LSTM + Linear semantics."""
    B, T, _ = x.shape
    H = HIDDEN

    def cell(x_t, h, c, w_ih, w_hh, b_ih, b_hh):
        g = x_t @ w_ih.T + h @ w_hh.T + b_ih + b_hh
        i = jax.nn.sigmoid(g[:, 0 * H:1 * H])
        f = jax.nn.sigmoid(g[:, 1 * H:2 * H])
        gg = jnp.tanh(g[:, 2 * H:3 * H])
        o = jax.nn.sigmoid(g[:, 3 * H:4 * H])
        c = f * c + i * gg
        h = o * jnp.tanh(c)
        return h, c

    def scan_step(carry, x_t):
        h0, c0, h1, c1 = carry
        h0, c0 = cell(x_t, h0, c0, params["w_ih0"], params["w_hh0"],
                      params["b_ih0"], params["b_hh0"])
        h1, c1 = cell(h0, h1, c1, params["w_ih1"], params["w_hh1"],
                      params["b_ih1"], params["b_hh1"])
        return (h0, c0, h1, c1), h1

    z = jnp.zeros((B, H), jnp.float32)
    (_, _, h1, _), _ = lax.scan(scan_step, (z, z, z, z),
                                jnp.transpose(x, (1, 0, 2)))
    return h1 @ params["w_fc"].T + params["b_fc"]


def init_params(key):
    """Deterministic init matching PyTorch's U(-1/sqrt(H), 1/sqrt(H)) shapes."""
    H = HIDDEN
    bound = 1.0 / jnp.sqrt(jnp.float32(H))
    ks = jax.random.split(key, 10)
    u = lambda k, shape: jax.random.uniform(k, shape, jnp.float32, -bound, bound)
    return {
        "w_ih0": u(ks[0], (4 * H, 1)),
        "w_hh0": u(ks[1], (4 * H, H)),
        "b_ih0": u(ks[2], (4 * H,)),
        "b_hh0": u(ks[3], (4 * H,)),
        "w_ih1": u(ks[4], (4 * H, H)),
        "w_hh1": u(ks[5], (4 * H, H)),
        "b_ih1": u(ks[6], (4 * H,)),
        "b_hh1": u(ks[7], (4 * H,)),
        "w_fc": u(ks[8], (1, H)),
        "b_fc": u(ks[9], (1,)),
    }


if __name__ == "__main__":
    key = jax.random.PRNGKey(0)
    k_x, k_p = jax.random.split(key)

    B, T = 2, 8
    x = jax.random.normal(k_x, (B, T, 1), jnp.float32)
    params = init_params(k_p)

    out = jax.block_until_ready(lstm_forward(x, params))
    ref = jax.block_until_ready(_ref_forward(x, params))

    assert out.shape == (B, 1)
    assert jnp.allclose(out, ref, atol=1e-5, rtol=1e-5), (out, ref)
    print("KERNEL_OK")
</pallas_src>

<mosaic_0001>
module attributes {stable_mosaic.version = 11 : i64} {
  func.func @_lstm_kernel(%arg0: memref<8x2x1xf32, #tpu.memory_space<vmem>>, %arg1: memref<1x512xf32, #tpu.memory_space<vmem>>, %arg2: memref<128x512xf32, #tpu.memory_space<vmem>>, %arg3: memref<1x512xf32, #tpu.memory_space<vmem>>, %arg4: memref<128x512xf32, #tpu.memory_space<vmem>>, %arg5: memref<128x512xf32, #tpu.memory_space<vmem>>, %arg6: memref<1x512xf32, #tpu.memory_space<vmem>>, %arg7: memref<1x128xf32, #tpu.memory_space<vmem>>, %arg8: memref<1x1xf32, #tpu.memory_space<vmem>>, %arg9: memref<2x1xf32, #tpu.memory_space<vmem>>) attributes {dimension_semantics = [], scalar_prefetch = 0 : i64, scratch_operands = 0 : i64, tpu.core_type = #tpu.core_type<tc>} {
    %c0 = arith.constant 0 : index
    %c0_0 = arith.constant 0 : index
    %0 = vector.load %arg1[%c0, %c0_0] : memref<1x512xf32, #tpu.memory_space<vmem>>, vector<1x512xf32>
    %1 = vector.shape_cast %0 : vector<1x512xf32> to vector<1x512xf32>
    %2 = vector.broadcast %1 : vector<1x512xf32> to vector<2x512xf32>
    %c0_1 = arith.constant 0 : index
    %c0_2 = arith.constant 0 : index
    %3 = vector.load %arg3[%c0_1, %c0_2] : memref<1x512xf32, #tpu.memory_space<vmem>>, vector<1x512xf32>
    %4 = vector.shape_cast %3 : vector<1x512xf32> to vector<1x512xf32>
    %5 = vector.broadcast %4 : vector<1x512xf32> to vector<2x512xf32>
    %c0_3 = arith.constant 0 : index
    %c0_4 = arith.constant 0 : index
    %6 = vector.load %arg6[%c0_3, %c0_4] : memref<1x512xf32, #tpu.memory_space<vmem>>, vector<1x512xf32>
    %7 = vector.shape_cast %6 : vector<1x512xf32> to vector<1x512xf32>
    %8 = vector.broadcast %7 : vector<1x512xf32> to vector<2x512xf32>
    %cst = arith.constant 0.000000e+00 : f32
    %9 = vector.broadcast %cst : f32 to vector<2x128xf32>
    %c0_i32 = arith.constant 0 : i32
    %c0_5 = arith.constant 0 : index
    %c0_6 = arith.constant 0 : index
    %10 = vector.load %arg5[%c0_5, %c0_6] : memref<128x512xf32, #tpu.memory_space<vmem>>, vector<128x512xf32>
    %cst_7 = arith.constant dense<0.000000e+00> : vector<2x512xf32>
    %11 = tpu.matmul %9, %10, %cst_7 {dimension_numbers = #tpu.dot_dimension_numbers<[1], [0], [0], [1], [0, 0, 1, 1], [], []>} : vector<2x128xf32>, vector<128x512xf32>, vector<2x512xf32> -> vector<2x512xf32>
    %12 = arith.addf %11, %8 : vector<2x512xf32>
    %13 = arith.index_cast %c0_i32 : i32 to index
    %c0_8 = arith.constant 0 : index
    %c0_9 = arith.constant 0 : index
    %14 = vector.load %arg0[%13, %c0_8, %c0_9] : memref<8x2x1xf32, #tpu.memory_space<vmem>>, vector<1x2x1xf32>
    %15 = vector.shape_cast %14 : vector<1x2x1xf32> to vector<2x1xf32>
    %16 = vector.broadcast %15 : vector<2x1xf32> to vector<2x512xf32>
    %17 = arith.mulf %16, %2 : vector<2x512xf32>
    %18 = arith.addf %17, %5 : vector<2x512xf32>
    %c0_10 = arith.constant 0 : index
    %c0_11 = arith.constant 0 : index
    %19 = vector.load %arg2[%c0_10, %c0_11] : memref<128x512xf32, #tpu.memory_space<vmem>>, vector<128x512xf32>
    %cst_12 = arith.constant dense<0.000000e+00> : vector<2x512xf32>
    %20 = tpu.matmul %9, %19, %cst_12 {dimension_numbers = #tpu.dot_dimension_numbers<[1], [0], [0], [1], [0, 0, 1, 1], [], []>} : vector<2x128xf32>, vector<128x512xf32>, vector<2x512xf32> -> vector<2x512xf32>
    %21 = arith.addf %18, %20 : vector<2x512xf32>
    %22 = vector.extract_strided_slice %21 {offsets = [0, 0], sizes = [2, 384], strides = [1, 1]} : vector<2x512xf32> to vector<2x384xf32>
    %23 = math.tanh %22 : vector<2x384xf32>
    %cst_13 = arith.constant 5.000000e-01 : f32
    %24 = vector.broadcast %cst_13 : f32 to vector<2x384xf32>
    %25 = arith.mulf %24, %23 : vector<2x384xf32>
    %cst_14 = arith.constant 5.000000e-01 : f32
    %26 = vector.broadcast %cst_14 : f32 to vector<2x384xf32>
    %27 = arith.addf %25, %26 : vector<2x384xf32>
    %28 = vector.extract_strided_slice %27 {offsets = [0, 0], sizes = [2, 128], strides = [1, 1]} : vector<2x384xf32> to vector<2x128xf32>
    %29 = vector.extract_strided_slice %27 {offsets = [0, 128], sizes = [2, 128], strides = [1, 1]} : vector<2x384xf32> to vector<2x128xf32>
    %30 = vector.extract_strided_slice %27 {offsets = [0, 256], sizes = [2, 128], strides = [1, 1]} : vector<2x384xf32> to vector<2x128xf32>
    %31 = vector.extract_strided_slice %21 {offsets = [0, 384], sizes = [2, 128], strides = [1, 1]} : vector<2x512xf32> to vector<2x128xf32>
    %32 = math.tanh %31 : vector<2x128xf32>
    %33 = arith.mulf %29, %9 : vector<2x128xf32>
    %34 = arith.mulf %28, %32 : vector<2x128xf32>
    %35 = arith.addf %33, %34 : vector<2x128xf32>
    %36 = math.tanh %35 : vector<2x128xf32>
    %37 = arith.mulf %30, %36 : vector<2x128xf32>
    %c0_15 = arith.constant 0 : index
    %c0_16 = arith.constant 0 : index
    %38 = vector.load %arg4[%c0_15, %c0_16] : memref<128x512xf32, #tpu.memory_space<vmem>>, vector<128x512xf32>
    %cst_17 = arith.constant dense<0.000000e+00> : vector<2x512xf32>
    %39 = tpu.matmul %37, %38, %cst_17 {dimension_numbers = #tpu.dot_dimension_numbers<[1], [0], [0], [1], [0, 0, 1, 1], [], []>} : vector<2x128xf32>, vector<128x512xf32>, vector<2x512xf32> -> vector<2x512xf32>
    %40 = arith.addf %39, %12 : vector<2x512xf32>
    %41 = vector.extract_strided_slice %40 {offsets = [0, 0], sizes = [2, 384], strides = [1, 1]} : vector<2x512xf32> to vector<2x384xf32>
    %42 = math.tanh %41 : vector<2x384xf32>
    %cst_18 = arith.constant 5.000000e-01 : f32
    %43 = vector.broadcast %cst_18 : f32 to vector<2x384xf32>
    %44 = arith.mulf %43, %42 : vector<2x384xf32>
    %cst_19 = arith.constant 5.000000e-01 : f32
    %45 = vector.broadcast %cst_19 : f32 to vector<2x384xf32>
    %46 = arith.addf %44, %45 : vector<2x384xf32>
    %47 = vector.extract_strided_slice %46 {offsets = [0, 0], sizes = [2, 128], strides = [1, 1]} : vector<2x384xf32> to vector<2x128xf32>
    %48 = vector.extract_strided_slice %46 {offsets = [0, 128], sizes = [2, 128], strides = [1, 1]} : vector<2x384xf32> to vector<2x128xf32>
    %49 = vector.extract_strided_slice %46 {offsets = [0, 256], sizes = [2, 128], strides = [1, 1]} : vector<2x384xf32> to vector<2x128xf32>
    %50 = vector.extract_strided_slice %40 {offsets = [0, 384], sizes = [2, 128], strides = [1, 1]} : vector<2x512xf32> to vector<2x128xf32>
    %51 = math.tanh %50 : vector<2x128xf32>
    %52 = arith.mulf %48, %9 : vector<2x128xf32>
    %53 = arith.mulf %47, %51 : vector<2x128xf32>
    %54 = arith.addf %52, %53 : vector<2x128xf32>
    %55 = math.tanh %54 : vector<2x128xf32>
    %56 = arith.mulf %49, %55 : vector<2x128xf32>
    %c1_i32 = arith.constant 1 : i32
    %c0_20 = arith.constant 0 : index
    %c0_21 = arith.constant 0 : index
    %57 = vector.load %arg5[%c0_20, %c0_21] : memref<128x512xf32, #tpu.memory_space<vmem>>, vector<128x512xf32>
    %cst_22 = arith.constant dense<0.000000e+00> : vector<2x512xf32>
    %58 = tpu.matmul %56, %57, %cst_22 {dimension_numbers = #tpu.dot_dimension_numbers<[1], [0], [0], [1], [0, 0, 1, 1], [], []>} : vector<2x128xf32>, vector<128x512xf32>, vector<2x512xf32> -> vector<2x512xf32>
    %59 = arith.addf %58, %8 : vector<2x512xf32>
    %60 = arith.index_cast %c1_i32 : i32 to index
    %c0_23 = arith.constant 0 : index
    %c0_24 = arith.constant 0 : index
    %61 = vector.load %arg0[%60, %c0_23, %c0_24] : memref<8x2x1xf32, #tpu.memory_space<vmem>>, vector<1x2x1xf32>
    %62 = vector.shape_cast %61 : vector<1x2x1xf32> to vector<2x1xf32>
    %63 = vector.broadcast %62 : vector<2x1xf32> to vector<2x512xf32>
    %64 = arith.mulf %63, %2 : vector<2x512xf32>
    %65 = arith.addf %64, %5 : vector<2x512xf32>
    %c0_25 = arith.constant 0 : index
    %c0_26 = arith.constant 0 : index
    %66 = vector.load %arg2[%c0_25, %c0_26] : memref<128x512xf32, #tpu.memory_space<vmem>>, vector<128x512xf32>
    %cst_27 = arith.constant dense<0.000000e+00> : vector<2x512xf32>
    %67 = tpu.matmul %37, %66, %cst_27 {dimension_numbers = #tpu.dot_dimension_numbers<[1], [0], [0], [1], [0, 0, 1, 1], [], []>} : vector<2x128xf32>, vector<128x512xf32>, vector<2x512xf32> -> vector<2x512xf32>
    %68 = arith.addf %65, %67 : vector<2x512xf32>
    %69 = vector.extract_strided_slice %68 {offsets = [0, 0], sizes = [2, 384], strides = [1, 1]} : vector<2x512xf32> to vector<2x384xf32>
    %70 = math.tanh %69 : vector<2x384xf32>
    %cst_28 = arith.constant 5.000000e-01 : f32
    %71 = vector.broadcast %cst_28 : f32 to vector<2x384xf32>
    %72 = arith.mulf %71, %70 : vector<2x384xf32>
    %cst_29 = arith.constant 5.000000e-01 : f32
    %73 = vector.broadcast %cst_29 : f32 to vector<2x384xf32>
    %74 = arith.addf %72, %73 : vector<2x384xf32>
    %75 = vector.extract_strided_slice %74 {offsets = [0, 0], sizes = [2, 128], strides = [1, 1]} : vector<2x384xf32> to vector<2x128xf32>
    %76 = vector.extract_strided_slice %74 {offsets = [0, 128], sizes = [2, 128], strides = [1, 1]} : vector<2x384xf32> to vector<2x128xf32>
    %77 = vector.extract_strided_slice %74 {offsets = [0, 256], sizes = [2, 128], strides = [1, 1]} : vector<2x384xf32> to vector<2x128xf32>
    %78 = vector.extract_strided_slice %68 {offsets = [0, 384], sizes = [2, 128], strides = [1, 1]} : vector<2x512xf32> to vector<2x128xf32>
    %79 = math.tanh %78 : vector<2x128xf32>
    %80 = arith.mulf %76, %35 : vector<2x128xf32>
    %81 = arith.mulf %75, %79 : vector<2x128xf32>
    %82 = arith.addf %80, %81 : vector<2x128xf32>
    %83 = math.tanh %82 : vector<2x128xf32>
    %84 = arith.mulf %77, %83 : vector<2x128xf32>
    %c0_30 = arith.constant 0 : index
    %c0_31 = arith.constant 0 : index
    %85 = vector.load %arg4[%c0_30, %c0_31] : memref<128x512xf32, #tpu.memory_space<vmem>>, vector<128x512xf32>
    %cst_32 = arith.constant dense<0.000000e+00> : vector<2x512xf32>
    %86 = tpu.matmul %84, %85, %cst_32 {dimension_numbers = #tpu.dot_dimension_numbers<[1], [0], [0], [1], [0, 0, 1, 1], [], []>} : vector<2x128xf32>, vector<128x512xf32>, vector<2x512xf32> -> vector<2x512xf32>
    %87 = arith.addf %86, %59 : vector<2x512xf32>
    %88 = vector.extract_strided_slice %87 {offsets = [0, 0], sizes = [2, 384], strides = [1, 1]} : vector<2x512xf32> to vector<2x384xf32>
    %89 = math.tanh %88 : vector<2x384xf32>
    %cst_33 = arith.constant 5.000000e-01 : f32
    %90 = vector.broadcast %cst_33 : f32 to vector<2x384xf32>
    %91 = arith.mulf %90, %89 : vector<2x384xf32>
    %cst_34 = arith.constant 5.000000e-01 : f32
    %92 = vector.broadcast %cst_34 : f32 to vector<2x384xf32>
    %93 = arith.addf %91, %92 : vector<2x384xf32>
    %94 = vector.extract_strided_slice %93 {offsets = [0, 0], sizes = [2, 128], strides = [1, 1]} : vector<2x384xf32> to vector<2x128xf32>
    %95 = vector.extract_strided_slice %93 {offsets = [0, 128], sizes = [2, 128], strides = [1, 1]} : vector<2x384xf32> to vector<2x128xf32>
    %96 = vector.extract_strided_slice %93 {offsets = [0, 256], sizes = [2, 128], strides = [1, 1]} : vector<2x384xf32> to vector<2x128xf32>
    %97 = vector.extract_strided_slice %87 {offsets = [0, 384], sizes = [2, 128], strides = [1, 1]} : vector<2x512xf32> to vector<2x128xf32>
    %98 = math.tanh %97 : vector<2x128xf32>
    %99 = arith.mulf %95, %54 : vector<2x128xf32>
    %100 = arith.mulf %94, %98 : vector<2x128xf32>
    %101 = arith.addf %99, %100 : vector<2x128xf32>
    %102 = math.tanh %101 : vector<2x128xf32>
    %103 = arith.mulf %96, %102 : vector<2x128xf32>
    %c2_i32 = arith.constant 2 : i32
    %c0_35 = arith.constant 0 : index
    %c0_36 = arith.constant 0 : index
    %104 = vector.load %arg5[%c0_35, %c0_36] : memref<128x512xf32, #tpu.memory_space<vmem>>, vector<128x512xf32>
    %cst_37 = arith.constant dense<0.000000e+00> : vector<2x512xf32>
    %105 = tpu.matmul %103, %104, %cst_37 {dimension_numbers = #tpu.dot_dimension_numbers<[1], [0], [0], [1], [0, 0, 1, 1], [], []>} : vector<2x128xf32>, vector<128x512xf32>, vector<2x512xf32> -> vector<2x512xf32>
    %106 = arith.addf %105, %8 : vector<2x512xf32>
    %107 = arith.index_cast %c2_i32 : i32 to index
    %c0_38 = arith.constant 0 : index
    %c0_39 = arith.constant 0 : index
    %108 = vector.load %arg0[%107, %c0_38, %c0_39] : memref<8x2x1xf32, #tpu.memory_space<vmem>>, vector<1x2x1xf32>
    %109 = vector.shape_cast %108 : vector<1x2x1xf32> to vector<2x1xf32>
    %110 = vector.broadcast %109 : vector<2x1xf32> to vector<2x512xf32>
    %111 = arith.mulf %110, %2 : vector<2x512xf32>
    %112 = arith.addf %111, %5 : vector<2x512xf32>
    %c0_40 = arith.constant 0 : index
    %c0_41 = arith.constant 0 : index
    %113 = vector.load %arg2[%c0_40, %c0_41] : memref<128x512xf32, #tpu.memory_space<vmem>>, vector<128x512xf32>
    %cst_42 = arith.constant dense<0.000000e+00> : vector<2x512xf32>
    %114 = tpu.matmul %84, %113, %cst_42 {dimension_numbers = #tpu.dot_dimension_numbers<[1], [0], [0], [1], [0, 0, 1, 1], [], []>} : vector<2x128xf32>, vector<128x512xf32>, vector<2x512xf32> -> vector<2x512xf32>
    %115 = arith.addf %112, %114 : vector<2x512xf32>
    %116 = vector.extract_strided_slice %115 {offsets = [0, 0], sizes = [2, 384], strides = [1, 1]} : vector<2x512xf32> to vector<2x384xf32>
    %117 = math.tanh %116 : vector<2x384xf32>
    %cst_43 = arith.constant 5.000000e-01 : f32
    %118 = vector.broadcast %cst_43 : f32 to vector<2x384xf32>
    %119 = arith.mulf %118, %117 : vector<2x384xf32>
    %cst_44 = arith.constant 5.000000e-01 : f32
    %120 = vector.broadcast %cst_44 : f32 to vector<2x384xf32>
    %121 = arith.addf %119, %120 : vector<2x384xf32>
    %122 = vector.extract_strided_slice %121 {offsets = [0, 0], sizes = [2, 128], strides = [1, 1]} : vector<2x384xf32> to vector<2x128xf32>
    %123 = vector.extract_strided_slice %121 {offsets = [0, 128], sizes = [2, 128], strides = [1, 1]} : vector<2x384xf32> to vector<2x128xf32>
    %124 = vector.extract_strided_slice %121 {offsets = [0, 256], sizes = [2, 128], strides = [1, 1]} : vector<2x384xf32> to vector<2x128xf32>
    %125 = vector.extract_strided_slice %115 {offsets = [0, 384], sizes = [2, 128], strides = [1, 1]} : vector<2x512xf32> to vector<2x128xf32>
    %126 = math.tanh %125 : vector<2x128xf32>
    %127 = arith.mulf %123, %82 : vector<2x128xf32>
    %128 = arith.mulf %122, %126 : vector<2x128xf32>
    %129 = arith.addf %127, %128 : vector<2x128xf32>
    %130 = math.tanh %129 : vector<2x128xf32>
    %131 = arith.mulf %124, %130 : vector<2x128xf32>
    %c0_45 = arith.constant 0 : index
    %c0_46 = arith.constant 0 : index
    %132 = vector.load %arg4[%c0_45, %c0_46] : memref<128x512xf32, #tpu.memory_space<vmem>>, vector<128x512xf32>
    %cst_47 = arith.constant dense<0.000000e+00> : vector<2x512xf32>
    %133 = tpu.matmul %131, %132, %cst_47 {dimension_numbers = #tpu.dot_dimension_numbers<[1], [0], [0], [1], [0, 0, 1, 1], [], []>} : vector<2x128xf32>, vector<128x512xf32>, vector<2x512xf32> -> vector<2x512xf32>
    %134 = arith.addf %133, %106 : vector<2x512xf32>
    %135 = vector.extract_strided_slice %134 {offsets = [0, 0], sizes = [2, 384], strides = [1, 1]} : vector<2x512xf32> to vector<2x384xf32>
    %136 = math.tanh %135 : vector<2x384xf32>
    %cst_48 = arith.constant 5.000000e-01 : f32
    %137 = vector.broadcast %cst_48 : f32 to vector<2x384xf32>
    %138 = arith.mulf %137, %136 : vector<2x384xf32>
    %cst_49 = arith.constant 5.000000e-01 : f32
    %139 = vector.broadcast %cst_49 : f32 to vector<2x384xf32>
    %140 = arith.addf %138, %139 : vector<2x384xf32>
    %141 = vector.extract_strided_slice %140 {offsets = [0, 0], sizes = [2, 128], strides = [1, 1]} : vector<2x384xf32> to vector<2x128xf32>
    %142 = vector.extract_strided_slice %140 {offsets = [0, 128], sizes = [2, 128], strides = [1, 1]} : vector<2x384xf32> to vector<2x128xf32>
    %143 = vector.extract_strided_slice %140 {offsets = [0, 256], sizes = [2, 128], strides = [1, 1]} : vector<2x384xf32> to vector<2x128xf32>
    %144 = vector.extract_strided_slice %134 {offsets = [0, 384], sizes = [2, 128], strides = [1, 1]} : vector<2x512xf32> to vector<2x128xf32>
    %145 = math.tanh %144 : vector<2x128xf32>
    %146 = arith.mulf %142, %101 : vector<2x128xf32>
    %147 = arith.mulf %141, %145 : vector<2x128xf32>
    %148 = arith.addf %146, %147 : vector<2x128xf32>
    %149 = math.tanh %148 : vector<2x128xf32>
    %150 = arith.mulf %143, %149 : vector<2x128xf32>
    %c3_i32 = arith.constant 3 : i32
    %c0_50 = arith.constant 0 : index
    %c0_51 = arith.constant 0 : index
    %151 = vector.load %arg5[%c0_50, %c0_51] : memref<128x512xf32, #tpu.memory_space<vmem>>, vector<128x512xf32>
    %cst_52 = arith.constant dense<0.000000e+00> : vector<2x512xf32>
    %152 = tpu.matmul %150, %151, %cst_52 {dimension_numbers = #tpu.dot_dimension_numbers<[1], [0], [0], [1], [0, 0, 1, 1], [], []>} : vector<2x128xf32>, vector<128x512xf32>, vector<2x512xf32> -> vector<2x512xf32>
    %153 = arith.addf %152, %8 : vector<2x512xf32>
    %154 = arith.index_cast %c3_i32 : i32 to index
    %c0_53 = arith.constant 0 : index
    %c0_54 = arith.constant 0 : index
    %155 = vector.load %arg0[%154, %c0_53, %c0_54] : memref<8x2x1xf32, #tpu.memory_space<vmem>>, vector<1x2x1xf32>
    %156 = vector.shape_cast %155 : vector<1x2x1xf32> to vector<2x1xf32>
    %157 = vector.broadcast %156 : vector<2x1xf32> to vector<2x512xf32>
    %158 = arith.mulf %157, %2 : vector<2x512xf32>
    %159 = arith.addf %158, %5 : vector<2x512xf32>
    %c0_55 = arith.constant 0 : index
    %c0_56 = arith.constant 0 : index
    %160 = vector.load %arg2[%c0_55, %c0_56] : memref<128x512xf32, #tpu.memory_space<vmem>>, vector<128x512xf32>
    %cst_57 = arith.constant dense<0.000000e+00> : vector<2x512xf32>
    %161 = tpu.matmul %131, %160, %cst_57 {dimension_numbers = #tpu.dot_dimension_numbers<[1], [0], [0], [1], [0, 0, 1, 1], [], []>} : vector<2x128xf32>, vector<128x512xf32>, vector<2x512xf32> -> vector<2x512xf32>
    %162 = arith.addf %159, %161 : vector<2x512xf32>
    %163 = vector.extract_strided_slice %162 {offsets = [0, 0], sizes = [2, 384], strides = [1, 1]} : vector<2x512xf32> to vector<2x384xf32>
    %164 = math.tanh %163 : vector<2x384xf32>
    %cst_58 = arith.constant 5.000000e-01 : f32
    %165 = vector.broadcast %cst_58 : f32 to vector<2x384xf32>
    %166 = arith.mulf %165, %164 : vector<2x384xf32>
    %cst_59 = arith.constant 5.000000e-01 : f32
    %167 = vector.broadcast %cst_59 : f32 to vector<2x384xf32>
    %168 = arith.addf %166, %167 : vector<2x384xf32>
    %169 = vector.extract_strided_slice %168 {offsets = [0, 0], sizes = [2, 128], strides = [1, 1]} : vector<2x384xf32> to vector<2x128xf32>
    %170 = vector.extract_strided_slice %168 {offsets = [0, 128], sizes = [2, 128], strides = [1, 1]} : vector<2x384xf32> to vector<2x128xf32>
    %171 = vector.extract_strided_slice %168 {offsets = [0, 256], sizes = [2, 128], strides = [1, 1]} : vector<2x384xf32> to vector<2x128xf32>
    %172 = vector.extract_strided_slice %162 {offsets = [0, 384], sizes = [2, 128], strides = [1, 1]} : vector<2x512xf32> to vector<2x128xf32>
    %173 = math.tanh %172 : vector<2x128xf32>
    %174 = arith.mulf %170, %129 : vector<2x128xf32>
    %175 = arith.mulf %169, %173 : vector<2x128xf32>
    %176 = arith.addf %174, %175 : vector<2x128xf32>
    %177 = math.tanh %176 : vector<2x128xf32>
    %178 = arith.mulf %171, %177 : vector<2x128xf32>
    %c0_60 = arith.constant 0 : index
    %c0_61 = arith.constant 0 : index
    %179 = vector.load %arg4[%c0_60, %c0_61] : memref<128x512xf32, #tpu.memory_space<vmem>>, vector<128x512xf32>
    %cst_62 = arith.constant dense<0.000000e+00> : vector<2x512xf32>
    %180 = tpu.matmul %178, %179, %cst_62 {dimension_numbers = #tpu.dot_dimension_numbers<[1], [0], [0], [1], [0, 0, 1, 1], [], []>} : vector<2x128xf32>, vector<128x512xf32>, vector<2x512xf32> -> vector<2x512xf32>
    %181 = arith.addf %180, %153 : vector<2x512xf32>
    %182 = vector.extract_strided_slice %181 {offsets = [0, 0], sizes = [2, 384], strides = [1, 1]} : vector<2x512xf32> to vector<2x384xf32>
    %183 = math.tanh %182 : vector<2x384xf32>
    %cst_63 = arith.constant 5.000000e-01 : f32
    %184 = vector.broadcast %cst_63 : f32 to vector<2x384xf32>
    %185 = arith.mulf %184, %183 : vector<2x384xf32>
    %cst_64 = arith.constant 5.000000e-01 : f32
    %186 = vector.broadcast %cst_64 : f32 to vector<2x384xf32>
    %187 = arith.addf %185, %186 : vector<2x384xf32>
    %188 = vector.extract_strided_slice %187 {offsets = [0, 0], sizes = [2, 128], strides = [1, 1]} : vector<2x384xf32> to vector<2x128xf32>
    %189 = vector.extract_strided_slice %187 {offsets = [0, 128], sizes = [2, 128], strides = [1, 1]} : vector<2x384xf32> to vector<2x128xf32>
    %190 = vector.extract_strided_slice %187 {offsets = [0, 256], sizes = [2, 128], strides = [1, 1]} : vector<2x384xf32> to vector<2x128xf32>
    %191 = vector.extract_strided_slice %181 {offsets = [0, 384], sizes = [2, 128], strides = [1, 1]} : vector<2x512xf32> to vector<2x128xf32>
    %192 = math.tanh %191 : vector<2x128xf32>
    %193 = arith.mulf %189, %148 : vector<2x128xf32>
    %194 = arith.mulf %188, %192 : vector<2x128xf32>
    %195 = arith.addf %193, %194 : vector<2x128xf32>
    %196 = math.tanh %195 : vector<2x128xf32>
    %197 = arith.mulf %190, %196 : vector<2x128xf32>
    %c4_i32 = arith.constant 4 : i32
    %c0_65 = arith.constant 0 : index
    %c0_66 = arith.constant 0 : index
    %198 = vector.load %arg5[%c0_65, %c0_66] : memref<128x512xf32, #tpu.memory_space<vmem>>, vector<128x512xf32>
    %cst_67 = arith.constant dense<0.000000e+00> : vector<2x512xf32>
    %199 = tpu.matmul %197, %198, %cst_67 {dimension_numbers = #tpu.dot_dimension_numbers<[1], [0], [0], [1], [0, 0, 1, 1], [], []>} : vector<2x128xf32>, vector<128x512xf32>, vector<2x512xf32> -> vector<2x512xf32>
    %200 = arith.addf %199, %8 : vector<2x512xf32>
    %201 = arith.index_cast %c4_i32 : i32 to index
    %c0_68 = arith.constant 0 : index
    %c0_69 = arith.constant 0 : index
    %202 = vector.load %arg0[%201, %c0_68, %c0_69] : memref<8x2x1xf32, #tpu.memory_space<vmem>>, vector<1x2x1xf32>
    %203 = vector.shape_cast %202 : vector<1x2x1xf32> to vector<2x1xf32>
    %204 = vector.broadcast %203 : vector<2x1xf32> to vector<2x512xf32>
    %205 = arith.mulf %204, %2 : vector<2x512xf32>
    %206 = arith.addf %205, %5 : vector<2x512xf32>
    %c0_70 = arith.constant 0 : index
    %c0_71 = arith.constant 0 : index
    %207 = vector.load %arg2[%c0_70, %c0_71] : memref<128x512xf32, #tpu.memory_space<vmem>>, vector<128x512xf32>
    %cst_72 = arith.constant dense<0.000000e+00> : vector<2x512xf32>
    %208 = tpu.matmul %178, %207, %cst_72 {dimension_numbers = #tpu.dot_dimension_numbers<[1], [0], [0], [1], [0, 0, 1, 1], [], []>} : vector<2x128xf32>, vector<128x512xf32>, vector<2x512xf32> -> vector<2x512xf32>
    %209 = arith.addf %206, %208 : vector<2x512xf32>
    %210 = vector.extract_strided_slice %209 {offsets = [0, 0], sizes = [2, 384], strides = [1, 1]} : vector<2x512xf32> to vector<2x384xf32>
    %211 = math.tanh %210 : vector<2x384xf32>
    %cst_73 = arith.constant 5.000000e-01 : f32
    %212 = vector.broadcast %cst_73 : f32 to vector<2x384xf32>
    %213 = arith.mulf %212, %211 : vector<2x384xf32>
    %cst_74 = arith.constant 5.000000e-01 : f32
    %214 = vector.broadcast %cst_74 : f32 to vector<2x384xf32>
    %215 = arith.addf %213, %214 : vector<2x384xf32>
    %216 = vector.extract_strided_slice %215 {offsets = [0, 0], sizes = [2, 128], strides = [1, 1]} : vector<2x384xf32> to vector<2x128xf32>
    %217 = vector.extract_strided_slice %215 {offsets = [0, 128], sizes = [2, 128], strides = [1, 1]} : vector<2x384xf32> to vector<2x128xf32>
    %218 = vector.extract_strided_slice %215 {offsets = [0, 256], sizes = [2, 128], strides = [1, 1]} : vector<2x384xf32> to vector<2x128xf32>
    %219 = vector.extract_strided_slice %209 {offsets = [0, 384], sizes = [2, 128], strides = [1, 1]} : vector<2x512xf32> to vector<2x128xf32>
    %220 = math.tanh %219 : vector<2x128xf32>
    %221 = arith.mulf %217, %176 : vector<2x128xf32>
    %222 = arith.mulf %216, %220 : vector<2x128xf32>
    %223 = arith.addf %221, %222 : vector<2x128xf32>
    %224 = math.tanh %223 : vector<2x128xf32>
    %225 = arith.mulf %218, %224 : vector<2x128xf32>
    %c0_75 = arith.constant 0 : index
    %c0_76 = arith.constant 0 : index
    %226 = vector.load %arg4[%c0_75, %c0_76] : memref<128x512xf32, #tpu.memory_space<vmem>>, vector<128x512xf32>
    %cst_77 = arith.constant dense<0.000000e+00> : vector<2x512xf32>
    %227 = tpu.matmul %225, %226, %cst_77 {dimension_numbers = #tpu.dot_dimension_numbers<[1], [0], [0], [1], [0, 0, 1, 1], [], []>} : vector<2x128xf32>, vector<128x512xf32>, vector<2x512xf32> -> vector<2x512xf32>
    %228 = arith.addf %227, %200 : vector<2x512xf32>
    %229 = vector.extract_strided_slice %228 {offsets = [0, 0], sizes = [2, 384], strides = [1, 1]} : vector<2x512xf32> to vector<2x384xf32>
    %230 = math.tanh %229 : vector<2x384xf32>
    %cst_78 = arith.constant 5.000000e-01 : f32
    %231 = vector.broadcast %cst_78 : f32 to vector<2x384xf32>
    %232 = arith.mulf %231, %230 : vector<2x384xf32>
    %cst_79 = arith.constant 5.000000e-01 : f32
    %233 = vector.broadcast %cst_79 : f32 to vector<2x384xf32>
    %234 = arith.addf %232, %233 : vector<2x384xf32>
    %235 = vector.extract_strided_slice %234 {offsets = [0, 0], sizes = [2, 128], strides = [1, 1]} : vector<2x384xf32> to vector<2x128xf32>
    %236 = vector.extract_strided_slice %234 {offsets = [0, 128], sizes = [2, 128], strides = [1, 1]} : vector<2x384xf32> to vector<2x128xf32>
    %237 = vector.extract_strided_slice %234 {offsets = [0, 256], sizes = [2, 128], strides = [1, 1]} : vector<2x384xf32> to vector<2x128xf32>
    %238 = vector.extract_strided_slice %228 {offsets = [0, 384], sizes = [2, 128], strides = [1, 1]} : vector<2x512xf32> to vector<2x128xf32>
    %239 = math.tanh %238 : vector<2x128xf32>
    %240 = arith.mulf %236, %195 : vector<2x128xf32>
    %241 = arith.mulf %235, %239 : vector<2x128xf32>
    %242 = arith.addf %240, %241 : vector<2x128xf32>
    %243 = math.tanh %242 : vector<2x128xf32>
    %244 = arith.mulf %237, %243 : vector<2x128xf32>
    %c5_i32 = arith.constant 5 : i32
    %c0_80 = arith.constant 0 : index
    %c0_81 = arith.constant 0 : index
    %245 = vector.load %arg5[%c0_80, %c0_81] : memref<128x512xf32, #tpu.memory_space<vmem>>, vector<128x512xf32>
    %cst_82 = arith.constant dense<0.000000e+00> : vector<2x512xf32>
    %246 = tpu.matmul %244, %245, %cst_82 {dimension_numbers = #tpu.dot_dimension_numbers<[1], [0], [0], [1], [0, 0, 1, 1], [], []>} : vector<2x128xf32>, vector<128x512xf32>, vector<2x512xf32> -> vector<2x512xf32>
    %247 = arith.addf %246, %8 : vector<2x512xf32>
    %248 = arith.index_cast %c5_i32 : i32 to index
    %c0_83 = arith.constant 0 : index
    %c0_84 = arith.constant 0 : index
    %249 = vector.load %arg0[%248, %c0_83, %c0_84] : memref<8x2x1xf32, #tpu.memory_space<vmem>>, vector<1x2x1xf32>
    %250 = vector.shape_cast %249 : vector<1x2x1xf32> to vector<2x1xf32>
    %251 = vector.broadcast %250 : vector<2x1xf32> to vector<2x512xf32>
    %252 = arith.mulf %251, %2 : vector<2x512xf32>
    %253 = arith.addf %252, %5 : vector<2x512xf32>
    %c0_85 = arith.constant 0 : index
    %c0_86 = arith.constant 0 : index
    %254 = vector.load %arg2[%c0_85, %c0_86] : memref<128x512xf32, #tpu.memory_space<vmem>>, vector<128x512xf32>
    %cst_87 = arith.constant dense<0.000000e+00> : vector<2x512xf32>
    %255 = tpu.matmul %225, %254, %cst_87 {dimension_numbers = #tpu.dot_dimension_numbers<[1], [0], [0], [1], [0, 0, 1, 1], [], []>} : vector<2x128xf32>, vector<128x512xf32>, vector<2x512xf32> -> vector<2x512xf32>
    %256 = arith.addf %253, %255 : vector<2x512xf32>
    %257 = vector.extract_strided_slice %256 {offsets = [0, 0], sizes = [2, 384], strides = [1, 1]} : vector<2x512xf32> to vector<2x384xf32>
    %258 = math.tanh %257 : vector<2x384xf32>
    %cst_88 = arith.constant 5.000000e-01 : f32
    %259 = vector.broadcast %cst_88 : f32 to vector<2x384xf32>
    %260 = arith.mulf %259, %258 : vector<2x384xf32>
    %cst_89 = arith.constant 5.000000e-01 : f32
    %261 = vector.broadcast %cst_89 : f32 to vector<2x384xf32>
    %262 = arith.addf %260, %261 : vector<2x384xf32>
    %263 = vector.extract_strided_slice %262 {offsets = [0, 0], sizes = [2, 128], strides = [1, 1]} : vector<2x384xf32> to vector<2x128xf32>
    %264 = vector.extract_strided_slice %262 {offsets = [0, 128], sizes = [2, 128], strides = [1, 1]} : vector<2x384xf32> to vector<2x128xf32>
    %265 = vector.extract_strided_slice %262 {offsets = [0, 256], sizes = [2, 128], strides = [1, 1]} : vector<2x384xf32> to vector<2x128xf32>
    %266 = vector.extract_strided_slice %256 {offsets = [0, 384], sizes = [2, 128], strides = [1, 1]} : vector<2x512xf32> to vector<2x128xf32>
    %267 = math.tanh %266 : vector<2x128xf32>
    %268 = arith.mulf %264, %223 : vector<2x128xf32>
    %269 = arith.mulf %263, %267 : vector<2x128xf32>
    %270 = arith.addf %268, %269 : vector<2x128xf32>
    %271 = math.tanh %270 : vector<2x128xf32>
    %272 = arith.mulf %265, %271 : vector<2x128xf32>
    %c0_90 = arith.constant 0 : index
    %c0_91 = arith.constant 0 : index
    %273 = vector.load %arg4[%c0_90, %c0_91] : memref<128x512xf32, #tpu.memory_space<vmem>>, vector<128x512xf32>
    %cst_92 = arith.constant dense<0.000000e+00> : vector<2x512xf32>
    %274 = tpu.matmul %272, %273, %cst_92 {dimension_numbers = #tpu.dot_dimension_numbers<[1], [0], [0], [1], [0, 0, 1, 1], [], []>} : vector<2x128xf32>, vector<128x512xf32>, vector<2x512xf32> -> vector<2x512xf32>
    %275 = arith.addf %274, %247 : vector<2x512xf32>
    %276 = vector.extract_strided_slice %275 {offsets = [0, 0], sizes = [2, 384], strides = [1, 1]} : vector<2x512xf32> to vector<2x384xf32>
    %277 = math.tanh %276 : vector<2x384xf32>
    %cst_93 = arith.constant 5.000000e-01 : f32
    %278 = vector.broadcast %cst_93 : f32 to vector<2x384xf32>
    %279 = arith.mulf %278, %277 : vector<2x384xf32>
    %cst_94 = arith.constant 5.000000e-01 : f32
    %280 = vector.broadcast %cst_94 : f32 to vector<2x384xf32>
    %281 = arith.addf %279, %280 : vector<2x384xf32>
    %282 = vector.extract_strided_slice %281 {offsets = [0, 0], sizes = [2, 128], strides = [1, 1]} : vector<2x384xf32> to vector<2x128xf32>
    %283 = vector.extract_strided_slice %281 {offsets = [0, 128], sizes = [2, 128], strides = [1, 1]} : vector<2x384xf32> to vector<2x128xf32>
    %284 = vector.extract_strided_slice %281 {offsets = [0, 256], sizes = [2, 128], strides = [1, 1]} : vector<2x384xf32> to vector<2x128xf32>
    %285 = vector.extract_strided_slice %275 {offsets = [0, 384], sizes = [2, 128], strides = [1, 1]} : vector<2x512xf32> to vector<2x128xf32>
    %286 = math.tanh %285 : vector<2x128xf32>
    %287 = arith.mulf %283, %242 : vector<2x128xf32>
    %288 = arith.mulf %282, %286 : vector<2x128xf32>
    %289 = arith.addf %287, %288 : vector<2x128xf32>
    %290 = math.tanh %289 : vector<2x128xf32>
    %291 = arith.mulf %284, %290 : vector<2x128xf32>
    %c6_i32 = arith.constant 6 : i32
    %c0_95 = arith.constant 0 : index
    %c0_96 = arith.constant 0 : index
    %292 = vector.load %arg5[%c0_95, %c0_96] : memref<128x512xf32, #tpu.memory_space<vmem>>, vector<128x512xf32>
    %cst_97 = arith.constant dense<0.000000e+00> : vector<2x512xf32>
    %293 = tpu.matmul %291, %292, %cst_97 {dimension_numbers = #tpu.dot_dimension_numbers<[1], [0], [0], [1], [0, 0, 1, 1], [], []>} : vector<2x128xf32>, vector<128x512xf32>, vector<2x512xf32> -> vector<2x512xf32>
    %294 = arith.addf %293, %8 : vector<2x512xf32>
    %295 = arith.index_cast %c6_i32 : i32 to index
    %c0_98 = arith.constant 0 : index
    %c0_99 = arith.constant 0 : index
    %296 = vector.load %arg0[%295, %c0_98, %c0_99] : memref<8x2x1xf32, #tpu.memory_space<vmem>>, vector<1x2x1xf32>
    %297 = vector.shape_cast %296 : vector<1x2x1xf32> to vector<2x1xf32>
    %298 = vector.broadcast %297 : vector<2x1xf32> to vector<2x512xf32>
    %299 = arith.mulf %298, %2 : vector<2x512xf32>
    %300 = arith.addf %299, %5 : vector<2x512xf32>
    %c0_100 = arith.constant 0 : index
    %c0_101 = arith.constant 0 : index
    %301 = vector.load %arg2[%c0_100, %c0_101] : memref<128x512xf32, #tpu.memory_space<vmem>>, vector<128x512xf32>
    %cst_102 = arith.constant dense<0.000000e+00> : vector<2x512xf32>
    %302 = tpu.matmul %272, %301, %cst_102 {dimension_numbers = #tpu.dot_dimension_numbers<[1], [0], [0], [1], [0, 0, 1, 1], [], []>} : vector<2x128xf32>, vector<128x512xf32>, vector<2x512xf32> -> vector<2x512xf32>
    %303 = arith.addf %300, %302 : vector<2x512xf32>
    %304 = vector.extract_strided_slice %303 {offsets = [0, 0], sizes = [2, 384], strides = [1, 1]} : vector<2x512xf32> to vector<2x384xf32>
    %305 = math.tanh %304 : vector<2x384xf32>
    %cst_103 = arith.constant 5.000000e-01 : f32
    %306 = vector.broadcast %cst_103 : f32 to vector<2x384xf32>
    %307 = arith.mulf %306, %305 : vector<2x384xf32>
    %cst_104 = arith.constant 5.000000e-01 : f32
    %308 = vector.broadcast %cst_104 : f32 to vector<2x384xf32>
    %309 = arith.addf %307, %308 : vector<2x384xf32>
    %310 = vector.extract_strided_slice %309 {offsets = [0, 0], sizes = [2, 128], strides = [1, 1]} : vector<2x384xf32> to vector<2x128xf32>
    %311 = vector.extract_strided_slice %309 {offsets = [0, 128], sizes = [2, 128], strides = [1, 1]} : vector<2x384xf32> to vector<2x128xf32>
    %312 = vector.extract_strided_slice %309 {offsets = [0, 256], sizes = [2, 128], strides = [1, 1]} : vector<2x384xf32> to vector<2x128xf32>
    %313 = vector.extract_strided_slice %303 {offsets = [0, 384], sizes = [2, 128], strides = [1, 1]} : vector<2x512xf32> to vector<2x128xf32>
    %314 = math.tanh %313 : vector<2x128xf32>
    %315 = arith.mulf %311, %270 : vector<2x128xf32>
    %316 = arith.mulf %310, %314 : vector<2x128xf32>
    %317 = arith.addf %315, %316 : vector<2x128xf32>
    %318 = math.tanh %317 : vector<2x128xf32>
    %319 = arith.mulf %312, %318 : vector<2x128xf32>
    %c0_105 = arith.constant 0 : index
    %c0_106 = arith.constant 0 : index
    %320 = vector.load %arg4[%c0_105, %c0_106] : memref<128x512xf32, #tpu.memory_space<vmem>>, vector<128x512xf32>
    %cst_107 = arith.constant dense<0.000000e+00> : vector<2x512xf32>
    %321 = tpu.matmul %319, %320, %cst_107 {dimension_numbers = #tpu.dot_dimension_numbers<[1], [0], [0], [1], [0, 0, 1, 1], [], []>} : vector<2x128xf32>, vector<128x512xf32>, vector<2x512xf32> -> vector<2x512xf32>
    %322 = arith.addf %321, %294 : vector<2x512xf32>
    %323 = vector.extract_strided_slice %322 {offsets = [0, 0], sizes = [2, 384], strides = [1, 1]} : vector<2x512xf32> to vector<2x384xf32>
    %324 = math.tanh %323 : vector<2x384xf32>
    %cst_108 = arith.constant 5.000000e-01 : f32
    %325 = vector.broadcast %cst_108 : f32 to vector<2x384xf32>
    %326 = arith.mulf %325, %324 : vector<2x384xf32>
    %cst_109 = arith.constant 5.000000e-01 : f32
    %327 = vector.broadcast %cst_109 : f32 to vector<2x384xf32>
    %328 = arith.addf %326, %327 : vector<2x384xf32>
    %329 = vector.extract_strided_slice %328 {offsets = [0, 0], sizes = [2, 128], strides = [1, 1]} : vector<2x384xf32> to vector<2x128xf32>
    %330 = vector.extract_strided_slice %328 {offsets = [0, 128], sizes = [2, 128], strides = [1, 1]} : vector<2x384xf32> to vector<2x128xf32>
    %331 = vector.extract_strided_slice %328 {offsets = [0, 256], sizes = [2, 128], strides = [1, 1]} : vector<2x384xf32> to vector<2x128xf32>
    %332 = vector.extract_strided_slice %322 {offsets = [0, 384], sizes = [2, 128], strides = [1, 1]} : vector<2x512xf32> to vector<2x128xf32>
    %333 = math.tanh %332 : vector<2x128xf32>
    %334 = arith.mulf %330, %289 : vector<2x128xf32>
    %335 = arith.mulf %329, %333 : vector<2x128xf32>
    %336 = arith.addf %334, %335 : vector<2x128xf32>
    %337 = math.tanh %336 : vector<2x128xf32>
    %338 = arith.mulf %331, %337 : vector<2x128xf32>
    %c7_i32 = arith.constant 7 : i32
    %c0_110 = arith.constant 0 : index
    %c0_111 = arith.constant 0 : index
    %339 = vector.load %arg5[%c0_110, %c0_111] : memref<128x512xf32, #tpu.memory_space<vmem>>, vector<128x512xf32>
    %cst_112 = arith.constant dense<0.000000e+00> : vector<2x512xf32>
    %340 = tpu.matmul %338, %339, %cst_112 {dimension_numbers = #tpu.dot_dimension_numbers<[1], [0], [0], [1], [0, 0, 1, 1], [], []>} : vector<2x128xf32>, vector<128x512xf32>, vector<2x512xf32> -> vector<2x512xf32>
    %341 = arith.addf %340, %8 : vector<2x512xf32>
    %342 = arith.index_cast %c7_i32 : i32 to index
    %c0_113 = arith.constant 0 : index
    %c0_114 = arith.constant 0 : index
    %343 = vector.load %arg0[%342, %c0_113, %c0_114] : memref<8x2x1xf32, #tpu.memory_space<vmem>>, vector<1x2x1xf32>
    %344 = vector.shape_cast %343 : vector<1x2x1xf32> to vector<2x1xf32>
    %345 = vector.broadcast %344 : vector<2x1xf32> to vector<2x512xf32>
    %346 = arith.mulf %345, %2 : vector<2x512xf32>
    %347 = arith.addf %346, %5 : vector<2x512xf32>
    %c0_115 = arith.constant 0 : index
    %c0_116 = arith.constant 0 : index
    %348 = vector.load %arg2[%c0_115, %c0_116] : memref<128x512xf32, #tpu.memory_space<vmem>>, vector<128x512xf32>
    %cst_117 = arith.constant dense<0.000000e+00> : vector<2x512xf32>
    %349 = tpu.matmul %319, %348, %cst_117 {dimension_numbers = #tpu.dot_dimension_numbers<[1], [0], [0], [1], [0, 0, 1, 1], [], []>} : vector<2x128xf32>, vector<128x512xf32>, vector<2x512xf32> -> vector<2x512xf32>
    %350 = arith.addf %347, %349 : vector<2x512xf32>
    %351 = vector.extract_strided_slice %350 {offsets = [0, 0], sizes = [2, 384], strides = [1, 1]} : vector<2x512xf32> to vector<2x384xf32>
    %352 = math.tanh %351 : vector<2x384xf32>
    %cst_118 = arith.constant 5.000000e-01 : f32
    %353 = vector.broadcast %cst_118 : f32 to vector<2x384xf32>
    %354 = arith.mulf %353, %352 : vector<2x384xf32>
    %cst_119 = arith.constant 5.000000e-01 : f32
    %355 = vector.broadcast %cst_119 : f32 to vector<2x384xf32>
    %356 = arith.addf %354, %355 : vector<2x384xf32>
    %357 = vector.extract_strided_slice %356 {offsets = [0, 0], sizes = [2, 128], strides = [1, 1]} : vector<2x384xf32> to vector<2x128xf32>
    %358 = vector.extract_strided_slice %356 {offsets = [0, 128], sizes = [2, 128], strides = [1, 1]} : vector<2x384xf32> to vector<2x128xf32>
    %359 = vector.extract_strided_slice %356 {offsets = [0, 256], sizes = [2, 128], strides = [1, 1]} : vector<2x384xf32> to vector<2x128xf32>
    %360 = vector.extract_strided_slice %350 {offsets = [0, 384], sizes = [2, 128], strides = [1, 1]} : vector<2x512xf32> to vector<2x128xf32>
    %361 = math.tanh %360 : vector<2x128xf32>
    %362 = arith.mulf %358, %317 : vector<2x128xf32>
    %363 = arith.mulf %357, %361 : vector<2x128xf32>
    %364 = arith.addf %362, %363 : vector<2x128xf32>
    %365 = math.tanh %364 : vector<2x128xf32>
    %366 = arith.mulf %359, %365 : vector<2x128xf32>
    %c0_120 = arith.constant 0 : index
    %c0_121 = arith.constant 0 : index
    %367 = vector.load %arg4[%c0_120, %c0_121] : memref<128x512xf32, #tpu.memory_space<vmem>>, vector<128x512xf32>
    %cst_122 = arith.constant dense<0.000000e+00> : vector<2x512xf32>
    %368 = tpu.matmul %366, %367, %cst_122 {dimension_numbers = #tpu.dot_dimension_numbers<[1], [0], [0], [1], [0, 0, 1, 1], [], []>} : vector<2x128xf32>, vector<128x512xf32>, vector<2x512xf32> -> vector<2x512xf32>
    %369 = arith.addf %368, %341 : vector<2x512xf32>
    %370 = vector.extract_strided_slice %369 {offsets = [0, 0], sizes = [2, 384], strides = [1, 1]} : vector<2x512xf32> to vector<2x384xf32>
    %371 = math.tanh %370 : vector<2x384xf32>
    %cst_123 = arith.constant 5.000000e-01 : f32
    %372 = vector.broadcast %cst_123 : f32 to vector<2x384xf32>
    %373 = arith.mulf %372, %371 : vector<2x384xf32>
    %cst_124 = arith.constant 5.000000e-01 : f32
    %374 = vector.broadcast %cst_124 : f32 to vector<2x384xf32>
    %375 = arith.addf %373, %374 : vector<2x384xf32>
    %376 = vector.extract_strided_slice %375 {offsets = [0, 0], sizes = [2, 128], strides = [1, 1]} : vector<2x384xf32> to vector<2x128xf32>
    %377 = vector.extract_strided_slice %375 {offsets = [0, 128], sizes = [2, 128], strides = [1, 1]} : vector<2x384xf32> to vector<2x128xf32>
    %378 = vector.extract_strided_slice %375 {offsets = [0, 256], sizes = [2, 128], strides = [1, 1]} : vector<2x384xf32> to vector<2x128xf32>
    %379 = vector.extract_strided_slice %369 {offsets = [0, 384], sizes = [2, 128], strides = [1, 1]} : vector<2x512xf32> to vector<2x128xf32>
    %380 = math.tanh %379 : vector<2x128xf32>
    %381 = arith.mulf %377, %336 : vector<2x128xf32>
    %382 = arith.mulf %376, %380 : vector<2x128xf32>
    %383 = arith.addf %381, %382 : vector<2x128xf32>
    %384 = math.tanh %383 : vector<2x128xf32>
    %385 = arith.mulf %378, %384 : vector<2x128xf32>
    %c8_i32 = arith.constant 8 : i32
    %c0_125 = arith.constant 0 : index
    %c0_126 = arith.constant 0 : index
    %386 = vector.load %arg7[%c0_125, %c0_126] : memref<1x128xf32, #tpu.memory_space<vmem>>, vector<1x128xf32>
    %387 = vector.broadcast %386 : vector<1x128xf32> to vector<2x128xf32>
    %388 = arith.mulf %385, %387 : vector<2x128xf32>
    %cst_127 = arith.constant dense<0.000000e+00> : vector<2xf32>
    %389 = vector.multi_reduction <add>, %388, %cst_127 [1] : vector<2x128xf32> to vector<2xf32>
    %390 = vector.shape_cast %389 : vector<2xf32> to vector<2x1xf32>
    %c0_128 = arith.constant 0 : index
    %c0_129 = arith.constant 0 : index
    %391 = vector.load %arg8[%c0_128, %c0_129] : memref<1x1xf32, #tpu.memory_space<vmem>>, vector<1x1xf32>
    %392 = vector.broadcast %391 : vector<1x1xf32> to vector<2x1xf32>
    %393 = arith.addf %390, %392 : vector<2x1xf32>
    %c0_130 = arith.constant 0 : index
    %c0_131 = arith.constant 0 : index
    %394 = vector.load %arg9[%c0_130, %c0_131] : memref<2x1xf32, #tpu.memory_space<vmem>>, vector<2x1xf32>
    tpu.vector_store %arg9[%c0_130, %c0_131], %393 {strides = array<i32>} : memref<2x1xf32, #tpu.memory_space<vmem>>, vector<2x1xf32>,
    return
  }
}

</mosaic_0001>

<bundles_post_ra>
// kernel: tpu_custom_call.1
= control target key start
LH: loop header
LB: loop body
LE: loop exit
PB: predicated region body
PF: predicated region fallthrough
CT: control target
= control target key end

     0   :  { %s8532_s0 = inlined_call_operand.vmem [shape: f32[8,2,1], index: 0, kind: input, shape index: {}]   ;;  %s8533_s1 = inlined_call_operand.vmem [shape: f32[1,512], index: 1, kind: input, shape index: {}]   ;;  %s8534_s2 = inlined_call_operand.hbm [shape: f32[128,512], index: 2, kind: input, shape index: {}]   ;;  %s8535_s3 = inlined_call_operand.vmem [shape: f32[1,512], index: 3, kind: input, shape index: {}]   ;;  %s8536_s4 = inlined_call_operand.hbm [shape: f32[128,512], index: 4, kind: input, shape index: {}]   ;;  %s8537_s5 = inlined_call_operand.hbm [shape: f32[128,512], index: 5, kind: input, shape index: {}]   ;;  %s8538_s6 = inlined_call_operand.vmem [shape: f32[1,512], index: 6, kind: input, shape index: {}]   ;;  %s8539_s7 = inlined_call_operand.vmem [shape: f32[1,128], index: 7, kind: input, shape index: {}]   ;;  %s8540_s8 = inlined_call_operand.<no memory space> [shape: f32[1,1], index: 8, kind: input, shape index: {}]   ;;  %s8541_s9 = inlined_call_operand.vmem [shape: f32[2,1], index: 9, kind: output, shape index: {}]  }
   0x1   :  { %v14_v0 = vstv %s8540_s8 }
   0x2   :  { %15 = vst [vmem:[#allocation2] sm:$0x1] %v14_v0 }
   0x3   :  { %16 = vsyncpa [#allocation4], 0 }
   0x4   :  { %17 = vsyncpa [#allocation6], 0  ;;  %s4978_s11 = smov [#allocation5]   ;;  %s4979_s13 = smov [#allocation3]  }
   0x5   :  { %s41_s12 = sshll.u32 %s4978_s11, 4  ;;  %s27_s14 = sshll.u32 %s4979_s13, 4  ;;  %s42_s12 = int_to_ptr.vmem [resolvable:$true] %s41_s12  ;;  %s28_s14 = int_to_ptr.vmem [resolvable:$true] %s27_s14 }
   0x6   :  { %s4922_s15 = scalar_lea.vmem %s42_s12, 8192  ;;  %p4927_p1 = scmp.lt.s32.totalorder %s42_s12, %s42_s12 }
   0x7   :  { %p4923_p0 = scmp.ne.s32.totalorder %s42_s12, %s4922_s15  ;;  %p4928_p2 = scmp.lt.s32.totalorder %s4922_s15, %s4922_s15 }
   0x9   :  { %p4929_p3 = por %p4928_p2, %p4927_p1 }
   0xb   :  { %p4930_p4 = pnand %p4929_p3, %p4923_p0 }
   0xd   :  { %4933 = shalt.err (!%p4930_p4)
}
   0xe   :  { %s4980_s16 = smov 512   ;;  %s4981_s17 = smov 32  }
   0xf   :  { %47 = dma.hbm_to_vmem [thread:$0]  %s8536_s4, 8192, %s42_s12, [#allocation6], %s4980_s16, %s4980_s16, %s4981_s17  }
  0x10   :  { %s4942_s19 = scalar_lea.vmem %s28_s14, 8192  ;;  %p4947_p6 = scmp.lt.s32.totalorder %s28_s14, %s28_s14 }
  0x11   :  { %p4943_p5 = scmp.ne.s32.totalorder %s28_s14, %s4942_s19  ;;  %p4948_p7 = scmp.lt.s32.totalorder %s4942_s19, %s4942_s19 }
  0x13   :  { %p4949_p8 = por %p4948_p7, %p4947_p6 }
  0x15   :  { %p4950_p9 = pnand %p4949_p8, %p4943_p5 }
  0x17   :  { %4953 = shalt.err (!%p4950_p9)
}
  0x18   :  { %33 = dma.hbm_to_vmem [thread:$0]  %s8534_s2, 8192, %s28_s14, [#allocation4], %s4980_s16, %s4980_s16, %s4981_s17  }
  0x19   :  { %s4982_s22 = smov [#allocation7]  }
  0x1a   :  { %s53_s23 = sshll.u32 %s4982_s22, 4  ;;  %s54_s23 = int_to_ptr.vmem [resolvable:$true] %s53_s23 }
  0x1b   :  { %s4962_s24 = scalar_lea.vmem %s54_s23, 8192  ;;  %p4967_p11 = scmp.lt.s32.totalorder %s54_s23, %s54_s23 }
  0x1c   :  { %p4963_p10 = scmp.ne.s32.totalorder %s54_s23, %s4962_s24  ;;  %p4968_p12 = scmp.lt.s32.totalorder %s4962_s24, %s4962_s24 }
  0x1e   :  { %p4969_p13 = por %p4968_p12, %p4967_p11 }
  0x20   :  { %p4970_p0 = pnand %p4969_p13, %p4963_p10 }
  0x22   :  { %4973 = shalt.err (!%p4970_p0)
}
  0x23   :  { %59 = dma.hbm_to_vmem [thread:$0]  %s8537_s5, 8192, %s54_s23, [#allocation6], %s4980_s16, %s4980_s16, %s4981_s17  }
  0x24   :  { %4974 = dma.done.wait [#allocation4], 8192  }
  0x25   :  { %4975 = vsyncadd [#allocation4], 4294959104 }
  0x26   :  { %4976 = dma.done.wait [#allocation6], 16384  }
  0x27   :  { %4977 = vsyncadd [#allocation6], 4294950912  ;;  %v8542_v1 = vmov 0.0   ;;  %v4984_v2 = vmov 0   ;;  %v5049_v3 = vld [vmem:[#allocation7 + $0x1e8] sm:$0xff]  ;;  %v5051_v4 = vld [vmem:[#allocation7 + $0x1f8] sm:$0xff] }
  0x28   :  { %269 = vmatprep.mubr.f32.mxu0 %v8542_v1  ;;  %340 = vmatprep.mubr.f32.mxu1 %v8542_v1  ;;  %v5053_v5 = vld [vmem:[#allocation7 + $0x1e0] sm:$0xff]  ;;  %v5057_v6 = vld [vmem:[#allocation7 + $0x1f0] sm:$0xff]  ;;  %v5059_v7 = vld [vmem:[#allocation7 + $0x1c8] sm:$0xff]  ;;  %vm4140_vm0 = vcmask 1041408   ;;  %vm4152_vm1 = vcmask 1024  }
  0x29   :  { %4176 = vset.pattern.permute.xlu0 %v4984_v2  ;;  %4177 = vset.pattern.permute.xlu1 %v4984_v2  ;;  %v5061_v8 = vld [vmem:[#allocation7 + $0x1d8] sm:$0xff]  ;;  %v5065_v9 = vld [vmem:[#allocation7 + $0x1c0] sm:$0xff]  ;;  %v5067_v10 = vld [vmem:[#allocation7 + $0x1d0] sm:$0xff] }
  0x2a   :  { %205 = vmatprep.subr.mxu0 %v5049_v3  ;;  %276 = vmatprep.subr.mxu1 %v5051_v4  ;;  %v5069_v11 = vld [vmem:[#allocation7 + $0x1a8] sm:$0xff]  ;;  %v5073_v12 = vld [vmem:[#allocation7 + $0x1b8] sm:$0xff]  ;;  %v5075_v13 = vld [vmem:[#allocation7 + $0x1a0] sm:$0xff] }
  0x2b   :  { %206 = vmatpush1.msra.mxu0 %v5053_v5  ;;  %277 = vmatpush1.msra.mxu1 %v5057_v6  ;;  %v5077_v14 = vld [vmem:[#allocation7 + $0x1b0] sm:$0xff]  ;;  %v5081_v15 = vld [vmem:[#allocation7 + $0x188] sm:$0xff]  ;;  %v5083_v16 = vld [vmem:[#allocation7 + $0x198] sm:$0xff] }
  0x2c   :  { %207 = vmatprep.subr.mxu0 %v5059_v7  ;;  %278 = vmatprep.subr.mxu1 %v5061_v8  ;;  %v5087_v17 = vld [vmem:[#allocation7 + $0x180] sm:$0xff]  ;;  %v5089_v18 = vld [vmem:[#allocation7 + $0x190] sm:$0xff]  ;;  %v5093_v19 = vld [vmem:[#allocation7 + $0x168] sm:$0xff] }
  0x2d   :  { %208 = vmatpush1.msra.mxu0 %v5065_v9  ;;  %279 = vmatpush1.msra.mxu1 %v5067_v10  ;;  %v5095_v20 = vld [vmem:[#allocation7 + $0x178] sm:$0xff]  ;;  %v5099_v21 = vld [vmem:[#allocation7 + $0x160] sm:$0xff]  ;;  %v5101_v22 = vld [vmem:[#allocation7 + $0x170] sm:$0xff] }
  0x2e   :  { %209 = vmatprep.subr.mxu0 %v5069_v11  ;;  %280 = vmatprep.subr.mxu1 %v5073_v12  ;;  %v5105_v23 = vld [vmem:[#allocation7 + $0x148] sm:$0xff]  ;;  %v5107_v24 = vld [vmem:[#allocation7 + $0x158] sm:$0xff]  ;;  %v5111_v25 = vld [vmem:[#allocation7 + $0x140] sm:$0xff] }
  0x2f   :  { %210 = vmatpush1.msra.mxu0 %v5075_v13  ;;  %281 = vmatpush1.msra.mxu1 %v5077_v14  ;;  %v5113_v26 = vld [vmem:[#allocation7 + $0x150] sm:$0xff]  ;;  %v5117_v27 = vld [vmem:[#allocation7 + $0x128] sm:$0xff]  ;;  %v5119_v28 = vld [vmem:[#allocation7 + $0x138] sm:$0xff] }
  0x30   :  { %211 = vmatprep.subr.mxu0 %v5081_v15  ;;  %282 = vmatprep.subr.mxu1 %v5083_v16  ;;  %v5123_v29 = vld [vmem:[#allocation7 + $0x120] sm:$0xff]  ;;  %v5125_v30 = vld [vmem:[#allocation7 + $0x130] sm:$0xff]  ;;  %v5129_v31 = vld [vmem:[#allocation7 + $0x108] sm:$0xff] }
  0x31   :  { %212 = vmatpush1.msra.mxu0 %v5087_v17  ;;  %283 = vmatpush1.msra.mxu1 %v5089_v18  ;;  %v5131_v32 = vld [vmem:[#allocation7 + $0x118] sm:$0xff]  ;;  %v5135_v33 = vld [vmem:[#allocation7 + $0x100] sm:$0xff]  ;;  %v5137_v34 = vld [vmem:[#allocation7 + $0x110] sm:$0xff] }
  0x32   :  { %213 = vmatprep.subr.mxu0 %v5093_v19  ;;  %284 = vmatprep.subr.mxu1 %v5095_v20  ;;  %v5141_v35 = vld [vmem:[#allocation7 + $0xe8] sm:$0xff]  ;;  %v5143_v36 = vld [vmem:[#allocation7 + $0xf8] sm:$0xff]  ;;  %v5147_v37 = vld [vmem:[#allocation7 + $0xe0] sm:$0xff] }
  0x33   :  { %214 = vmatpush1.msra.mxu0 %v5099_v21  ;;  %285 = vmatpush1.msra.mxu1 %v5101_v22  ;;  %v5149_v38 = vld [vmem:[#allocation7 + $0xf0] sm:$0xff]  ;;  %v5153_v39 = vld [vmem:[#allocation7 + $0xc8] sm:$0xff]  ;;  %v5155_v40 = vld [vmem:[#allocation7 + $0xd8] sm:$0xff] }
  0x34   :  { %215 = vmatprep.subr.mxu0 %v5105_v23  ;;  %286 = vmatprep.subr.mxu1 %v5107_v24  ;;  %v5159_v41 = vld [vmem:[#allocation7 + $0xc0] sm:$0xff]  ;;  %v5161_v42 = vld [vmem:[#allocation7 + $0xd0] sm:$0xff]  ;;  %v5165_v43 = vld [vmem:[#allocation7 + $0xa8] sm:$0xff] }
  0x35   :  { %216 = vmatpush1.msra.mxu0 %v5111_v25  ;;  %287 = vmatpush1.msra.mxu1 %v5113_v26  ;;  %v5167_v44 = vld [vmem:[#allocation7 + $0xb8] sm:$0xff]  ;;  %v5171_v45 = vld [vmem:[#allocation7 + $0xa0] sm:$0xff]  ;;  %v5173_v46 = vld [vmem:[#allocation7 + $0xb0] sm:$0xff] }
  0x36   :  { %217 = vmatprep.subr.mxu0 %v5117_v27  ;;  %288 = vmatprep.subr.mxu1 %v5119_v28  ;;  %v5177_v47 = vld [vmem:[#allocation7 + $0x88] sm:$0xff]  ;;  %v5179_v48 = vld [vmem:[#allocation7 + $0x98] sm:$0xff]  ;;  %v5183_v49 = vld [vmem:[#allocation7 + $0x80] sm:$0xff] }
  0x37   :  { %218 = vmatpush1.msra.mxu0 %v5123_v29  ;;  %289 = vmatpush1.msra.mxu1 %v5125_v30  ;;  %9205 = vst [vmem:[#allocation10_spill] sm:$0xff] %v5177_v47  ;;  %9206 = vst [vmem:[#allocation11_spill] sm:$0xff] %v5179_v48  ;;  %v5185_v50 = vld [vmem:[#allocation7 + $0x90] sm:$0xff]  ;;  %v5189_v51 = vld [vmem:[#allocation7 + $0x68] sm:$0xff] }
  0x38   :  { %219 = vmatprep.subr.mxu0 %v5129_v31  ;;  %290 = vmatprep.subr.mxu1 %v5131_v32  ;;  %9207 = vst [vmem:[#allocation12_spill] sm:$0xff] %v5183_v49  ;;  %9208 = vst [vmem:[#allocation13_spill] sm:$0xff] %v5185_v50  ;;  %v5191_v52 = vld [vmem:[#allocation7 + $0x78] sm:$0xff]  ;;  %v5195_v53 = vld [vmem:[#allocation7 + $0x60] sm:$0xff] }
  0x39   :  { %220 = vmatpush1.msra.mxu0 %v5135_v33  ;;  %291 = vmatpush1.msra.mxu1 %v5137_v34  ;;  %9209 = vst [vmem:[#allocation14_spill] sm:$0xff] %v5189_v51  ;;  %9210 = vst [vmem:[#allocation15_spill] sm:$0xff] %v5191_v52  ;;  %v5197_v54 = vld [vmem:[#allocation7 + $0x70] sm:$0xff]  ;;  %v5201_v55 = vld [vmem:[#allocation7 + $0x48] sm:$0xff] }
  0x3a   :  { %221 = vmatprep.subr.mxu0 %v5141_v35  ;;  %292 = vmatprep.subr.mxu1 %v5143_v36  ;;  %9211 = vst [vmem:[#allocation16_spill] sm:$0xff] %v5195_v53  ;;  %9212 = vst [vmem:[#allocation17_spill] sm:$0xff] %v5197_v54  ;;  %v5203_v56 = vld [vmem:[#allocation7 + $0x58] sm:$0xff]  ;;  %v5207_v57 = vld [vmem:[#allocation7 + $0x40] sm:$0xff] }
  0x3b   :  { %222 = vmatpush1.msra.mxu0 %v5147_v37  ;;  %293 = vmatpush1.msra.mxu1 %v5149_v38  ;;  %9213 = vst [vmem:[#allocation18_spill] sm:$0xff] %v5201_v55  ;;  %9214 = vst [vmem:[#allocation19_spill] sm:$0xff] %v5203_v56  ;;  %v5209_v58 = vld [vmem:[#allocation7 + $0x50] sm:$0xff]  ;;  %v5213_v59 = vld [vmem:[#allocation7 + $0x28] sm:$0xff] }
  0x3c   :  { %223 = vmatprep.subr.mxu0 %v5153_v39  ;;  %294 = vmatprep.subr.mxu1 %v5155_v40  ;;  %9215 = vst [vmem:[#allocation20_spill] sm:$0xff] %v5207_v57  ;;  %9216 = vst [vmem:[#allocation21_spill] sm:$0xff] %v5209_v58  ;;  %v5215_v60 = vld [vmem:[#allocation7 + $0x38] sm:$0xff]  ;;  %v5219_v61 = vld [vmem:[#allocation7 + $0x20] sm:$0xff] }
  0x3d   :  { %224 = vmatpush1.msra.mxu0 %v5159_v41  ;;  %295 = vmatpush1.msra.mxu1 %v5161_v42  ;;  %9217 = vst [vmem:[#allocation22_spill] sm:$0xff] %v5213_v59  ;;  %9218 = vst [vmem:[#allocation23_spill] sm:$0xff] %v5215_v60  ;;  %v5221_v62 = vld [vmem:[#allocation7 + $0x30] sm:$0xff]  ;;  %v5225_v63 = vld [vmem:[#allocation7 + $0x8] sm:$0xff] }
  0x3e   :  { %225 = vmatprep.subr.mxu0 %v5165_v43  ;;  %296 = vmatprep.subr.mxu1 %v5167_v44  ;;  %9219 = vst [vmem:[#allocation24_spill] sm:$0xff] %v5219_v61  ;;  %9220 = vst [vmem:[#allocation25_spill] sm:$0xff] %v5221_v62  ;;  %v5227_v0 = vld [vmem:[#allocation7 + $0x18] sm:$0xff]  ;;  %v5231_v2 = vld [vmem:[#allocation7] sm:$0xff] }
  0x3f   :  { %226 = vmatpush1.msra.mxu0 %v5171_v45  ;;  %297 = vmatpush1.msra.mxu1 %v5173_v46  ;;  %9221 = vst [vmem:[#allocation26_spill] sm:$0xff] %v5225_v63  ;;  %9222 = vst [vmem:[#allocation27_spill] sm:$0xff] %v5227_v0  ;;  %v5233_v1 = vld [vmem:[#allocation7 + $0x10] sm:$0xff] }
  0x40   :  { %227 = vmatprep.subr.mxu0 %v5177_v47  ;;  %298 = vmatprep.subr.mxu1 %v5179_v48  ;;  %9223 = vst [vmem:[#allocation28_spill] sm:$0xff] %v5231_v2  ;;  %9224 = vst [vmem:[#allocation29_spill] sm:$0xff] %v5233_v1 }
  0x41   :  { %228 = vmatpush1.msra.mxu0 %v5183_v49  ;;  %299 = vmatpush1.msra.mxu1 %v5185_v50 }
  0x42   :  { %229 = vmatprep.subr.mxu0 %v5189_v51  ;;  %300 = vmatprep.subr.mxu1 %v5191_v52 }
  0x43   :  { %230 = vmatpush1.msra.mxu0 %v5195_v53  ;;  %301 = vmatpush1.msra.mxu1 %v5197_v54 }
  0x44   :  { %231 = vmatprep.subr.mxu0 %v5201_v55  ;;  %302 = vmatprep.subr.mxu1 %v5203_v56  ;;  %v5237_v56 = vld [vmem:[#allocation3 + $0x1e8] sm:$0xff] }
  0x45   :  { %232 = vmatpush1.msra.mxu0 %v5207_v57  ;;  %303 = vmatpush1.msra.mxu1 %v5209_v58  ;;  %9225 = vst [vmem:[#allocation30_spill] sm:$0xff] %v5237_v56  ;;  %v5241_v58 = vld [vmem:[#allocation3 + $0x1f8] sm:$0xff]  ;;  %v9229_v57 = vmov 0.0   ;;  %v5275_v55 = vld [vmem:[#allocation3 + $0x188] sm:$0xff] }
  0x46   :  { %233 = vmatprep.subr.mxu0 %v5213_v59  ;;  %304 = vmatprep.subr.mxu1 %v5215_v60  ;;  %9226 = vst [vmem:[#allocation31_spill] sm:$0xff] %v5241_v58  ;;  %v5245_v60 = vld [vmem:[#allocation3 + $0x1e0] sm:$0xff]  ;;  %v5247_v59 = vld [vmem:[#allocation3 + $0x1f0] sm:$0xff]  ;;  %9238 = vst [vmem:[#allocation42_spill] sm:$0xff] %v5275_v55 }
  0x47   :  { %234 = vmatpush1.msra.mxu0 %v5219_v61  ;;  %305 = vmatpush1.msra.mxu1 %v5221_v62  ;;  %9227 = vst [vmem:[#allocation32_spill] sm:$0xff] %v5245_v60  ;;  %9228 = vst [vmem:[#allocation33_spill] sm:$0xff] %v5247_v59  ;;  %v5251_v62 = vld [vmem:[#allocation3 + $0x1c8] sm:$0xff]  ;;  %v5253_v61 = vld [vmem:[#allocation3 + $0x1d8] sm:$0xff] }
  0x48   :  { %235 = vmatprep.subr.mxu0 %v5225_v63  ;;  %306 = vmatprep.subr.mxu1 %v5227_v0  ;;  %9230 = vst [vmem:[#allocation34_spill] sm:$0xff] %v5251_v62  ;;  %9231 = vst [vmem:[#allocation35_spill] sm:$0xff] %v5253_v61  ;;  %v5257_v0 = vld [vmem:[#allocation3 + $0x1c0] sm:$0xff]  ;;  %v5265_v63 = vld [vmem:[#allocation3 + $0x1b8] sm:$0xff] }
  0x49   :  { %236 = vmatpush1.msra.mxu0 %v5231_v2  ;;  %307 = vmatpush1.msra.mxu1 %v5233_v1  ;;  %9232 = vst [vmem:[#allocation36_spill] sm:$0xff] %v5257_v0  ;;  %v5259_v2 = vld [vmem:[#allocation3 + $0x1d0] sm:$0xff]  ;;  %v5263_v1 = vld [vmem:[#allocation3 + $0x1a8] sm:$0xff]  ;;  %9235 = vst [vmem:[#allocation39_spill] sm:$0xff] %v5265_v63 }
  0x4a   :  { %270 = vmatmul.mubr.f32.vlgmr.msra.gmra.mxu0 %v9229_v57  ;;  %425 = vmatprep.subr.mxu0 %v5237_v56  ;;  %9233 = vst [vmem:[#allocation37_spill] sm:$0xff] %v5259_v2  ;;  %9234 = vst [vmem:[#allocation38_spill] sm:$0xff] %v5263_v1  ;;  %v5269_v56 = vld [vmem:[#allocation3 + $0x1a0] sm:$0xff] }
  0x4b   :  { %496 = vmatprep.subr.mxu1 %v5241_v58  ;;  %341 = vmatmul.mubr.f32.vlgmr.msra.gmra.mxu1 %v9229_v57  ;;  %9236 = vst [vmem:[#allocation40_spill] sm:$0xff] %v5269_v56  ;;  %v5271_v58 = vld [vmem:[#allocation3 + $0x1b0] sm:$0xff] }
  0x4c   :  { %426 = vmatpush1.msra.mxu0 %v5245_v60  ;;  %497 = vmatpush1.msra.mxu1 %v5247_v59  ;;  %9237 = vst [vmem:[#allocation41_spill] sm:$0xff] %v5271_v58  ;;  %v5277_v60 = vld [vmem:[#allocation3 + $0x198] sm:$0xff]  ;;  %v5281_v59 = vld [vmem:[#allocation3 + $0x180] sm:$0xff] }
  0x4d   :  { %427 = vmatprep.subr.mxu0 %v5251_v62  ;;  %498 = vmatprep.subr.mxu1 %v5253_v61  ;;  %9239 = vst [vmem:[#allocation43_spill] sm:$0xff] %v5277_v60  ;;  %9240 = vst [vmem:[#allocation44_spill] sm:$0xff] %v5281_v59  ;;  %v5283_v62 = vld [vmem:[#allocation3 + $0x190] sm:$0xff]  ;;  %v5287_v61 = vld [vmem:[#allocation3 + $0x168] sm:$0xff] }
  0x4e   :  { %428 = vmatpush1.msra.mxu0 %v5257_v0  ;;  %499 = vmatpush1.msra.mxu1 %v5259_v2  ;;  %9241 = vst [vmem:[#allocation45_spill] sm:$0xff] %v5283_v62  ;;  %9242 = vst [vmem:[#allocation46_spill] sm:$0xff] %v5287_v61  ;;  %v5289_v0 = vld [vmem:[#allocation3 + $0x178] sm:$0xff]  ;;  %v5293_v2 = vld [vmem:[#allocation3 + $0x160] sm:$0xff] }
  0x4f   :  { %429 = vmatprep.subr.mxu0 %v5263_v1  ;;  %500 = vmatprep.subr.mxu1 %v5265_v63  ;;  %9243 = vst [vmem:[#allocation47_spill] sm:$0xff] %v5289_v0  ;;  %9244 = vst [vmem:[#allocation48_spill] sm:$0xff] %v5293_v2  ;;  %v5295_v1 = vld [vmem:[#allocation3 + $0x170] sm:$0xff]  ;;  %v5299_v63 = vld [vmem:[#allocation3 + $0x148] sm:$0xff] }
  0x50   :  { %430 = vmatpush1.msra.mxu0 %v5269_v56  ;;  %501 = vmatpush1.msra.mxu1 %v5271_v58  ;;  %9245 = vst [vmem:[#allocation49_spill] sm:$0xff] %v5295_v1  ;;  %9246 = vst [vmem:[#allocation50_spill] sm:$0xff] %v5299_v63  ;;  %v5301_v56 = vld [vmem:[#allocation3 + $0x158] sm:$0xff]  ;;  %v5305_v58 = vld [vmem:[#allocation3 + $0x140] sm:$0xff] }
  0x51   :  { %431 = vmatprep.subr.mxu0 %v5275_v55  ;;  %502 = vmatprep.subr.mxu1 %v5277_v60  ;;  %9247 = vst [vmem:[#allocation51_spill] sm:$0xff] %v5301_v56  ;;  %9248 = vst [vmem:[#allocation52_spill] sm:$0xff] %v5305_v58  ;;  %v5307_v55 = vld [vmem:[#allocation3 + $0x150] sm:$0xff]  ;;  %v5311_v60 = vld [vmem:[#allocation3 + $0x128] sm:$0xff] }
  0x52   :  { %432 = vmatpush1.msra.mxu0 %v5281_v59  ;;  %503 = vmatpush1.msra.mxu1 %v5283_v62  ;;  %9249 = vst [vmem:[#allocation53_spill] sm:$0xff] %v5307_v55  ;;  %9250 = vst [vmem:[#allocation54_spill] sm:$0xff] %v5311_v60  ;;  %v5313_v59 = vld [vmem:[#allocation3 + $0x138] sm:$0xff]  ;;  %v5317_v62 = vld [vmem:[#allocation3 + $0x120] sm:$0xff] }
  0x53   :  { %433 = vmatprep.subr.mxu0 %v5287_v61  ;;  %504 = vmatprep.subr.mxu1 %v5289_v0  ;;  %9251 = vst [vmem:[#allocation55_spill] sm:$0xff] %v5313_v59  ;;  %9252 = vst [vmem:[#allocation56_spill] sm:$0xff] %v5317_v62  ;;  %v5319_v61 = vld [vmem:[#allocation3 + $0x130] sm:$0xff]  ;;  %v5323_v0 = vld [vmem:[#allocation3 + $0x108] sm:$0xff] }
  0x54   :  { %434 = vmatpush1.msra.mxu0 %v5293_v2  ;;  %505 = vmatpush1.msra.mxu1 %v5295_v1  ;;  %9253 = vst [vmem:[#allocation57_spill] sm:$0xff] %v5319_v61  ;;  %9254 = vst [vmem:[#allocation58_spill] sm:$0xff] %v5323_v0  ;;  %v5325_v2 = vld [vmem:[#allocation3 + $0x118] sm:$0xff]  ;;  %v5329_v1 = vld [vmem:[#allocation3 + $0x100] sm:$0xff] }
  0x55   :  { %435 = vmatprep.subr.mxu0 %v5299_v63  ;;  %506 = vmatprep.subr.mxu1 %v5301_v56  ;;  %9255 = vst [vmem:[#allocation59_spill] sm:$0xff] %v5325_v2  ;;  %9256 = vst [vmem:[#allocation60_spill] sm:$0xff] %v5329_v1  ;;  %v5331_v63 = vld [vmem:[#allocation3 + $0x110] sm:$0xff]  ;;  %v5335_v56 = vld [vmem:[#allocation3 + $0xe8] sm:$0xff] }
  0x56   :  { %436 = vmatpush1.msra.mxu0 %v5305_v58  ;;  %507 = vmatpush1.msra.mxu1 %v5307_v55  ;;  %9257 = vst [vmem:[#allocation61_spill] sm:$0xff] %v5331_v63  ;;  %9258 = vst [vmem:[#allocation62_spill] sm:$0xff] %v5335_v56  ;;  %v5337_v58 = vld [vmem:[#allocation3 + $0xf8] sm:$0xff]  ;;  %v5341_v55 = vld [vmem:[#allocation3 + $0xe0] sm:$0xff] }
  0x57   :  { %437 = vmatprep.subr.mxu0 %v5311_v60  ;;  %508 = vmatprep.subr.mxu1 %v5313_v59  ;;  %9259 = vst [vmem:[#allocation63_spill] sm:$0xff] %v5337_v58  ;;  %9260 = vst [vmem:[#allocation64_spill] sm:$0xff] %v5341_v55  ;;  %v5343_v60 = vld [vmem:[#allocation3 + $0xf0] sm:$0xff]  ;;  %v5347_v59 = vld [vmem:[#allocation3 + $0xc8] sm:$0xff] }
  0x58   :  { %438 = vmatpush1.msra.mxu0 %v5317_v62  ;;  %509 = vmatpush1.msra.mxu1 %v5319_v61  ;;  %9261 = vst [vmem:[#allocation65_spill] sm:$0xff] %v5343_v60  ;;  %9262 = vst [vmem:[#allocation66_spill] sm:$0xff] %v5347_v59  ;;  %v5349_v62 = vld [vmem:[#allocation3 + $0xd8] sm:$0xff]  ;;  %v5353_v61 = vld [vmem:[#allocation3 + $0xc0] sm:$0xff] }
  0x59   :  { %439 = vmatprep.subr.mxu0 %v5323_v0  ;;  %510 = vmatprep.subr.mxu1 %v5325_v2  ;;  %9263 = vst [vmem:[#allocation67_spill] sm:$0xff] %v5349_v62  ;;  %9264 = vst [vmem:[#allocation68_spill] sm:$0xff] %v5353_v61  ;;  %v5355_v0 = vld [vmem:[#allocation3 + $0xd0] sm:$0xff]  ;;  %v5359_v2 = vld [vmem:[#allocation3 + $0xa8] sm:$0xff] }
  0x5a   :  { %440 = vmatpush1.msra.mxu0 %v5329_v1  ;;  %511 = vmatpush1.msra.mxu1 %v5331_v63  ;;  %9265 = vst [vmem:[#allocation69_spill] sm:$0xff] %v5355_v0  ;;  %9266 = vst [vmem:[#allocation70_spill] sm:$0xff] %v5359_v2  ;;  %v5361_v1 = vld [vmem:[#allocation3 + $0xb8] sm:$0xff]  ;;  %v5365_v63 = vld [vmem:[#allocation3 + $0xa0] sm:$0xff] }
  0x5b   :  { %441 = vmatprep.subr.mxu0 %v5335_v56  ;;  %512 = vmatprep.subr.mxu1 %v5337_v58  ;;  %9267 = vst [vmem:[#allocation71_spill] sm:$0xff] %v5361_v1  ;;  %9268 = vst [vmem:[#allocation72_spill] sm:$0xff] %v5365_v63  ;;  %v5367_v56 = vld [vmem:[#allocation3 + $0xb0] sm:$0xff]  ;;  %v5371_v58 = vld [vmem:[#allocation3 + $0x88] sm:$0xff] }
  0x5c   :  { %442 = vmatpush1.msra.mxu0 %v5341_v55  ;;  %513 = vmatpush1.msra.mxu1 %v5343_v60  ;;  %9269 = vst [vmem:[#allocation73_spill] sm:$0xff] %v5367_v56  ;;  %9270 = vst [vmem:[#allocation74_spill] sm:$0xff] %v5371_v58  ;;  %v5373_v55 = vld [vmem:[#allocation3 + $0x98] sm:$0xff]  ;;  %v5377_v60 = vld [vmem:[#allocation3 + $0x80] sm:$0xff] }
  0x5d   :  { %443 = vmatprep.subr.mxu0 %v5347_v59  ;;  %514 = vmatprep.subr.mxu1 %v5349_v62  ;;  %9271 = vst [vmem:[#allocation75_spill] sm:$0xff] %v5373_v55  ;;  %9272 = vst [vmem:[#allocation76_spill] sm:$0xff] %v5377_v60  ;;  %v5379_v59 = vld [vmem:[#allocation3 + $0x90] sm:$0xff]  ;;  %v5383_v62 = vld [vmem:[#allocation3 + $0x68] sm:$0xff] }
  0x5e   :  { %444 = vmatpush1.msra.mxu0 %v5353_v61  ;;  %515 = vmatpush1.msra.mxu1 %v5355_v0  ;;  %9273 = vst [vmem:[#allocation77_spill] sm:$0xff] %v5379_v59  ;;  %9274 = vst [vmem:[#allocation78_spill] sm:$0xff] %v5383_v62  ;;  %v5385_v61 = vld [vmem:[#allocation3 + $0x78] sm:$0xff]  ;;  %v5389_v0 = vld [vmem:[#allocation3 + $0x60] sm:$0xff] }
  0x5f   :  { %445 = vmatprep.subr.mxu0 %v5359_v2  ;;  %516 = vmatprep.subr.mxu1 %v5361_v1  ;;  %9275 = vst [vmem:[#allocation79_spill] sm:$0xff] %v5385_v61  ;;  %9276 = vst [vmem:[#allocation80_spill] sm:$0xff] %v5389_v0  ;;  %v5391_v2 = vld [vmem:[#allocation3 + $0x70] sm:$0xff]  ;;  %v5395_v1 = vld [vmem:[#allocation3 + $0x48] sm:$0xff] }
  0x60   :  { %446 = vmatpush1.msra.mxu0 %v5365_v63  ;;  %517 = vmatpush1.msra.mxu1 %v5367_v56  ;;  %9277 = vst [vmem:[#allocation81_spill] sm:$0xff] %v5391_v2  ;;  %9278 = vst [vmem:[#allocation82_spill] sm:$0xff] %v5395_v1  ;;  %v5397_v63 = vld [vmem:[#allocation3 + $0x58] sm:$0xff]  ;;  %v5401_v56 = vld [vmem:[#allocation3 + $0x40] sm:$0xff] }
  0x61   :  { %447 = vmatprep.subr.mxu0 %v5371_v58  ;;  %518 = vmatprep.subr.mxu1 %v5373_v55  ;;  %9279 = vst [vmem:[#allocation83_spill] sm:$0xff] %v5397_v63  ;;  %9280 = vst [vmem:[#allocation84_spill] sm:$0xff] %v5401_v56  ;;  %v5403_v58 = vld [vmem:[#allocation3 + $0x50] sm:$0xff]  ;;  %v5407_v55 = vld [vmem:[#allocation3 + $0x28] sm:$0xff] }
  0x62   :  { %448 = vmatpush1.msra.mxu0 %v5377_v60  ;;  %519 = vmatpush1.msra.mxu1 %v5379_v59  ;;  %9281 = vst [vmem:[#allocation85_spill] sm:$0xff] %v5403_v58  ;;  %9282 = vst [vmem:[#allocation86_spill] sm:$0xff] %v5407_v55  ;;  %v5409_v60 = vld [vmem:[#allocation3 + $0x38] sm:$0xff]  ;;  %v5413_v59 = vld [vmem:[#allocation3 + $0x20] sm:$0xff] }
  0x63   :  { %449 = vmatprep.subr.mxu0 %v5383_v62  ;;  %520 = vmatprep.subr.mxu1 %v5385_v61  ;;  %9283 = vst [vmem:[#allocation87_spill] sm:$0xff] %v5409_v60  ;;  %9284 = vst [vmem:[#allocation88_spill] sm:$0xff] %v5413_v59  ;;  %v5415_v62 = vld [vmem:[#allocation3 + $0x30] sm:$0xff]  ;;  %v5419_v61 = vld [vmem:[#allocation3 + $0x8] sm:$0xff] }
  0x64   :  { %450 = vmatpush1.msra.mxu0 %v5389_v0  ;;  %521 = vmatpush1.msra.mxu1 %v5391_v2  ;;  %9285 = vst [vmem:[#allocation89_spill] sm:$0xff] %v5415_v62  ;;  %9286 = vst [vmem:[#allocation90_spill] sm:$0xff] %v5419_v61  ;;  %v5421_v0 = vld [vmem:[#allocation3 + $0x18] sm:$0xff]  ;;  %v5425_v2 = vld [vmem:[#allocation3] sm:$0xff] }
  0x65   :  { %451 = vmatprep.subr.mxu0 %v5395_v1  ;;  %522 = vmatprep.subr.mxu1 %v5397_v63  ;;  %9287 = vst [vmem:[#allocation91_spill] sm:$0xff] %v5421_v0  ;;  %9288 = vst [vmem:[#allocation92_spill] sm:$0xff] %v5425_v2  ;;  %v5429_v63 = vld [vmem:[#allocation3 + $0x10] sm:$0xff]  ;;  %v5593_v1 = vld [vmem:[#allocation5 + $0x68] sm:$0xff] }
  0x66   :  { %452 = vmatpush1.msra.mxu0 %v5401_v56  ;;  %523 = vmatpush1.msra.mxu1 %v5403_v58  ;;  %9289 = vst [vmem:[#allocation93_spill] sm:$0xff] %v5429_v63  ;;  %v5569_v58 = vld [vmem:[#allocation5 + $0xa8] sm:$0xff]  ;;  %v5577_v56 = vld [vmem:[#allocation5 + $0xb0] sm:$0xff]  ;;  %9338 = vst [vmem:[#allocation142_spill] sm:$0xff] %v5593_v1 }
  0x67   :  { %453 = vmatprep.subr.mxu0 %v5407_v55  ;;  %524 = vmatprep.subr.mxu1 %v5409_v60  ;;  %v347_v60 = vld [vmem:[%s8532_s0] sm:$0x3]  ;;  %9330 = vst [vmem:[#allocation134_spill] sm:$0xff] %v5569_v58  ;;  %9333 = vst [vmem:[#allocation137_spill] sm:$0xff] %v5577_v56 }
  0x68   :  { %454 = vmatpush1.msra.mxu0 %v5413_v59  ;;  %525 = vmatpush1.msra.mxu1 %v5415_v62  ;;  %v5459_v62 = vld [vmem:[#allocation5 + $0x1e0] sm:$0xff]  ;;  %v5467_v59 = vld [vmem:[#allocation5 + $0x1d8] sm:$0xff] }
  0x69   :  { %455 = vmatprep.subr.mxu0 %v5419_v61  ;;  %526 = vmatprep.subr.mxu1 %v5421_v0  ;;  %v4165_v0 = vld [vmem:[%s8532_s0 + $0xc] sm:$0x3]  ;;  %v5455_v61 = vld [vmem:[#allocation5 + $0x1f8] sm:$0xff]  ;;  %9292 = vst [vmem:[#allocation96_spill] sm:$0xff] %v5459_v62  ;;  %9295 = vst [vmem:[#allocation99_spill] sm:$0xff] %v5467_v59 }
  0x6a   :  { %456 = vmatpush1.msra.mxu0 %v5425_v2  ;;  %489 = vmatprep.mubr.f32.mxu0 %v9229_v57  ;;  %v4160_v2 = vld [vmem:[%s8532_s0 + $0x2] sm:$0x3]  ;;  %9291 = vst [vmem:[#allocation95_spill] sm:$0xff] %v5455_v61  ;;  %v5561_v55 = vld [vmem:[#allocation5 + $0xd8] sm:$0xff] }
  0x6b   :  { %527 = vmatpush1.msra.mxu1 %v5429_v63  ;;  %560 = vmatprep.mubr.f32.mxu1 %v9229_v57  ;;  %v4163_v63 = vld [vmem:[%s8532_s0 + $0x8] sm:$0x3]  ;;  %9327 = vst [vmem:[#allocation131_spill] sm:$0xff] %v5561_v55 }
  0x6c   :  { %490 = vmatmul.mubr.f32.vlgmr.msra.gmra.mxu0 %v9229_v57  ;;  %561 = vmatmul.mubr.f32.vlgmr.msra.gmra.mxu1 %v9229_v57 }
  0x6d   :  { %350 = vperm.xlu0 %4176, %v347_v60   ;;  %714 = vmatprep.mubr.f32.mxu0 %v9229_v57  ;;  %v5453_v60 = vld [vmem:[#allocation5 + $0x1e8] sm:$0xff] }
  0x6e   :  { %785 = vmatprep.mubr.f32.mxu1 %v9229_v57  ;;  %9290 = vst [vmem:[#allocation94_spill] sm:$0xff] %v5453_v60  ;;  %650 = vmatprep.subr.mxu0 %v5453_v60  ;;  %v5473_v60 = vld [vmem:[#allocation5 + $0x1d0] sm:$0xff] }
  0x6f   :  { %721 = vmatprep.subr.mxu1 %v5455_v61  ;;  %651 = vmatpush1.msra.mxu0 %v5459_v62  ;;  %9297 = vst [vmem:[#allocation101_spill] sm:$0xff] %v5473_v60  ;;  %v5477_v61 = vld [vmem:[#allocation5 + $0x1a8] sm:$0xff]  ;;  %v5479_v62 = vld [vmem:[#allocation5 + $0x1b8] sm:$0xff] }
  0x70   :  { %9298 = vst [vmem:[#allocation102_spill] sm:$0xff] %v5477_v61  ;;  %9299 = vst [vmem:[#allocation103_spill] sm:$0xff] %v5479_v62 }
  0x71   :  { %953 = vperm.xlu0 %4176, %v4160_v2   ;;  %v5461_v2 = vld [vmem:[#allocation5 + $0x1f0] sm:$0xff] }
  0x72   :  { %9293 = vst [vmem:[#allocation97_spill] sm:$0xff] %v5461_v2  ;;  %722 = vmatpush1.msra.mxu1 %v5461_v2  ;;  %v5483_v2 = vld [vmem:[#allocation5 + $0x1a0] sm:$0xff] }
  0x73   :  { %723 = vmatprep.subr.mxu1 %v5467_v59  ;;  %9300 = vst [vmem:[#allocation104_spill] sm:$0xff] %v5483_v2  ;;  %v5489_v59 = vld [vmem:[#allocation5 + $0x188] sm:$0xff] }
  0x74   :  { %724 = vmatpush1.msra.mxu1 %v5473_v60  ;;  %9302 = vst [vmem:[#allocation106_spill] sm:$0xff] %v5489_v59  ;;  %v5495_v60 = vld [vmem:[#allocation5 + $0x180] sm:$0xff] }
  0x75   :  { %2378 = vperm.xlu0 %4176, %v4163_v63   ;;  %v5465_v63 = vld [vmem:[#allocation5 + $0x1c8] sm:$0xff]  ;;  %725 = vmatprep.subr.mxu1 %v5479_v62  ;;  %9304 = vst [vmem:[#allocation108_spill] sm:$0xff] %v5495_v60 }
  0x76   :  { %9294 = vst [vmem:[#allocation98_spill] sm:$0xff] %v5465_v63  ;;  %652 = vmatprep.subr.mxu0 %v5465_v63  ;;  %v5485_v63 = vld [vmem:[#allocation5 + $0x1b0] sm:$0xff]  ;;  %v5501_v62 = vld [vmem:[#allocation5 + $0x168] sm:$0xff] }
  0x77   :  { %9301 = vst [vmem:[#allocation105_spill] sm:$0xff] %v5485_v63  ;;  %726 = vmatpush1.msra.mxu1 %v5485_v63  ;;  %9306 = vst [vmem:[#allocation110_spill] sm:$0xff] %v5501_v62  ;;  %v5507_v63 = vld [vmem:[#allocation5 + $0x160] sm:$0xff] }
  0x78   :  { %9308 = vst [vmem:[#allocation112_spill] sm:$0xff] %v5507_v63 }
  0x79   :  { %3328 = vperm.xlu0 %4176, %v4165_v0   ;;  %v5471_v0 = vld [vmem:[#allocation5 + $0x1c0] sm:$0xff] }
  0x7a   :  { %9296 = vst [vmem:[#allocation100_spill] sm:$0xff] %v5471_v0  ;;  %653 = vmatpush1.msra.mxu0 %v5471_v0  ;;  %v5491_v0 = vld [vmem:[#allocation5 + $0x198] sm:$0xff] }
  0x7b   :  { %654 = vmatprep.subr.mxu0 %v5477_v61  ;;  %9303 = vst [vmem:[#allocation107_spill] sm:$0xff] %v5491_v0  ;;  %727 = vmatprep.subr.mxu1 %v5491_v0  ;;  %v5497_v61 = vld [vmem:[#allocation5 + $0x190] sm:$0xff]  ;;  %v5513_v0 = vld [vmem:[#allocation5 + $0x148] sm:$0xff] }
  0x7c   :  { %655 = vmatpush1.msra.mxu0 %v5483_v2  ;;  %9305 = vst [vmem:[#allocation109_spill] sm:$0xff] %v5497_v61  ;;  %728 = vmatpush1.msra.mxu1 %v5497_v61  ;;  %v5503_v2 = vld [vmem:[#allocation5 + $0x178] sm:$0xff]  ;;  %9310 = vst [vmem:[#allocation114_spill] sm:$0xff] %v5513_v0  ;;  %v5519_v61 = vld [vmem:[#allocation5 + $0x140] sm:$0xff] }
  0x7d   :  { %656 = vmatprep.subr.mxu0 %v5489_v59  ;;  %9307 = vst [vmem:[#allocation111_spill] sm:$0xff] %v5503_v2  ;;  %729 = vmatprep.subr.mxu1 %v5503_v2  ;;  %v5509_v59 = vld [vmem:[#allocation5 + $0x170] sm:$0xff]  ;;  %9312 = vst [vmem:[#allocation116_spill] sm:$0xff] %v5519_v61  ;;  %v5525_v2 = vld [vmem:[#allocation5 + $0x128] sm:$0xff] }
  0x7e   :  { %657 = vmatpush1.msra.mxu0 %v5495_v60  ;;  %9309 = vst [vmem:[#allocation113_spill] sm:$0xff] %v5509_v59  ;;  %730 = vmatpush1.msra.mxu1 %v5509_v59  ;;  %v5515_v60 = vld [vmem:[#allocation5 + $0x158] sm:$0xff]  ;;  %9314 = vst [vmem:[#allocation118_spill] sm:$0xff] %v5525_v2  ;;  %v5531_v59 = vld [vmem:[#allocation5 + $0x120] sm:$0xff] }
  0x7f   :  { %658 = vmatprep.subr.mxu0 %v5501_v62  ;;  %9311 = vst [vmem:[#allocation115_spill] sm:$0xff] %v5515_v60  ;;  %731 = vmatprep.subr.mxu1 %v5515_v60  ;;  %v5521_v62 = vld [vmem:[#allocation5 + $0x150] sm:$0xff]  ;;  %9316 = vst [vmem:[#allocation120_spill] sm:$0xff] %v5531_v59  ;;  %v5537_v60 = vld [vmem:[#allocation5 + $0x108] sm:$0xff] }
  0x80   :  { %659 = vmatpush1.msra.mxu0 %v5507_v63  ;;  %9313 = vst [vmem:[#allocation117_spill] sm:$0xff] %v5521_v62  ;;  %732 = vmatpush1.msra.mxu1 %v5521_v62  ;;  %v5527_v63 = vld [vmem:[#allocation5 + $0x138] sm:$0xff]  ;;  %9318 = vst [vmem:[#allocation122_spill] sm:$0xff] %v5537_v60  ;;  %v5543_v62 = vld [vmem:[#allocation5 + $0x100] sm:$0xff] }
  0x81   :  { %660 = vmatprep.subr.mxu0 %v5513_v0  ;;  %9315 = vst [vmem:[#allocation119_spill] sm:$0xff] %v5527_v63  ;;  %733 = vmatprep.subr.mxu1 %v5527_v63  ;;  %v5533_v0 = vld [vmem:[#allocation5 + $0x130] sm:$0xff]  ;;  %9320 = vst [vmem:[#allocation124_spill] sm:$0xff] %v5543_v62  ;;  %v5549_v63 = vld [vmem:[#allocation5 + $0xe8] sm:$0xff] }
  0x82   :  { %661 = vmatpush1.msra.mxu0 %v5519_v61  ;;  %9317 = vst [vmem:[#allocation121_spill] sm:$0xff] %v5533_v0  ;;  %734 = vmatpush1.msra.mxu1 %v5533_v0  ;;  %v5539_v61 = vld [vmem:[#allocation5 + $0x118] sm:$0xff]  ;;  %9322 = vst [vmem:[#allocation126_spill] sm:$0xff] %v5549_v63  ;;  %v5553_v0 = vld [vmem:[#allocation5 + $0xe0] sm:$0xff] }
  0x83   :  { %662 = vmatprep.subr.mxu0 %v5525_v2  ;;  %9319 = vst [vmem:[#allocation123_spill] sm:$0xff] %v5539_v61  ;;  %735 = vmatprep.subr.mxu1 %v5539_v61  ;;  %v5545_v2 = vld [vmem:[#allocation5 + $0x110] sm:$0xff]  ;;  %9324 = vst [vmem:[#allocation128_spill] sm:$0xff] %v5553_v0  ;;  %v5559_v61 = vld [vmem:[#allocation5 + $0xc8] sm:$0xff] }
  0x84   :  { %663 = vmatpush1.msra.mxu0 %v5531_v59  ;;  %9321 = vst [vmem:[#allocation125_spill] sm:$0xff] %v5545_v2  ;;  %736 = vmatpush1.msra.mxu1 %v5545_v2  ;;  %v5551_v59 = vld [vmem:[#allocation5 + $0xf8] sm:$0xff]  ;;  %9326 = vst [vmem:[#allocation130_spill] sm:$0xff] %v5559_v61  ;;  %v5565_v2 = vld [vmem:[#allocation5 + $0xc0] sm:$0xff] }
  0x85   :  { %664 = vmatprep.subr.mxu0 %v5537_v60  ;;  %9323 = vst [vmem:[#allocation127_spill] sm:$0xff] %v5551_v59  ;;  %737 = vmatprep.subr.mxu1 %v5551_v59  ;;  %v5557_v60 = vld [vmem:[#allocation5 + $0xf0] sm:$0xff]  ;;  %9328 = vst [vmem:[#allocation132_spill] sm:$0xff] %v5565_v2  ;;  %v5573_v59 = vld [vmem:[#allocation5 + $0xb8] sm:$0xff] }
  0x86   :  { %665 = vmatpush1.msra.mxu0 %v5543_v62  ;;  %9325 = vst [vmem:[#allocation129_spill] sm:$0xff] %v5557_v60  ;;  %738 = vmatpush1.msra.mxu1 %v5557_v60  ;;  %v5567_v62 = vld [vmem:[#allocation5 + $0xd0] sm:$0xff]  ;;  %9331 = vst [vmem:[#allocation135_spill] sm:$0xff] %v5573_v59  ;;  %v5581_v60 = vld [vmem:[#allocation5 + $0x88] sm:$0xff] }
  0x87   :  { %666 = vmatprep.subr.mxu0 %v5549_v63  ;;  %9329 = vst [vmem:[#allocation133_spill] sm:$0xff] %v5567_v62  ;;  %739 = vmatprep.subr.mxu1 %v5561_v55  ;;  %v5575_v63 = vld [vmem:[#allocation5 + $0xa0] sm:$0xff]  ;;  %9334 = vst [vmem:[#allocation138_spill] sm:$0xff] %v5581_v60  ;;  %v5589_v55 = vld [vmem:[#allocation5 + $0x90] sm:$0xff] }
  0x88   :  { %667 = vmatpush1.msra.mxu0 %v5553_v0  ;;  %9332 = vst [vmem:[#allocation136_spill] sm:$0xff] %v5575_v63  ;;  %740 = vmatpush1.msra.mxu1 %v5567_v62  ;;  %v5583_v0 = vld [vmem:[#allocation5 + $0x98] sm:$0xff]  ;;  %9337 = vst [vmem:[#allocation141_spill] sm:$0xff] %v5589_v55  ;;  %v5599_v62 = vld [vmem:[#allocation5 + $0x60] sm:$0xff] }
  0x89   :  { %668 = vmatprep.subr.mxu0 %v5559_v61  ;;  %9335 = vst [vmem:[#allocation139_spill] sm:$0xff] %v5583_v0  ;;  %741 = vmatprep.subr.mxu1 %v5573_v59  ;;  %v5587_v61 = vld [vmem:[#allocation5 + $0x80] sm:$0xff]  ;;  %9340 = vst [vmem:[#allocation144_spill] sm:$0xff] %v5599_v62  ;;  %v5605_v59 = vld [vmem:[#allocation5 + $0x48] sm:$0xff] }
  0x8a   :  { %669 = vmatpush1.msra.mxu0 %v5565_v2  ;;  %9336 = vst [vmem:[#allocation140_spill] sm:$0xff] %v5587_v61  ;;  %742 = vmatpush1.msra.mxu1 %v5577_v56  ;;  %v5595_v2 = vld [vmem:[#allocation5 + $0x78] sm:$0xff]  ;;  %9342 = vst [vmem:[#allocation146_spill] sm:$0xff] %v5605_v59  ;;  %v5611_v56 = vld [vmem:[#allocation5 + $0x40] sm:$0xff] }
  0x8b   :  { %670 = vmatprep.subr.mxu0 %v5569_v58  ;;  %9339 = vst [vmem:[#allocation143_spill] sm:$0xff] %v5595_v2  ;;  %743 = vmatprep.subr.mxu1 %v5583_v0  ;;  %v5601_v58 = vld [vmem:[#allocation5 + $0x70] sm:$0xff]  ;;  %9344 = vst [vmem:[#allocation148_spill] sm:$0xff] %v5611_v56  ;;  %v5617_v0 = vld [vmem:[#allocation5 + $0x28] sm:$0xff] }
  0x8c   :  { %671 = vmatpush1.msra.mxu0 %v5575_v63  ;;  %9341 = vst [vmem:[#allocation145_spill] sm:$0xff] %v5601_v58  ;;  %744 = vmatpush1.msra.mxu1 %v5589_v55  ;;  %v5607_v63 = vld [vmem:[#allocation5 + $0x58] sm:$0xff]  ;;  %9346 = vst [vmem:[#allocation150_spill] sm:$0xff] %v5617_v0  ;;  %v5623_v55 = vld [vmem:[#allocation5 + $0x20] sm:$0xff] }
  0x8d   :  { %672 = vmatprep.subr.mxu0 %v5581_v60  ;;  %9343 = vst [vmem:[#allocation147_spill] sm:$0xff] %v5607_v63  ;;  %745 = vmatprep.subr.mxu1 %v5595_v2  ;;  %v5613_v60 = vld [vmem:[#allocation5 + $0x50] sm:$0xff]  ;;  %9348 = vst [vmem:[#allocation152_spill] sm:$0xff] %v5623_v55  ;;  %v5629_v2 = vld [vmem:[#allocation5 + $0x8] sm:$0xff] }
  0x8e   :  { %673 = vmatpush1.msra.mxu0 %v5587_v61  ;;  %9345 = vst [vmem:[#allocation149_spill] sm:$0xff] %v5613_v60  ;;  %746 = vmatpush1.msra.mxu1 %v5601_v58  ;;  %v5619_v61 = vld [vmem:[#allocation5 + $0x38] sm:$0xff]  ;;  %9350 = vst [vmem:[#allocation154_spill] sm:$0xff] %v5629_v2  ;;  %v5635_v58 = vld [vmem:[#allocation5] sm:$0xff] }
  0x8f   :  { %674 = vmatprep.subr.mxu0 %v5593_v1  ;;  %9347 = vst [vmem:[#allocation151_spill] sm:$0xff] %v5619_v61  ;;  %747 = vmatprep.subr.mxu1 %v5607_v63  ;;  %v5625_v1 = vld [vmem:[#allocation5 + $0x30] sm:$0xff]  ;;  %9352 = vst [vmem:[#allocation156_spill] sm:$0xff] %v5635_v58 }
  0x90   :  { %675 = vmatpush1.msra.mxu0 %v5599_v62  ;;  %9349 = vst [vmem:[#allocation153_spill] sm:$0xff] %v5625_v1  ;;  %748 = vmatpush1.msra.mxu1 %v5613_v60  ;;  %v5631_v62 = vld [vmem:[#allocation5 + $0x18] sm:$0xff] }
  0x91   :  { %676 = vmatprep.subr.mxu0 %v5605_v59  ;;  %9351 = vst [vmem:[#allocation155_spill] sm:$0xff] %v5631_v62  ;;  %749 = vmatprep.subr.mxu1 %v5619_v61  ;;  %v5637_v59 = vld [vmem:[#allocation5 + $0x10] sm:$0xff]  ;;  %v77_v61 = vlaneseq }
  0x92   :  { %677 = vmatpush1.msra.mxu0 %v5611_v56  ;;  %9353 = vst [vmem:[#allocation157_spill] sm:$0xff] %v5637_v59  ;;  %750 = vmatpush1.msra.mxu1 %v5625_v1 }
  0x93   :  { %678 = vmatprep.subr.mxu0 %v5617_v0  ;;  %751 = vmatprep.subr.mxu1 %v5631_v62  ;;  %v78_v0 = vshrl.u32 %v77_v61, 7 }
  0x94   :  { %679 = vmatpush1.msra.mxu0 %v5623_v55  ;;  %752 = vmatpush1.msra.mxu1 %v5637_v59  ;;  %v75_v55 = vld [vmem:[%s8533_s1] sm:$0xf] }
  0x95   :  { %680 = vmatprep.subr.mxu0 %v5629_v2  ;;  %878 = vmatprep.subr.mxu1 %v5051_v4  ;;  %v5650_v60 = vsub.s32 0, %v78_v0  ;;  %v5652_v1 = vsub.s32 1, %v78_v0  ;;  %v97_v59 = vld [vmem:[%s8535_s3] sm:$0xf]  ;;  %v5690_v48 = vsub.s32 2, %v78_v0 }
  0x96   :  { %681 = vmatpush1.msra.mxu0 %v5635_v58 }
  0x97   :  { %807 = vmatprep.subr.mxu0 %v5049_v3  ;;  %9354 = vst [vmem:[#allocation158_spill] sm:$0xff] %v5650_v60  ;;  %9355 = vst [vmem:[#allocation159_spill] sm:$0xff] %v5652_v1  ;;  %v5655_v62 = vrot.slane %v75_v55, %v5650_v60  ;;  %v5660_v3 = vsub.s32 3, %v78_v0  ;;  %v5663_v4 = vrot.slane %v75_v55, %v5652_v1 }
  0x98   :  { %v5666_v58 = vrot.slane %v97_v59, %v5650_v60  ;;  %v5677_v54 = vrot.slane %v97_v59, %v5652_v1 }
  0x99   :  { %9356 = vst [vmem:[#allocation160_spill] sm:$0xff] %v5655_v62  ;;  %9357 = vst [vmem:[#allocation161_spill] sm:$0xff] %v5660_v3  ;;  %v5670_v56 = vrot.slane %v75_v55, %v5660_v3  ;;  %v5682_v51 = vrot.slane %v97_v59, %v5660_v3 }
  0x9a   :  { %9358 = vst [vmem:[#allocation162_spill] sm:$0xff] %v5663_v4  ;;  %9359 = vst [vmem:[#allocation163_spill] sm:$0xff] %v5666_v58 }
  0x9b   :  { %9360 = vst [vmem:[#allocation164_spill] sm:$0xff] %v5670_v56  ;;  %9363 = vst [vmem:[#allocation167_spill] sm:$0xff] %v5677_v54 }
  0x9c   :  { %9364 = vst [vmem:[#allocation168_spill] sm:$0xff] %v5682_v51 }
  0xe8   :  { %v351_v61 = vpop.permute.xlu0 %350 }
  0xe9   :  { %v353_v2 = vmul.f32 %v351_v61, %v5655_v62  ;;  %v354_v53 = vmul.f32 %v351_v61, %v5663_v4  ;;  %v356_v60 = vmul.f32 %v351_v61, %v5670_v56 }
  0xeb   :  { %v357_v52 = vadd.f32 %v353_v2, %v5666_v58  ;;  %v360_v4 = vadd.f32 %v356_v60, %v5682_v51  ;;  %v5694_v58 = vrot.slane %v75_v55, %v5690_v48 }
 0x10a   :  { %v5672_v63 = vpop.f32.mrf.mxu0 }
 0x10b   :  { %9361 = vst [vmem:[#allocation165_spill] sm:$0xff] %v5672_v63  ;;  %v5674_v57 = vpop.f32.mrf.mxu1  ;;  %v358_v63 = vadd.f32 %v354_v53, %v5677_v54  ;;  %v355_v53 = vmul.f32 %v351_v61, %v5694_v58 }
 0x10c   :  { %9362 = vst [vmem:[#allocation166_spill] sm:$0xff] %v5674_v57  ;;  %v5685_v62 = vpop.f32.mrf.mxu0 }
 0x10d   :  { %9365 = vst [vmem:[#allocation169_spill] sm:$0xff] %v5685_v62  ;;  %v5687_v50 = vpop.f32.mrf.mxu1 }
 0x10e   :  { %9366 = vst [vmem:[#allocation170_spill] sm:$0xff] %v5687_v50  ;;  %v5697_v50 = vrot.slane %v97_v59, %v5690_v48 }
 0x110   :  { %v359_v0 = vadd.f32 %v355_v53, %v5697_v50 }
 0x12c   :  { %v491_v49 = vpop.f32.mrf.mxu0  ;;  %v562_v57 = vpop.f32.mrf.mxu1 }
 0x12d   :  { %v567_v1 = vadd.f32 %v491_v49, %v357_v52  ;;  %v569_v49 = vadd.f32 %v562_v57, %v359_v0  ;;  %v9398_v57 = vld [vmem:[#allocation166_spill] sm:$0xff] }
 0x12e   :  { %v493_v47 = vpop.f32.mrf.mxu0  ;;  %v564_v2 = vpop.f32.mrf.mxu1 }
 0x12f   :  { %4178 = vtanh.f32 %v567_v1  ;;  %v568_v56 = vadd.f32 %v493_v47, %v358_v63  ;;  %v570_v62 = vadd.f32 %v564_v2, %v360_v4 }
 0x131   :  { %4180 = vtanh.f32 %v568_v56 }
 0x132   :  { %4182 = vtanh.f32 %v570_v62 }
 0x133   :  { %4184 = vtanh.f32 %v569_v49 }
 0x13c   :  { %v4179_v52 = vpop.eup %4178 }
 0x13d   :  { %v574_v60 = vmul.f32 0.5, %v4179_v52 }
 0x13e   :  { %v4181_v51 = vpop.eup %4180 }
 0x13f   :  { %v577_v54 = vadd.f32 0.5, %v574_v60  ;;  %v575_v1 = vmul.f32 0.5, %v4181_v51  ;;  %v4183_v3 = vpop.eup %4182 }
 0x140   :  { %v4185_v59 = vpop.eup %4184 }
 0x141   :  { %v578_v55 = vadd.f32 0.5, %v575_v1  ;;  %v582_v56 = vmul.f32 %v4183_v3, %v577_v54  ;;  %v576_v4 = vmul.f32 0.5, %v4185_v59 }
 0x143   :  { %v581_v47 = vmul.f32 0.0, %v578_v55  ;;  %v579_v62 = vadd.f32 0.5, %v576_v4 }
 0x145   :  { %v5701_v63 = vadd.f32 %v582_v56, %v581_v47 }
 0x147   :  { %4186 = vtanh.f32 %v5701_v63 }
 0x154   :  { %v4187_v61 = vpop.eup %4186 }
 0x155   :  { %v5704_v2 = vmul.f32 %v4187_v61, %v579_v62 }
 0x157   :  { %715 = vmatmul.mubr.f32.vlgmr.msra.gmra.mxu0 %v5704_v2  ;;  %786 = vmatmul.mubr.f32.vlgmr.msra.gmra.mxu1 %v5704_v2 }
 0x158   :  { %808 = vmatpush1.msra.mxu0 %v5053_v5  ;;  %879 = vmatpush1.msra.mxu1 %v5057_v6  ;;  %v9367_v5 = vld [vmem:[#allocation10_spill] sm:$0xff]  ;;  %v9368_v6 = vld [vmem:[#allocation11_spill] sm:$0xff] }
 0x159   :  { %809 = vmatprep.subr.mxu0 %v5059_v7  ;;  %880 = vmatprep.subr.mxu1 %v5061_v8  ;;  %v9369_v7 = vld [vmem:[#allocation12_spill] sm:$0xff]  ;;  %v9370_v8 = vld [vmem:[#allocation13_spill] sm:$0xff] }
 0x15a   :  { %810 = vmatpush1.msra.mxu0 %v5065_v9  ;;  %881 = vmatpush1.msra.mxu1 %v5067_v10  ;;  %v9371_v9 = vld [vmem:[#allocation14_spill] sm:$0xff]  ;;  %v9372_v10 = vld [vmem:[#allocation15_spill] sm:$0xff] }
 0x15b   :  { %811 = vmatprep.subr.mxu0 %v5069_v11  ;;  %882 = vmatprep.subr.mxu1 %v5073_v12  ;;  %v9373_v11 = vld [vmem:[#allocation16_spill] sm:$0xff]  ;;  %v9374_v12 = vld [vmem:[#allocation17_spill] sm:$0xff] }
 0x15c   :  { %812 = vmatpush1.msra.mxu0 %v5075_v13  ;;  %883 = vmatpush1.msra.mxu1 %v5077_v14  ;;  %v9375_v13 = vld [vmem:[#allocation18_spill] sm:$0xff]  ;;  %v9376_v14 = vld [vmem:[#allocation19_spill] sm:$0xff] }
 0x15d   :  { %813 = vmatprep.subr.mxu0 %v5081_v15  ;;  %884 = vmatprep.subr.mxu1 %v5083_v16  ;;  %v9377_v15 = vld [vmem:[#allocation20_spill] sm:$0xff]  ;;  %v9378_v16 = vld [vmem:[#allocation21_spill] sm:$0xff] }
 0x15e   :  { %814 = vmatpush1.msra.mxu0 %v5087_v17  ;;  %885 = vmatpush1.msra.mxu1 %v5089_v18  ;;  %v9379_v17 = vld [vmem:[#allocation22_spill] sm:$0xff]  ;;  %v9380_v18 = vld [vmem:[#allocation23_spill] sm:$0xff] }
 0x15f   :  { %815 = vmatprep.subr.mxu0 %v5093_v19  ;;  %886 = vmatprep.subr.mxu1 %v5095_v20  ;;  %v9381_v19 = vld [vmem:[#allocation24_spill] sm:$0xff]  ;;  %v9382_v20 = vld [vmem:[#allocation25_spill] sm:$0xff] }
 0x160   :  { %816 = vmatpush1.msra.mxu0 %v5099_v21  ;;  %887 = vmatpush1.msra.mxu1 %v5101_v22  ;;  %v9383_v21 = vld [vmem:[#allocation26_spill] sm:$0xff]  ;;  %v9384_v22 = vld [vmem:[#allocation27_spill] sm:$0xff] }
 0x161   :  { %817 = vmatprep.subr.mxu0 %v5105_v23  ;;  %888 = vmatprep.subr.mxu1 %v5107_v24  ;;  %v9385_v23 = vld [vmem:[#allocation28_spill] sm:$0xff]  ;;  %v9386_v24 = vld [vmem:[#allocation29_spill] sm:$0xff] }
 0x162   :  { %818 = vmatpush1.msra.mxu0 %v5111_v25  ;;  %889 = vmatpush1.msra.mxu1 %v5113_v26  ;;  %v9387_v25 = vmov 0.0   ;;  %v9388_v26 = vld [vmem:[#allocation30_spill] sm:$0xff] }
 0x163   :  { %819 = vmatprep.subr.mxu0 %v5117_v27  ;;  %890 = vmatprep.subr.mxu1 %v5119_v28  ;;  %v9389_v27 = vld [vmem:[#allocation31_spill] sm:$0xff]  ;;  %v119_v28 = vld [vmem:[%s8538_s6] sm:$0xf] }
 0x164   :  { %820 = vmatpush1.msra.mxu0 %v5123_v29  ;;  %891 = vmatpush1.msra.mxu1 %v5125_v30  ;;  %v9390_v29 = vld [vmem:[#allocation158_spill] sm:$0xff]  ;;  %v5793_v54 = vrot.slane %v119_v28, %v5690_v48 }
 0x165   :  { %821 = vmatprep.subr.mxu0 %v5129_v31  ;;  %892 = vmatprep.subr.mxu1 %v5131_v32  ;;  %v5778_v30 = vrot.slane %v119_v28, %v9390_v29  ;;  %v9392_v31 = vld [vmem:[#allocation159_spill] sm:$0xff]  ;;  %v9420_v29 = vld [vmem:[#allocation53_spill] sm:$0xff] }
 0x166   :  { %822 = vmatpush1.msra.mxu0 %v5135_v33  ;;  %893 = vmatpush1.msra.mxu1 %v5137_v34  ;;  %v5781_v32 = vrot.slane %v119_v28, %v9392_v31  ;;  %v9394_v33 = vld [vmem:[#allocation161_spill] sm:$0xff]  ;;  %v343_v3 = vadd.f32 %v9398_v57, %v5793_v54  ;;  %v9421_v31 = vld [vmem:[#allocation54_spill] sm:$0xff] }
 0x167   :  { %823 = vmatprep.subr.mxu0 %v5141_v35  ;;  %894 = vmatprep.subr.mxu1 %v5143_v36  ;;  %9391 = vst [vmem:[#allocation10_spill] sm:$0xff] %v5778_v30  ;;  %v5784_v34 = vrot.slane %v119_v28, %v9394_v33  ;;  %v9395_v35 = vld [vmem:[#allocation165_spill] sm:$0xff]  ;;  %v9419_v28 = vld [vmem:[#allocation52_spill] sm:$0xff]  ;;  %v9422_v33 = vld [vmem:[#allocation55_spill] sm:$0xff] }
 0x168   :  { %824 = vmatpush1.msra.mxu0 %v5147_v37  ;;  %895 = vmatpush1.msra.mxu1 %v5149_v38  ;;  %9393 = vst [vmem:[#allocation11_spill] sm:$0xff] %v5781_v32  ;;  %v272_v36 = vadd.f32 %v9395_v35, %v5778_v30  ;;  %v9423_v35 = vld [vmem:[#allocation56_spill] sm:$0xff]  ;;  %v9436_v57 = vld [vmem:[#allocation69_spill] sm:$0xff] }
 0x169   :  { %825 = vmatprep.subr.mxu0 %v5153_v39  ;;  %896 = vmatprep.subr.mxu1 %v5155_v40  ;;  %v9396_v39 = vld [vmem:[#allocation169_spill] sm:$0xff] }
 0x16a   :  { %826 = vmatpush1.msra.mxu0 %v5159_v41  ;;  %897 = vmatpush1.msra.mxu1 %v5161_v42  ;;  %v274_v40 = vadd.f32 %v9396_v39, %v5781_v32  ;;  %v9397_v41 = vld [vmem:[#allocation170_spill] sm:$0xff]  ;;  %v9427_v39 = vld [vmem:[#allocation60_spill] sm:$0xff] }
 0x16b   :  { %827 = vmatprep.subr.mxu0 %v5165_v43  ;;  %898 = vmatprep.subr.mxu1 %v5167_v44  ;;  %v345_v42 = vadd.f32 %v9397_v41, %v5784_v34  ;;  %v9429_v41 = vld [vmem:[#allocation62_spill] sm:$0xff] }
 0x16c   :  { %828 = vmatpush1.msra.mxu0 %v5171_v45  ;;  %899 = vmatpush1.msra.mxu1 %v5173_v46 }
 0x16d   :  { %829 = vmatprep.subr.mxu0 %v9367_v5  ;;  %900 = vmatprep.subr.mxu1 %v9368_v6 }
 0x16e   :  { %830 = vmatpush1.msra.mxu0 %v9369_v7  ;;  %901 = vmatpush1.msra.mxu1 %v9370_v8  ;;  %v9399_v7 = vld [vmem:[#allocation32_spill] sm:$0xff]  ;;  %v9400_v8 = vld [vmem:[#allocation33_spill] sm:$0xff] }
 0x16f   :  { %831 = vmatprep.subr.mxu0 %v9371_v9  ;;  %902 = vmatprep.subr.mxu1 %v9372_v10  ;;  %v9401_v9 = vld [vmem:[#allocation34_spill] sm:$0xff]  ;;  %v9402_v10 = vld [vmem:[#allocation35_spill] sm:$0xff] }
 0x170   :  { %832 = vmatpush1.msra.mxu0 %v9373_v11  ;;  %903 = vmatpush1.msra.mxu1 %v9374_v12  ;;  %v9403_v11 = vld [vmem:[#allocation36_spill] sm:$0xff]  ;;  %v9404_v12 = vld [vmem:[#allocation37_spill] sm:$0xff] }
 0x171   :  { %833 = vmatprep.subr.mxu0 %v9375_v13  ;;  %904 = vmatprep.subr.mxu1 %v9376_v14  ;;  %v9405_v13 = vld [vmem:[#allocation38_spill] sm:$0xff]  ;;  %v9406_v14 = vld [vmem:[#allocation39_spill] sm:$0xff] }
 0x172   :  { %834 = vmatpush1.msra.mxu0 %v9377_v15  ;;  %905 = vmatpush1.msra.mxu1 %v9378_v16  ;;  %v9407_v15 = vld [vmem:[#allocation40_spill] sm:$0xff]  ;;  %v9408_v16 = vld [vmem:[#allocation41_spill] sm:$0xff] }
 0x173   :  { %835 = vmatprep.subr.mxu0 %v9379_v17  ;;  %906 = vmatprep.subr.mxu1 %v9380_v18  ;;  %v9409_v17 = vld [vmem:[#allocation42_spill] sm:$0xff]  ;;  %v9410_v18 = vld [vmem:[#allocation43_spill] sm:$0xff] }
 0x174   :  { %836 = vmatpush1.msra.mxu0 %v9381_v19  ;;  %907 = vmatpush1.msra.mxu1 %v9382_v20  ;;  %v9411_v19 = vld [vmem:[#allocation44_spill] sm:$0xff]  ;;  %v9412_v20 = vld [vmem:[#allocation45_spill] sm:$0xff] }
 0x175   :  { %837 = vmatprep.subr.mxu0 %v9383_v21  ;;  %908 = vmatprep.subr.mxu1 %v9384_v22  ;;  %v9413_v21 = vld [vmem:[#allocation46_spill] sm:$0xff]  ;;  %v9414_v22 = vld [vmem:[#allocation47_spill] sm:$0xff] }
 0x176   :  { %838 = vmatpush1.msra.mxu0 %v9385_v23  ;;  %909 = vmatpush1.msra.mxu1 %v9386_v24  ;;  %v9415_v23 = vld [vmem:[#allocation48_spill] sm:$0xff]  ;;  %v9416_v24 = vld [vmem:[#allocation49_spill] sm:$0xff] }
 0x177   :  { %871 = vmatprep.mubr.f32.mxu0 %v9387_v25  ;;  %942 = vmatprep.mubr.f32.mxu1 %v9387_v25 }
 0x178   :  { %964 = vmatprep.subr.mxu0 %v9388_v26  ;;  %1035 = vmatprep.subr.mxu1 %v9389_v27  ;;  %v9417_v26 = vld [vmem:[#allocation50_spill] sm:$0xff]  ;;  %v9418_v27 = vld [vmem:[#allocation51_spill] sm:$0xff] }
 0x217   :  { %v716_v37 = vpop.f32.mrf.mxu0  ;;  %v787_v38 = vpop.f32.mrf.mxu1 }
 0x218   :  { %v717_v43 = vadd.f32 %v716_v37, %v272_v36  ;;  %v788_v53 = vadd.f32 %v787_v38, %v343_v3  ;;  %v9424_v36 = vld [vmem:[#allocation57_spill] sm:$0xff]  ;;  %v9425_v37 = vld [vmem:[#allocation58_spill] sm:$0xff]  ;;  %v9426_v38 = vld [vmem:[#allocation59_spill] sm:$0xff] }
 0x219   :  { %v718_v44 = vpop.f32.mrf.mxu0  ;;  %v789_v45 = vpop.f32.mrf.mxu1  ;;  %v9437_v3 = vld [vmem:[#allocation70_spill] sm:$0xff] }
 0x21a   :  { %4188 = vtanh.f32 %v717_v43  ;;  %v719_v46 = vadd.f32 %v718_v44, %v274_v40  ;;  %v790_v51 = vadd.f32 %v789_v45, %v345_v42  ;;  %v9428_v40 = vld [vmem:[#allocation61_spill] sm:$0xff]  ;;  %v9430_v42 = vld [vmem:[#allocation63_spill] sm:$0xff]  ;;  %v9431_v43 = vld [vmem:[#allocation64_spill] sm:$0xff] }
 0x21b   :  { %v9432_v44 = vld [vmem:[#allocation65_spill] sm:$0xff]  ;;  %v9433_v45 = vld [vmem:[#allocation66_spill] sm:$0xff] }
 0x21c   :  { %4190 = vtanh.f32 %v719_v46  ;;  %v9434_v46 = vld [vmem:[#allocation67_spill] sm:$0xff] }
 0x21d   :  { %4192 = vtanh.f32 %v790_v51  ;;  %v9435_v51 = vld [vmem:[#allocation68_spill] sm:$0xff] }
 0x21e   :  { %4194 = vtanh.f32 %v788_v53  ;;  %v9438_v53 = vld [vmem:[#allocation71_spill] sm:$0xff] }
 0x227   :  { %v4189_v0 = vpop.eup %4188 }
 0x228   :  { %v795_v49 = vmul.f32 0.5, %v4189_v0  ;;  %v9439_v0 = vld [vmem:[#allocation72_spill] sm:$0xff] }
 0x229   :  { %v4191_v52 = vpop.eup %4190 }
 0x22a   :  { %v798_v60 = vadd.f32 0.5, %v795_v49  ;;  %v796_v1 = vmul.f32 0.5, %v4191_v52  ;;  %v4193_v55 = vpop.eup %4192  ;;  %v9440_v49 = vld [vmem:[#allocation73_spill] sm:$0xff]  ;;  %v9441_v52 = vld [vmem:[#allocation74_spill] sm:$0xff] }
 0x22b   :  { %v4195_v48 = vpop.eup %4194 }
 0x22c   :  { %v799_v47 = vadd.f32 0.5, %v796_v1  ;;  %v803_v56 = vmul.f32 %v4193_v55, %v798_v60  ;;  %v797_v62 = vmul.f32 0.5, %v4195_v48  ;;  %v9442_v60 = vld [vmem:[#allocation75_spill] sm:$0xff]  ;;  %v9443_v1 = vld [vmem:[#allocation76_spill] sm:$0xff]  ;;  %v9444_v55 = vld [vmem:[#allocation77_spill] sm:$0xff] }
 0x22d   :  { %v9448_v48 = vld [vmem:[#allocation81_spill] sm:$0xff] }
 0x22e   :  { %v802_v59 = vmul.f32 0.0, %v799_v47  ;;  %v800_v61 = vadd.f32 0.5, %v797_v62  ;;  %v9445_v47 = vld [vmem:[#allocation78_spill] sm:$0xff] }
 0x22f   :  { %v9449_v62 = vld [vmem:[#allocation82_spill] sm:$0xff] }
 0x230   :  { %v5797_v4 = vadd.f32 %v803_v56, %v802_v59  ;;  %v9446_v56 = vld [vmem:[#allocation79_spill] sm:$0xff]  ;;  %v9447_v59 = vld [vmem:[#allocation80_spill] sm:$0xff] }
 0x232   :  { %4196 = vtanh.f32 %v5797_v4 }
 0x23f   :  { %v4197_v5 = vpop.eup %4196 }
 0x240   :  { %v806_v6 = vmul.f32 %v4197_v5, %v800_v61  ;;  %v9450_v61 = vld [vmem:[#allocation83_spill] sm:$0xff]  ;;  %v9451_v5 = vld [vmem:[#allocation84_spill] sm:$0xff] }
 0x242   :  { %872 = vmatmul.mubr.f32.vlgmr.msra.gmra.mxu0 %v806_v6  ;;  %943 = vmatmul.mubr.f32.vlgmr.msra.gmra.mxu1 %v806_v6  ;;  %v9452_v6 = vld [vmem:[#allocation85_spill] sm:$0xff] }
 0x243   :  { %965 = vmatpush1.msra.mxu0 %v9399_v7  ;;  %1036 = vmatpush1.msra.mxu1 %v9400_v8  ;;  %v9453_v7 = vld [vmem:[#allocation86_spill] sm:$0xff]  ;;  %v9454_v8 = vld [vmem:[#allocation87_spill] sm:$0xff] }
 0x244   :  { %966 = vmatprep.subr.mxu0 %v9401_v9  ;;  %1037 = vmatprep.subr.mxu1 %v9402_v10  ;;  %v9455_v9 = vld [vmem:[#allocation88_spill] sm:$0xff]  ;;  %v9456_v10 = vld [vmem:[#allocation89_spill] sm:$0xff] }
 0x245   :  { %967 = vmatpush1.msra.mxu0 %v9403_v11  ;;  %1038 = vmatpush1.msra.mxu1 %v9404_v12  ;;  %v9457_v11 = vld [vmem:[#allocation90_spill] sm:$0xff]  ;;  %v9458_v12 = vld [vmem:[#allocation91_spill] sm:$0xff] }
 0x246   :  { %968 = vmatprep.subr.mxu0 %v9405_v13  ;;  %1039 = vmatprep.subr.mxu1 %v9406_v14  ;;  %v9459_v13 = vld [vmem:[#allocation92_spill] sm:$0xff]  ;;  %v9460_v14 = vld [vmem:[#allocation93_spill] sm:$0xff] }
 0x247   :  { %969 = vmatpush1.msra.mxu0 %v9407_v15  ;;  %1040 = vmatpush1.msra.mxu1 %v9408_v16  ;;  %v9461_v15 = vld [vmem:[#allocation94_spill] sm:$0xff]  ;;  %v9462_v16 = vld [vmem:[#allocation95_spill] sm:$0xff] }
 0x248   :  { %970 = vmatprep.subr.mxu0 %v9409_v17  ;;  %1041 = vmatprep.subr.mxu1 %v9410_v18  ;;  %v9463_v17 = vld [vmem:[#allocation96_spill] sm:$0xff]  ;;  %v9464_v18 = vld [vmem:[#allocation97_spill] sm:$0xff] }
 0x249   :  { %971 = vmatpush1.msra.mxu0 %v9411_v19  ;;  %1042 = vmatpush1.msra.mxu1 %v9412_v20  ;;  %v9465_v19 = vld [vmem:[#allocation98_spill] sm:$0xff]  ;;  %v9466_v20 = vld [vmem:[#allocation99_spill] sm:$0xff] }
 0x24a   :  { %972 = vmatprep.subr.mxu0 %v9413_v21  ;;  %1043 = vmatprep.subr.mxu1 %v9414_v22  ;;  %v9467_v21 = vld [vmem:[#allocation100_spill] sm:$0xff]  ;;  %v9468_v22 = vld [vmem:[#allocation101_spill] sm:$0xff] }
 0x24b   :  { %973 = vmatpush1.msra.mxu0 %v9415_v23  ;;  %1044 = vmatpush1.msra.mxu1 %v9416_v24  ;;  %v9469_v23 = vld [vmem:[#allocation102_spill] sm:$0xff]  ;;  %v9470_v24 = vld [vmem:[#allocation103_spill] sm:$0xff] }
 0x24c   :  { %974 = vmatprep.subr.mxu0 %v9417_v26  ;;  %1045 = vmatprep.subr.mxu1 %v9418_v27  ;;  %v9472_v26 = vld [vmem:[#allocation105_spill] sm:$0xff]  ;;  %v9473_v27 = vld [vmem:[#allocation106_spill] sm:$0xff] }
 0x24d   :  { %975 = vmatpush1.msra.mxu0 %v9419_v28  ;;  %1046 = vmatpush1.msra.mxu1 %v9420_v29  ;;  %v9474_v28 = vld [vmem:[#allocation107_spill] sm:$0xff]  ;;  %v9475_v29 = vld [vmem:[#allocation108_spill] sm:$0xff] }
 0x24e   :  { %976 = vmatprep.subr.mxu0 %v9421_v31  ;;  %1047 = vmatprep.subr.mxu1 %v9422_v33  ;;  %v9476_v31 = vld [vmem:[#allocation109_spill] sm:$0xff]  ;;  %v9477_v33 = vld [vmem:[#allocation110_spill] sm:$0xff] }
 0x24f   :  { %977 = vmatpush1.msra.mxu0 %v9423_v35  ;;  %1048 = vmatpush1.msra.mxu1 %v9424_v36  ;;  %v9478_v35 = vld [vmem:[#allocation111_spill] sm:$0xff]  ;;  %v9479_v36 = vld [vmem:[#allocation112_spill] sm:$0xff] }
 0x250   :  { %978 = vmatprep.subr.mxu0 %v9425_v37  ;;  %1049 = vmatprep.subr.mxu1 %v9426_v38  ;;  %v9480_v37 = vld [vmem:[#allocation113_spill] sm:$0xff]  ;;  %v9481_v38 = vld [vmem:[#allocation114_spill] sm:$0xff] }
 0x251   :  { %979 = vmatpush1.msra.mxu0 %v9427_v39  ;;  %1050 = vmatpush1.msra.mxu1 %v9428_v40  ;;  %v9482_v39 = vld [vmem:[#allocation115_spill] sm:$0xff]  ;;  %v9483_v40 = vld [vmem:[#allocation116_spill] sm:$0xff] }
 0x252   :  { %980 = vmatprep.subr.mxu0 %v9429_v41  ;;  %1051 = vmatprep.subr.mxu1 %v9430_v42  ;;  %v9484_v41 = vld [vmem:[#allocation117_spill] sm:$0xff]  ;;  %v9485_v42 = vld [vmem:[#allocation118_spill] sm:$0xff] }
 0x253   :  { %981 = vmatpush1.msra.mxu0 %v9431_v43  ;;  %1052 = vmatpush1.msra.mxu1 %v9432_v44  ;;  %v9486_v43 = vld [vmem:[#allocation119_spill] sm:$0xff]  ;;  %v9487_v44 = vld [vmem:[#allocation120_spill] sm:$0xff] }
 0x254   :  { %982 = vmatprep.subr.mxu0 %v9433_v45  ;;  %1053 = vmatprep.subr.mxu1 %v9434_v46  ;;  %v9488_v45 = vld [vmem:[#allocation121_spill] sm:$0xff]  ;;  %v9489_v46 = vld [vmem:[#allocation122_spill] sm:$0xff] }
 0x255   :  { %983 = vmatpush1.msra.mxu0 %v9435_v51  ;;  %1054 = vmatpush1.msra.mxu1 %v9436_v57  ;;  %v9490_v51 = vld [vmem:[#allocation123_spill] sm:$0xff]  ;;  %v9491_v57 = vld [vmem:[#allocation124_spill] sm:$0xff] }
 0x256   :  { %984 = vmatprep.subr.mxu0 %v9437_v3  ;;  %1055 = vmatprep.subr.mxu1 %v9438_v53  ;;  %v9492_v3 = vld [vmem:[#allocation125_spill] sm:$0xff]  ;;  %v9493_v53 = vld [vmem:[#allocation126_spill] sm:$0xff] }
 0x257   :  { %985 = vmatpush1.msra.mxu0 %v9439_v0  ;;  %1056 = vmatpush1.msra.mxu1 %v9440_v49  ;;  %v9494_v0 = vld [vmem:[#allocation127_spill] sm:$0xff]  ;;  %v9495_v49 = vld [vmem:[#allocation128_spill] sm:$0xff] }
 0x258   :  { %986 = vmatprep.subr.mxu0 %v9441_v52  ;;  %1057 = vmatprep.subr.mxu1 %v9442_v60  ;;  %v9496_v52 = vld [vmem:[#allocation129_spill] sm:$0xff]  ;;  %v9497_v60 = vld [vmem:[#allocation130_spill] sm:$0xff] }
 0x259   :  { %987 = vmatpush1.msra.mxu0 %v9443_v1  ;;  %1058 = vmatpush1.msra.mxu1 %v9444_v55  ;;  %v9498_v1 = vld [vmem:[#allocation131_spill] sm:$0xff]  ;;  %v9499_v55 = vld [vmem:[#allocation132_spill] sm:$0xff] }
 0x25a   :  { %988 = vmatprep.subr.mxu0 %v9445_v47  ;;  %1059 = vmatprep.subr.mxu1 %v9446_v56  ;;  %v9500_v47 = vld [vmem:[#allocation133_spill] sm:$0xff]  ;;  %v9501_v56 = vld [vmem:[#allocation134_spill] sm:$0xff] }
 0x25b   :  { %989 = vmatpush1.msra.mxu0 %v9447_v59  ;;  %1060 = vmatpush1.msra.mxu1 %v9448_v48  ;;  %v9502_v59 = vld [vmem:[#allocation135_spill] sm:$0xff]  ;;  %v9503_v48 = vld [vmem:[#allocation136_spill] sm:$0xff] }
 0x25c   :  { %990 = vmatprep.subr.mxu0 %v9449_v62  ;;  %1061 = vmatprep.subr.mxu1 %v9450_v61  ;;  %v9504_v62 = vld [vmem:[#allocation137_spill] sm:$0xff]  ;;  %v9505_v61 = vld [vmem:[#allocation138_spill] sm:$0xff] }
 0x25d   :  { %991 = vmatpush1.msra.mxu0 %v9451_v5  ;;  %1062 = vmatpush1.msra.mxu1 %v9452_v6  ;;  %v9506_v5 = vld [vmem:[#allocation139_spill] sm:$0xff]  ;;  %v9507_v6 = vld [vmem:[#allocation140_spill] sm:$0xff] }
 0x25e   :  { %992 = vmatprep.subr.mxu0 %v9453_v7  ;;  %1063 = vmatprep.subr.mxu1 %v9454_v8  ;;  %v9508_v7 = vld [vmem:[#allocation141_spill] sm:$0xff]  ;;  %v9509_v8 = vld [vmem:[#allocation142_spill] sm:$0xff] }
 0x25f   :  { %993 = vmatpush1.msra.mxu0 %v9455_v9  ;;  %1064 = vmatpush1.msra.mxu1 %v9456_v10  ;;  %v9510_v9 = vld [vmem:[#allocation143_spill] sm:$0xff]  ;;  %v9511_v10 = vld [vmem:[#allocation144_spill] sm:$0xff] }
 0x260   :  { %994 = vmatprep.subr.mxu0 %v9457_v11  ;;  %1065 = vmatprep.subr.mxu1 %v9458_v12  ;;  %v9512_v11 = vld [vmem:[#allocation145_spill] sm:$0xff]  ;;  %v9513_v12 = vld [vmem:[#allocation146_spill] sm:$0xff] }
 0x261   :  { %995 = vmatpush1.msra.mxu0 %v9459_v13  ;;  %1028 = vmatprep.mubr.f32.mxu0 %v9387_v25  ;;  %v9514_v13 = vld [vmem:[#allocation147_spill] sm:$0xff] }
 0x262   :  { %1066 = vmatpush1.msra.mxu1 %v9460_v14  ;;  %1099 = vmatprep.mubr.f32.mxu1 %v9387_v25  ;;  %v9515_v14 = vld [vmem:[#allocation148_spill] sm:$0xff] }
 0x263   :  { %1029 = vmatmul.mubr.f32.vlgmr.msra.gmra.mxu0 %v5704_v2  ;;  %1100 = vmatmul.mubr.f32.vlgmr.msra.gmra.mxu1 %v5704_v2  ;;  %v9471_v2 = vld [vmem:[#allocation104_spill] sm:$0xff] }
 0x264   :  { %1125 = vmatprep.subr.mxu0 %v9461_v15  ;;  %1196 = vmatprep.subr.mxu1 %v9462_v16  ;;  %v9516_v15 = vld [vmem:[#allocation149_spill] sm:$0xff]  ;;  %v9517_v16 = vld [vmem:[#allocation150_spill] sm:$0xff] }
 0x265   :  { %1126 = vmatpush1.msra.mxu0 %v9463_v17  ;;  %1197 = vmatpush1.msra.mxu1 %v9464_v18  ;;  %v9518_v17 = vld [vmem:[#allocation151_spill] sm:$0xff]  ;;  %v9519_v18 = vld [vmem:[#allocation152_spill] sm:$0xff] }
 0x266   :  { %1127 = vmatprep.subr.mxu0 %v9465_v19  ;;  %1198 = vmatprep.subr.mxu1 %v9466_v20  ;;  %v9520_v19 = vld [vmem:[#allocation153_spill] sm:$0xff]  ;;  %v9521_v20 = vld [vmem:[#allocation154_spill] sm:$0xff] }
 0x267   :  { %1128 = vmatpush1.msra.mxu0 %v9467_v21  ;;  %1199 = vmatpush1.msra.mxu1 %v9468_v22  ;;  %v9522_v21 = vld [vmem:[#allocation155_spill] sm:$0xff]  ;;  %v9523_v22 = vld [vmem:[#allocation156_spill] sm:$0xff] }
 0x268   :  { %1129 = vmatprep.subr.mxu0 %v9469_v23  ;;  %1200 = vmatprep.subr.mxu1 %v9470_v24  ;;  %v9524_v23 = vld [vmem:[#allocation157_spill] sm:$0xff]  ;;  %v5932_v24 = vld [vmem:[#allocation7 + $0x1e8] sm:$0xff] }
 0x269   :  { %1130 = vmatpush1.msra.mxu0 %v9471_v2  ;;  %1201 = vmatpush1.msra.mxu1 %v9472_v26  ;;  %v5935_v2 = vld [vmem:[#allocation7 + $0x1f8] sm:$0xff]  ;;  %v954_v26 = vpop.permute.xlu0 %953 }
 0x26a   :  { %1131 = vmatprep.subr.mxu0 %v9473_v27  ;;  %1202 = vmatprep.subr.mxu1 %v9474_v28 }
 0x26b   :  { %1132 = vmatpush1.msra.mxu0 %v9475_v29  ;;  %1203 = vmatpush1.msra.mxu1 %v9476_v31  ;;  %v9525_v29 = vld [vmem:[#allocation160_spill] sm:$0xff] }
 0x26c   :  { %1133 = vmatprep.subr.mxu0 %v9477_v33  ;;  %1204 = vmatprep.subr.mxu1 %v9478_v35  ;;  %v956_v31 = vmul.f32 %v954_v26, %v9525_v29  ;;  %v9526_v33 = vld [vmem:[#allocation162_spill] sm:$0xff] }
 0x26d   :  { %1134 = vmatpush1.msra.mxu0 %v9479_v36  ;;  %1205 = vmatpush1.msra.mxu1 %v9480_v37  ;;  %v957_v35 = vmul.f32 %v954_v26, %v9526_v33 }
 0x26e   :  { %1135 = vmatprep.subr.mxu0 %v9481_v38  ;;  %1206 = vmatprep.subr.mxu1 %v9482_v39  ;;  %v9527_v38 = vld [vmem:[#allocation163_spill] sm:$0xff] }
 0x26f   :  { %1136 = vmatpush1.msra.mxu0 %v9483_v40  ;;  %1207 = vmatpush1.msra.mxu1 %v9484_v41  ;;  %v960_v39 = vadd.f32 %v956_v31, %v9527_v38  ;;  %v9528_v40 = vld [vmem:[#allocation164_spill] sm:$0xff] }
 0x270   :  { %1137 = vmatprep.subr.mxu0 %v9485_v42  ;;  %1208 = vmatprep.subr.mxu1 %v9486_v43  ;;  %v959_v41 = vmul.f32 %v954_v26, %v9528_v40  ;;  %v6001_v31 = vld [vmem:[#allocation7 + $0x190] sm:$0xff] }
 0x271   :  { %1138 = vmatpush1.msra.mxu0 %v9487_v44  ;;  %1209 = vmatpush1.msra.mxu1 %v9488_v45  ;;  %v9529_v45 = vld [vmem:[#allocation167_spill] sm:$0xff] }
 0x272   :  { %1139 = vmatprep.subr.mxu0 %v9489_v46  ;;  %1210 = vmatprep.subr.mxu1 %v9490_v51  ;;  %v961_v46 = vadd.f32 %v957_v35, %v9529_v45  ;;  %v6004_v35 = vld [vmem:[#allocation7 + $0x168] sm:$0xff] }
 0x273   :  { %1140 = vmatpush1.msra.mxu0 %v9491_v57  ;;  %1211 = vmatpush1.msra.mxu1 %v9492_v3 }
 0x274   :  { %1141 = vmatprep.subr.mxu0 %v9493_v53  ;;  %1212 = vmatprep.subr.mxu1 %v9494_v0  ;;  %v9530_v53 = vld [vmem:[#allocation168_spill] sm:$0xff] }
 0x275   :  { %1142 = vmatpush1.msra.mxu0 %v9495_v49  ;;  %1213 = vmatpush1.msra.mxu1 %v9496_v52  ;;  %v963_v0 = vadd.f32 %v959_v41, %v9530_v53  ;;  %v958_v52 = vmul.f32 %v954_v26, %v5694_v58  ;;  %v5998_v26 = vld [vmem:[#allocation7 + $0x180] sm:$0xff] }
 0x276   :  { %1143 = vmatprep.subr.mxu0 %v9497_v60  ;;  %1214 = vmatprep.subr.mxu1 %v9498_v1  ;;  %v6010_v41 = vld [vmem:[#allocation7 + $0x160] sm:$0xff] }
 0x277   :  { %1144 = vmatpush1.msra.mxu0 %v9499_v55  ;;  %1215 = vmatpush1.msra.mxu1 %v9500_v47  ;;  %v962_v60 = vadd.f32 %v958_v52, %v5697_v50  ;;  %v6040_v52 = vld [vmem:[#allocation7 + $0x108] sm:$0xff] }
 0x278   :  { %1145 = vmatprep.subr.mxu0 %v9501_v56  ;;  %1216 = vmatprep.subr.mxu1 %v9502_v59 }
 0x279   :  { %1146 = vmatpush1.msra.mxu0 %v9503_v48  ;;  %1217 = vmatpush1.msra.mxu1 %v9504_v62 }
 0x27a   :  { %1147 = vmatprep.subr.mxu0 %v9505_v61  ;;  %1218 = vmatprep.subr.mxu1 %v9506_v5 }
 0x27b   :  { %1148 = vmatpush1.msra.mxu0 %v9507_v6  ;;  %1219 = vmatpush1.msra.mxu1 %v9508_v7 }
 0x27c   :  { %1149 = vmatprep.subr.mxu0 %v9509_v8  ;;  %1220 = vmatprep.subr.mxu1 %v9510_v9 }
 0x27d   :  { %1150 = vmatpush1.msra.mxu0 %v9511_v10  ;;  %1221 = vmatpush1.msra.mxu1 %v9512_v11 }
 0x27e   :  { %1151 = vmatprep.subr.mxu0 %v9513_v12  ;;  %1222 = vmatprep.subr.mxu1 %v9514_v13  ;;  %v5962_v13 = vld [vmem:[#allocation7 + $0x1e0] sm:$0xff] }
 0x27f   :  { %1152 = vmatpush1.msra.mxu0 %v9515_v14  ;;  %1223 = vmatpush1.msra.mxu1 %v9516_v15  ;;  %v5968_v14 = vld [vmem:[#allocation7 + $0x1c8] sm:$0xff]  ;;  %v5971_v15 = vld [vmem:[#allocation7 + $0x1d8] sm:$0xff] }
 0x280   :  { %1153 = vmatprep.subr.mxu0 %v9517_v16  ;;  %1224 = vmatprep.subr.mxu1 %v9518_v17  ;;  %v5974_v16 = vld [vmem:[#allocation7 + $0x1c0] sm:$0xff]  ;;  %v5977_v17 = vld [vmem:[#allocation7 + $0x1d0] sm:$0xff] }
 0x281   :  { %1154 = vmatpush1.msra.mxu0 %v9519_v18  ;;  %1225 = vmatpush1.msra.mxu1 %v9520_v19  ;;  %v5980_v18 = vld [vmem:[#allocation7 + $0x1a8] sm:$0xff]  ;;  %v5983_v19 = vld [vmem:[#allocation7 + $0x1b8] sm:$0xff] }
 0x282   :  { %1155 = vmatprep.subr.mxu0 %v9521_v20  ;;  %1226 = vmatprep.subr.mxu1 %v9522_v21  ;;  %v5986_v20 = vld [vmem:[#allocation7 + $0x1a0] sm:$0xff]  ;;  %v5989_v21 = vld [vmem:[#allocation7 + $0x1b0] sm:$0xff] }
 0x283   :  { %1156 = vmatpush1.msra.mxu0 %v9523_v22  ;;  %1189 = vmatprep.mubr.f32.mxu0 %v9387_v25  ;;  %v5992_v22 = vld [vmem:[#allocation7 + $0x188] sm:$0xff] }
 0x284   :  { %1227 = vmatpush1.msra.mxu1 %v9524_v23  ;;  %1260 = vmatprep.mubr.f32.mxu1 %v9387_v25  ;;  %v5995_v23 = vld [vmem:[#allocation7 + $0x198] sm:$0xff] }
 0x285   :  { %1282 = vmatprep.subr.mxu0 %v5932_v24  ;;  %1353 = vmatprep.subr.mxu1 %v5935_v2 }
 0x302   :  { %v5938_v27 = vpop.f32.mrf.mxu0  ;;  %v5940_v28 = vpop.f32.mrf.mxu1 }
 0x304   :  { %v5944_v36 = vpop.f32.mrf.mxu0  ;;  %v5946_v37 = vpop.f32.mrf.mxu1 }
 0x323   :  { %v1030_v42 = vpop.f32.mrf.mxu0  ;;  %v1101_v43 = vpop.f32.mrf.mxu1 }
 0x324   :  { %v1106_v44 = vadd.f32 %v1030_v42, %v960_v39  ;;  %v1108_v1 = vadd.f32 %v1101_v43, %v962_v60  ;;  %v6007_v39 = vld [vmem:[#allocation7 + $0x178] sm:$0xff]  ;;  %v6013_v42 = vld [vmem:[#allocation7 + $0x170] sm:$0xff]  ;;  %v6016_v43 = vld [vmem:[#allocation7 + $0x148] sm:$0xff] }
 0x325   :  { %v1032_v51 = vpop.f32.mrf.mxu0  ;;  %v1103_v57 = vpop.f32.mrf.mxu1  ;;  %v6043_v60 = vld [vmem:[#allocation7 + $0x118] sm:$0xff] }
 0x326   :  { %4198 = vtanh.f32 %v1106_v44  ;;  %v1107_v3 = vadd.f32 %v1032_v51, %v961_v46  ;;  %v1109_v49 = vadd.f32 %v1103_v57, %v963_v0  ;;  %v6019_v44 = vld [vmem:[#allocation7 + $0x158] sm:$0xff]  ;;  %v6022_v46 = vld [vmem:[#allocation7 + $0x140] sm:$0xff]  ;;  %v6025_v51 = vld [vmem:[#allocation7 + $0x150] sm:$0xff] }
 0x327   :  { %v6028_v57 = vld [vmem:[#allocation7 + $0x128] sm:$0xff]  ;;  %v6034_v0 = vld [vmem:[#allocation7 + $0x120] sm:$0xff] }
 0x328   :  { %4200 = vtanh.f32 %v1107_v3  ;;  %v6031_v3 = vld [vmem:[#allocation7 + $0x138] sm:$0xff] }
 0x329   :  { %4202 = vtanh.f32 %v1109_v49  ;;  %v6037_v49 = vld [vmem:[#allocation7 + $0x130] sm:$0xff] }
 0x32a   :  { %4204 = vtanh.f32 %v1108_v1  ;;  %v6046_v1 = vld [vmem:[#allocation7 + $0x100] sm:$0xff] }
 0x32b   :  { %9531 = vst [vmem:[#allocation12_spill] sm:$0xff] %v6046_v1 }
 0x333   :  { %v4199_v55 = vpop.eup %4198 }
 0x334   :  { %v1113_v47 = vmul.f32 0.5, %v4199_v55  ;;  %v6049_v55 = vld [vmem:[#allocation7 + $0x110] sm:$0xff] }
 0x335   :  { %v4201_v56 = vpop.eup %4200  ;;  %9532 = vst [vmem:[#allocation13_spill] sm:$0xff] %v6049_v55 }
 0x336   :  { %v1116_v59 = vadd.f32 0.5, %v1113_v47  ;;  %v1114_v48 = vmul.f32 0.5, %v4201_v56  ;;  %v4203_v61 = vpop.eup %4202  ;;  %v6052_v47 = vld [vmem:[#allocation7 + $0xe8] sm:$0xff]  ;;  %v6055_v56 = vld [vmem:[#allocation7 + $0xf8] sm:$0xff] }
 0x337   :  { %v4205_v8 = vpop.eup %4204  ;;  %9533 = vst [vmem:[#allocation14_spill] sm:$0xff] %v6052_v47  ;;  %9534 = vst [vmem:[#allocation15_spill] sm:$0xff] %v6055_v56 }
 0x338   :  { %v1117_v62 = vadd.f32 0.5, %v1114_v48  ;;  %v1121_v6 = vmul.f32 %v4203_v61, %v1116_v59  ;;  %v1115_v9 = vmul.f32 0.5, %v4205_v8  ;;  %v6058_v59 = vld [vmem:[#allocation7 + $0xe0] sm:$0xff]  ;;  %v6061_v48 = vld [vmem:[#allocation7 + $0xf0] sm:$0xff]  ;;  %v6067_v61 = vld [vmem:[#allocation7 + $0xd8] sm:$0xff] }
 0x339   :  { %9535 = vst [vmem:[#allocation16_spill] sm:$0xff] %v6058_v59  ;;  %9536 = vst [vmem:[#allocation17_spill] sm:$0xff] %v6061_v48  ;;  %v6076_v8 = vld [vmem:[#allocation7 + $0xa8] sm:$0xff] }
 0x33a   :  { %v1120_v5 = vmul.f32 %v1117_v62, %v5701_v63  ;;  %v1118_v10 = vadd.f32 0.5, %v1115_v9  ;;  %v5965_v63 = vld [vmem:[#allocation7 + $0x1f0] sm:$0xff]  ;;  %v6064_v62 = vld [vmem:[#allocation7 + $0xc8] sm:$0xff]  ;;  %9538 = vst [vmem:[#allocation19_spill] sm:$0xff] %v6067_v61  ;;  %9541 = vst [vmem:[#allocation22_spill] sm:$0xff] %v6076_v8 }
 0x33b   :  { %9537 = vst [vmem:[#allocation18_spill] sm:$0xff] %v6064_v62  ;;  %v6079_v9 = vld [vmem:[#allocation7 + $0xb8] sm:$0xff] }
 0x33c   :  { %v5955_v7 = vadd.f32 %v1121_v6, %v1120_v5  ;;  %v6070_v5 = vld [vmem:[#allocation7 + $0xc0] sm:$0xff]  ;;  %v6073_v6 = vld [vmem:[#allocation7 + $0xd0] sm:$0xff]  ;;  %9542 = vst [vmem:[#allocation23_spill] sm:$0xff] %v6079_v9 }
 0x33d   :  { %9539 = vst [vmem:[#allocation20_spill] sm:$0xff] %v6070_v5  ;;  %9540 = vst [vmem:[#allocation21_spill] sm:$0xff] %v6073_v6 }
 0x33e   :  { %4206 = vtanh.f32 %v5955_v7 }
 0x34b   :  { %v4207_v11 = vpop.eup %4206 }
 0x34c   :  { %v5958_v12 = vmul.f32 %v4207_v11, %v1118_v10  ;;  %v6082_v10 = vld [vmem:[#allocation7 + $0xa0] sm:$0xff]  ;;  %v6085_v11 = vld [vmem:[#allocation7 + $0xb0] sm:$0xff] }
 0x34d   :  { %9543 = vst [vmem:[#allocation24_spill] sm:$0xff] %v6082_v10  ;;  %9544 = vst [vmem:[#allocation25_spill] sm:$0xff] %v6085_v11 }
 0x34e   :  { %1190 = vmatmul.mubr.f32.vlgmr.msra.gmra.mxu0 %v5958_v12  ;;  %1261 = vmatmul.mubr.f32.vlgmr.msra.gmra.mxu1 %v5958_v12 }
 0x34f   :  { %1283 = vmatpush1.msra.mxu0 %v5962_v13  ;;  %1354 = vmatpush1.msra.mxu1 %v5965_v63 }
 0x350   :  { %1284 = vmatprep.subr.mxu0 %v5968_v14  ;;  %1355 = vmatprep.subr.mxu1 %v5971_v15 }
 0x351   :  { %1285 = vmatpush1.msra.mxu0 %v5974_v16  ;;  %1356 = vmatpush1.msra.mxu1 %v5977_v17 }
 0x352   :  { %1286 = vmatprep.subr.mxu0 %v5980_v18  ;;  %1357 = vmatprep.subr.mxu1 %v5983_v19 }
 0x353   :  { %1287 = vmatpush1.msra.mxu0 %v5986_v20  ;;  %1358 = vmatpush1.msra.mxu1 %v5989_v21 }
 0x354   :  { %1288 = vmatprep.subr.mxu0 %v5992_v22  ;;  %1359 = vmatprep.subr.mxu1 %v5995_v23 }
 0x355   :  { %1289 = vmatpush1.msra.mxu0 %v5998_v26  ;;  %1360 = vmatpush1.msra.mxu1 %v6001_v31 }
 0x356   :  { %1290 = vmatprep.subr.mxu0 %v6004_v35  ;;  %1361 = vmatprep.subr.mxu1 %v6007_v39 }
 0x357   :  { %1291 = vmatpush1.msra.mxu0 %v6010_v41  ;;  %1362 = vmatpush1.msra.mxu1 %v6013_v42 }
 0x358   :  { %1292 = vmatprep.subr.mxu0 %v6016_v43  ;;  %1363 = vmatprep.subr.mxu1 %v6019_v44 }
 0x359   :  { %1293 = vmatpush1.msra.mxu0 %v6022_v46  ;;  %1364 = vmatpush1.msra.mxu1 %v6025_v51 }
 0x35a   :  { %1294 = vmatprep.subr.mxu0 %v6028_v57  ;;  %1365 = vmatprep.subr.mxu1 %v6031_v3 }
 0x35b   :  { %1295 = vmatpush1.msra.mxu0 %v6034_v0  ;;  %1366 = vmatpush1.msra.mxu1 %v6037_v49 }
 0x35c   :  { %1296 = vmatprep.subr.mxu0 %v6040_v52  ;;  %1367 = vmatprep.subr.mxu1 %v6043_v60 }
 0x35d   :  { %1297 = vmatpush1.msra.mxu0 %v6046_v1  ;;  %1368 = vmatpush1.msra.mxu1 %v6049_v55 }
 0x35e   :  { %1298 = vmatprep.subr.mxu0 %v6052_v47  ;;  %1369 = vmatprep.subr.mxu1 %v6055_v56 }
 0x35f   :  { %1299 = vmatpush1.msra.mxu0 %v6058_v59  ;;  %1370 = vmatpush1.msra.mxu1 %v6061_v48 }
 0x360   :  { %1300 = vmatprep.subr.mxu0 %v6064_v62  ;;  %1371 = vmatprep.subr.mxu1 %v6067_v61  ;;  %v876_v61 = vadd.f32 %v5944_v36, %v5781_v32 }
 0x361   :  { %1301 = vmatpush1.msra.mxu0 %v6070_v5  ;;  %1372 = vmatpush1.msra.mxu1 %v6073_v6  ;;  %v6088_v5 = vld [vmem:[#allocation7 + $0x88] sm:$0xff]  ;;  %v6091_v6 = vld [vmem:[#allocation7 + $0x98] sm:$0xff] }
 0x362   :  { %1302 = vmatprep.subr.mxu0 %v6076_v8  ;;  %1373 = vmatprep.subr.mxu1 %v6079_v9  ;;  %9545 = vst [vmem:[#allocation26_spill] sm:$0xff] %v6088_v5  ;;  %9546 = vst [vmem:[#allocation27_spill] sm:$0xff] %v6091_v6  ;;  %v6094_v8 = vld [vmem:[#allocation7 + $0x80] sm:$0xff]  ;;  %v6097_v9 = vld [vmem:[#allocation7 + $0x90] sm:$0xff] }
 0x363   :  { %1303 = vmatpush1.msra.mxu0 %v6082_v10  ;;  %1374 = vmatpush1.msra.mxu1 %v6085_v11  ;;  %9547 = vst [vmem:[#allocation28_spill] sm:$0xff] %v6094_v8  ;;  %9548 = vst [vmem:[#allocation29_spill] sm:$0xff] %v6097_v9  ;;  %v6100_v10 = vld [vmem:[#allocation7 + $0x68] sm:$0xff]  ;;  %v6103_v11 = vld [vmem:[#allocation7 + $0x78] sm:$0xff] }
 0x364   :  { %1304 = vmatprep.subr.mxu0 %v6088_v5  ;;  %1375 = vmatprep.subr.mxu1 %v6091_v6  ;;  %9549 = vst [vmem:[#allocation30_spill] sm:$0xff] %v6100_v10  ;;  %9550 = vst [vmem:[#allocation31_spill] sm:$0xff] %v6103_v11  ;;  %v6106_v5 = vld [vmem:[#allocation7 + $0x60] sm:$0xff]  ;;  %v6109_v6 = vld [vmem:[#allocation7 + $0x70] sm:$0xff] }
 0x365   :  { %1305 = vmatpush1.msra.mxu0 %v6094_v8  ;;  %1376 = vmatpush1.msra.mxu1 %v6097_v9  ;;  %9551 = vst [vmem:[#allocation158_spill] sm:$0xff] %v6106_v5  ;;  %9552 = vst [vmem:[#allocation159_spill] sm:$0xff] %v6109_v6  ;;  %v6112_v8 = vld [vmem:[#allocation7 + $0x48] sm:$0xff]  ;;  %v6115_v9 = vld [vmem:[#allocation7 + $0x58] sm:$0xff] }
 0x366   :  { %1306 = vmatprep.subr.mxu0 %v6100_v10  ;;  %1377 = vmatprep.subr.mxu1 %v6103_v11  ;;  %9553 = vst [vmem:[#allocation161_spill] sm:$0xff] %v6112_v8  ;;  %9554 = vst [vmem:[#allocation165_spill] sm:$0xff] %v6115_v9  ;;  %v6118_v10 = vld [vmem:[#allocation7 + $0x40] sm:$0xff]  ;;  %v6121_v11 = vld [vmem:[#allocation7 + $0x50] sm:$0xff] }
 0x367   :  { %1307 = vmatpush1.msra.mxu0 %v6106_v5  ;;  %1378 = vmatpush1.msra.mxu1 %v6109_v6  ;;  %9555 = vst [vmem:[#allocation169_spill] sm:$0xff] %v6118_v10  ;;  %9556 = vst [vmem:[#allocation170_spill] sm:$0xff] %v6121_v11  ;;  %v6124_v5 = vld [vmem:[#allocation7 + $0x28] sm:$0xff]  ;;  %v6127_v6 = vld [vmem:[#allocation7 + $0x38] sm:$0xff] }
 0x368   :  { %1308 = vmatprep.subr.mxu0 %v6112_v8  ;;  %1379 = vmatprep.subr.mxu1 %v6115_v9  ;;  %9557 = vst [vmem:[#allocation166_spill] sm:$0xff] %v6124_v5  ;;  %9558 = vst [vmem:[#allocation32_spill] sm:$0xff] %v6127_v6  ;;  %v6130_v8 = vld [vmem:[#allocation7 + $0x20] sm:$0xff]  ;;  %v6133_v9 = vld [vmem:[#allocation7 + $0x30] sm:$0xff] }
 0x369   :  { %1309 = vmatpush1.msra.mxu0 %v6118_v10  ;;  %1380 = vmatpush1.msra.mxu1 %v6121_v11  ;;  %9559 = vst [vmem:[#allocation33_spill] sm:$0xff] %v6130_v8  ;;  %9560 = vst [vmem:[#allocation34_spill] sm:$0xff] %v6133_v9  ;;  %v6136_v10 = vld [vmem:[#allocation7 + $0x8] sm:$0xff]  ;;  %v6139_v11 = vld [vmem:[#allocation7 + $0x18] sm:$0xff] }
 0x36a   :  { %1310 = vmatprep.subr.mxu0 %v6124_v5  ;;  %1381 = vmatprep.subr.mxu1 %v6127_v6  ;;  %9561 = vst [vmem:[#allocation35_spill] sm:$0xff] %v6136_v10  ;;  %9562 = vst [vmem:[#allocation36_spill] sm:$0xff] %v6139_v11  ;;  %v6142_v5 = vld [vmem:[#allocation7] sm:$0xff]  ;;  %v6145_v6 = vld [vmem:[#allocation7 + $0x10] sm:$0xff] }
 0x36b   :  { %1311 = vmatpush1.msra.mxu0 %v6130_v8  ;;  %1382 = vmatpush1.msra.mxu1 %v6133_v9  ;;  %9563 = vst [vmem:[#allocation37_spill] sm:$0xff] %v6142_v5  ;;  %9564 = vst [vmem:[#allocation38_spill] sm:$0xff] %v6145_v6  ;;  %v6150_v9 = vld [vmem:[#allocation3 + $0x1e8] sm:$0xff] }
 0x36c   :  { %1312 = vmatprep.subr.mxu0 %v6136_v10  ;;  %1383 = vmatprep.subr.mxu1 %v6139_v11  ;;  %9565 = vst [vmem:[#allocation39_spill] sm:$0xff] %v6150_v9  ;;  %v6153_v10 = vld [vmem:[#allocation3 + $0x1f8] sm:$0xff]  ;;  %v4164_v11 = vld [vmem:[%s8532_s0 + $0xa] sm:$0x3] }
 0x36d   :  { %1313 = vmatpush1.msra.mxu0 %v6142_v5  ;;  %1384 = vmatpush1.msra.mxu1 %v6145_v6  ;;  %9566 = vst [vmem:[#allocation40_spill] sm:$0xff] %v6153_v10  ;;  %v4161_v5 = vld [vmem:[%s8532_s0 + $0x4] sm:$0x3]  ;;  %v4162_v6 = vld [vmem:[%s8532_s0 + $0x6] sm:$0x3] }
 0x36e   :  { %1346 = vmatprep.mubr.f32.mxu0 %v9387_v25  ;;  %1417 = vmatprep.mubr.f32.mxu1 %v9387_v25 }
 0x36f   :  { %1439 = vmatprep.subr.mxu0 %v6150_v9  ;;  %1510 = vmatprep.subr.mxu1 %v6153_v10  ;;  %v4166_v9 = vld [vmem:[%s8532_s0 + $0xe] sm:$0x3]  ;;  %v874_v10 = vadd.f32 %v5938_v27, %v5778_v30 }
 0x370   :  { %1428 = vperm.xlu1 %4177, %v4161_v5  }
 0x374   :  { %1903 = vperm.xlu1 %4177, %v4162_v6   ;;  %v947_v6 = vadd.f32 %v5946_v37, %v5784_v34 }
 0x378   :  { %2853 = vperm.xlu1 %4177, %v4164_v11  }
 0x37c   :  { %3803 = vperm.xlu1 %4177, %v4166_v9   ;;  %v945_v9 = vadd.f32 %v5940_v28, %v5793_v54 }
 0x40e   :  { %v1191_v8 = vpop.f32.mrf.mxu0  ;;  %v1262_v5 = vpop.f32.mrf.mxu1 }
 0x40f   :  { %v1192_v62 = vadd.f32 %v1191_v8, %v874_v10  ;;  %v1263_v27 = vadd.f32 %v1262_v5, %v945_v9  ;;  %v6198_v5 = vld [vmem:[#allocation3 + $0x1a8] sm:$0xff]  ;;  %v6207_v9 = vld [vmem:[#allocation3 + $0x1b0] sm:$0xff] }
 0x410   :  { %v1193_v48 = vpop.f32.mrf.mxu0  ;;  %v1264_v59 = vpop.f32.mrf.mxu1  ;;  %9568 = vst [vmem:[#allocation42_spill] sm:$0xff] %v6198_v5  ;;  %9571 = vst [vmem:[#allocation45_spill] sm:$0xff] %v6207_v9 }
 0x411   :  { %4208 = vtanh.f32 %v1192_v62  ;;  %v1194_v11 = vadd.f32 %v1193_v48, %v876_v61  ;;  %v1265_v56 = vadd.f32 %v1264_v59, %v947_v6  ;;  %v6201_v6 = vld [vmem:[#allocation3 + $0x1b8] sm:$0xff] }
 0x412   :  { %9569 = vst [vmem:[#allocation43_spill] sm:$0xff] %v6201_v6 }
 0x413   :  { %4210 = vtanh.f32 %v1194_v11  ;;  %v6204_v11 = vld [vmem:[#allocation3 + $0x1a0] sm:$0xff] }
 0x414   :  { %4212 = vtanh.f32 %v1265_v56  ;;  %9570 = vst [vmem:[#allocation44_spill] sm:$0xff] %v6204_v11 }
 0x415   :  { %4214 = vtanh.f32 %v1263_v27  ;;  %v6210_v27 = vld [vmem:[#allocation3 + $0x188] sm:$0xff] }
 0x416   :  { %9572 = vst [vmem:[#allocation46_spill] sm:$0xff] %v6210_v27 }
 0x41e   :  { %v4209_v30 = vpop.eup %4208 }
 0x41f   :  { %v1270_v47 = vmul.f32 0.5, %v4209_v30  ;;  %v6180_v30 = vld [vmem:[#allocation3 + $0x1e0] sm:$0xff] }
 0x420   :  { %v4211_v55 = vpop.eup %4210 }
 0x421   :  { %v1273_v1 = vadd.f32 0.5, %v1270_v47  ;;  %v1271_v36 = vmul.f32 0.5, %v4211_v55  ;;  %v4213_v32 = vpop.eup %4212  ;;  %v6183_v55 = vld [vmem:[#allocation3 + $0x1f0] sm:$0xff] }
 0x422   :  { %v4215_v56 = vpop.eup %4214  ;;  %v6195_v47 = vld [vmem:[#allocation3 + $0x1d0] sm:$0xff] }
 0x423   :  { %v1274_v37 = vadd.f32 0.5, %v1271_v36  ;;  %v1278_v8 = vmul.f32 %v4213_v32, %v1273_v1  ;;  %v1272_v59 = vmul.f32 0.5, %v4215_v56  ;;  %v6186_v32 = vld [vmem:[#allocation3 + $0x1c8] sm:$0xff]  ;;  %v6192_v1 = vld [vmem:[#allocation3 + $0x1c0] sm:$0xff]  ;;  %9567 = vst [vmem:[#allocation41_spill] sm:$0xff] %v6195_v47  ;;  %v6213_v36 = vld [vmem:[#allocation3 + $0x198] sm:$0xff] }
 0x424   :  { %9573 = vst [vmem:[#allocation47_spill] sm:$0xff] %v6213_v36  ;;  %v6225_v56 = vld [vmem:[#allocation3 + $0x178] sm:$0xff] }
 0x425   :  { %v1277_v10 = vmul.f32 %v1274_v37, %v5797_v4  ;;  %v1275_v48 = vadd.f32 0.5, %v1272_v59  ;;  %v6189_v4 = vld [vmem:[#allocation3 + $0x1d8] sm:$0xff]  ;;  %v6216_v37 = vld [vmem:[#allocation3 + $0x180] sm:$0xff]  ;;  %9577 = vst [vmem:[#allocation51_spill] sm:$0xff] %v6225_v56 }
 0x426   :  { %9574 = vst [vmem:[#allocation48_spill] sm:$0xff] %v6216_v37  ;;  %v6228_v59 = vld [vmem:[#allocation3 + $0x160] sm:$0xff] }
 0x427   :  { %v6177_v62 = vadd.f32 %v1278_v8, %v1277_v10  ;;  %v6219_v8 = vld [vmem:[#allocation3 + $0x190] sm:$0xff]  ;;  %v6222_v10 = vld [vmem:[#allocation3 + $0x168] sm:$0xff]  ;;  %9578 = vst [vmem:[#allocation52_spill] sm:$0xff] %v6228_v59 }
 0x428   :  { %9575 = vst [vmem:[#allocation49_spill] sm:$0xff] %v6219_v8  ;;  %9576 = vst [vmem:[#allocation50_spill] sm:$0xff] %v6222_v10 }
 0x429   :  { %4216 = vtanh.f32 %v6177_v62 }
 0x436   :  { %v4217_v28 = vpop.eup %4216 }
 0x437   :  { %v1281_v61 = vmul.f32 %v4217_v28, %v1275_v48  ;;  %v6231_v48 = vld [vmem:[#allocation3 + $0x170] sm:$0xff]  ;;  %v6234_v28 = vld [vmem:[#allocation3 + $0x148] sm:$0xff] }
 0x438   :  { %9579 = vst [vmem:[#allocation53_spill] sm:$0xff] %v6231_v48  ;;  %9580 = vst [vmem:[#allocation54_spill] sm:$0xff] %v6234_v28 }
 0x439   :  { %1347 = vmatmul.mubr.f32.vlgmr.msra.gmra.mxu0 %v1281_v61  ;;  %1418 = vmatmul.mubr.f32.vlgmr.msra.gmra.mxu1 %v1281_v61  ;;  %v6237_v61 = vld [vmem:[#allocation3 + $0x158] sm:$0xff] }
 0x43a   :  { %1440 = vmatpush1.msra.mxu0 %v6180_v30  ;;  %1511 = vmatpush1.msra.mxu1 %v6183_v55  ;;  %9581 = vst [vmem:[#allocation55_spill] sm:$0xff] %v6237_v61 }
 0x43b   :  { %1441 = vmatprep.subr.mxu0 %v6186_v32  ;;  %1512 = vmatprep.subr.mxu1 %v6189_v4 }
 0x43c   :  { %1442 = vmatpush1.msra.mxu0 %v6192_v1  ;;  %1513 = vmatpush1.msra.mxu1 %v6195_v47 }
 0x43d   :  { %1443 = vmatprep.subr.mxu0 %v6198_v5  ;;  %1514 = vmatprep.subr.mxu1 %v6201_v6 }
 0x43e   :  { %1444 = vmatpush1.msra.mxu0 %v6204_v11  ;;  %1515 = vmatpush1.msra.mxu1 %v6207_v9 }
 0x43f   :  { %1445 = vmatprep.subr.mxu0 %v6210_v27  ;;  %1516 = vmatprep.subr.mxu1 %v6213_v36 }
 0x440   :  { %1446 = vmatpush1.msra.mxu0 %v6216_v37  ;;  %1517 = vmatpush1.msra.mxu1 %v6219_v8 }
 0x441   :  { %1447 = vmatprep.subr.mxu0 %v6222_v10  ;;  %1518 = vmatprep.subr.mxu1 %v6225_v56  ;;  %v6240_v10 = vld [vmem:[#allocation3 + $0x140] sm:$0xff]  ;;  %v6243_v56 = vld [vmem:[#allocation3 + $0x150] sm:$0xff] }
 0x442   :  { %1448 = vmatpush1.msra.mxu0 %v6228_v59  ;;  %1519 = vmatpush1.msra.mxu1 %v6231_v48  ;;  %9582 = vst [vmem:[#allocation56_spill] sm:$0xff] %v6240_v10  ;;  %9583 = vst [vmem:[#allocation57_spill] sm:$0xff] %v6243_v56  ;;  %v6246_v59 = vld [vmem:[#allocation3 + $0x128] sm:$0xff]  ;;  %v6249_v48 = vld [vmem:[#allocation3 + $0x138] sm:$0xff] }
 0x443   :  { %1449 = vmatprep.subr.mxu0 %v6234_v28  ;;  %1520 = vmatprep.subr.mxu1 %v6237_v61  ;;  %9584 = vst [vmem:[#allocation58_spill] sm:$0xff] %v6246_v59  ;;  %9585 = vst [vmem:[#allocation59_spill] sm:$0xff] %v6249_v48  ;;  %v6252_v28 = vld [vmem:[#allocation3 + $0x120] sm:$0xff]  ;;  %v6255_v61 = vld [vmem:[#allocation3 + $0x130] sm:$0xff] }
 0x444   :  { %1450 = vmatpush1.msra.mxu0 %v6240_v10  ;;  %1521 = vmatpush1.msra.mxu1 %v6243_v56  ;;  %9586 = vst [vmem:[#allocation60_spill] sm:$0xff] %v6252_v28  ;;  %9587 = vst [vmem:[#allocation61_spill] sm:$0xff] %v6255_v61  ;;  %v6258_v10 = vld [vmem:[#allocation3 + $0x108] sm:$0xff]  ;;  %v6261_v56 = vld [vmem:[#allocation3 + $0x118] sm:$0xff] }
 0x445   :  { %1451 = vmatprep.subr.mxu0 %v6246_v59  ;;  %1522 = vmatprep.subr.mxu1 %v6249_v48  ;;  %9588 = vst [vmem:[#allocation62_spill] sm:$0xff] %v6258_v10  ;;  %9589 = vst [vmem:[#allocation63_spill] sm:$0xff] %v6261_v56  ;;  %v6264_v59 = vld [vmem:[#allocation3 + $0x100] sm:$0xff]  ;;  %v6267_v48 = vld [vmem:[#allocation3 + $0x110] sm:$0xff] }
 0x446   :  { %1452 = vmatpush1.msra.mxu0 %v6252_v28  ;;  %1523 = vmatpush1.msra.mxu1 %v6255_v61  ;;  %9590 = vst [vmem:[#allocation64_spill] sm:$0xff] %v6264_v59  ;;  %9591 = vst [vmem:[#allocation65_spill] sm:$0xff] %v6267_v48  ;;  %v6270_v28 = vld [vmem:[#allocation3 + $0xe8] sm:$0xff]  ;;  %v6273_v61 = vld [vmem:[#allocation3 + $0xf8] sm:$0xff] }
 0x447   :  { %1453 = vmatprep.subr.mxu0 %v6258_v10  ;;  %1524 = vmatprep.subr.mxu1 %v6261_v56  ;;  %9592 = vst [vmem:[#allocation66_spill] sm:$0xff] %v6270_v28  ;;  %9593 = vst [vmem:[#allocation67_spill] sm:$0xff] %v6273_v61  ;;  %v6276_v10 = vld [vmem:[#allocation3 + $0xe0] sm:$0xff]  ;;  %v6279_v56 = vld [vmem:[#allocation3 + $0xf0] sm:$0xff] }
 0x448   :  { %1454 = vmatpush1.msra.mxu0 %v6264_v59  ;;  %1525 = vmatpush1.msra.mxu1 %v6267_v48  ;;  %9594 = vst [vmem:[#allocation68_spill] sm:$0xff] %v6276_v10  ;;  %9595 = vst [vmem:[#allocation69_spill] sm:$0xff] %v6279_v56  ;;  %v6282_v59 = vld [vmem:[#allocation3 + $0xc8] sm:$0xff]  ;;  %v6285_v48 = vld [vmem:[#allocation3 + $0xd8] sm:$0xff] }
 0x449   :  { %1455 = vmatprep.subr.mxu0 %v6270_v28  ;;  %1526 = vmatprep.subr.mxu1 %v6273_v61  ;;  %9596 = vst [vmem:[#allocation70_spill] sm:$0xff] %v6282_v59  ;;  %9597 = vst [vmem:[#allocation71_spill] sm:$0xff] %v6285_v48  ;;  %v6288_v28 = vld [vmem:[#allocation3 + $0xc0] sm:$0xff]  ;;  %v6291_v61 = vld [vmem:[#allocation3 + $0xd0] sm:$0xff] }
 0x44a   :  { %1456 = vmatpush1.msra.mxu0 %v6276_v10  ;;  %1527 = vmatpush1.msra.mxu1 %v6279_v56  ;;  %9598 = vst [vmem:[#allocation72_spill] sm:$0xff] %v6288_v28  ;;  %9599 = vst [vmem:[#allocation73_spill] sm:$0xff] %v6291_v61  ;;  %v6294_v10 = vld [vmem:[#allocation3 + $0xa8] sm:$0xff]  ;;  %v6297_v56 = vld [vmem:[#allocation3 + $0xb8] sm:$0xff] }
 0x44b   :  { %1457 = vmatprep.subr.mxu0 %v6282_v59  ;;  %1528 = vmatprep.subr.mxu1 %v6285_v48  ;;  %9600 = vst [vmem:[#allocation74_spill] sm:$0xff] %v6294_v10  ;;  %9601 = vst [vmem:[#allocation75_spill] sm:$0xff] %v6297_v56  ;;  %v6300_v59 = vld [vmem:[#allocation3 + $0xa0] sm:$0xff]  ;;  %v6303_v48 = vld [vmem:[#allocation3 + $0xb0] sm:$0xff] }
 0x44c   :  { %1458 = vmatpush1.msra.mxu0 %v6288_v28  ;;  %1529 = vmatpush1.msra.mxu1 %v6291_v61  ;;  %9602 = vst [vmem:[#allocation76_spill] sm:$0xff] %v6300_v59  ;;  %9603 = vst [vmem:[#allocation77_spill] sm:$0xff] %v6303_v48  ;;  %v6306_v28 = vld [vmem:[#allocation3 + $0x88] sm:$0xff]  ;;  %v6309_v61 = vld [vmem:[#allocation3 + $0x98] sm:$0xff] }
 0x44d   :  { %1459 = vmatprep.subr.mxu0 %v6294_v10  ;;  %1530 = vmatprep.subr.mxu1 %v6297_v56  ;;  %9604 = vst [vmem:[#allocation78_spill] sm:$0xff] %v6306_v28  ;;  %9605 = vst [vmem:[#allocation79_spill] sm:$0xff] %v6309_v61  ;;  %v6312_v10 = vld [vmem:[#allocation3 + $0x80] sm:$0xff]  ;;  %v6315_v56 = vld [vmem:[#allocation3 + $0x90] sm:$0xff] }
 0x44e   :  { %1460 = vmatpush1.msra.mxu0 %v6300_v59  ;;  %1531 = vmatpush1.msra.mxu1 %v6303_v48  ;;  %9606 = vst [vmem:[#allocation80_spill] sm:$0xff] %v6312_v10  ;;  %9607 = vst [vmem:[#allocation81_spill] sm:$0xff] %v6315_v56  ;;  %v6318_v59 = vld [vmem:[#allocation3 + $0x68] sm:$0xff]  ;;  %v6321_v48 = vld [vmem:[#allocation3 + $0x78] sm:$0xff] }
 0x44f   :  { %1461 = vmatprep.subr.mxu0 %v6306_v28  ;;  %1532 = vmatprep.subr.mxu1 %v6309_v61  ;;  %9608 = vst [vmem:[#allocation82_spill] sm:$0xff] %v6318_v59  ;;  %9609 = vst [vmem:[#allocation83_spill] sm:$0xff] %v6321_v48  ;;  %v6324_v28 = vld [vmem:[#allocation3 + $0x60] sm:$0xff]  ;;  %v6327_v61 = vld [vmem:[#allocation3 + $0x70] sm:$0xff] }
 0x450   :  { %1462 = vmatpush1.msra.mxu0 %v6312_v10  ;;  %1533 = vmatpush1.msra.mxu1 %v6315_v56  ;;  %9610 = vst [vmem:[#allocation84_spill] sm:$0xff] %v6324_v28  ;;  %9611 = vst [vmem:[#allocation85_spill] sm:$0xff] %v6327_v61  ;;  %v6330_v10 = vld [vmem:[#allocation3 + $0x48] sm:$0xff]  ;;  %v6333_v56 = vld [vmem:[#allocation3 + $0x58] sm:$0xff] }
 0x451   :  { %1463 = vmatprep.subr.mxu0 %v6318_v59  ;;  %1534 = vmatprep.subr.mxu1 %v6321_v48  ;;  %9612 = vst [vmem:[#allocation86_spill] sm:$0xff] %v6330_v10  ;;  %9613 = vst [vmem:[#allocation87_spill] sm:$0xff] %v6333_v56  ;;  %v6336_v59 = vld [vmem:[#allocation3 + $0x40] sm:$0xff]  ;;  %v6339_v48 = vld [vmem:[#allocation3 + $0x50] sm:$0xff] }
 0x452   :  { %1464 = vmatpush1.msra.mxu0 %v6324_v28  ;;  %1535 = vmatpush1.msra.mxu1 %v6327_v61  ;;  %9614 = vst [vmem:[#allocation88_spill] sm:$0xff] %v6336_v59  ;;  %9615 = vst [vmem:[#allocation89_spill] sm:$0xff] %v6339_v48  ;;  %v6342_v28 = vld [vmem:[#allocation3 + $0x28] sm:$0xff]  ;;  %v6345_v61 = vld [vmem:[#allocation3 + $0x38] sm:$0xff] }
 0x453   :  { %1465 = vmatprep.subr.mxu0 %v6330_v10  ;;  %1536 = vmatprep.subr.mxu1 %v6333_v56  ;;  %9616 = vst [vmem:[#allocation90_spill] sm:$0xff] %v6342_v28  ;;  %9617 = vst [vmem:[#allocation91_spill] sm:$0xff] %v6345_v61  ;;  %v6348_v10 = vld [vmem:[#allocation3 + $0x20] sm:$0xff]  ;;  %v6351_v56 = vld [vmem:[#allocation3 + $0x30] sm:$0xff] }
 0x454   :  { %1466 = vmatpush1.msra.mxu0 %v6336_v59  ;;  %1537 = vmatpush1.msra.mxu1 %v6339_v48  ;;  %9618 = vst [vmem:[#allocation92_spill] sm:$0xff] %v6348_v10  ;;  %9619 = vst [vmem:[#allocation93_spill] sm:$0xff] %v6351_v56  ;;  %v6354_v59 = vld [vmem:[#allocation3 + $0x8] sm:$0xff]  ;;  %v6357_v48 = vld [vmem:[#allocation3 + $0x18] sm:$0xff] }
 0x455   :  { %1467 = vmatprep.subr.mxu0 %v6342_v28  ;;  %1538 = vmatprep.subr.mxu1 %v6345_v61  ;;  %9620 = vst [vmem:[#allocation94_spill] sm:$0xff] %v6354_v59  ;;  %9621 = vst [vmem:[#allocation95_spill] sm:$0xff] %v6357_v48  ;;  %v6360_v28 = vld [vmem:[#allocation3] sm:$0xff]  ;;  %v6364_v61 = vld [vmem:[#allocation3 + $0x10] sm:$0xff] }
 0x456   :  { %1468 = vmatpush1.msra.mxu0 %v6348_v10  ;;  %1539 = vmatpush1.msra.mxu1 %v6351_v56  ;;  %9622 = vst [vmem:[#allocation96_spill] sm:$0xff] %v6360_v28  ;;  %9623 = vst [vmem:[#allocation97_spill] sm:$0xff] %v6364_v61  ;;  %v6379_v56 = vld [vmem:[#allocation5 + $0x1f0] sm:$0xff] }
 0x457   :  { %1469 = vmatprep.subr.mxu0 %v6354_v59  ;;  %1540 = vmatprep.subr.mxu1 %v6357_v48  ;;  %v6370_v59 = vld [vmem:[#allocation5 + $0x1e8] sm:$0xff]  ;;  %v6373_v48 = vld [vmem:[#allocation5 + $0x1f8] sm:$0xff]  ;;  %9627 = vst [vmem:[#allocation101_spill] sm:$0xff] %v6379_v56 }
 0x458   :  { %1470 = vmatpush1.msra.mxu0 %v6360_v28  ;;  %1503 = vmatprep.mubr.f32.mxu0 %v9387_v25  ;;  %9624 = vst [vmem:[#allocation98_spill] sm:$0xff] %v6370_v59  ;;  %9625 = vst [vmem:[#allocation99_spill] sm:$0xff] %v6373_v48  ;;  %v6376_v28 = vld [vmem:[#allocation5 + $0x1e0] sm:$0xff] }
 0x459   :  { %1541 = vmatpush1.msra.mxu1 %v6364_v61  ;;  %1574 = vmatprep.mubr.f32.mxu1 %v9387_v25  ;;  %9626 = vst [vmem:[#allocation100_spill] sm:$0xff] %v6376_v28  ;;  %v6382_v61 = vld [vmem:[#allocation5 + $0x1c8] sm:$0xff] }
 0x45a   :  { %1504 = vmatmul.mubr.f32.vlgmr.msra.gmra.mxu0 %v5958_v12  ;;  %1575 = vmatmul.mubr.f32.vlgmr.msra.gmra.mxu1 %v5958_v12  ;;  %9628 = vst [vmem:[#allocation102_spill] sm:$0xff] %v6382_v61  ;;  %v6385_v12 = vld [vmem:[#allocation5 + $0x1d8] sm:$0xff] }
 0x45b   :  { %1600 = vmatprep.subr.mxu0 %v6370_v59  ;;  %1671 = vmatprep.subr.mxu1 %v6373_v48  ;;  %9629 = vst [vmem:[#allocation103_spill] sm:$0xff] %v6385_v12  ;;  %v6388_v59 = vld [vmem:[#allocation5 + $0x1c0] sm:$0xff]  ;;  %v6391_v48 = vld [vmem:[#allocation5 + $0x1d0] sm:$0xff] }
 0x45c   :  { %1601 = vmatpush1.msra.mxu0 %v6376_v28  ;;  %1672 = vmatpush1.msra.mxu1 %v6379_v56  ;;  %9630 = vst [vmem:[#allocation104_spill] sm:$0xff] %v6388_v59  ;;  %9631 = vst [vmem:[#allocation105_spill] sm:$0xff] %v6391_v48  ;;  %v6394_v28 = vld [vmem:[#allocation5 + $0x1a8] sm:$0xff]  ;;  %v6397_v56 = vld [vmem:[#allocation5 + $0x1b8] sm:$0xff] }
 0x45d   :  { %1602 = vmatprep.subr.mxu0 %v6382_v61  ;;  %1673 = vmatprep.subr.mxu1 %v6385_v12  ;;  %9632 = vst [vmem:[#allocation106_spill] sm:$0xff] %v6394_v28  ;;  %9633 = vst [vmem:[#allocation107_spill] sm:$0xff] %v6397_v56  ;;  %v6400_v61 = vld [vmem:[#allocation5 + $0x1a0] sm:$0xff]  ;;  %v6403_v12 = vld [vmem:[#allocation5 + $0x1b0] sm:$0xff] }
 0x45e   :  { %1603 = vmatpush1.msra.mxu0 %v6388_v59  ;;  %1674 = vmatpush1.msra.mxu1 %v6391_v48  ;;  %9634 = vst [vmem:[#allocation108_spill] sm:$0xff] %v6400_v61  ;;  %9635 = vst [vmem:[#allocation109_spill] sm:$0xff] %v6403_v12  ;;  %v6406_v59 = vld [vmem:[#allocation5 + $0x188] sm:$0xff]  ;;  %v6409_v48 = vld [vmem:[#allocation5 + $0x198] sm:$0xff] }
 0x45f   :  { %1604 = vmatprep.subr.mxu0 %v6394_v28  ;;  %1675 = vmatprep.subr.mxu1 %v6397_v56  ;;  %9636 = vst [vmem:[#allocation110_spill] sm:$0xff] %v6406_v59  ;;  %9637 = vst [vmem:[#allocation111_spill] sm:$0xff] %v6409_v48  ;;  %v6412_v28 = vld [vmem:[#allocation5 + $0x180] sm:$0xff]  ;;  %v6415_v56 = vld [vmem:[#allocation5 + $0x190] sm:$0xff] }
 0x460   :  { %1605 = vmatpush1.msra.mxu0 %v6400_v61  ;;  %1676 = vmatpush1.msra.mxu1 %v6403_v12  ;;  %9638 = vst [vmem:[#allocation112_spill] sm:$0xff] %v6412_v28  ;;  %9639 = vst [vmem:[#allocation113_spill] sm:$0xff] %v6415_v56  ;;  %v6418_v61 = vld [vmem:[#allocation5 + $0x168] sm:$0xff]  ;;  %v6421_v12 = vld [vmem:[#allocation5 + $0x178] sm:$0xff] }
 0x461   :  { %1606 = vmatprep.subr.mxu0 %v6406_v59  ;;  %1677 = vmatprep.subr.mxu1 %v6409_v48  ;;  %9640 = vst [vmem:[#allocation114_spill] sm:$0xff] %v6418_v61  ;;  %9641 = vst [vmem:[#allocation115_spill] sm:$0xff] %v6421_v12  ;;  %v6424_v59 = vld [vmem:[#allocation5 + $0x160] sm:$0xff]  ;;  %v6427_v48 = vld [vmem:[#allocation5 + $0x170] sm:$0xff] }
 0x462   :  { %1607 = vmatpush1.msra.mxu0 %v6412_v28  ;;  %1678 = vmatpush1.msra.mxu1 %v6415_v56  ;;  %9642 = vst [vmem:[#allocation116_spill] sm:$0xff] %v6424_v59  ;;  %9643 = vst [vmem:[#allocation117_spill] sm:$0xff] %v6427_v48  ;;  %v6430_v28 = vld [vmem:[#allocation5 + $0x148] sm:$0xff]  ;;  %v6433_v56 = vld [vmem:[#allocation5 + $0x158] sm:$0xff] }
 0x463   :  { %1608 = vmatprep.subr.mxu0 %v6418_v61  ;;  %1679 = vmatprep.subr.mxu1 %v6421_v12  ;;  %9644 = vst [vmem:[#allocation118_spill] sm:$0xff] %v6430_v28  ;;  %9645 = vst [vmem:[#allocation119_spill] sm:$0xff] %v6433_v56  ;;  %v6436_v61 = vld [vmem:[#allocation5 + $0x140] sm:$0xff]  ;;  %v6439_v12 = vld [vmem:[#allocation5 + $0x150] sm:$0xff] }
 0x464   :  { %1609 = vmatpush1.msra.mxu0 %v6424_v59  ;;  %1680 = vmatpush1.msra.mxu1 %v6427_v48  ;;  %9646 = vst [vmem:[#allocation120_spill] sm:$0xff] %v6436_v61  ;;  %9647 = vst [vmem:[#allocation121_spill] sm:$0xff] %v6439_v12  ;;  %v6442_v59 = vld [vmem:[#allocation5 + $0x128] sm:$0xff]  ;;  %v6445_v48 = vld [vmem:[#allocation5 + $0x138] sm:$0xff] }
 0x465   :  { %1610 = vmatprep.subr.mxu0 %v6430_v28  ;;  %1681 = vmatprep.subr.mxu1 %v6433_v56  ;;  %9648 = vst [vmem:[#allocation122_spill] sm:$0xff] %v6442_v59  ;;  %9649 = vst [vmem:[#allocation123_spill] sm:$0xff] %v6445_v48  ;;  %v6448_v28 = vld [vmem:[#allocation5 + $0x120] sm:$0xff]  ;;  %v6451_v56 = vld [vmem:[#allocation5 + $0x130] sm:$0xff] }
 0x466   :  { %1611 = vmatpush1.msra.mxu0 %v6436_v61  ;;  %1682 = vmatpush1.msra.mxu1 %v6439_v12  ;;  %9650 = vst [vmem:[#allocation124_spill] sm:$0xff] %v6448_v28  ;;  %9651 = vst [vmem:[#allocation125_spill] sm:$0xff] %v6451_v56  ;;  %v6454_v61 = vld [vmem:[#allocation5 + $0x108] sm:$0xff]  ;;  %v6457_v12 = vld [vmem:[#allocation5 + $0x118] sm:$0xff] }
 0x467   :  { %1612 = vmatprep.subr.mxu0 %v6442_v59  ;;  %1683 = vmatprep.subr.mxu1 %v6445_v48  ;;  %9652 = vst [vmem:[#allocation126_spill] sm:$0xff] %v6454_v61  ;;  %9653 = vst [vmem:[#allocation127_spill] sm:$0xff] %v6457_v12  ;;  %v6460_v59 = vld [vmem:[#allocation5 + $0x100] sm:$0xff]  ;;  %v6463_v48 = vld [vmem:[#allocation5 + $0x110] sm:$0xff] }
 0x468   :  { %1613 = vmatpush1.msra.mxu0 %v6448_v28  ;;  %1684 = vmatpush1.msra.mxu1 %v6451_v56  ;;  %9654 = vst [vmem:[#allocation128_spill] sm:$0xff] %v6460_v59  ;;  %9655 = vst [vmem:[#allocation129_spill] sm:$0xff] %v6463_v48  ;;  %v6466_v28 = vld [vmem:[#allocation5 + $0xe8] sm:$0xff]  ;;  %v6469_v56 = vld [vmem:[#allocation5 + $0xf8] sm:$0xff] }
 0x469   :  { %1614 = vmatprep.subr.mxu0 %v6454_v61  ;;  %1685 = vmatprep.subr.mxu1 %v6457_v12  ;;  %9656 = vst [vmem:[#allocation130_spill] sm:$0xff] %v6466_v28  ;;  %9657 = vst [vmem:[#allocation131_spill] sm:$0xff] %v6469_v56  ;;  %v6472_v61 = vld [vmem:[#allocation5 + $0xe0] sm:$0xff]  ;;  %v6475_v12 = vld [vmem:[#allocation5 + $0xf0] sm:$0xff] }
 0x46a   :  { %1615 = vmatpush1.msra.mxu0 %v6460_v59  ;;  %1686 = vmatpush1.msra.mxu1 %v6463_v48  ;;  %9658 = vst [vmem:[#allocation132_spill] sm:$0xff] %v6472_v61  ;;  %9659 = vst [vmem:[#allocation133_spill] sm:$0xff] %v6475_v12  ;;  %v6478_v59 = vld [vmem:[#allocation5 + $0xc8] sm:$0xff]  ;;  %v6481_v48 = vld [vmem:[#allocation5 + $0xd8] sm:$0xff] }
 0x46b   :  { %1616 = vmatprep.subr.mxu0 %v6466_v28  ;;  %1687 = vmatprep.subr.mxu1 %v6469_v56  ;;  %9660 = vst [vmem:[#allocation134_spill] sm:$0xff] %v6478_v59  ;;  %9661 = vst [vmem:[#allocation135_spill] sm:$0xff] %v6481_v48  ;;  %v6484_v28 = vld [vmem:[#allocation5 + $0xc0] sm:$0xff]  ;;  %v6487_v56 = vld [vmem:[#allocation5 + $0xd0] sm:$0xff] }
 0x46c   :  { %1617 = vmatpush1.msra.mxu0 %v6472_v61  ;;  %1688 = vmatpush1.msra.mxu1 %v6475_v12  ;;  %9662 = vst [vmem:[#allocation136_spill] sm:$0xff] %v6484_v28  ;;  %9663 = vst [vmem:[#allocation137_spill] sm:$0xff] %v6487_v56  ;;  %v6490_v61 = vld [vmem:[#allocation5 + $0xa8] sm:$0xff]  ;;  %v6493_v12 = vld [vmem:[#allocation5 + $0xb8] sm:$0xff] }
 0x46d   :  { %1618 = vmatprep.subr.mxu0 %v6478_v59  ;;  %1689 = vmatprep.subr.mxu1 %v6481_v48  ;;  %9664 = vst [vmem:[#allocation138_spill] sm:$0xff] %v6490_v61  ;;  %9665 = vst [vmem:[#allocation139_spill] sm:$0xff] %v6493_v12  ;;  %v6496_v59 = vld [vmem:[#allocation5 + $0xa0] sm:$0xff]  ;;  %v6499_v48 = vld [vmem:[#allocation5 + $0xb0] sm:$0xff] }
 0x46e   :  { %1619 = vmatpush1.msra.mxu0 %v6484_v28  ;;  %1690 = vmatpush1.msra.mxu1 %v6487_v56  ;;  %9666 = vst [vmem:[#allocation140_spill] sm:$0xff] %v6496_v59  ;;  %9667 = vst [vmem:[#allocation141_spill] sm:$0xff] %v6499_v48  ;;  %v6502_v28 = vld [vmem:[#allocation5 + $0x88] sm:$0xff]  ;;  %v6505_v56 = vld [vmem:[#allocation5 + $0x98] sm:$0xff] }
 0x46f   :  { %1620 = vmatprep.subr.mxu0 %v6490_v61  ;;  %1691 = vmatprep.subr.mxu1 %v6493_v12  ;;  %9668 = vst [vmem:[#allocation142_spill] sm:$0xff] %v6502_v28  ;;  %9669 = vst [vmem:[#allocation143_spill] sm:$0xff] %v6505_v56  ;;  %v6508_v61 = vld [vmem:[#allocation5 + $0x80] sm:$0xff]  ;;  %v6511_v12 = vld [vmem:[#allocation5 + $0x90] sm:$0xff] }
 0x470   :  { %1621 = vmatpush1.msra.mxu0 %v6496_v59  ;;  %1692 = vmatpush1.msra.mxu1 %v6499_v48  ;;  %9670 = vst [vmem:[#allocation144_spill] sm:$0xff] %v6508_v61  ;;  %9671 = vst [vmem:[#allocation145_spill] sm:$0xff] %v6511_v12  ;;  %v6514_v59 = vld [vmem:[#allocation5 + $0x68] sm:$0xff]  ;;  %v6517_v48 = vld [vmem:[#allocation5 + $0x78] sm:$0xff] }
 0x471   :  { %1622 = vmatprep.subr.mxu0 %v6502_v28  ;;  %1693 = vmatprep.subr.mxu1 %v6505_v56  ;;  %9672 = vst [vmem:[#allocation146_spill] sm:$0xff] %v6514_v59  ;;  %9673 = vst [vmem:[#allocation147_spill] sm:$0xff] %v6517_v48  ;;  %v6520_v28 = vld [vmem:[#allocation5 + $0x60] sm:$0xff]  ;;  %v6523_v56 = vld [vmem:[#allocation5 + $0x70] sm:$0xff] }
 0x472   :  { %1623 = vmatpush1.msra.mxu0 %v6508_v61  ;;  %1694 = vmatpush1.msra.mxu1 %v6511_v12  ;;  %9674 = vst [vmem:[#allocation148_spill] sm:$0xff] %v6520_v28  ;;  %9675 = vst [vmem:[#allocation149_spill] sm:$0xff] %v6523_v56  ;;  %v6526_v61 = vld [vmem:[#allocation5 + $0x48] sm:$0xff]  ;;  %v6529_v12 = vld [vmem:[#allocation5 + $0x58] sm:$0xff] }
 0x473   :  { %1624 = vmatprep.subr.mxu0 %v6514_v59  ;;  %1695 = vmatprep.subr.mxu1 %v6517_v48  ;;  %9676 = vst [vmem:[#allocation150_spill] sm:$0xff] %v6526_v61  ;;  %9677 = vst [vmem:[#allocation151_spill] sm:$0xff] %v6529_v12  ;;  %v6532_v59 = vld [vmem:[#allocation5 + $0x40] sm:$0xff]  ;;  %v6535_v48 = vld [vmem:[#allocation5 + $0x50] sm:$0xff] }
 0x474   :  { %1625 = vmatpush1.msra.mxu0 %v6520_v28  ;;  %1696 = vmatpush1.msra.mxu1 %v6523_v56  ;;  %9678 = vst [vmem:[#allocation152_spill] sm:$0xff] %v6532_v59  ;;  %9679 = vst [vmem:[#allocation153_spill] sm:$0xff] %v6535_v48  ;;  %v6538_v28 = vld [vmem:[#allocation5 + $0x28] sm:$0xff]  ;;  %v6541_v56 = vld [vmem:[#allocation5 + $0x38] sm:$0xff] }
 0x475   :  { %1626 = vmatprep.subr.mxu0 %v6526_v61  ;;  %1697 = vmatprep.subr.mxu1 %v6529_v12  ;;  %9680 = vst [vmem:[#allocation154_spill] sm:$0xff] %v6538_v28  ;;  %9681 = vst [vmem:[#allocation155_spill] sm:$0xff] %v6541_v56  ;;  %v6544_v61 = vld [vmem:[#allocation5 + $0x20] sm:$0xff]  ;;  %v6547_v12 = vld [vmem:[#allocation5 + $0x30] sm:$0xff] }
 0x476   :  { %1627 = vmatpush1.msra.mxu0 %v6532_v59  ;;  %1698 = vmatpush1.msra.mxu1 %v6535_v48  ;;  %9682 = vst [vmem:[#allocation156_spill] sm:$0xff] %v6544_v61  ;;  %9683 = vst [vmem:[#allocation157_spill] sm:$0xff] %v6547_v12  ;;  %v6550_v59 = vld [vmem:[#allocation5 + $0x8] sm:$0xff]  ;;  %v6553_v48 = vld [vmem:[#allocation5 + $0x18] sm:$0xff] }
 0x477   :  { %1628 = vmatprep.subr.mxu0 %v6538_v28  ;;  %1699 = vmatprep.subr.mxu1 %v6541_v56  ;;  %9684 = vst [vmem:[#allocation171_spill] sm:$0xff] %v6550_v59  ;;  %9685 = vst [vmem:[#allocation172_spill] sm:$0xff] %v6553_v48  ;;  %v6556_v28 = vld [vmem:[#allocation5] sm:$0xff]  ;;  %v6560_v56 = vld [vmem:[#allocation5 + $0x10] sm:$0xff] }
 0x478   :  { %1629 = vmatpush1.msra.mxu0 %v6544_v61  ;;  %1700 = vmatpush1.msra.mxu1 %v6547_v12  ;;  %9686 = vst [vmem:[#allocation173_spill] sm:$0xff] %v6556_v28  ;;  %9687 = vst [vmem:[#allocation174_spill] sm:$0xff] %v6560_v56 }
 0x479   :  { %1630 = vmatprep.subr.mxu0 %v6550_v59  ;;  %1701 = vmatprep.subr.mxu1 %v6553_v48  ;;  %v1429_v59 = vpop.permute.xlu1 %1428 }
 0x47a   :  { %1631 = vmatpush1.msra.mxu0 %v6556_v28  ;;  %1664 = vmatprep.mubr.f32.mxu0 %v9387_v25  ;;  %v1431_v12 = vmul.f32 %v1429_v59, %v9525_v29  ;;  %v1432_v28 = vmul.f32 %v1429_v59, %v9526_v33  ;;  %v1434_v8 = vmul.f32 %v1429_v59, %v9528_v40 }
 0x47b   :  { %1702 = vmatpush1.msra.mxu1 %v6560_v56  ;;  %1735 = vmatprep.mubr.f32.mxu1 %v9387_v25 }
 0x47c   :  { %1757 = vmatprep.subr.mxu0 %v5932_v24  ;;  %1828 = vmatprep.subr.mxu1 %v5935_v2  ;;  %v1435_v10 = vadd.f32 %v1431_v12, %v9527_v38  ;;  %v1436_v24 = vadd.f32 %v1432_v28, %v9529_v45  ;;  %v1438_v29 = vadd.f32 %v1434_v8, %v9530_v53 }
 0x47d   :  { %v1433_v12 = vmul.f32 %v1429_v59, %v5694_v58  ;;  %v9723_v59 = vld [vmem:[#allocation40_spill] sm:$0xff] }
 0x47f   :  { %v1437_v40 = vadd.f32 %v1433_v12, %v5697_v50 }
 0x4f9   :  { %v6567_v48 = vpop.f32.mrf.mxu0  ;;  %v6569_v61 = vpop.f32.mrf.mxu1 }
 0x4fb   :  { %v6574_v56 = vpop.f32.mrf.mxu0  ;;  %v6576_v37 = vpop.f32.mrf.mxu1 }
 0x51a   :  { %v1505_v2 = vpop.f32.mrf.mxu0  ;;  %v1576_v36 = vpop.f32.mrf.mxu1 }
 0x51b   :  { %v1581_v27 = vadd.f32 %v1505_v2, %v1435_v10  ;;  %v1583_v38 = vadd.f32 %v1576_v36, %v1437_v40  ;;  %v9722_v36 = vld [vmem:[#allocation39_spill] sm:$0xff] }
 0x51c   :  { %v1507_v9 = vpop.f32.mrf.mxu0  ;;  %v1578_v11 = vpop.f32.mrf.mxu1 }
 0x51d   :  { %4218 = vtanh.f32 %v1581_v27  ;;  %v1582_v6 = vadd.f32 %v1507_v9, %v1436_v24  ;;  %v1584_v33 = vadd.f32 %v1578_v11, %v1438_v29  ;;  %v9724_v24 = vld [vmem:[#allocation10_spill] sm:$0xff] }
 0x51e   :  { %v1349_v12 = vadd.f32 %v6567_v48, %v9724_v24 }
 0x51f   :  { %4220 = vtanh.f32 %v1582_v6 }
 0x520   :  { %4222 = vtanh.f32 %v1584_v33 }
 0x521   :  { %4224 = vtanh.f32 %v1583_v38  ;;  %v9688_v38 = vld [vmem:[#allocation12_spill] sm:$0xff] }
 0x52a   :  { %v4219_v5 = vpop.eup %4218 }
 0x52b   :  { %v1588_v47 = vmul.f32 0.5, %v4219_v5  ;;  %v9721_v5 = vld [vmem:[#allocation38_spill] sm:$0xff] }
 0x52c   :  { %v4221_v28 = vpop.eup %4220 }
 0x52d   :  { %v1591_v45 = vadd.f32 0.5, %v1588_v47  ;;  %v1589_v10 = vmul.f32 0.5, %v4221_v28  ;;  %v4223_v8 = vpop.eup %4222  ;;  %v9720_v47 = vld [vmem:[#allocation37_spill] sm:$0xff] }
 0x52e   :  { %v4225_v29 = vpop.eup %4224 }
 0x52f   :  { %v1592_v2 = vadd.f32 0.5, %v1589_v10  ;;  %v1596_v27 = vmul.f32 %v4223_v8, %v1591_v45  ;;  %v1590_v33 = vmul.f32 0.5, %v4225_v29  ;;  %v9689_v45 = vld [vmem:[#allocation13_spill] sm:$0xff] }
 0x531   :  { %v1595_v53 = vmul.f32 %v1592_v2, %v5955_v7  ;;  %v1593_v6 = vadd.f32 0.5, %v1590_v33  ;;  %v9691_v7 = vld [vmem:[#allocation15_spill] sm:$0xff] }
 0x532   :  { %v9725_v2 = vld [vmem:[#allocation11_spill] sm:$0xff] }
 0x533   :  { %v6583_v9 = vadd.f32 %v1596_v27, %v1595_v53  ;;  %v9690_v53 = vld [vmem:[#allocation14_spill] sm:$0xff]  ;;  %v1351_v8 = vadd.f32 %v6574_v56, %v9725_v2  ;;  %v1422_v27 = vadd.f32 %v6576_v37, %v5784_v34 }
 0x535   :  { %4226 = vtanh.f32 %v6583_v9 }
 0x542   :  { %v4227_v11 = vpop.eup %4226 }
 0x543   :  { %v6586_v40 = vmul.f32 %v4227_v11, %v1593_v6 }
 0x545   :  { %1665 = vmatmul.mubr.f32.vlgmr.msra.gmra.mxu0 %v6586_v40  ;;  %1736 = vmatmul.mubr.f32.vlgmr.msra.gmra.mxu1 %v6586_v40 }
 0x546   :  { %1758 = vmatpush1.msra.mxu0 %v5962_v13  ;;  %1829 = vmatpush1.msra.mxu1 %v5965_v63  ;;  %v9692_v13 = vld [vmem:[#allocation16_spill] sm:$0xff]  ;;  %v9693_v63 = vld [vmem:[#allocation17_spill] sm:$0xff] }
 0x547   :  { %1759 = vmatprep.subr.mxu0 %v5968_v14  ;;  %1830 = vmatprep.subr.mxu1 %v5971_v15  ;;  %v9694_v14 = vld [vmem:[#allocation18_spill] sm:$0xff]  ;;  %v9695_v15 = vld [vmem:[#allocation19_spill] sm:$0xff] }
 0x548   :  { %1760 = vmatpush1.msra.mxu0 %v5974_v16  ;;  %1831 = vmatpush1.msra.mxu1 %v5977_v17  ;;  %v9696_v16 = vld [vmem:[#allocation20_spill] sm:$0xff]  ;;  %v9697_v17 = vld [vmem:[#allocation21_spill] sm:$0xff] }
 0x549   :  { %1761 = vmatprep.subr.mxu0 %v5980_v18  ;;  %1832 = vmatprep.subr.mxu1 %v5983_v19  ;;  %v9698_v18 = vld [vmem:[#allocation22_spill] sm:$0xff]  ;;  %v9699_v19 = vld [vmem:[#allocation23_spill] sm:$0xff] }
 0x54a   :  { %1762 = vmatpush1.msra.mxu0 %v5986_v20  ;;  %1833 = vmatpush1.msra.mxu1 %v5989_v21  ;;  %v9700_v20 = vld [vmem:[#allocation24_spill] sm:$0xff]  ;;  %v9701_v21 = vld [vmem:[#allocation25_spill] sm:$0xff] }
 0x54b   :  { %1763 = vmatprep.subr.mxu0 %v5992_v22  ;;  %1834 = vmatprep.subr.mxu1 %v5995_v23  ;;  %v9702_v22 = vld [vmem:[#allocation26_spill] sm:$0xff]  ;;  %v9703_v23 = vld [vmem:[#allocation27_spill] sm:$0xff] }
 0x54c   :  { %1764 = vmatpush1.msra.mxu0 %v5998_v26  ;;  %1835 = vmatpush1.msra.mxu1 %v6001_v31  ;;  %v9704_v26 = vld [vmem:[#allocation28_spill] sm:$0xff]  ;;  %v9705_v31 = vld [vmem:[#allocation29_spill] sm:$0xff] }
 0x54d   :  { %1765 = vmatprep.subr.mxu0 %v6004_v35  ;;  %1836 = vmatprep.subr.mxu1 %v6007_v39  ;;  %v9706_v35 = vld [vmem:[#allocation30_spill] sm:$0xff]  ;;  %v9707_v39 = vld [vmem:[#allocation31_spill] sm:$0xff] }
 0x54e   :  { %1766 = vmatpush1.msra.mxu0 %v6010_v41  ;;  %1837 = vmatpush1.msra.mxu1 %v6013_v42  ;;  %v9708_v41 = vld [vmem:[#allocation158_spill] sm:$0xff]  ;;  %v9709_v42 = vld [vmem:[#allocation159_spill] sm:$0xff] }
 0x54f   :  { %1767 = vmatprep.subr.mxu0 %v6016_v43  ;;  %1838 = vmatprep.subr.mxu1 %v6019_v44  ;;  %v9710_v43 = vld [vmem:[#allocation161_spill] sm:$0xff] }
 0x550   :  { %1768 = vmatpush1.msra.mxu0 %v6022_v46  ;;  %1839 = vmatpush1.msra.mxu1 %v6025_v51  ;;  %v9711_v44 = vld [vmem:[#allocation165_spill] sm:$0xff]  ;;  %v9713_v51 = vld [vmem:[#allocation170_spill] sm:$0xff] }
 0x551   :  { %1769 = vmatprep.subr.mxu0 %v6028_v57  ;;  %1840 = vmatprep.subr.mxu1 %v6031_v3  ;;  %v9712_v46 = vld [vmem:[#allocation169_spill] sm:$0xff]  ;;  %v9714_v57 = vld [vmem:[#allocation166_spill] sm:$0xff]  ;;  %v9715_v3 = vld [vmem:[#allocation32_spill] sm:$0xff] }
 0x552   :  { %1770 = vmatpush1.msra.mxu0 %v6034_v0  ;;  %1841 = vmatpush1.msra.mxu1 %v6037_v49  ;;  %v9716_v0 = vld [vmem:[#allocation33_spill] sm:$0xff]  ;;  %v9717_v49 = vld [vmem:[#allocation34_spill] sm:$0xff] }
 0x553   :  { %1771 = vmatprep.subr.mxu0 %v6040_v52  ;;  %1842 = vmatprep.subr.mxu1 %v6043_v60  ;;  %v9718_v52 = vld [vmem:[#allocation35_spill] sm:$0xff]  ;;  %v9719_v60 = vld [vmem:[#allocation36_spill] sm:$0xff] }
 0x554   :  { %1772 = vmatpush1.msra.mxu0 %v9688_v38  ;;  %1843 = vmatpush1.msra.mxu1 %v9689_v45  ;;  %v1420_v45 = vadd.f32 %v6569_v61, %v5793_v54 }
 0x555   :  { %1773 = vmatprep.subr.mxu0 %v9690_v53  ;;  %1844 = vmatprep.subr.mxu1 %v9691_v7 }
 0x556   :  { %1774 = vmatpush1.msra.mxu0 %v9692_v13  ;;  %1845 = vmatpush1.msra.mxu1 %v9693_v63 }
 0x557   :  { %1775 = vmatprep.subr.mxu0 %v9694_v14  ;;  %1846 = vmatprep.subr.mxu1 %v9695_v15 }
 0x558   :  { %1776 = vmatpush1.msra.mxu0 %v9696_v16  ;;  %1847 = vmatpush1.msra.mxu1 %v9697_v17 }
 0x559   :  { %1777 = vmatprep.subr.mxu0 %v9698_v18  ;;  %1848 = vmatprep.subr.mxu1 %v9699_v19 }
 0x55a   :  { %1778 = vmatpush1.msra.mxu0 %v9700_v20  ;;  %1849 = vmatpush1.msra.mxu1 %v9701_v21 }
 0x55b   :  { %1779 = vmatprep.subr.mxu0 %v9702_v22  ;;  %1850 = vmatprep.subr.mxu1 %v9703_v23  ;;  %v9727_v22 = vld [vmem:[#allocation42_spill] sm:$0xff]  ;;  %v9728_v23 = vld [vmem:[#allocation43_spill] sm:$0xff] }
 0x55c   :  { %1780 = vmatpush1.msra.mxu0 %v9704_v26  ;;  %1851 = vmatpush1.msra.mxu1 %v9705_v31  ;;  %v9729_v26 = vld [vmem:[#allocation44_spill] sm:$0xff]  ;;  %v9730_v31 = vld [vmem:[#allocation45_spill] sm:$0xff] }
 0x55d   :  { %1781 = vmatprep.subr.mxu0 %v9706_v35  ;;  %1852 = vmatprep.subr.mxu1 %v9707_v39  ;;  %v9731_v35 = vld [vmem:[#allocation46_spill] sm:$0xff]  ;;  %v9737_v39 = vld [vmem:[#allocation52_spill] sm:$0xff] }
 0x55e   :  { %1782 = vmatpush1.msra.mxu0 %v9708_v41  ;;  %1853 = vmatpush1.msra.mxu1 %v9709_v42  ;;  %v9738_v41 = vld [vmem:[#allocation53_spill] sm:$0xff]  ;;  %v9739_v42 = vld [vmem:[#allocation54_spill] sm:$0xff] }
 0x55f   :  { %1783 = vmatprep.subr.mxu0 %v9710_v43  ;;  %1854 = vmatprep.subr.mxu1 %v9711_v44  ;;  %v9740_v43 = vld [vmem:[#allocation55_spill] sm:$0xff]  ;;  %v9741_v44 = vld [vmem:[#allocation56_spill] sm:$0xff] }
 0x560   :  { %1784 = vmatpush1.msra.mxu0 %v9712_v46  ;;  %1855 = vmatpush1.msra.mxu1 %v9713_v51  ;;  %v9742_v46 = vld [vmem:[#allocation57_spill] sm:$0xff]  ;;  %v9743_v51 = vld [vmem:[#allocation58_spill] sm:$0xff] }
 0x561   :  { %1785 = vmatprep.subr.mxu0 %v9714_v57  ;;  %1856 = vmatprep.subr.mxu1 %v9715_v3  ;;  %v9744_v57 = vld [vmem:[#allocation59_spill] sm:$0xff]  ;;  %v9745_v3 = vld [vmem:[#allocation60_spill] sm:$0xff] }
 0x562   :  { %1786 = vmatpush1.msra.mxu0 %v9716_v0  ;;  %1857 = vmatpush1.msra.mxu1 %v9717_v49  ;;  %v9746_v0 = vld [vmem:[#allocation61_spill] sm:$0xff]  ;;  %v9747_v49 = vld [vmem:[#allocation62_spill] sm:$0xff] }
 0x563   :  { %1787 = vmatprep.subr.mxu0 %v9718_v52  ;;  %1858 = vmatprep.subr.mxu1 %v9719_v60  ;;  %v9748_v52 = vld [vmem:[#allocation63_spill] sm:$0xff]  ;;  %v9749_v60 = vld [vmem:[#allocation64_spill] sm:$0xff] }
 0x564   :  { %1788 = vmatpush1.msra.mxu0 %v9720_v47  ;;  %1859 = vmatpush1.msra.mxu1 %v9721_v5  ;;  %v9750_v47 = vld [vmem:[#allocation65_spill] sm:$0xff]  ;;  %v9751_v5 = vld [vmem:[#allocation66_spill] sm:$0xff] }
 0x565   :  { %1821 = vmatprep.mubr.f32.mxu0 %v9387_v25  ;;  %1892 = vmatprep.mubr.f32.mxu1 %v9387_v25 }
 0x566   :  { %1914 = vmatprep.subr.mxu0 %v9722_v36  ;;  %1985 = vmatprep.subr.mxu1 %v9723_v59  ;;  %v9752_v36 = vld [vmem:[#allocation67_spill] sm:$0xff]  ;;  %v9753_v59 = vld [vmem:[#allocation68_spill] sm:$0xff] }
 0x605   :  { %v1666_v28 = vpop.f32.mrf.mxu0  ;;  %v1737_v10 = vpop.f32.mrf.mxu1 }
 0x606   :  { %v1667_v29 = vadd.f32 %v1666_v28, %v1349_v12  ;;  %v1738_v48 = vadd.f32 %v1737_v10, %v1420_v45  ;;  %v9754_v12 = vld [vmem:[#allocation69_spill] sm:$0xff]  ;;  %v9755_v28 = vld [vmem:[#allocation70_spill] sm:$0xff]  ;;  %v9756_v10 = vld [vmem:[#allocation71_spill] sm:$0xff] }
 0x607   :  { %v1668_v33 = vpop.f32.mrf.mxu0  ;;  %v1739_v6 = vpop.f32.mrf.mxu1  ;;  %v9764_v45 = vld [vmem:[#allocation79_spill] sm:$0xff] }
 0x608   :  { %4228 = vtanh.f32 %v1667_v29  ;;  %v1669_v11 = vadd.f32 %v1668_v33, %v1351_v8  ;;  %v1740_v38 = vadd.f32 %v1739_v6, %v1422_v27  ;;  %v9757_v8 = vld [vmem:[#allocation72_spill] sm:$0xff]  ;;  %v9758_v27 = vld [vmem:[#allocation73_spill] sm:$0xff]  ;;  %v9759_v29 = vld [vmem:[#allocation74_spill] sm:$0xff] }
 0x609   :  { %v9760_v33 = vld [vmem:[#allocation75_spill] sm:$0xff]  ;;  %v9761_v6 = vld [vmem:[#allocation76_spill] sm:$0xff] }
 0x60a   :  { %4230 = vtanh.f32 %v1669_v11  ;;  %v9762_v11 = vld [vmem:[#allocation77_spill] sm:$0xff] }
 0x60b   :  { %4232 = vtanh.f32 %v1740_v38  ;;  %v9763_v38 = vld [vmem:[#allocation78_spill] sm:$0xff] }
 0x60c   :  { %4234 = vtanh.f32 %v1738_v48  ;;  %v9765_v48 = vld [vmem:[#allocation80_spill] sm:$0xff] }
 0x615   :  { %v4229_v53 = vpop.eup %4228 }
 0x616   :  { %v1745_v7 = vmul.f32 0.5, %v4229_v53  ;;  %v9766_v53 = vld [vmem:[#allocation81_spill] sm:$0xff] }
 0x617   :  { %v4231_v13 = vpop.eup %4230 }
 0x618   :  { %v1748_v63 = vadd.f32 0.5, %v1745_v7  ;;  %v1746_v56 = vmul.f32 0.5, %v4231_v13  ;;  %v4233_v14 = vpop.eup %4232  ;;  %v9767_v7 = vld [vmem:[#allocation82_spill] sm:$0xff]  ;;  %v9768_v13 = vld [vmem:[#allocation83_spill] sm:$0xff] }
 0x619   :  { %v4235_v18 = vpop.eup %4234 }
 0x61a   :  { %v1749_v37 = vadd.f32 0.5, %v1746_v56  ;;  %v1753_v15 = vmul.f32 %v4233_v14, %v1748_v63  ;;  %v1747_v19 = vmul.f32 0.5, %v4235_v18  ;;  %v9769_v63 = vld [vmem:[#allocation84_spill] sm:$0xff]  ;;  %v9770_v56 = vld [vmem:[#allocation85_spill] sm:$0xff]  ;;  %v9771_v14 = vld [vmem:[#allocation86_spill] sm:$0xff] }
 0x61b   :  { %v9775_v18 = vld [vmem:[#allocation90_spill] sm:$0xff] }
 0x61c   :  { %v1752_v16 = vmul.f32 %v1749_v37, %v6177_v62  ;;  %v1750_v20 = vadd.f32 0.5, %v1747_v19  ;;  %v9726_v62 = vld [vmem:[#allocation41_spill] sm:$0xff]  ;;  %v9772_v37 = vld [vmem:[#allocation87_spill] sm:$0xff] }
 0x61d   :  { %v9776_v19 = vld [vmem:[#allocation91_spill] sm:$0xff] }
 0x61e   :  { %v6665_v17 = vadd.f32 %v1753_v15, %v1752_v16  ;;  %v9773_v15 = vld [vmem:[#allocation88_spill] sm:$0xff]  ;;  %v9774_v16 = vld [vmem:[#allocation89_spill] sm:$0xff] }
 0x620   :  { %4236 = vtanh.f32 %v6665_v17 }
 0x62d   :  { %v4237_v61 = vpop.eup %4236 }
 0x62e   :  { %v1756_v21 = vmul.f32 %v4237_v61, %v1750_v20  ;;  %v9777_v20 = vld [vmem:[#allocation92_spill] sm:$0xff]  ;;  %v9778_v61 = vld [vmem:[#allocation93_spill] sm:$0xff] }
 0x630   :  { %1822 = vmatmul.mubr.f32.vlgmr.msra.gmra.mxu0 %v1756_v21  ;;  %1893 = vmatmul.mubr.f32.vlgmr.msra.gmra.mxu1 %v1756_v21  ;;  %v9779_v21 = vld [vmem:[#allocation94_spill] sm:$0xff] }
 0x631   :  { %1915 = vmatpush1.msra.mxu0 %v6180_v30  ;;  %1986 = vmatpush1.msra.mxu1 %v6183_v55  ;;  %v9732_v30 = vld [vmem:[#allocation47_spill] sm:$0xff]  ;;  %v9733_v55 = vld [vmem:[#allocation48_spill] sm:$0xff] }
 0x632   :  { %1916 = vmatprep.subr.mxu0 %v6186_v32  ;;  %1987 = vmatprep.subr.mxu1 %v6189_v4  ;;  %v9734_v32 = vld [vmem:[#allocation49_spill] sm:$0xff]  ;;  %v9735_v4 = vld [vmem:[#allocation50_spill] sm:$0xff] }
 0x633   :  { %1917 = vmatpush1.msra.mxu0 %v6192_v1  ;;  %1988 = vmatpush1.msra.mxu1 %v9726_v62  ;;  %v9736_v1 = vld [vmem:[#allocation51_spill] sm:$0xff] }
 0x634   :  { %1918 = vmatprep.subr.mxu0 %v9727_v22  ;;  %1989 = vmatprep.subr.mxu1 %v9728_v23  ;;  %v9780_v62 = vld [vmem:[#allocation95_spill] sm:$0xff]  ;;  %v9781_v22 = vld [vmem:[#allocation96_spill] sm:$0xff]  ;;  %v9782_v23 = vld [vmem:[#allocation97_spill] sm:$0xff] }
 0x635   :  { %1919 = vmatpush1.msra.mxu0 %v9729_v26  ;;  %1990 = vmatpush1.msra.mxu1 %v9730_v31  ;;  %v9783_v26 = vld [vmem:[#allocation98_spill] sm:$0xff]  ;;  %v9784_v31 = vld [vmem:[#allocation99_spill] sm:$0xff] }
 0x636   :  { %1920 = vmatprep.subr.mxu0 %v9731_v35  ;;  %1991 = vmatprep.subr.mxu1 %v9732_v30  ;;  %v9785_v35 = vld [vmem:[#allocation100_spill] sm:$0xff]  ;;  %v9786_v30 = vld [vmem:[#allocation101_spill] sm:$0xff] }
 0x637   :  { %1921 = vmatpush1.msra.mxu0 %v9733_v55  ;;  %1992 = vmatpush1.msra.mxu1 %v9734_v32  ;;  %v9787_v55 = vld [vmem:[#allocation102_spill] sm:$0xff]  ;;  %v9788_v32 = vld [vmem:[#allocation103_spill] sm:$0xff] }
 0x638   :  { %1922 = vmatprep.subr.mxu0 %v9735_v4  ;;  %1993 = vmatprep.subr.mxu1 %v9736_v1  ;;  %v9789_v4 = vld [vmem:[#allocation104_spill] sm:$0xff]  ;;  %v9790_v1 = vld [vmem:[#allocation105_spill] sm:$0xff] }
 0x639   :  { %1923 = vmatpush1.msra.mxu0 %v9737_v39  ;;  %1994 = vmatpush1.msra.mxu1 %v9738_v41  ;;  %v9791_v39 = vld [vmem:[#allocation106_spill] sm:$0xff]  ;;  %v9792_v41 = vld [vmem:[#allocation107_spill] sm:$0xff] }
 0x63a   :  { %1924 = vmatprep.subr.mxu0 %v9739_v42  ;;  %1995 = vmatprep.subr.mxu1 %v9740_v43  ;;  %v9794_v42 = vld [vmem:[#allocation109_spill] sm:$0xff]  ;;  %v9795_v43 = vld [vmem:[#allocation110_spill] sm:$0xff] }
 0x63b   :  { %1925 = vmatpush1.msra.mxu0 %v9741_v44  ;;  %1996 = vmatpush1.msra.mxu1 %v9742_v46  ;;  %v9796_v44 = vld [vmem:[#allocation111_spill] sm:$0xff]  ;;  %v9797_v46 = vld [vmem:[#allocation112_spill] sm:$0xff] }
 0x63c   :  { %1926 = vmatprep.subr.mxu0 %v9743_v51  ;;  %1997 = vmatprep.subr.mxu1 %v9744_v57  ;;  %v9798_v51 = vld [vmem:[#allocation113_spill] sm:$0xff]  ;;  %v9799_v57 = vld [vmem:[#allocation114_spill] sm:$0xff] }
 0x63d   :  { %1927 = vmatpush1.msra.mxu0 %v9745_v3  ;;  %1998 = vmatpush1.msra.mxu1 %v9746_v0  ;;  %v9800_v3 = vld [vmem:[#allocation115_spill] sm:$0xff]  ;;  %v9801_v0 = vld [vmem:[#allocation116_spill] sm:$0xff] }
 0x63e   :  { %1928 = vmatprep.subr.mxu0 %v9747_v49  ;;  %1999 = vmatprep.subr.mxu1 %v9748_v52  ;;  %v9802_v49 = vld [vmem:[#allocation117_spill] sm:$0xff]  ;;  %v9803_v52 = vld [vmem:[#allocation118_spill] sm:$0xff] }
 0x63f   :  { %1929 = vmatpush1.msra.mxu0 %v9749_v60  ;;  %2000 = vmatpush1.msra.mxu1 %v9750_v47  ;;  %v9804_v60 = vld [vmem:[#allocation119_spill] sm:$0xff]  ;;  %v9805_v47 = vld [vmem:[#allocation120_spill] sm:$0xff] }
 0x640   :  { %1930 = vmatprep.subr.mxu0 %v9751_v5  ;;  %2001 = vmatprep.subr.mxu1 %v9752_v36  ;;  %v9806_v5 = vld [vmem:[#allocation121_spill] sm:$0xff]  ;;  %v9807_v36 = vld [vmem:[#allocation122_spill] sm:$0xff] }
 0x641   :  { %1931 = vmatpush1.msra.mxu0 %v9753_v59  ;;  %2002 = vmatpush1.msra.mxu1 %v9754_v12  ;;  %v9808_v59 = vld [vmem:[#allocation123_spill] sm:$0xff]  ;;  %v9809_v12 = vld [vmem:[#allocation124_spill] sm:$0xff] }
 0x642   :  { %1932 = vmatprep.subr.mxu0 %v9755_v28  ;;  %2003 = vmatprep.subr.mxu1 %v9756_v10  ;;  %v9810_v28 = vld [vmem:[#allocation125_spill] sm:$0xff]  ;;  %v9811_v10 = vld [vmem:[#allocation126_spill] sm:$0xff] }
 0x643   :  { %1933 = vmatpush1.msra.mxu0 %v9757_v8  ;;  %2004 = vmatpush1.msra.mxu1 %v9758_v27  ;;  %v9812_v8 = vld [vmem:[#allocation127_spill] sm:$0xff]  ;;  %v9813_v27 = vld [vmem:[#allocation128_spill] sm:$0xff] }
 0x644   :  { %1934 = vmatprep.subr.mxu0 %v9759_v29  ;;  %2005 = vmatprep.subr.mxu1 %v9760_v33  ;;  %v9814_v29 = vld [vmem:[#allocation129_spill] sm:$0xff]  ;;  %v9815_v33 = vld [vmem:[#allocation130_spill] sm:$0xff] }
 0x645   :  { %1935 = vmatpush1.msra.mxu0 %v9761_v6  ;;  %2006 = vmatpush1.msra.mxu1 %v9762_v11  ;;  %v9816_v6 = vld [vmem:[#allocation131_spill] sm:$0xff]  ;;  %v9817_v11 = vld [vmem:[#allocation132_spill] sm:$0xff] }
 0x646   :  { %1936 = vmatprep.subr.mxu0 %v9763_v38  ;;  %2007 = vmatprep.subr.mxu1 %v9764_v45  ;;  %v9818_v38 = vld [vmem:[#allocation133_spill] sm:$0xff]  ;;  %v9819_v45 = vld [vmem:[#allocation134_spill] sm:$0xff] }
 0x647   :  { %1937 = vmatpush1.msra.mxu0 %v9765_v48  ;;  %2008 = vmatpush1.msra.mxu1 %v9766_v53  ;;  %v9820_v48 = vld [vmem:[#allocation135_spill] sm:$0xff]  ;;  %v9821_v53 = vld [vmem:[#allocation136_spill] sm:$0xff] }
 0x648   :  { %1938 = vmatprep.subr.mxu0 %v9767_v7  ;;  %2009 = vmatprep.subr.mxu1 %v9768_v13  ;;  %v9822_v7 = vld [vmem:[#allocation137_spill] sm:$0xff]  ;;  %v9823_v13 = vld [vmem:[#allocation138_spill] sm:$0xff] }
 0x649   :  { %1939 = vmatpush1.msra.mxu0 %v9769_v63  ;;  %2010 = vmatpush1.msra.mxu1 %v9770_v56  ;;  %v9824_v63 = vld [vmem:[#allocation139_spill] sm:$0xff]  ;;  %v9825_v56 = vld [vmem:[#allocation140_spill] sm:$0xff] }
 0x64a   :  { %1940 = vmatprep.subr.mxu0 %v9771_v14  ;;  %2011 = vmatprep.subr.mxu1 %v9772_v37  ;;  %v9826_v14 = vld [vmem:[#allocation141_spill] sm:$0xff]  ;;  %v9827_v37 = vld [vmem:[#allocation142_spill] sm:$0xff] }
 0x64b   :  { %1941 = vmatpush1.msra.mxu0 %v9773_v15  ;;  %2012 = vmatpush1.msra.mxu1 %v9774_v16  ;;  %v9828_v15 = vld [vmem:[#allocation143_spill] sm:$0xff]  ;;  %v9829_v16 = vld [vmem:[#allocation144_spill] sm:$0xff] }
 0x64c   :  { %1942 = vmatprep.subr.mxu0 %v9775_v18  ;;  %2013 = vmatprep.subr.mxu1 %v9776_v19  ;;  %v9830_v18 = vld [vmem:[#allocation145_spill] sm:$0xff]  ;;  %v9831_v19 = vld [vmem:[#allocation146_spill] sm:$0xff] }
 0x64d   :  { %1943 = vmatpush1.msra.mxu0 %v9777_v20  ;;  %2014 = vmatpush1.msra.mxu1 %v9778_v61  ;;  %v9832_v20 = vld [vmem:[#allocation147_spill] sm:$0xff]  ;;  %v9833_v61 = vld [vmem:[#allocation148_spill] sm:$0xff] }
 0x64e   :  { %1944 = vmatprep.subr.mxu0 %v9779_v21  ;;  %2015 = vmatprep.subr.mxu1 %v9780_v62  ;;  %v9834_v21 = vld [vmem:[#allocation149_spill] sm:$0xff]  ;;  %v9835_v62 = vld [vmem:[#allocation150_spill] sm:$0xff] }
 0x64f   :  { %1945 = vmatpush1.msra.mxu0 %v9781_v22  ;;  %1978 = vmatprep.mubr.f32.mxu0 %v9387_v25  ;;  %v9836_v22 = vld [vmem:[#allocation151_spill] sm:$0xff] }
 0x650   :  { %2016 = vmatpush1.msra.mxu1 %v9782_v23  ;;  %2049 = vmatprep.mubr.f32.mxu1 %v9387_v25  ;;  %v9837_v23 = vld [vmem:[#allocation152_spill] sm:$0xff] }
 0x651   :  { %1979 = vmatmul.mubr.f32.vlgmr.msra.gmra.mxu0 %v6586_v40  ;;  %2050 = vmatmul.mubr.f32.vlgmr.msra.gmra.mxu1 %v6586_v40  ;;  %v9793_v40 = vld [vmem:[#allocation108_spill] sm:$0xff] }
 0x652   :  { %2075 = vmatprep.subr.mxu0 %v9783_v26  ;;  %2146 = vmatprep.subr.mxu1 %v9784_v31  ;;  %v9838_v26 = vld [vmem:[#allocation153_spill] sm:$0xff]  ;;  %v9839_v31 = vld [vmem:[#allocation154_spill] sm:$0xff] }
 0x653   :  { %2076 = vmatpush1.msra.mxu0 %v9785_v35  ;;  %2147 = vmatpush1.msra.mxu1 %v9786_v30  ;;  %v9840_v35 = vld [vmem:[#allocation155_spill] sm:$0xff]  ;;  %v9841_v30 = vld [vmem:[#allocation156_spill] sm:$0xff] }
 0x654   :  { %2077 = vmatprep.subr.mxu0 %v9787_v55  ;;  %2148 = vmatprep.subr.mxu1 %v9788_v32  ;;  %v9842_v55 = vld [vmem:[#allocation157_spill] sm:$0xff]  ;;  %v9843_v32 = vld [vmem:[#allocation171_spill] sm:$0xff] }
 0x655   :  { %2078 = vmatpush1.msra.mxu0 %v9789_v4  ;;  %2149 = vmatpush1.msra.mxu1 %v9790_v1  ;;  %v9844_v4 = vld [vmem:[#allocation172_spill] sm:$0xff]  ;;  %v9845_v1 = vld [vmem:[#allocation173_spill] sm:$0xff] }
 0x656   :  { %2079 = vmatprep.subr.mxu0 %v9791_v39  ;;  %2150 = vmatprep.subr.mxu1 %v9792_v41  ;;  %v9846_v39 = vld [vmem:[#allocation174_spill] sm:$0xff]  ;;  %v6800_v41 = vld [vmem:[#allocation7 + $0x1e8] sm:$0xff] }
 0x657   :  { %2080 = vmatpush1.msra.mxu0 %v9793_v40  ;;  %2151 = vmatpush1.msra.mxu1 %v9794_v42  ;;  %v6803_v40 = vld [vmem:[#allocation7 + $0x1f8] sm:$0xff]  ;;  %v1904_v42 = vpop.permute.xlu1 %1903 }
 0x658   :  { %2081 = vmatprep.subr.mxu0 %v9795_v43  ;;  %2152 = vmatprep.subr.mxu1 %v9796_v44 }
 0x659   :  { %2082 = vmatpush1.msra.mxu0 %v9797_v46  ;;  %2153 = vmatpush1.msra.mxu1 %v9798_v51  ;;  %v9847_v46 = vld [vmem:[#allocation160_spill] sm:$0xff] }
 0x65a   :  { %2083 = vmatprep.subr.mxu0 %v9799_v57  ;;  %2154 = vmatprep.subr.mxu1 %v9800_v3  ;;  %v1906_v51 = vmul.f32 %v1904_v42, %v9847_v46  ;;  %v9848_v57 = vld [vmem:[#allocation162_spill] sm:$0xff] }
 0x65b   :  { %2084 = vmatpush1.msra.mxu0 %v9801_v0  ;;  %2155 = vmatpush1.msra.mxu1 %v9802_v49  ;;  %v1907_v3 = vmul.f32 %v1904_v42, %v9848_v57 }
 0x65c   :  { %2085 = vmatprep.subr.mxu0 %v9803_v52  ;;  %2156 = vmatprep.subr.mxu1 %v9804_v60  ;;  %v9849_v52 = vld [vmem:[#allocation163_spill] sm:$0xff] }
 0x65d   :  { %2086 = vmatpush1.msra.mxu0 %v9805_v47  ;;  %2157 = vmatpush1.msra.mxu1 %v9806_v5  ;;  %v1910_v60 = vadd.f32 %v1906_v51, %v9849_v52  ;;  %v9850_v47 = vld [vmem:[#allocation164_spill] sm:$0xff] }
 0x65e   :  { %2087 = vmatprep.subr.mxu0 %v9807_v36  ;;  %2158 = vmatprep.subr.mxu1 %v9808_v59  ;;  %v1909_v5 = vmul.f32 %v1904_v42, %v9850_v47  ;;  %v6869_v51 = vld [vmem:[#allocation7 + $0x190] sm:$0xff] }
 0x65f   :  { %2088 = vmatpush1.msra.mxu0 %v9809_v12  ;;  %2159 = vmatpush1.msra.mxu1 %v9810_v28  ;;  %v9851_v28 = vld [vmem:[#allocation167_spill] sm:$0xff] }
 0x660   :  { %2089 = vmatprep.subr.mxu0 %v9811_v10  ;;  %2160 = vmatprep.subr.mxu1 %v9812_v8  ;;  %v1911_v10 = vadd.f32 %v1907_v3, %v9851_v28  ;;  %v6872_v3 = vld [vmem:[#allocation7 + $0x168] sm:$0xff] }
 0x661   :  { %2090 = vmatpush1.msra.mxu0 %v9813_v27  ;;  %2161 = vmatpush1.msra.mxu1 %v9814_v29 }
 0x662   :  { %2091 = vmatprep.subr.mxu0 %v9815_v33  ;;  %2162 = vmatprep.subr.mxu1 %v9816_v6  ;;  %v9852_v33 = vld [vmem:[#allocation168_spill] sm:$0xff] }
 0x663   :  { %2092 = vmatpush1.msra.mxu0 %v9817_v11  ;;  %2163 = vmatpush1.msra.mxu1 %v9818_v38  ;;  %v1913_v6 = vadd.f32 %v1909_v5, %v9852_v33  ;;  %v1908_v38 = vmul.f32 %v1904_v42, %v5694_v58  ;;  %v6866_v42 = vld [vmem:[#allocation7 + $0x180] sm:$0xff] }
 0x664   :  { %2093 = vmatprep.subr.mxu0 %v9819_v45  ;;  %2164 = vmatprep.subr.mxu1 %v9820_v48  ;;  %v6878_v5 = vld [vmem:[#allocation7 + $0x160] sm:$0xff] }
 0x665   :  { %2094 = vmatpush1.msra.mxu0 %v9821_v53  ;;  %2165 = vmatpush1.msra.mxu1 %v9822_v7  ;;  %v1912_v45 = vadd.f32 %v1908_v38, %v5697_v50  ;;  %v6908_v38 = vld [vmem:[#allocation7 + $0x108] sm:$0xff] }
 0x666   :  { %2095 = vmatprep.subr.mxu0 %v9823_v13  ;;  %2166 = vmatprep.subr.mxu1 %v9824_v63 }
 0x667   :  { %2096 = vmatpush1.msra.mxu0 %v9825_v56  ;;  %2167 = vmatpush1.msra.mxu1 %v9826_v14 }
 0x668   :  { %2097 = vmatprep.subr.mxu0 %v9827_v37  ;;  %2168 = vmatprep.subr.mxu1 %v9828_v15 }
 0x669   :  { %2098 = vmatpush1.msra.mxu0 %v9829_v16  ;;  %2169 = vmatpush1.msra.mxu1 %v9830_v18 }
 0x66a   :  { %2099 = vmatprep.subr.mxu0 %v9831_v19  ;;  %2170 = vmatprep.subr.mxu1 %v9832_v20 }
 0x66b   :  { %2100 = vmatpush1.msra.mxu0 %v9833_v61  ;;  %2171 = vmatpush1.msra.mxu1 %v9834_v21 }
 0x66c   :  { %2101 = vmatprep.subr.mxu0 %v9835_v62  ;;  %2172 = vmatprep.subr.mxu1 %v9836_v22  ;;  %v6830_v22 = vld [vmem:[#allocation7 + $0x1e0] sm:$0xff] }
 0x66d   :  { %2102 = vmatpush1.msra.mxu0 %v9837_v23  ;;  %2173 = vmatpush1.msra.mxu1 %v9838_v26  ;;  %v6836_v23 = vld [vmem:[#allocation7 + $0x1c8] sm:$0xff]  ;;  %v6839_v26 = vld [vmem:[#allocation7 + $0x1d8] sm:$0xff] }
 0x66e   :  { %2103 = vmatprep.subr.mxu0 %v9839_v31  ;;  %2174 = vmatprep.subr.mxu1 %v9840_v35  ;;  %v6842_v31 = vld [vmem:[#allocation7 + $0x1c0] sm:$0xff]  ;;  %v6845_v35 = vld [vmem:[#allocation7 + $0x1d0] sm:$0xff] }
 0x66f   :  { %2104 = vmatpush1.msra.mxu0 %v9841_v30  ;;  %2175 = vmatpush1.msra.mxu1 %v9842_v55  ;;  %v6848_v30 = vld [vmem:[#allocation7 + $0x1a8] sm:$0xff]  ;;  %v6851_v55 = vld [vmem:[#allocation7 + $0x1b8] sm:$0xff] }
 0x670   :  { %2105 = vmatprep.subr.mxu0 %v9843_v32  ;;  %2176 = vmatprep.subr.mxu1 %v9844_v4  ;;  %v6854_v32 = vld [vmem:[#allocation7 + $0x1a0] sm:$0xff]  ;;  %v6857_v4 = vld [vmem:[#allocation7 + $0x1b0] sm:$0xff] }
 0x671   :  { %2106 = vmatpush1.msra.mxu0 %v9845_v1  ;;  %2139 = vmatprep.mubr.f32.mxu0 %v9387_v25  ;;  %v6860_v1 = vld [vmem:[#allocation7 + $0x188] sm:$0xff] }
 0x672   :  { %2177 = vmatpush1.msra.mxu1 %v9846_v39  ;;  %2210 = vmatprep.mubr.f32.mxu1 %v9387_v25  ;;  %v6863_v39 = vld [vmem:[#allocation7 + $0x198] sm:$0xff] }
 0x673   :  { %2232 = vmatprep.subr.mxu0 %v6800_v41  ;;  %2303 = vmatprep.subr.mxu1 %v6803_v40 }
 0x6f0   :  { %v6806_v43 = vpop.f32.mrf.mxu0  ;;  %v6808_v44 = vpop.f32.mrf.mxu1 }
 0x6f2   :  { %v6812_v0 = vpop.f32.mrf.mxu0  ;;  %v6814_v49 = vpop.f32.mrf.mxu1 }
 0x711   :  { %v1980_v36 = vpop.f32.mrf.mxu0  ;;  %v2051_v59 = vpop.f32.mrf.mxu1 }
 0x712   :  { %v2056_v12 = vadd.f32 %v1980_v36, %v1910_v60  ;;  %v2058_v48 = vadd.f32 %v2051_v59, %v1912_v45  ;;  %v6875_v60 = vld [vmem:[#allocation7 + $0x178] sm:$0xff]  ;;  %v6881_v36 = vld [vmem:[#allocation7 + $0x170] sm:$0xff]  ;;  %v6884_v59 = vld [vmem:[#allocation7 + $0x148] sm:$0xff] }
 0x713   :  { %v1982_v8 = vpop.f32.mrf.mxu0  ;;  %v2053_v27 = vpop.f32.mrf.mxu1  ;;  %v6911_v45 = vld [vmem:[#allocation7 + $0x118] sm:$0xff] }
 0x714   :  { %4238 = vtanh.f32 %v2056_v12  ;;  %v2057_v29 = vadd.f32 %v1982_v8, %v1911_v10  ;;  %v2059_v11 = vadd.f32 %v2053_v27, %v1913_v6  ;;  %v6887_v12 = vld [vmem:[#allocation7 + $0x158] sm:$0xff]  ;;  %v6890_v10 = vld [vmem:[#allocation7 + $0x140] sm:$0xff]  ;;  %v6893_v8 = vld [vmem:[#allocation7 + $0x150] sm:$0xff] }
 0x715   :  { %v6896_v27 = vld [vmem:[#allocation7 + $0x128] sm:$0xff]  ;;  %v6902_v6 = vld [vmem:[#allocation7 + $0x120] sm:$0xff] }
 0x716   :  { %4240 = vtanh.f32 %v2057_v29  ;;  %v6899_v29 = vld [vmem:[#allocation7 + $0x138] sm:$0xff] }
 0x717   :  { %4242 = vtanh.f32 %v2059_v11  ;;  %v6905_v11 = vld [vmem:[#allocation7 + $0x130] sm:$0xff] }
 0x718   :  { %4244 = vtanh.f32 %v2058_v48  ;;  %v6914_v48 = vld [vmem:[#allocation7 + $0x100] sm:$0xff] }
 0x719   :  { %9853 = vst [vmem:[#allocation12_spill] sm:$0xff] %v6914_v48 }
 0x721   :  { %v4239_v53 = vpop.eup %4238 }
 0x722   :  { %v2063_v7 = vmul.f32 0.5, %v4239_v53  ;;  %v6917_v53 = vld [vmem:[#allocation7 + $0x110] sm:$0xff] }
 0x723   :  { %v4241_v13 = vpop.eup %4240  ;;  %9854 = vst [vmem:[#allocation13_spill] sm:$0xff] %v6917_v53 }
 0x724   :  { %v2066_v63 = vadd.f32 0.5, %v2063_v7  ;;  %v2064_v56 = vmul.f32 0.5, %v4241_v13  ;;  %v4243_v37 = vpop.eup %4242  ;;  %v6920_v7 = vld [vmem:[#allocation7 + $0xe8] sm:$0xff]  ;;  %v6923_v13 = vld [vmem:[#allocation7 + $0xf8] sm:$0xff] }
 0x725   :  { %v4245_v19 = vpop.eup %4244  ;;  %9855 = vst [vmem:[#allocation14_spill] sm:$0xff] %v6920_v7  ;;  %9856 = vst [vmem:[#allocation15_spill] sm:$0xff] %v6923_v13 }
 0x726   :  { %v2067_v14 = vadd.f32 0.5, %v2064_v56  ;;  %v2071_v16 = vmul.f32 %v4243_v37, %v2066_v63  ;;  %v2065_v20 = vmul.f32 0.5, %v4245_v19  ;;  %v6926_v63 = vld [vmem:[#allocation7 + $0xe0] sm:$0xff]  ;;  %v6929_v56 = vld [vmem:[#allocation7 + $0xf0] sm:$0xff]  ;;  %v6935_v37 = vld [vmem:[#allocation7 + $0xd8] sm:$0xff] }
 0x727   :  { %9857 = vst [vmem:[#allocation16_spill] sm:$0xff] %v6926_v63  ;;  %9858 = vst [vmem:[#allocation17_spill] sm:$0xff] %v6929_v56  ;;  %v6944_v19 = vld [vmem:[#allocation7 + $0xa8] sm:$0xff] }
 0x728   :  { %v2070_v15 = vmul.f32 %v2067_v14, %v6583_v9  ;;  %v2068_v61 = vadd.f32 0.5, %v2065_v20  ;;  %v6833_v9 = vld [vmem:[#allocation7 + $0x1f0] sm:$0xff]  ;;  %v6932_v14 = vld [vmem:[#allocation7 + $0xc8] sm:$0xff]  ;;  %9860 = vst [vmem:[#allocation19_spill] sm:$0xff] %v6935_v37  ;;  %9863 = vst [vmem:[#allocation22_spill] sm:$0xff] %v6944_v19 }
 0x729   :  { %9859 = vst [vmem:[#allocation18_spill] sm:$0xff] %v6932_v14  ;;  %v6947_v20 = vld [vmem:[#allocation7 + $0xb8] sm:$0xff] }
 0x72a   :  { %v6823_v18 = vadd.f32 %v2071_v16, %v2070_v15  ;;  %v6938_v15 = vld [vmem:[#allocation7 + $0xc0] sm:$0xff]  ;;  %v6941_v16 = vld [vmem:[#allocation7 + $0xd0] sm:$0xff]  ;;  %9864 = vst [vmem:[#allocation23_spill] sm:$0xff] %v6947_v20 }
 0x72b   :  { %9861 = vst [vmem:[#allocation20_spill] sm:$0xff] %v6938_v15  ;;  %9862 = vst [vmem:[#allocation21_spill] sm:$0xff] %v6941_v16 }
 0x72c   :  { %4246 = vtanh.f32 %v6823_v18 }
 0x739   :  { %v4247_v21 = vpop.eup %4246 }
 0x73a   :  { %v6826_v62 = vmul.f32 %v4247_v21, %v2068_v61  ;;  %v6950_v61 = vld [vmem:[#allocation7 + $0xa0] sm:$0xff]  ;;  %v6953_v21 = vld [vmem:[#allocation7 + $0xb0] sm:$0xff] }
 0x73b   :  { %9865 = vst [vmem:[#allocation24_spill] sm:$0xff] %v6950_v61  ;;  %9866 = vst [vmem:[#allocation25_spill] sm:$0xff] %v6953_v21 }
 0x73c   :  { %2140 = vmatmul.mubr.f32.vlgmr.msra.gmra.mxu0 %v6826_v62  ;;  %2211 = vmatmul.mubr.f32.vlgmr.msra.gmra.mxu1 %v6826_v62 }
 0x73d   :  { %2233 = vmatpush1.msra.mxu0 %v6830_v22  ;;  %2304 = vmatpush1.msra.mxu1 %v6833_v9 }
 0x73e   :  { %2234 = vmatprep.subr.mxu0 %v6836_v23  ;;  %2305 = vmatprep.subr.mxu1 %v6839_v26 }
 0x73f   :  { %2235 = vmatpush1.msra.mxu0 %v6842_v31  ;;  %2306 = vmatpush1.msra.mxu1 %v6845_v35 }
 0x740   :  { %2236 = vmatprep.subr.mxu0 %v6848_v30  ;;  %2307 = vmatprep.subr.mxu1 %v6851_v55 }
 0x741   :  { %2237 = vmatpush1.msra.mxu0 %v6854_v32  ;;  %2308 = vmatpush1.msra.mxu1 %v6857_v4 }
 0x742   :  { %2238 = vmatprep.subr.mxu0 %v6860_v1  ;;  %2309 = vmatprep.subr.mxu1 %v6863_v39 }
 0x743   :  { %2239 = vmatpush1.msra.mxu0 %v6866_v42  ;;  %2310 = vmatpush1.msra.mxu1 %v6869_v51 }
 0x744   :  { %2240 = vmatprep.subr.mxu0 %v6872_v3  ;;  %2311 = vmatprep.subr.mxu1 %v6875_v60 }
 0x745   :  { %2241 = vmatpush1.msra.mxu0 %v6878_v5  ;;  %2312 = vmatpush1.msra.mxu1 %v6881_v36 }
 0x746   :  { %2242 = vmatprep.subr.mxu0 %v6884_v59  ;;  %2313 = vmatprep.subr.mxu1 %v6887_v12 }
 0x747   :  { %2243 = vmatpush1.msra.mxu0 %v6890_v10  ;;  %2314 = vmatpush1.msra.mxu1 %v6893_v8 }
 0x748   :  { %2244 = vmatprep.subr.mxu0 %v6896_v27  ;;  %2315 = vmatprep.subr.mxu1 %v6899_v29 }
 0x749   :  { %2245 = vmatpush1.msra.mxu0 %v6902_v6  ;;  %2316 = vmatpush1.msra.mxu1 %v6905_v11 }
 0x74a   :  { %2246 = vmatprep.subr.mxu0 %v6908_v38  ;;  %2317 = vmatprep.subr.mxu1 %v6911_v45 }
 0x74b   :  { %2247 = vmatpush1.msra.mxu0 %v6914_v48  ;;  %2318 = vmatpush1.msra.mxu1 %v6917_v53 }
 0x74c   :  { %2248 = vmatprep.subr.mxu0 %v6920_v7  ;;  %2319 = vmatprep.subr.mxu1 %v6923_v13 }
 0x74d   :  { %2249 = vmatpush1.msra.mxu0 %v6926_v63  ;;  %2320 = vmatpush1.msra.mxu1 %v6929_v56 }
 0x74e   :  { %2250 = vmatprep.subr.mxu0 %v6932_v14  ;;  %2321 = vmatprep.subr.mxu1 %v6935_v37  ;;  %v1897_v37 = vadd.f32 %v6814_v49, %v5784_v34 }
 0x74f   :  { %2251 = vmatpush1.msra.mxu0 %v6938_v15  ;;  %2322 = vmatpush1.msra.mxu1 %v6941_v16  ;;  %v6956_v15 = vld [vmem:[#allocation7 + $0x88] sm:$0xff]  ;;  %v6959_v16 = vld [vmem:[#allocation7 + $0x98] sm:$0xff] }
 0x750   :  { %2252 = vmatprep.subr.mxu0 %v6944_v19  ;;  %2323 = vmatprep.subr.mxu1 %v6947_v20  ;;  %9867 = vst [vmem:[#allocation26_spill] sm:$0xff] %v6956_v15  ;;  %9868 = vst [vmem:[#allocation27_spill] sm:$0xff] %v6959_v16  ;;  %v6962_v19 = vld [vmem:[#allocation7 + $0x80] sm:$0xff]  ;;  %v6965_v20 = vld [vmem:[#allocation7 + $0x90] sm:$0xff] }
 0x751   :  { %2253 = vmatpush1.msra.mxu0 %v6950_v61  ;;  %2324 = vmatpush1.msra.mxu1 %v6953_v21  ;;  %9869 = vst [vmem:[#allocation28_spill] sm:$0xff] %v6962_v19  ;;  %9870 = vst [vmem:[#allocation29_spill] sm:$0xff] %v6965_v20  ;;  %v6968_v61 = vld [vmem:[#allocation7 + $0x68] sm:$0xff]  ;;  %v6971_v21 = vld [vmem:[#allocation7 + $0x78] sm:$0xff] }
 0x752   :  { %2254 = vmatprep.subr.mxu0 %v6956_v15  ;;  %2325 = vmatprep.subr.mxu1 %v6959_v16  ;;  %9871 = vst [vmem:[#allocation30_spill] sm:$0xff] %v6968_v61  ;;  %9872 = vst [vmem:[#allocation31_spill] sm:$0xff] %v6971_v21  ;;  %v6974_v15 = vld [vmem:[#allocation7 + $0x60] sm:$0xff]  ;;  %v6977_v16 = vld [vmem:[#allocation7 + $0x70] sm:$0xff] }
 0x753   :  { %2255 = vmatpush1.msra.mxu0 %v6962_v19  ;;  %2326 = vmatpush1.msra.mxu1 %v6965_v20  ;;  %9873 = vst [vmem:[#allocation158_spill] sm:$0xff] %v6974_v15  ;;  %9874 = vst [vmem:[#allocation159_spill] sm:$0xff] %v6977_v16  ;;  %v6980_v19 = vld [vmem:[#allocation7 + $0x48] sm:$0xff]  ;;  %v6983_v20 = vld [vmem:[#allocation7 + $0x58] sm:$0xff] }
 0x754   :  { %2256 = vmatprep.subr.mxu0 %v6968_v61  ;;  %2327 = vmatprep.subr.mxu1 %v6971_v21  ;;  %9875 = vst [vmem:[#allocation161_spill] sm:$0xff] %v6980_v19  ;;  %9876 = vst [vmem:[#allocation165_spill] sm:$0xff] %v6983_v20  ;;  %v6986_v61 = vld [vmem:[#allocation7 + $0x40] sm:$0xff]  ;;  %v6989_v21 = vld [vmem:[#allocation7 + $0x50] sm:$0xff] }
 0x755   :  { %2257 = vmatpush1.msra.mxu0 %v6974_v15  ;;  %2328 = vmatpush1.msra.mxu1 %v6977_v16  ;;  %9877 = vst [vmem:[#allocation169_spill] sm:$0xff] %v6986_v61  ;;  %9878 = vst [vmem:[#allocation170_spill] sm:$0xff] %v6989_v21  ;;  %v6992_v15 = vld [vmem:[#allocation7 + $0x28] sm:$0xff]  ;;  %v6995_v16 = vld [vmem:[#allocation7 + $0x38] sm:$0xff] }
 0x756   :  { %2258 = vmatprep.subr.mxu0 %v6980_v19  ;;  %2329 = vmatprep.subr.mxu1 %v6983_v20  ;;  %9879 = vst [vmem:[#allocation166_spill] sm:$0xff] %v6992_v15  ;;  %9880 = vst [vmem:[#allocation32_spill] sm:$0xff] %v6995_v16  ;;  %v6998_v19 = vld [vmem:[#allocation7 + $0x20] sm:$0xff]  ;;  %v7001_v20 = vld [vmem:[#allocation7 + $0x30] sm:$0xff] }
 0x757   :  { %2259 = vmatpush1.msra.mxu0 %v6986_v61  ;;  %2330 = vmatpush1.msra.mxu1 %v6989_v21  ;;  %9881 = vst [vmem:[#allocation33_spill] sm:$0xff] %v6998_v19  ;;  %9882 = vst [vmem:[#allocation34_spill] sm:$0xff] %v7001_v20  ;;  %v7004_v61 = vld [vmem:[#allocation7 + $0x8] sm:$0xff]  ;;  %v7007_v21 = vld [vmem:[#allocation7 + $0x18] sm:$0xff] }
 0x758   :  { %2260 = vmatprep.subr.mxu0 %v6992_v15  ;;  %2331 = vmatprep.subr.mxu1 %v6995_v16  ;;  %9883 = vst [vmem:[#allocation35_spill] sm:$0xff] %v7004_v61  ;;  %9884 = vst [vmem:[#allocation36_spill] sm:$0xff] %v7007_v21  ;;  %v7010_v15 = vld [vmem:[#allocation7] sm:$0xff]  ;;  %v7013_v16 = vld [vmem:[#allocation7 + $0x10] sm:$0xff] }
 0x759   :  { %2261 = vmatpush1.msra.mxu0 %v6998_v19  ;;  %2332 = vmatpush1.msra.mxu1 %v7001_v20  ;;  %9885 = vst [vmem:[#allocation37_spill] sm:$0xff] %v7010_v15  ;;  %9886 = vst [vmem:[#allocation38_spill] sm:$0xff] %v7013_v16  ;;  %v7018_v20 = vld [vmem:[#allocation3 + $0x1e8] sm:$0xff] }
 0x75a   :  { %2262 = vmatprep.subr.mxu0 %v7004_v61  ;;  %2333 = vmatprep.subr.mxu1 %v7007_v21  ;;  %9887 = vst [vmem:[#allocation39_spill] sm:$0xff] %v7018_v20  ;;  %v7021_v61 = vld [vmem:[#allocation3 + $0x1f8] sm:$0xff]  ;;  %v1824_v21 = vadd.f32 %v6806_v43, %v9724_v24 }
 0x75b   :  { %2263 = vmatpush1.msra.mxu0 %v7010_v15  ;;  %2334 = vmatpush1.msra.mxu1 %v7013_v16  ;;  %9888 = vst [vmem:[#allocation40_spill] sm:$0xff] %v7021_v61  ;;  %v1826_v16 = vadd.f32 %v6812_v0, %v9725_v2 }
 0x75c   :  { %2296 = vmatprep.mubr.f32.mxu0 %v9387_v25  ;;  %2367 = vmatprep.mubr.f32.mxu1 %v9387_v25 }
 0x75d   :  { %2389 = vmatprep.subr.mxu0 %v7018_v20  ;;  %2460 = vmatprep.subr.mxu1 %v7021_v61  ;;  %v1895_v61 = vadd.f32 %v6808_v44, %v5793_v54 }
 0x7fc   :  { %v2141_v15 = vpop.f32.mrf.mxu0  ;;  %v2212_v19 = vpop.f32.mrf.mxu1 }
 0x7fd   :  { %v2142_v14 = vadd.f32 %v2141_v15, %v1824_v21  ;;  %v2213_v43 = vadd.f32 %v2212_v19, %v1895_v61  ;;  %v7057_v19 = vld [vmem:[#allocation3 + $0x1b8] sm:$0xff]  ;;  %v7063_v61 = vld [vmem:[#allocation3 + $0x1b0] sm:$0xff] }
 0x7fe   :  { %v2143_v56 = vpop.f32.mrf.mxu0  ;;  %v2214_v63 = vpop.f32.mrf.mxu1  ;;  %9892 = vst [vmem:[#allocation44_spill] sm:$0xff] %v7057_v19  ;;  %9894 = vst [vmem:[#allocation46_spill] sm:$0xff] %v7063_v61 }
 0x7ff   :  { %4248 = vtanh.f32 %v2142_v14  ;;  %v2144_v20 = vadd.f32 %v2143_v56, %v1826_v16  ;;  %v2215_v13 = vadd.f32 %v2214_v63, %v1897_v37  ;;  %v7054_v16 = vld [vmem:[#allocation3 + $0x1a8] sm:$0xff] }
 0x800   :  { %9891 = vst [vmem:[#allocation43_spill] sm:$0xff] %v7054_v16 }
 0x801   :  { %4250 = vtanh.f32 %v2144_v20  ;;  %v7060_v20 = vld [vmem:[#allocation3 + $0x1a0] sm:$0xff] }
 0x802   :  { %4252 = vtanh.f32 %v2215_v13  ;;  %9893 = vst [vmem:[#allocation45_spill] sm:$0xff] %v7060_v20 }
 0x803   :  { %4254 = vtanh.f32 %v2213_v43  ;;  %v7066_v43 = vld [vmem:[#allocation3 + $0x188] sm:$0xff] }
 0x804   :  { %9895 = vst [vmem:[#allocation47_spill] sm:$0xff] %v7066_v43 }
 0x80c   :  { %v4249_v24 = vpop.eup %4248 }
 0x80d   :  { %v2220_v7 = vmul.f32 0.5, %v4249_v24  ;;  %v7036_v24 = vld [vmem:[#allocation3 + $0x1e0] sm:$0xff] }
 0x80e   :  { %v4251_v53 = vpop.eup %4250 }
 0x80f   :  { %v2223_v48 = vadd.f32 0.5, %v2220_v7  ;;  %v2221_v0 = vmul.f32 0.5, %v4251_v53  ;;  %v4253_v2 = vpop.eup %4252  ;;  %v7039_v53 = vld [vmem:[#allocation3 + $0x1f0] sm:$0xff] }
 0x810   :  { %v4255_v13 = vpop.eup %4254  ;;  %v7051_v7 = vld [vmem:[#allocation3 + $0x1d0] sm:$0xff] }
 0x811   :  { %v2224_v49 = vadd.f32 0.5, %v2221_v0  ;;  %v2228_v15 = vmul.f32 %v4253_v2, %v2223_v48  ;;  %v2222_v63 = vmul.f32 0.5, %v4255_v13  ;;  %v7042_v2 = vld [vmem:[#allocation3 + $0x1c8] sm:$0xff]  ;;  %v7048_v48 = vld [vmem:[#allocation3 + $0x1c0] sm:$0xff]  ;;  %9890 = vst [vmem:[#allocation42_spill] sm:$0xff] %v7051_v7  ;;  %v7069_v0 = vld [vmem:[#allocation3 + $0x198] sm:$0xff] }
 0x812   :  { %9889 = vst [vmem:[#allocation41_spill] sm:$0xff] %v7048_v48  ;;  %9896 = vst [vmem:[#allocation48_spill] sm:$0xff] %v7069_v0  ;;  %v7081_v13 = vld [vmem:[#allocation3 + $0x178] sm:$0xff] }
 0x813   :  { %v2227_v21 = vmul.f32 %v2224_v49, %v6665_v17  ;;  %v2225_v56 = vadd.f32 0.5, %v2222_v63  ;;  %v7045_v17 = vld [vmem:[#allocation3 + $0x1d8] sm:$0xff]  ;;  %v7072_v49 = vld [vmem:[#allocation3 + $0x180] sm:$0xff]  ;;  %9900 = vst [vmem:[#allocation52_spill] sm:$0xff] %v7081_v13 }
 0x814   :  { %9897 = vst [vmem:[#allocation49_spill] sm:$0xff] %v7072_v49  ;;  %v7084_v63 = vld [vmem:[#allocation3 + $0x160] sm:$0xff] }
 0x815   :  { %v7033_v14 = vadd.f32 %v2228_v15, %v2227_v21  ;;  %v7075_v15 = vld [vmem:[#allocation3 + $0x190] sm:$0xff]  ;;  %v7078_v21 = vld [vmem:[#allocation3 + $0x168] sm:$0xff]  ;;  %9901 = vst [vmem:[#allocation53_spill] sm:$0xff] %v7084_v63 }
 0x816   :  { %9898 = vst [vmem:[#allocation50_spill] sm:$0xff] %v7075_v15  ;;  %9899 = vst [vmem:[#allocation51_spill] sm:$0xff] %v7078_v21 }
 0x817   :  { %4256 = vtanh.f32 %v7033_v14 }
 0x824   :  { %v4257_v44 = vpop.eup %4256 }
 0x825   :  { %v2231_v37 = vmul.f32 %v4257_v44, %v2225_v56  ;;  %v7087_v56 = vld [vmem:[#allocation3 + $0x170] sm:$0xff]  ;;  %v7090_v44 = vld [vmem:[#allocation3 + $0x148] sm:$0xff] }
 0x826   :  { %9902 = vst [vmem:[#allocation54_spill] sm:$0xff] %v7087_v56  ;;  %9903 = vst [vmem:[#allocation55_spill] sm:$0xff] %v7090_v44 }
 0x827   :  { %2297 = vmatmul.mubr.f32.vlgmr.msra.gmra.mxu0 %v2231_v37  ;;  %2368 = vmatmul.mubr.f32.vlgmr.msra.gmra.mxu1 %v2231_v37  ;;  %v7093_v37 = vld [vmem:[#allocation3 + $0x158] sm:$0xff] }
 0x828   :  { %2390 = vmatpush1.msra.mxu0 %v7036_v24  ;;  %2461 = vmatpush1.msra.mxu1 %v7039_v53  ;;  %9904 = vst [vmem:[#allocation56_spill] sm:$0xff] %v7093_v37 }
 0x829   :  { %2391 = vmatprep.subr.mxu0 %v7042_v2  ;;  %2462 = vmatprep.subr.mxu1 %v7045_v17 }
 0x82a   :  { %2392 = vmatpush1.msra.mxu0 %v7048_v48  ;;  %2463 = vmatpush1.msra.mxu1 %v7051_v7 }
 0x82b   :  { %2393 = vmatprep.subr.mxu0 %v7054_v16  ;;  %2464 = vmatprep.subr.mxu1 %v7057_v19 }
 0x82c   :  { %2394 = vmatpush1.msra.mxu0 %v7060_v20  ;;  %2465 = vmatpush1.msra.mxu1 %v7063_v61 }
 0x82d   :  { %2395 = vmatprep.subr.mxu0 %v7066_v43  ;;  %2466 = vmatprep.subr.mxu1 %v7069_v0 }
 0x82e   :  { %2396 = vmatpush1.msra.mxu0 %v7072_v49  ;;  %2467 = vmatpush1.msra.mxu1 %v7075_v15 }
 0x82f   :  { %2397 = vmatprep.subr.mxu0 %v7078_v21  ;;  %2468 = vmatprep.subr.mxu1 %v7081_v13  ;;  %v7096_v21 = vld [vmem:[#allocation3 + $0x140] sm:$0xff]  ;;  %v7099_v13 = vld [vmem:[#allocation3 + $0x150] sm:$0xff] }
 0x830   :  { %2398 = vmatpush1.msra.mxu0 %v7084_v63  ;;  %2469 = vmatpush1.msra.mxu1 %v7087_v56  ;;  %9905 = vst [vmem:[#allocation57_spill] sm:$0xff] %v7096_v21  ;;  %9906 = vst [vmem:[#allocation58_spill] sm:$0xff] %v7099_v13  ;;  %v7102_v63 = vld [vmem:[#allocation3 + $0x128] sm:$0xff]  ;;  %v7105_v56 = vld [vmem:[#allocation3 + $0x138] sm:$0xff] }
 0x831   :  { %2399 = vmatprep.subr.mxu0 %v7090_v44  ;;  %2470 = vmatprep.subr.mxu1 %v7093_v37  ;;  %9907 = vst [vmem:[#allocation59_spill] sm:$0xff] %v7102_v63  ;;  %9908 = vst [vmem:[#allocation60_spill] sm:$0xff] %v7105_v56  ;;  %v7108_v44 = vld [vmem:[#allocation3 + $0x120] sm:$0xff]  ;;  %v7111_v37 = vld [vmem:[#allocation3 + $0x130] sm:$0xff] }
 0x832   :  { %2400 = vmatpush1.msra.mxu0 %v7096_v21  ;;  %2471 = vmatpush1.msra.mxu1 %v7099_v13  ;;  %9909 = vst [vmem:[#allocation61_spill] sm:$0xff] %v7108_v44  ;;  %9910 = vst [vmem:[#allocation62_spill] sm:$0xff] %v7111_v37  ;;  %v7114_v21 = vld [vmem:[#allocation3 + $0x108] sm:$0xff]  ;;  %v7117_v13 = vld [vmem:[#allocation3 + $0x118] sm:$0xff] }
 0x833   :  { %2401 = vmatprep.subr.mxu0 %v7102_v63  ;;  %2472 = vmatprep.subr.mxu1 %v7105_v56  ;;  %9911 = vst [vmem:[#allocation63_spill] sm:$0xff] %v7114_v21  ;;  %9912 = vst [vmem:[#allocation64_spill] sm:$0xff] %v7117_v13  ;;  %v7120_v63 = vld [vmem:[#allocation3 + $0x100] sm:$0xff]  ;;  %v7123_v56 = vld [vmem:[#allocation3 + $0x110] sm:$0xff] }
 0x834   :  { %2402 = vmatpush1.msra.mxu0 %v7108_v44  ;;  %2473 = vmatpush1.msra.mxu1 %v7111_v37  ;;  %9913 = vst [vmem:[#allocation65_spill] sm:$0xff] %v7120_v63  ;;  %9914 = vst [vmem:[#allocation66_spill] sm:$0xff] %v7123_v56  ;;  %v7126_v44 = vld [vmem:[#allocation3 + $0xe8] sm:$0xff]  ;;  %v7129_v37 = vld [vmem:[#allocation3 + $0xf8] sm:$0xff] }
 0x835   :  { %2403 = vmatprep.subr.mxu0 %v7114_v21  ;;  %2474 = vmatprep.subr.mxu1 %v7117_v13  ;;  %9915 = vst [vmem:[#allocation67_spill] sm:$0xff] %v7126_v44  ;;  %9916 = vst [vmem:[#allocation68_spill] sm:$0xff] %v7129_v37  ;;  %v7132_v21 = vld [vmem:[#allocation3 + $0xe0] sm:$0xff]  ;;  %v7135_v13 = vld [vmem:[#allocation3 + $0xf0] sm:$0xff] }
 0x836   :  { %2404 = vmatpush1.msra.mxu0 %v7120_v63  ;;  %2475 = vmatpush1.msra.mxu1 %v7123_v56  ;;  %9917 = vst [vmem:[#allocation69_spill] sm:$0xff] %v7132_v21  ;;  %9918 = vst [vmem:[#allocation70_spill] sm:$0xff] %v7135_v13  ;;  %v7138_v63 = vld [vmem:[#allocation3 + $0xc8] sm:$0xff]  ;;  %v7141_v56 = vld [vmem:[#allocation3 + $0xd8] sm:$0xff] }
 0x837   :  { %2405 = vmatprep.subr.mxu0 %v7126_v44  ;;  %2476 = vmatprep.subr.mxu1 %v7129_v37  ;;  %9919 = vst [vmem:[#allocation71_spill] sm:$0xff] %v7138_v63  ;;  %9920 = vst [vmem:[#allocation72_spill] sm:$0xff] %v7141_v56  ;;  %v7144_v44 = vld [vmem:[#allocation3 + $0xc0] sm:$0xff]  ;;  %v7147_v37 = vld [vmem:[#allocation3 + $0xd0] sm:$0xff] }
 0x838   :  { %2406 = vmatpush1.msra.mxu0 %v7132_v21  ;;  %2477 = vmatpush1.msra.mxu1 %v7135_v13  ;;  %9921 = vst [vmem:[#allocation73_spill] sm:$0xff] %v7144_v44  ;;  %9922 = vst [vmem:[#allocation74_spill] sm:$0xff] %v7147_v37  ;;  %v7150_v21 = vld [vmem:[#allocation3 + $0xa8] sm:$0xff]  ;;  %v7153_v13 = vld [vmem:[#allocation3 + $0xb8] sm:$0xff] }
 0x839   :  { %2407 = vmatprep.subr.mxu0 %v7138_v63  ;;  %2478 = vmatprep.subr.mxu1 %v7141_v56  ;;  %9923 = vst [vmem:[#allocation75_spill] sm:$0xff] %v7150_v21  ;;  %9924 = vst [vmem:[#allocation76_spill] sm:$0xff] %v7153_v13  ;;  %v7156_v63 = vld [vmem:[#allocation3 + $0xa0] sm:$0xff]  ;;  %v7159_v56 = vld [vmem:[#allocation3 + $0xb0] sm:$0xff] }
 0x83a   :  { %2408 = vmatpush1.msra.mxu0 %v7144_v44  ;;  %2479 = vmatpush1.msra.mxu1 %v7147_v37  ;;  %9925 = vst [vmem:[#allocation77_spill] sm:$0xff] %v7156_v63  ;;  %9926 = vst [vmem:[#allocation78_spill] sm:$0xff] %v7159_v56  ;;  %v7162_v44 = vld [vmem:[#allocation3 + $0x88] sm:$0xff]  ;;  %v7165_v37 = vld [vmem:[#allocation3 + $0x98] sm:$0xff] }
 0x83b   :  { %2409 = vmatprep.subr.mxu0 %v7150_v21  ;;  %2480 = vmatprep.subr.mxu1 %v7153_v13  ;;  %9927 = vst [vmem:[#allocation79_spill] sm:$0xff] %v7162_v44  ;;  %9928 = vst [vmem:[#allocation80_spill] sm:$0xff] %v7165_v37  ;;  %v7168_v21 = vld [vmem:[#allocation3 + $0x80] sm:$0xff]  ;;  %v7171_v13 = vld [vmem:[#allocation3 + $0x90] sm:$0xff] }
 0x83c   :  { %2410 = vmatpush1.msra.mxu0 %v7156_v63  ;;  %2481 = vmatpush1.msra.mxu1 %v7159_v56  ;;  %9929 = vst [vmem:[#allocation81_spill] sm:$0xff] %v7168_v21  ;;  %9930 = vst [vmem:[#allocation82_spill] sm:$0xff] %v7171_v13  ;;  %v7174_v63 = vld [vmem:[#allocation3 + $0x68] sm:$0xff]  ;;  %v7177_v56 = vld [vmem:[#allocation3 + $0x78] sm:$0xff] }
 0x83d   :  { %2411 = vmatprep.subr.mxu0 %v7162_v44  ;;  %2482 = vmatprep.subr.mxu1 %v7165_v37  ;;  %9931 = vst [vmem:[#allocation83_spill] sm:$0xff] %v7174_v63  ;;  %9932 = vst [vmem:[#allocation84_spill] sm:$0xff] %v7177_v56  ;;  %v7180_v44 = vld [vmem:[#allocation3 + $0x60] sm:$0xff]  ;;  %v7183_v37 = vld [vmem:[#allocation3 + $0x70] sm:$0xff] }
 0x83e   :  { %2412 = vmatpush1.msra.mxu0 %v7168_v21  ;;  %2483 = vmatpush1.msra.mxu1 %v7171_v13  ;;  %9933 = vst [vmem:[#allocation85_spill] sm:$0xff] %v7180_v44  ;;  %9934 = vst [vmem:[#allocation86_spill] sm:$0xff] %v7183_v37  ;;  %v7186_v21 = vld [vmem:[#allocation3 + $0x48] sm:$0xff]  ;;  %v7189_v13 = vld [vmem:[#allocation3 + $0x58] sm:$0xff] }
 0x83f   :  { %2413 = vmatprep.subr.mxu0 %v7174_v63  ;;  %2484 = vmatprep.subr.mxu1 %v7177_v56  ;;  %9935 = vst [vmem:[#allocation87_spill] sm:$0xff] %v7186_v21  ;;  %9936 = vst [vmem:[#allocation88_spill] sm:$0xff] %v7189_v13  ;;  %v7192_v63 = vld [vmem:[#allocation3 + $0x40] sm:$0xff]  ;;  %v7195_v56 = vld [vmem:[#allocation3 + $0x50] sm:$0xff] }
 0x840   :  { %2414 = vmatpush1.msra.mxu0 %v7180_v44  ;;  %2485 = vmatpush1.msra.mxu1 %v7183_v37  ;;  %9937 = vst [vmem:[#allocation89_spill] sm:$0xff] %v7192_v63  ;;  %9938 = vst [vmem:[#allocation90_spill] sm:$0xff] %v7195_v56  ;;  %v7198_v44 = vld [vmem:[#allocation3 + $0x28] sm:$0xff]  ;;  %v7201_v37 = vld [vmem:[#allocation3 + $0x38] sm:$0xff] }
 0x841   :  { %2415 = vmatprep.subr.mxu0 %v7186_v21  ;;  %2486 = vmatprep.subr.mxu1 %v7189_v13  ;;  %9939 = vst [vmem:[#allocation91_spill] sm:$0xff] %v7198_v44  ;;  %9940 = vst [vmem:[#allocation92_spill] sm:$0xff] %v7201_v37  ;;  %v7204_v21 = vld [vmem:[#allocation3 + $0x20] sm:$0xff]  ;;  %v7207_v13 = vld [vmem:[#allocation3 + $0x30] sm:$0xff] }
 0x842   :  { %2416 = vmatpush1.msra.mxu0 %v7192_v63  ;;  %2487 = vmatpush1.msra.mxu1 %v7195_v56  ;;  %9941 = vst [vmem:[#allocation93_spill] sm:$0xff] %v7204_v21  ;;  %9942 = vst [vmem:[#allocation94_spill] sm:$0xff] %v7207_v13  ;;  %v7210_v63 = vld [vmem:[#allocation3 + $0x8] sm:$0xff]  ;;  %v7213_v56 = vld [vmem:[#allocation3 + $0x18] sm:$0xff] }
 0x843   :  { %2417 = vmatprep.subr.mxu0 %v7198_v44  ;;  %2488 = vmatprep.subr.mxu1 %v7201_v37  ;;  %9943 = vst [vmem:[#allocation95_spill] sm:$0xff] %v7210_v63  ;;  %9944 = vst [vmem:[#allocation96_spill] sm:$0xff] %v7213_v56  ;;  %v7216_v44 = vld [vmem:[#allocation3] sm:$0xff]  ;;  %v7220_v37 = vld [vmem:[#allocation3 + $0x10] sm:$0xff] }
 0x844   :  { %2418 = vmatpush1.msra.mxu0 %v7204_v21  ;;  %2489 = vmatpush1.msra.mxu1 %v7207_v13  ;;  %9945 = vst [vmem:[#allocation97_spill] sm:$0xff] %v7216_v44  ;;  %9946 = vst [vmem:[#allocation98_spill] sm:$0xff] %v7220_v37  ;;  %v7235_v13 = vld [vmem:[#allocation5 + $0x1f0] sm:$0xff] }
 0x845   :  { %2419 = vmatprep.subr.mxu0 %v7210_v63  ;;  %2490 = vmatprep.subr.mxu1 %v7213_v56  ;;  %v7226_v63 = vld [vmem:[#allocation5 + $0x1e8] sm:$0xff]  ;;  %v7229_v56 = vld [vmem:[#allocation5 + $0x1f8] sm:$0xff]  ;;  %9950 = vst [vmem:[#allocation102_spill] sm:$0xff] %v7235_v13 }
 0x846   :  { %2420 = vmatpush1.msra.mxu0 %v7216_v44  ;;  %2453 = vmatprep.mubr.f32.mxu0 %v9387_v25  ;;  %9947 = vst [vmem:[#allocation99_spill] sm:$0xff] %v7226_v63  ;;  %9948 = vst [vmem:[#allocation100_spill] sm:$0xff] %v7229_v56  ;;  %v7232_v44 = vld [vmem:[#allocation5 + $0x1e0] sm:$0xff] }
 0x847   :  { %2491 = vmatpush1.msra.mxu1 %v7220_v37  ;;  %2524 = vmatprep.mubr.f32.mxu1 %v9387_v25  ;;  %9949 = vst [vmem:[#allocation101_spill] sm:$0xff] %v7232_v44  ;;  %v7238_v37 = vld [vmem:[#allocation5 + $0x1c8] sm:$0xff] }
 0x848   :  { %2454 = vmatmul.mubr.f32.vlgmr.msra.gmra.mxu0 %v6826_v62  ;;  %2525 = vmatmul.mubr.f32.vlgmr.msra.gmra.mxu1 %v6826_v62  ;;  %9951 = vst [vmem:[#allocation103_spill] sm:$0xff] %v7238_v37  ;;  %v7241_v62 = vld [vmem:[#allocation5 + $0x1d8] sm:$0xff] }
 0x849   :  { %2550 = vmatprep.subr.mxu0 %v7226_v63  ;;  %2621 = vmatprep.subr.mxu1 %v7229_v56  ;;  %9952 = vst [vmem:[#allocation104_spill] sm:$0xff] %v7241_v62  ;;  %v7244_v63 = vld [vmem:[#allocation5 + $0x1c0] sm:$0xff]  ;;  %v7247_v56 = vld [vmem:[#allocation5 + $0x1d0] sm:$0xff] }
 0x84a   :  { %2551 = vmatpush1.msra.mxu0 %v7232_v44  ;;  %2622 = vmatpush1.msra.mxu1 %v7235_v13  ;;  %9953 = vst [vmem:[#allocation105_spill] sm:$0xff] %v7244_v63  ;;  %9954 = vst [vmem:[#allocation106_spill] sm:$0xff] %v7247_v56  ;;  %v7250_v44 = vld [vmem:[#allocation5 + $0x1a8] sm:$0xff]  ;;  %v7253_v13 = vld [vmem:[#allocation5 + $0x1b8] sm:$0xff] }
 0x84b   :  { %2552 = vmatprep.subr.mxu0 %v7238_v37  ;;  %2623 = vmatprep.subr.mxu1 %v7241_v62  ;;  %9955 = vst [vmem:[#allocation107_spill] sm:$0xff] %v7250_v44  ;;  %9956 = vst [vmem:[#allocation108_spill] sm:$0xff] %v7253_v13  ;;  %v7256_v37 = vld [vmem:[#allocation5 + $0x1a0] sm:$0xff]  ;;  %v7259_v62 = vld [vmem:[#allocation5 + $0x1b0] sm:$0xff] }
 0x84c   :  { %2553 = vmatpush1.msra.mxu0 %v7244_v63  ;;  %2624 = vmatpush1.msra.mxu1 %v7247_v56  ;;  %9957 = vst [vmem:[#allocation109_spill] sm:$0xff] %v7256_v37  ;;  %9958 = vst [vmem:[#allocation110_spill] sm:$0xff] %v7259_v62  ;;  %v7262_v63 = vld [vmem:[#allocation5 + $0x188] sm:$0xff]  ;;  %v7265_v56 = vld [vmem:[#allocation5 + $0x198] sm:$0xff] }
 0x84d   :  { %2554 = vmatprep.subr.mxu0 %v7250_v44  ;;  %2625 = vmatprep.subr.mxu1 %v7253_v13  ;;  %9959 = vst [vmem:[#allocation111_spill] sm:$0xff] %v7262_v63  ;;  %9960 = vst [vmem:[#allocation112_spill] sm:$0xff] %v7265_v56  ;;  %v7268_v44 = vld [vmem:[#allocation5 + $0x180] sm:$0xff]  ;;  %v7271_v13 = vld [vmem:[#allocation5 + $0x190] sm:$0xff] }
 0x84e   :  { %2555 = vmatpush1.msra.mxu0 %v7256_v37  ;;  %2626 = vmatpush1.msra.mxu1 %v7259_v62  ;;  %9961 = vst [vmem:[#allocation113_spill] sm:$0xff] %v7268_v44  ;;  %9962 = vst [vmem:[#allocation114_spill] sm:$0xff] %v7271_v13  ;;  %v7274_v37 = vld [vmem:[#allocation5 + $0x168] sm:$0xff]  ;;  %v7277_v62 = vld [vmem:[#allocation5 + $0x178] sm:$0xff] }
 0x84f   :  { %2556 = vmatprep.subr.mxu0 %v7262_v63  ;;  %2627 = vmatprep.subr.mxu1 %v7265_v56  ;;  %9963 = vst [vmem:[#allocation115_spill] sm:$0xff] %v7274_v37  ;;  %9964 = vst [vmem:[#allocation116_spill] sm:$0xff] %v7277_v62  ;;  %v7280_v63 = vld [vmem:[#allocation5 + $0x160] sm:$0xff]  ;;  %v7283_v56 = vld [vmem:[#allocation5 + $0x170] sm:$0xff] }
 0x850   :  { %2557 = vmatpush1.msra.mxu0 %v7268_v44  ;;  %2628 = vmatpush1.msra.mxu1 %v7271_v13  ;;  %9965 = vst [vmem:[#allocation117_spill] sm:$0xff] %v7280_v63  ;;  %9966 = vst [vmem:[#allocation118_spill] sm:$0xff] %v7283_v56  ;;  %v7286_v44 = vld [vmem:[#allocation5 + $0x148] sm:$0xff]  ;;  %v7289_v13 = vld [vmem:[#allocation5 + $0x158] sm:$0xff] }
 0x851   :  { %2558 = vmatprep.subr.mxu0 %v7274_v37  ;;  %2629 = vmatprep.subr.mxu1 %v7277_v62  ;;  %9967 = vst [vmem:[#allocation119_spill] sm:$0xff] %v7286_v44  ;;  %9968 = vst [vmem:[#allocation120_spill] sm:$0xff] %v7289_v13  ;;  %v7292_v37 = vld [vmem:[#allocation5 + $0x140] sm:$0xff]  ;;  %v7295_v62 = vld [vmem:[#allocation5 + $0x150] sm:$0xff] }
 0x852   :  { %2559 = vmatpush1.msra.mxu0 %v7280_v63  ;;  %2630 = vmatpush1.msra.mxu1 %v7283_v56  ;;  %9969 = vst [vmem:[#allocation121_spill] sm:$0xff] %v7292_v37  ;;  %9970 = vst [vmem:[#allocation122_spill] sm:$0xff] %v7295_v62  ;;  %v7298_v63 = vld [vmem:[#allocation5 + $0x128] sm:$0xff]  ;;  %v7301_v56 = vld [vmem:[#allocation5 + $0x138] sm:$0xff] }
 0x853   :  { %2560 = vmatprep.subr.mxu0 %v7286_v44  ;;  %2631 = vmatprep.subr.mxu1 %v7289_v13  ;;  %9971 = vst [vmem:[#allocation123_spill] sm:$0xff] %v7298_v63  ;;  %9972 = vst [vmem:[#allocation124_spill] sm:$0xff] %v7301_v56  ;;  %v7304_v44 = vld [vmem:[#allocation5 + $0x120] sm:$0xff]  ;;  %v7307_v13 = vld [vmem:[#allocation5 + $0x130] sm:$0xff] }
 0x854   :  { %2561 = vmatpush1.msra.mxu0 %v7292_v37  ;;  %2632 = vmatpush1.msra.mxu1 %v7295_v62  ;;  %9973 = vst [vmem:[#allocation125_spill] sm:$0xff] %v7304_v44  ;;  %9974 = vst [vmem:[#allocation126_spill] sm:$0xff] %v7307_v13  ;;  %v7310_v37 = vld [vmem:[#allocation5 + $0x108] sm:$0xff]  ;;  %v7313_v62 = vld [vmem:[#allocation5 + $0x118] sm:$0xff] }
 0x855   :  { %2562 = vmatprep.subr.mxu0 %v7298_v63  ;;  %2633 = vmatprep.subr.mxu1 %v7301_v56  ;;  %9975 = vst [vmem:[#allocation127_spill] sm:$0xff] %v7310_v37  ;;  %9976 = vst [vmem:[#allocation128_spill] sm:$0xff] %v7313_v62  ;;  %v7316_v63 = vld [vmem:[#allocation5 + $0x100] sm:$0xff]  ;;  %v7319_v56 = vld [vmem:[#allocation5 + $0x110] sm:$0xff] }
 0x856   :  { %2563 = vmatpush1.msra.mxu0 %v7304_v44  ;;  %2634 = vmatpush1.msra.mxu1 %v7307_v13  ;;  %9977 = vst [vmem:[#allocation129_spill] sm:$0xff] %v7316_v63  ;;  %9978 = vst [vmem:[#allocation130_spill] sm:$0xff] %v7319_v56  ;;  %v7322_v44 = vld [vmem:[#allocation5 + $0xe8] sm:$0xff]  ;;  %v7325_v13 = vld [vmem:[#allocation5 + $0xf8] sm:$0xff] }
 0x857   :  { %2564 = vmatprep.subr.mxu0 %v7310_v37  ;;  %2635 = vmatprep.subr.mxu1 %v7313_v62  ;;  %9979 = vst [vmem:[#allocation131_spill] sm:$0xff] %v7322_v44  ;;  %9980 = vst [vmem:[#allocation132_spill] sm:$0xff] %v7325_v13  ;;  %v7328_v37 = vld [vmem:[#allocation5 + $0xe0] sm:$0xff]  ;;  %v7331_v62 = vld [vmem:[#allocation5 + $0xf0] sm:$0xff] }
 0x858   :  { %2565 = vmatpush1.msra.mxu0 %v7316_v63  ;;  %2636 = vmatpush1.msra.mxu1 %v7319_v56  ;;  %9981 = vst [vmem:[#allocation133_spill] sm:$0xff] %v7328_v37  ;;  %9982 = vst [vmem:[#allocation134_spill] sm:$0xff] %v7331_v62  ;;  %v7334_v63 = vld [vmem:[#allocation5 + $0xc8] sm:$0xff]  ;;  %v7337_v56 = vld [vmem:[#allocation5 + $0xd8] sm:$0xff] }
 0x859   :  { %2566 = vmatprep.subr.mxu0 %v7322_v44  ;;  %2637 = vmatprep.subr.mxu1 %v7325_v13  ;;  %9983 = vst [vmem:[#allocation135_spill] sm:$0xff] %v7334_v63  ;;  %9984 = vst [vmem:[#allocation136_spill] sm:$0xff] %v7337_v56  ;;  %v7340_v44 = vld [vmem:[#allocation5 + $0xc0] sm:$0xff]  ;;  %v7343_v13 = vld [vmem:[#allocation5 + $0xd0] sm:$0xff] }
 0x85a   :  { %2567 = vmatpush1.msra.mxu0 %v7328_v37  ;;  %2638 = vmatpush1.msra.mxu1 %v7331_v62  ;;  %9985 = vst [vmem:[#allocation137_spill] sm:$0xff] %v7340_v44  ;;  %9986 = vst [vmem:[#allocation138_spill] sm:$0xff] %v7343_v13  ;;  %v7346_v37 = vld [vmem:[#allocation5 + $0xa8] sm:$0xff]  ;;  %v7349_v62 = vld [vmem:[#allocation5 + $0xb8] sm:$0xff] }
 0x85b   :  { %2568 = vmatprep.subr.mxu0 %v7334_v63  ;;  %2639 = vmatprep.subr.mxu1 %v7337_v56  ;;  %9987 = vst [vmem:[#allocation139_spill] sm:$0xff] %v7346_v37  ;;  %9988 = vst [vmem:[#allocation140_spill] sm:$0xff] %v7349_v62  ;;  %v7352_v63 = vld [vmem:[#allocation5 + $0xa0] sm:$0xff]  ;;  %v7355_v56 = vld [vmem:[#allocation5 + $0xb0] sm:$0xff] }
 0x85c   :  { %2569 = vmatpush1.msra.mxu0 %v7340_v44  ;;  %2640 = vmatpush1.msra.mxu1 %v7343_v13  ;;  %9989 = vst [vmem:[#allocation141_spill] sm:$0xff] %v7352_v63  ;;  %9990 = vst [vmem:[#allocation142_spill] sm:$0xff] %v7355_v56  ;;  %v7358_v44 = vld [vmem:[#allocation5 + $0x88] sm:$0xff]  ;;  %v7361_v13 = vld [vmem:[#allocation5 + $0x98] sm:$0xff] }
 0x85d   :  { %2570 = vmatprep.subr.mxu0 %v7346_v37  ;;  %2641 = vmatprep.subr.mxu1 %v7349_v62  ;;  %9991 = vst [vmem:[#allocation143_spill] sm:$0xff] %v7358_v44  ;;  %9992 = vst [vmem:[#allocation144_spill] sm:$0xff] %v7361_v13  ;;  %v7364_v37 = vld [vmem:[#allocation5 + $0x80] sm:$0xff]  ;;  %v7367_v62 = vld [vmem:[#allocation5 + $0x90] sm:$0xff] }
 0x85e   :  { %2571 = vmatpush1.msra.mxu0 %v7352_v63  ;;  %2642 = vmatpush1.msra.mxu1 %v7355_v56  ;;  %9993 = vst [vmem:[#allocation145_spill] sm:$0xff] %v7364_v37  ;;  %9994 = vst [vmem:[#allocation146_spill] sm:$0xff] %v7367_v62  ;;  %v7370_v63 = vld [vmem:[#allocation5 + $0x68] sm:$0xff]  ;;  %v7373_v56 = vld [vmem:[#allocation5 + $0x78] sm:$0xff] }
 0x85f   :  { %2572 = vmatprep.subr.mxu0 %v7358_v44  ;;  %2643 = vmatprep.subr.mxu1 %v7361_v13  ;;  %9995 = vst [vmem:[#allocation147_spill] sm:$0xff] %v7370_v63  ;;  %9996 = vst [vmem:[#allocation148_spill] sm:$0xff] %v7373_v56  ;;  %v7376_v44 = vld [vmem:[#allocation5 + $0x60] sm:$0xff]  ;;  %v7379_v13 = vld [vmem:[#allocation5 + $0x70] sm:$0xff] }
 0x860   :  { %2573 = vmatpush1.msra.mxu0 %v7364_v37  ;;  %2644 = vmatpush1.msra.mxu1 %v7367_v62  ;;  %9997 = vst [vmem:[#allocation149_spill] sm:$0xff] %v7376_v44  ;;  %9998 = vst [vmem:[#allocation150_spill] sm:$0xff] %v7379_v13  ;;  %v7382_v37 = vld [vmem:[#allocation5 + $0x48] sm:$0xff]  ;;  %v7385_v62 = vld [vmem:[#allocation5 + $0x58] sm:$0xff] }
 0x861   :  { %2574 = vmatprep.subr.mxu0 %v7370_v63  ;;  %2645 = vmatprep.subr.mxu1 %v7373_v56  ;;  %9999 = vst [vmem:[#allocation151_spill] sm:$0xff] %v7382_v37  ;;  %10000 = vst [vmem:[#allocation152_spill] sm:$0xff] %v7385_v62  ;;  %v7388_v63 = vld [vmem:[#allocation5 + $0x40] sm:$0xff]  ;;  %v7391_v56 = vld [vmem:[#allocation5 + $0x50] sm:$0xff] }
 0x862   :  { %2575 = vmatpush1.msra.mxu0 %v7376_v44  ;;  %2646 = vmatpush1.msra.mxu1 %v7379_v13  ;;  %10001 = vst [vmem:[#allocation153_spill] sm:$0xff] %v7388_v63  ;;  %10002 = vst [vmem:[#allocation154_spill] sm:$0xff] %v7391_v56  ;;  %v7394_v44 = vld [vmem:[#allocation5 + $0x28] sm:$0xff]  ;;  %v7397_v13 = vld [vmem:[#allocation5 + $0x38] sm:$0xff] }
 0x863   :  { %2576 = vmatprep.subr.mxu0 %v7382_v37  ;;  %2647 = vmatprep.subr.mxu1 %v7385_v62  ;;  %10003 = vst [vmem:[#allocation155_spill] sm:$0xff] %v7394_v44  ;;  %10004 = vst [vmem:[#allocation156_spill] sm:$0xff] %v7397_v13  ;;  %v7400_v37 = vld [vmem:[#allocation5 + $0x20] sm:$0xff]  ;;  %v7403_v62 = vld [vmem:[#allocation5 + $0x30] sm:$0xff] }
 0x864   :  { %2577 = vmatpush1.msra.mxu0 %v7388_v63  ;;  %2648 = vmatpush1.msra.mxu1 %v7391_v56  ;;  %10005 = vst [vmem:[#allocation157_spill] sm:$0xff] %v7400_v37  ;;  %10006 = vst [vmem:[#allocation171_spill] sm:$0xff] %v7403_v62  ;;  %v7406_v63 = vld [vmem:[#allocation5 + $0x8] sm:$0xff]  ;;  %v7409_v56 = vld [vmem:[#allocation5 + $0x18] sm:$0xff] }
 0x865   :  { %2578 = vmatprep.subr.mxu0 %v7394_v44  ;;  %2649 = vmatprep.subr.mxu1 %v7397_v13  ;;  %10007 = vst [vmem:[#allocation172_spill] sm:$0xff] %v7406_v63  ;;  %10008 = vst [vmem:[#allocation173_spill] sm:$0xff] %v7409_v56  ;;  %v7412_v44 = vld [vmem:[#allocation5] sm:$0xff]  ;;  %v7416_v13 = vld [vmem:[#allocation5 + $0x10] sm:$0xff] }
 0x866   :  { %2579 = vmatpush1.msra.mxu0 %v7400_v37  ;;  %2650 = vmatpush1.msra.mxu1 %v7403_v62  ;;  %10009 = vst [vmem:[#allocation174_spill] sm:$0xff] %v7412_v44  ;;  %10010 = vst [vmem:[#allocation168_spill] sm:$0xff] %v7416_v13 }
 0x867   :  { %2580 = vmatprep.subr.mxu0 %v7406_v63  ;;  %2651 = vmatprep.subr.mxu1 %v7409_v56  ;;  %v2379_v63 = vpop.permute.xlu0 %2378 }
 0x868   :  { %2581 = vmatpush1.msra.mxu0 %v7412_v44  ;;  %2614 = vmatprep.mubr.f32.mxu0 %v9387_v25  ;;  %v2381_v37 = vmul.f32 %v2379_v63, %v9847_v46  ;;  %v2382_v44 = vmul.f32 %v2379_v63, %v9848_v57  ;;  %v2384_v49 = vmul.f32 %v2379_v63, %v9850_v47 }
 0x869   :  { %2652 = vmatpush1.msra.mxu1 %v7416_v13  ;;  %2685 = vmatprep.mubr.f32.mxu1 %v9387_v25  ;;  %v2383_v16 = vmul.f32 %v2379_v63, %v5694_v58  ;;  %v10046_v63 = vld [vmem:[#allocation40_spill] sm:$0xff] }
 0x86a   :  { %2707 = vmatprep.subr.mxu0 %v6800_v41  ;;  %2778 = vmatprep.subr.mxu1 %v6803_v40  ;;  %v2385_v13 = vadd.f32 %v2381_v37, %v9849_v52  ;;  %v2386_v43 = vadd.f32 %v2382_v44, %v9851_v28  ;;  %v2388_v46 = vadd.f32 %v2384_v49, %v9852_v33 }
 0x86b   :  { %v2387_v37 = vadd.f32 %v2383_v16, %v5697_v50 }
 0x8e7   :  { %v7422_v62 = vpop.f32.mrf.mxu0  ;;  %v7424_v56 = vpop.f32.mrf.mxu1 }
 0x8e9   :  { %v7428_v21 = vpop.f32.mrf.mxu0  ;;  %v7430_v15 = vpop.f32.mrf.mxu1 }
 0x908   :  { %v2455_v41 = vpop.f32.mrf.mxu0  ;;  %v2526_v0 = vpop.f32.mrf.mxu1 }
 0x909   :  { %v2531_v40 = vadd.f32 %v2455_v41, %v2385_v13  ;;  %v2533_v52 = vadd.f32 %v2526_v0, %v2387_v37  ;;  %v10045_v0 = vld [vmem:[#allocation39_spill] sm:$0xff] }
 0x90a   :  { %v2457_v61 = vpop.f32.mrf.mxu0  ;;  %v2528_v20 = vpop.f32.mrf.mxu1 }
 0x90b   :  { %4258 = vtanh.f32 %v2531_v40  ;;  %v2532_v19 = vadd.f32 %v2457_v61, %v2386_v43  ;;  %v2534_v57 = vadd.f32 %v2528_v20, %v2388_v46  ;;  %v10047_v40 = vld [vmem:[#allocation10_spill] sm:$0xff] }
 0x90c   :  { %v2299_v37 = vadd.f32 %v7422_v62, %v10047_v40 }
 0x90d   :  { %4260 = vtanh.f32 %v2532_v19 }
 0x90e   :  { %4262 = vtanh.f32 %v2534_v57 }
 0x90f   :  { %4264 = vtanh.f32 %v2533_v52  ;;  %v10011_v52 = vld [vmem:[#allocation12_spill] sm:$0xff] }
 0x918   :  { %v4259_v47 = vpop.eup %4258 }
 0x919   :  { %v2538_v7 = vmul.f32 0.5, %v4259_v47  ;;  %v10012_v47 = vld [vmem:[#allocation13_spill] sm:$0xff] }
 0x91a   :  { %v4261_v48 = vpop.eup %4260 }
 0x91b   :  { %v2541_v13 = vadd.f32 0.5, %v2538_v7  ;;  %v2539_v44 = vmul.f32 0.5, %v4261_v48  ;;  %v4263_v28 = vpop.eup %4262  ;;  %v10043_v48 = vld [vmem:[#allocation37_spill] sm:$0xff]  ;;  %v10044_v7 = vld [vmem:[#allocation38_spill] sm:$0xff] }
 0x91c   :  { %v4265_v46 = vpop.eup %4264 }
 0x91d   :  { %v2542_v41 = vadd.f32 0.5, %v2539_v44  ;;  %v2546_v43 = vmul.f32 %v4263_v28, %v2541_v13  ;;  %v2540_v57 = vmul.f32 0.5, %v4265_v46  ;;  %v10013_v28 = vld [vmem:[#allocation14_spill] sm:$0xff] }
 0x91f   :  { %v2545_v61 = vmul.f32 %v2542_v41, %v6823_v18  ;;  %v2543_v19 = vadd.f32 0.5, %v2540_v57  ;;  %v10014_v18 = vld [vmem:[#allocation15_spill] sm:$0xff] }
 0x920   :  { %v10048_v41 = vld [vmem:[#allocation11_spill] sm:$0xff] }
 0x921   :  { %v7439_v49 = vadd.f32 %v2546_v43, %v2545_v61  ;;  %v2301_v61 = vadd.f32 %v7428_v21, %v10048_v41  ;;  %v2372_v43 = vadd.f32 %v7430_v15, %v5784_v34 }
 0x923   :  { %4266 = vtanh.f32 %v7439_v49 }
 0x930   :  { %v4267_v16 = vpop.eup %4266 }
 0x931   :  { %v7442_v20 = vmul.f32 %v4267_v16, %v2543_v19 }
 0x933   :  { %2615 = vmatmul.mubr.f32.vlgmr.msra.gmra.mxu0 %v7442_v20  ;;  %2686 = vmatmul.mubr.f32.vlgmr.msra.gmra.mxu1 %v7442_v20 }
 0x934   :  { %2708 = vmatpush1.msra.mxu0 %v6830_v22  ;;  %2779 = vmatpush1.msra.mxu1 %v6833_v9  ;;  %v10015_v22 = vld [vmem:[#allocation16_spill] sm:$0xff]  ;;  %v10016_v9 = vld [vmem:[#allocation17_spill] sm:$0xff] }
 0x935   :  { %2709 = vmatprep.subr.mxu0 %v6836_v23  ;;  %2780 = vmatprep.subr.mxu1 %v6839_v26  ;;  %v10017_v23 = vld [vmem:[#allocation18_spill] sm:$0xff]  ;;  %v10018_v26 = vld [vmem:[#allocation19_spill] sm:$0xff] }
 0x936   :  { %2710 = vmatpush1.msra.mxu0 %v6842_v31  ;;  %2781 = vmatpush1.msra.mxu1 %v6845_v35  ;;  %v10019_v31 = vld [vmem:[#allocation20_spill] sm:$0xff]  ;;  %v10020_v35 = vld [vmem:[#allocation21_spill] sm:$0xff] }
 0x937   :  { %2711 = vmatprep.subr.mxu0 %v6848_v30  ;;  %2782 = vmatprep.subr.mxu1 %v6851_v55  ;;  %v10021_v30 = vld [vmem:[#allocation22_spill] sm:$0xff]  ;;  %v10022_v55 = vld [vmem:[#allocation23_spill] sm:$0xff] }
 0x938   :  { %2712 = vmatpush1.msra.mxu0 %v6854_v32  ;;  %2783 = vmatpush1.msra.mxu1 %v6857_v4  ;;  %v10023_v32 = vld [vmem:[#allocation24_spill] sm:$0xff]  ;;  %v10024_v4 = vld [vmem:[#allocation25_spill] sm:$0xff] }
 0x939   :  { %2713 = vmatprep.subr.mxu0 %v6860_v1  ;;  %2784 = vmatprep.subr.mxu1 %v6863_v39  ;;  %v10025_v1 = vld [vmem:[#allocation26_spill] sm:$0xff]  ;;  %v10026_v39 = vld [vmem:[#allocation27_spill] sm:$0xff] }
 0x93a   :  { %2714 = vmatpush1.msra.mxu0 %v6866_v42  ;;  %2785 = vmatpush1.msra.mxu1 %v6869_v51  ;;  %v10027_v42 = vld [vmem:[#allocation28_spill] sm:$0xff]  ;;  %v10028_v51 = vld [vmem:[#allocation29_spill] sm:$0xff] }
 0x93b   :  { %2715 = vmatprep.subr.mxu0 %v6872_v3  ;;  %2786 = vmatprep.subr.mxu1 %v6875_v60  ;;  %v10029_v3 = vld [vmem:[#allocation30_spill] sm:$0xff]  ;;  %v10030_v60 = vld [vmem:[#allocation31_spill] sm:$0xff] }
 0x93c   :  { %2716 = vmatpush1.msra.mxu0 %v6878_v5  ;;  %2787 = vmatpush1.msra.mxu1 %v6881_v36  ;;  %v10031_v5 = vld [vmem:[#allocation158_spill] sm:$0xff]  ;;  %v10032_v36 = vld [vmem:[#allocation159_spill] sm:$0xff] }
 0x93d   :  { %2717 = vmatprep.subr.mxu0 %v6884_v59  ;;  %2788 = vmatprep.subr.mxu1 %v6887_v12  ;;  %v10033_v59 = vld [vmem:[#allocation161_spill] sm:$0xff] }
 0x93e   :  { %2718 = vmatpush1.msra.mxu0 %v6890_v10  ;;  %2789 = vmatpush1.msra.mxu1 %v6893_v8  ;;  %v10034_v12 = vld [vmem:[#allocation165_spill] sm:$0xff]  ;;  %v10036_v8 = vld [vmem:[#allocation170_spill] sm:$0xff] }
 0x93f   :  { %2719 = vmatprep.subr.mxu0 %v6896_v27  ;;  %2790 = vmatprep.subr.mxu1 %v6899_v29  ;;  %v10035_v10 = vld [vmem:[#allocation169_spill] sm:$0xff]  ;;  %v10037_v27 = vld [vmem:[#allocation166_spill] sm:$0xff]  ;;  %v10038_v29 = vld [vmem:[#allocation32_spill] sm:$0xff] }
 0x940   :  { %2720 = vmatpush1.msra.mxu0 %v6902_v6  ;;  %2791 = vmatpush1.msra.mxu1 %v6905_v11  ;;  %v10039_v6 = vld [vmem:[#allocation33_spill] sm:$0xff]  ;;  %v10040_v11 = vld [vmem:[#allocation34_spill] sm:$0xff] }
 0x941   :  { %2721 = vmatprep.subr.mxu0 %v6908_v38  ;;  %2792 = vmatprep.subr.mxu1 %v6911_v45  ;;  %v10041_v38 = vld [vmem:[#allocation35_spill] sm:$0xff]  ;;  %v10042_v45 = vld [vmem:[#allocation36_spill] sm:$0xff] }
 0x942   :  { %2722 = vmatpush1.msra.mxu0 %v10011_v52  ;;  %2793 = vmatpush1.msra.mxu1 %v10012_v47  ;;  %v2370_v47 = vadd.f32 %v7424_v56, %v5793_v54 }
 0x943   :  { %2723 = vmatprep.subr.mxu0 %v10013_v28  ;;  %2794 = vmatprep.subr.mxu1 %v10014_v18 }
 0x944   :  { %2724 = vmatpush1.msra.mxu0 %v10015_v22  ;;  %2795 = vmatpush1.msra.mxu1 %v10016_v9 }
 0x945   :  { %2725 = vmatprep.subr.mxu0 %v10017_v23  ;;  %2796 = vmatprep.subr.mxu1 %v10018_v26 }
 0x946   :  { %2726 = vmatpush1.msra.mxu0 %v10019_v31  ;;  %2797 = vmatpush1.msra.mxu1 %v10020_v35 }
 0x947   :  { %2727 = vmatprep.subr.mxu0 %v10021_v30  ;;  %2798 = vmatprep.subr.mxu1 %v10022_v55 }
 0x948   :  { %2728 = vmatpush1.msra.mxu0 %v10023_v32  ;;  %2799 = vmatpush1.msra.mxu1 %v10024_v4 }
 0x949   :  { %2729 = vmatprep.subr.mxu0 %v10025_v1  ;;  %2800 = vmatprep.subr.mxu1 %v10026_v39  ;;  %v10050_v1 = vld [vmem:[#allocation42_spill] sm:$0xff]  ;;  %v10051_v39 = vld [vmem:[#allocation43_spill] sm:$0xff] }
 0x94a   :  { %2730 = vmatpush1.msra.mxu0 %v10027_v42  ;;  %2801 = vmatpush1.msra.mxu1 %v10028_v51  ;;  %v10052_v42 = vld [vmem:[#allocation44_spill] sm:$0xff]  ;;  %v10053_v51 = vld [vmem:[#allocation45_spill] sm:$0xff] }
 0x94b   :  { %2731 = vmatprep.subr.mxu0 %v10029_v3  ;;  %2802 = vmatprep.subr.mxu1 %v10030_v60  ;;  %v10054_v3 = vld [vmem:[#allocation46_spill] sm:$0xff]  ;;  %v10055_v60 = vld [vmem:[#allocation47_spill] sm:$0xff] }
 0x94c   :  { %2732 = vmatpush1.msra.mxu0 %v10031_v5  ;;  %2803 = vmatpush1.msra.mxu1 %v10032_v36  ;;  %v10060_v5 = vld [vmem:[#allocation52_spill] sm:$0xff]  ;;  %v10061_v36 = vld [vmem:[#allocation53_spill] sm:$0xff] }
 0x94d   :  { %2733 = vmatprep.subr.mxu0 %v10033_v59  ;;  %2804 = vmatprep.subr.mxu1 %v10034_v12  ;;  %v10062_v59 = vld [vmem:[#allocation54_spill] sm:$0xff]  ;;  %v10063_v12 = vld [vmem:[#allocation55_spill] sm:$0xff] }
 0x94e   :  { %2734 = vmatpush1.msra.mxu0 %v10035_v10  ;;  %2805 = vmatpush1.msra.mxu1 %v10036_v8  ;;  %v10064_v10 = vld [vmem:[#allocation56_spill] sm:$0xff]  ;;  %v10065_v8 = vld [vmem:[#allocation57_spill] sm:$0xff] }
 0x94f   :  { %2735 = vmatprep.subr.mxu0 %v10037_v27  ;;  %2806 = vmatprep.subr.mxu1 %v10038_v29  ;;  %v10066_v27 = vld [vmem:[#allocation58_spill] sm:$0xff]  ;;  %v10067_v29 = vld [vmem:[#allocation59_spill] sm:$0xff] }
 0x950   :  { %2736 = vmatpush1.msra.mxu0 %v10039_v6  ;;  %2807 = vmatpush1.msra.mxu1 %v10040_v11  ;;  %v10068_v6 = vld [vmem:[#allocation60_spill] sm:$0xff]  ;;  %v10069_v11 = vld [vmem:[#allocation61_spill] sm:$0xff] }
 0x951   :  { %2737 = vmatprep.subr.mxu0 %v10041_v38  ;;  %2808 = vmatprep.subr.mxu1 %v10042_v45  ;;  %v10070_v38 = vld [vmem:[#allocation62_spill] sm:$0xff]  ;;  %v10071_v45 = vld [vmem:[#allocation63_spill] sm:$0xff] }
 0x952   :  { %2738 = vmatpush1.msra.mxu0 %v10043_v48  ;;  %2809 = vmatpush1.msra.mxu1 %v10044_v7  ;;  %v10072_v48 = vld [vmem:[#allocation64_spill] sm:$0xff]  ;;  %v10073_v7 = vld [vmem:[#allocation65_spill] sm:$0xff] }
 0x953   :  { %2771 = vmatprep.mubr.f32.mxu0 %v9387_v25  ;;  %2842 = vmatprep.mubr.f32.mxu1 %v9387_v25 }
 0x954   :  { %2864 = vmatprep.subr.mxu0 %v10045_v0  ;;  %2935 = vmatprep.subr.mxu1 %v10046_v63  ;;  %v10074_v0 = vld [vmem:[#allocation66_spill] sm:$0xff]  ;;  %v10075_v63 = vld [vmem:[#allocation67_spill] sm:$0xff] }
 0x9f3   :  { %v2616_v13 = vpop.f32.mrf.mxu0  ;;  %v2687_v44 = vpop.f32.mrf.mxu1 }
 0x9f4   :  { %v2617_v46 = vadd.f32 %v2616_v13, %v2299_v37  ;;  %v2688_v62 = vadd.f32 %v2687_v44, %v2370_v47  ;;  %v10076_v37 = vld [vmem:[#allocation68_spill] sm:$0xff]  ;;  %v10077_v13 = vld [vmem:[#allocation69_spill] sm:$0xff]  ;;  %v10078_v44 = vld [vmem:[#allocation70_spill] sm:$0xff] }
 0x9f5   :  { %v2618_v57 = vpop.f32.mrf.mxu0  ;;  %v2689_v19 = vpop.f32.mrf.mxu1  ;;  %v10086_v47 = vld [vmem:[#allocation78_spill] sm:$0xff] }
 0x9f6   :  { %4268 = vtanh.f32 %v2617_v46  ;;  %v2619_v16 = vadd.f32 %v2618_v57, %v2301_v61  ;;  %v2690_v52 = vadd.f32 %v2689_v19, %v2372_v43  ;;  %v10079_v61 = vld [vmem:[#allocation71_spill] sm:$0xff]  ;;  %v10080_v43 = vld [vmem:[#allocation72_spill] sm:$0xff]  ;;  %v10081_v46 = vld [vmem:[#allocation73_spill] sm:$0xff] }
 0x9f7   :  { %v10082_v57 = vld [vmem:[#allocation74_spill] sm:$0xff]  ;;  %v10083_v19 = vld [vmem:[#allocation75_spill] sm:$0xff] }
 0x9f8   :  { %4270 = vtanh.f32 %v2619_v16  ;;  %v10084_v16 = vld [vmem:[#allocation76_spill] sm:$0xff] }
 0x9f9   :  { %4272 = vtanh.f32 %v2690_v52  ;;  %v10085_v52 = vld [vmem:[#allocation77_spill] sm:$0xff] }
 0x9fa   :  { %4274 = vtanh.f32 %v2688_v62  ;;  %v10087_v62 = vld [vmem:[#allocation79_spill] sm:$0xff] }
 0xa03   :  { %v4269_v28 = vpop.eup %4268 }
 0xa04   :  { %v2695_v18 = vmul.f32 0.5, %v4269_v28  ;;  %v10088_v28 = vld [vmem:[#allocation80_spill] sm:$0xff] }
 0xa05   :  { %v4271_v22 = vpop.eup %4270 }
 0xa06   :  { %v2698_v9 = vadd.f32 0.5, %v2695_v18  ;;  %v2696_v21 = vmul.f32 0.5, %v4271_v22  ;;  %v4273_v23 = vpop.eup %4272  ;;  %v10089_v18 = vld [vmem:[#allocation81_spill] sm:$0xff]  ;;  %v10090_v22 = vld [vmem:[#allocation82_spill] sm:$0xff] }
 0xa07   :  { %v4275_v30 = vpop.eup %4274 }
 0xa08   :  { %v2699_v15 = vadd.f32 0.5, %v2696_v21  ;;  %v2703_v26 = vmul.f32 %v4273_v23, %v2698_v9  ;;  %v2697_v55 = vmul.f32 0.5, %v4275_v30  ;;  %v10091_v9 = vld [vmem:[#allocation83_spill] sm:$0xff]  ;;  %v10092_v21 = vld [vmem:[#allocation84_spill] sm:$0xff]  ;;  %v10093_v23 = vld [vmem:[#allocation85_spill] sm:$0xff] }
 0xa09   :  { %v10097_v30 = vld [vmem:[#allocation89_spill] sm:$0xff] }
 0xa0a   :  { %v2702_v31 = vmul.f32 %v2699_v15, %v7033_v14  ;;  %v2700_v32 = vadd.f32 0.5, %v2697_v55  ;;  %v10049_v14 = vld [vmem:[#allocation41_spill] sm:$0xff]  ;;  %v10094_v15 = vld [vmem:[#allocation86_spill] sm:$0xff] }
 0xa0b   :  { %v10098_v55 = vld [vmem:[#allocation90_spill] sm:$0xff] }
 0xa0c   :  { %v7521_v35 = vadd.f32 %v2703_v26, %v2702_v31  ;;  %v10095_v26 = vld [vmem:[#allocation87_spill] sm:$0xff]  ;;  %v10096_v31 = vld [vmem:[#allocation88_spill] sm:$0xff] }
 0xa0e   :  { %4276 = vtanh.f32 %v7521_v35 }
 0xa1b   :  { %v4277_v56 = vpop.eup %4276 }
 0xa1c   :  { %v2706_v4 = vmul.f32 %v4277_v56, %v2700_v32  ;;  %v10099_v32 = vld [vmem:[#allocation91_spill] sm:$0xff]  ;;  %v10100_v56 = vld [vmem:[#allocation92_spill] sm:$0xff] }
 0xa1e   :  { %2772 = vmatmul.mubr.f32.vlgmr.msra.gmra.mxu0 %v2706_v4  ;;  %2843 = vmatmul.mubr.f32.vlgmr.msra.gmra.mxu1 %v2706_v4  ;;  %v10101_v4 = vld [vmem:[#allocation93_spill] sm:$0xff] }
 0xa1f   :  { %2865 = vmatpush1.msra.mxu0 %v7036_v24  ;;  %2936 = vmatpush1.msra.mxu1 %v7039_v53  ;;  %v10056_v24 = vld [vmem:[#allocation48_spill] sm:$0xff]  ;;  %v10057_v53 = vld [vmem:[#allocation49_spill] sm:$0xff] }
 0xa20   :  { %2866 = vmatprep.subr.mxu0 %v7042_v2  ;;  %2937 = vmatprep.subr.mxu1 %v7045_v17  ;;  %v10058_v2 = vld [vmem:[#allocation50_spill] sm:$0xff]  ;;  %v10059_v17 = vld [vmem:[#allocation51_spill] sm:$0xff] }
 0xa21   :  { %2867 = vmatpush1.msra.mxu0 %v10049_v14  ;;  %2938 = vmatpush1.msra.mxu1 %v10050_v1  ;;  %v10102_v14 = vld [vmem:[#allocation94_spill] sm:$0xff]  ;;  %v10103_v1 = vld [vmem:[#allocation95_spill] sm:$0xff] }
 0xa22   :  { %2868 = vmatprep.subr.mxu0 %v10051_v39  ;;  %2939 = vmatprep.subr.mxu1 %v10052_v42  ;;  %v10104_v39 = vld [vmem:[#allocation96_spill] sm:$0xff]  ;;  %v10105_v42 = vld [vmem:[#allocation97_spill] sm:$0xff] }
 0xa23   :  { %2869 = vmatpush1.msra.mxu0 %v10053_v51  ;;  %2940 = vmatpush1.msra.mxu1 %v10054_v3  ;;  %v10106_v51 = vld [vmem:[#allocation98_spill] sm:$0xff]  ;;  %v10107_v3 = vld [vmem:[#allocation99_spill] sm:$0xff] }
 0xa24   :  { %2870 = vmatprep.subr.mxu0 %v10055_v60  ;;  %2941 = vmatprep.subr.mxu1 %v10056_v24  ;;  %v10108_v60 = vld [vmem:[#allocation100_spill] sm:$0xff]  ;;  %v10109_v24 = vld [vmem:[#allocation101_spill] sm:$0xff] }
 0xa25   :  { %2871 = vmatpush1.msra.mxu0 %v10057_v53  ;;  %2942 = vmatpush1.msra.mxu1 %v10058_v2  ;;  %v10110_v53 = vld [vmem:[#allocation102_spill] sm:$0xff]  ;;  %v10111_v2 = vld [vmem:[#allocation103_spill] sm:$0xff] }
 0xa26   :  { %2872 = vmatprep.subr.mxu0 %v10059_v17  ;;  %2943 = vmatprep.subr.mxu1 %v10060_v5  ;;  %v10112_v17 = vld [vmem:[#allocation104_spill] sm:$0xff]  ;;  %v10113_v5 = vld [vmem:[#allocation105_spill] sm:$0xff] }
 0xa27   :  { %2873 = vmatpush1.msra.mxu0 %v10061_v36  ;;  %2944 = vmatpush1.msra.mxu1 %v10062_v59  ;;  %v10114_v36 = vld [vmem:[#allocation106_spill] sm:$0xff]  ;;  %v10115_v59 = vld [vmem:[#allocation107_spill] sm:$0xff] }
 0xa28   :  { %2874 = vmatprep.subr.mxu0 %v10063_v12  ;;  %2945 = vmatprep.subr.mxu1 %v10064_v10  ;;  %v10116_v12 = vld [vmem:[#allocation108_spill] sm:$0xff]  ;;  %v10118_v10 = vld [vmem:[#allocation110_spill] sm:$0xff] }
 0xa29   :  { %2875 = vmatpush1.msra.mxu0 %v10065_v8  ;;  %2946 = vmatpush1.msra.mxu1 %v10066_v27  ;;  %v10119_v8 = vld [vmem:[#allocation111_spill] sm:$0xff]  ;;  %v10120_v27 = vld [vmem:[#allocation112_spill] sm:$0xff] }
 0xa2a   :  { %2876 = vmatprep.subr.mxu0 %v10067_v29  ;;  %2947 = vmatprep.subr.mxu1 %v10068_v6  ;;  %v10121_v29 = vld [vmem:[#allocation113_spill] sm:$0xff]  ;;  %v10122_v6 = vld [vmem:[#allocation114_spill] sm:$0xff] }
 0xa2b   :  { %2877 = vmatpush1.msra.mxu0 %v10069_v11  ;;  %2948 = vmatpush1.msra.mxu1 %v10070_v38  ;;  %v10123_v11 = vld [vmem:[#allocation115_spill] sm:$0xff]  ;;  %v10124_v38 = vld [vmem:[#allocation116_spill] sm:$0xff] }
 0xa2c   :  { %2878 = vmatprep.subr.mxu0 %v10071_v45  ;;  %2949 = vmatprep.subr.mxu1 %v10072_v48  ;;  %v10125_v45 = vld [vmem:[#allocation117_spill] sm:$0xff]  ;;  %v10126_v48 = vld [vmem:[#allocation118_spill] sm:$0xff] }
 0xa2d   :  { %2879 = vmatpush1.msra.mxu0 %v10073_v7  ;;  %2950 = vmatpush1.msra.mxu1 %v10074_v0  ;;  %v10127_v7 = vld [vmem:[#allocation119_spill] sm:$0xff]  ;;  %v10128_v0 = vld [vmem:[#allocation120_spill] sm:$0xff] }
 0xa2e   :  { %2880 = vmatprep.subr.mxu0 %v10075_v63  ;;  %2951 = vmatprep.subr.mxu1 %v10076_v37  ;;  %v10129_v63 = vld [vmem:[#allocation121_spill] sm:$0xff]  ;;  %v10130_v37 = vld [vmem:[#allocation122_spill] sm:$0xff] }
 0xa2f   :  { %2881 = vmatpush1.msra.mxu0 %v10077_v13  ;;  %2952 = vmatpush1.msra.mxu1 %v10078_v44  ;;  %v10131_v13 = vld [vmem:[#allocation123_spill] sm:$0xff]  ;;  %v10132_v44 = vld [vmem:[#allocation124_spill] sm:$0xff] }
 0xa30   :  { %2882 = vmatprep.subr.mxu0 %v10079_v61  ;;  %2953 = vmatprep.subr.mxu1 %v10080_v43  ;;  %v10133_v61 = vld [vmem:[#allocation125_spill] sm:$0xff]  ;;  %v10134_v43 = vld [vmem:[#allocation126_spill] sm:$0xff] }
 0xa31   :  { %2883 = vmatpush1.msra.mxu0 %v10081_v46  ;;  %2954 = vmatpush1.msra.mxu1 %v10082_v57  ;;  %v10135_v46 = vld [vmem:[#allocation127_spill] sm:$0xff]  ;;  %v10136_v57 = vld [vmem:[#allocation128_spill] sm:$0xff] }
 0xa32   :  { %2884 = vmatprep.subr.mxu0 %v10083_v19  ;;  %2955 = vmatprep.subr.mxu1 %v10084_v16  ;;  %v10137_v19 = vld [vmem:[#allocation129_spill] sm:$0xff]  ;;  %v10138_v16 = vld [vmem:[#allocation130_spill] sm:$0xff] }
 0xa33   :  { %2885 = vmatpush1.msra.mxu0 %v10085_v52  ;;  %2956 = vmatpush1.msra.mxu1 %v10086_v47  ;;  %v10139_v52 = vld [vmem:[#allocation131_spill] sm:$0xff]  ;;  %v10140_v47 = vld [vmem:[#allocation132_spill] sm:$0xff] }
 0xa34   :  { %2886 = vmatprep.subr.mxu0 %v10087_v62  ;;  %2957 = vmatprep.subr.mxu1 %v10088_v28  ;;  %v10141_v62 = vld [vmem:[#allocation133_spill] sm:$0xff]  ;;  %v10142_v28 = vld [vmem:[#allocation134_spill] sm:$0xff] }
 0xa35   :  { %2887 = vmatpush1.msra.mxu0 %v10089_v18  ;;  %2958 = vmatpush1.msra.mxu1 %v10090_v22  ;;  %v10143_v18 = vld [vmem:[#allocation135_spill] sm:$0xff]  ;;  %v10144_v22 = vld [vmem:[#allocation136_spill] sm:$0xff] }
 0xa36   :  { %2888 = vmatprep.subr.mxu0 %v10091_v9  ;;  %2959 = vmatprep.subr.mxu1 %v10092_v21  ;;  %v10145_v9 = vld [vmem:[#allocation137_spill] sm:$0xff]  ;;  %v10146_v21 = vld [vmem:[#allocation138_spill] sm:$0xff] }
 0xa37   :  { %2889 = vmatpush1.msra.mxu0 %v10093_v23  ;;  %2960 = vmatpush1.msra.mxu1 %v10094_v15  ;;  %v10147_v23 = vld [vmem:[#allocation139_spill] sm:$0xff]  ;;  %v10148_v15 = vld [vmem:[#allocation140_spill] sm:$0xff] }
 0xa38   :  { %2890 = vmatprep.subr.mxu0 %v10095_v26  ;;  %2961 = vmatprep.subr.mxu1 %v10096_v31  ;;  %v10149_v26 = vld [vmem:[#allocation141_spill] sm:$0xff]  ;;  %v10150_v31 = vld [vmem:[#allocation142_spill] sm:$0xff] }
 0xa39   :  { %2891 = vmatpush1.msra.mxu0 %v10097_v30  ;;  %2962 = vmatpush1.msra.mxu1 %v10098_v55  ;;  %v10151_v30 = vld [vmem:[#allocation143_spill] sm:$0xff]  ;;  %v10152_v55 = vld [vmem:[#allocation144_spill] sm:$0xff] }
 0xa3a   :  { %2892 = vmatprep.subr.mxu0 %v10099_v32  ;;  %2963 = vmatprep.subr.mxu1 %v10100_v56  ;;  %v10153_v32 = vld [vmem:[#allocation145_spill] sm:$0xff]  ;;  %v10154_v56 = vld [vmem:[#allocation146_spill] sm:$0xff] }
 0xa3b   :  { %2893 = vmatpush1.msra.mxu0 %v10101_v4  ;;  %2964 = vmatpush1.msra.mxu1 %v10102_v14  ;;  %v10155_v4 = vld [vmem:[#allocation147_spill] sm:$0xff]  ;;  %v10156_v14 = vld [vmem:[#allocation148_spill] sm:$0xff] }
 0xa3c   :  { %2894 = vmatprep.subr.mxu0 %v10103_v1  ;;  %2965 = vmatprep.subr.mxu1 %v10104_v39  ;;  %v10157_v1 = vld [vmem:[#allocation149_spill] sm:$0xff]  ;;  %v10158_v39 = vld [vmem:[#allocation150_spill] sm:$0xff] }
 0xa3d   :  { %2895 = vmatpush1.msra.mxu0 %v10105_v42  ;;  %2928 = vmatprep.mubr.f32.mxu0 %v9387_v25  ;;  %v10159_v42 = vld [vmem:[#allocation151_spill] sm:$0xff] }
 0xa3e   :  { %2966 = vmatpush1.msra.mxu1 %v10106_v51  ;;  %2999 = vmatprep.mubr.f32.mxu1 %v9387_v25  ;;  %v10160_v51 = vld [vmem:[#allocation152_spill] sm:$0xff] }
 0xa3f   :  { %2929 = vmatmul.mubr.f32.vlgmr.msra.gmra.mxu0 %v7442_v20  ;;  %3000 = vmatmul.mubr.f32.vlgmr.msra.gmra.mxu1 %v7442_v20  ;;  %v10117_v20 = vld [vmem:[#allocation109_spill] sm:$0xff] }
 0xa40   :  { %3025 = vmatprep.subr.mxu0 %v10107_v3  ;;  %3096 = vmatprep.subr.mxu1 %v10108_v60  ;;  %v10161_v3 = vld [vmem:[#allocation153_spill] sm:$0xff]  ;;  %v10162_v60 = vld [vmem:[#allocation154_spill] sm:$0xff] }
 0xa41   :  { %3026 = vmatpush1.msra.mxu0 %v10109_v24  ;;  %3097 = vmatpush1.msra.mxu1 %v10110_v53  ;;  %v10163_v24 = vld [vmem:[#allocation155_spill] sm:$0xff]  ;;  %v10164_v53 = vld [vmem:[#allocation156_spill] sm:$0xff] }
 0xa42   :  { %3027 = vmatprep.subr.mxu0 %v10111_v2  ;;  %3098 = vmatprep.subr.mxu1 %v10112_v17  ;;  %v10165_v2 = vld [vmem:[#allocation157_spill] sm:$0xff]  ;;  %v10166_v17 = vld [vmem:[#allocation171_spill] sm:$0xff] }
 0xa43   :  { %3028 = vmatpush1.msra.mxu0 %v10113_v5  ;;  %3099 = vmatpush1.msra.mxu1 %v10114_v36  ;;  %v10167_v5 = vld [vmem:[#allocation172_spill] sm:$0xff]  ;;  %v10168_v36 = vld [vmem:[#allocation173_spill] sm:$0xff] }
 0xa44   :  { %3029 = vmatprep.subr.mxu0 %v10115_v59  ;;  %3100 = vmatprep.subr.mxu1 %v10116_v12  ;;  %v10169_v59 = vld [vmem:[#allocation174_spill] sm:$0xff]  ;;  %v10170_v12 = vld [vmem:[#allocation168_spill] sm:$0xff] }
 0xa45   :  { %3030 = vmatpush1.msra.mxu0 %v10117_v20  ;;  %3101 = vmatpush1.msra.mxu1 %v10118_v10  ;;  %v7656_v20 = vld [vmem:[#allocation7 + $0x1e8] sm:$0xff]  ;;  %v7659_v10 = vld [vmem:[#allocation7 + $0x1f8] sm:$0xff] }
 0xa46   :  { %3031 = vmatprep.subr.mxu0 %v10119_v8  ;;  %3102 = vmatprep.subr.mxu1 %v10120_v27  ;;  %v2854_v8 = vpop.permute.xlu1 %2853 }
 0xa47   :  { %3032 = vmatpush1.msra.mxu0 %v10121_v29  ;;  %3103 = vmatpush1.msra.mxu1 %v10122_v6  ;;  %v10171_v6 = vld [vmem:[#allocation160_spill] sm:$0xff] }
 0xa48   :  { %3033 = vmatprep.subr.mxu0 %v10123_v11  ;;  %3104 = vmatprep.subr.mxu1 %v10124_v38  ;;  %v2856_v11 = vmul.f32 %v2854_v8, %v10171_v6  ;;  %v10172_v38 = vld [vmem:[#allocation162_spill] sm:$0xff] }
 0xa49   :  { %3034 = vmatpush1.msra.mxu0 %v10125_v45  ;;  %3105 = vmatpush1.msra.mxu1 %v10126_v48  ;;  %v2857_v45 = vmul.f32 %v2854_v8, %v10172_v38 }
 0xa4a   :  { %3035 = vmatprep.subr.mxu0 %v10127_v7  ;;  %3106 = vmatprep.subr.mxu1 %v10128_v0  ;;  %v10173_v0 = vld [vmem:[#allocation163_spill] sm:$0xff] }
 0xa4b   :  { %3036 = vmatpush1.msra.mxu0 %v10129_v63  ;;  %3107 = vmatpush1.msra.mxu1 %v10130_v37  ;;  %v2860_v63 = vadd.f32 %v2856_v11, %v10173_v0  ;;  %v10174_v37 = vld [vmem:[#allocation164_spill] sm:$0xff] }
 0xa4c   :  { %3037 = vmatprep.subr.mxu0 %v10131_v13  ;;  %3108 = vmatprep.subr.mxu1 %v10132_v44  ;;  %v2859_v13 = vmul.f32 %v2854_v8, %v10174_v37  ;;  %v7725_v11 = vld [vmem:[#allocation7 + $0x190] sm:$0xff] }
 0xa4d   :  { %3038 = vmatpush1.msra.mxu0 %v10133_v61  ;;  %3109 = vmatpush1.msra.mxu1 %v10134_v43 }
 0xa4e   :  { %3039 = vmatprep.subr.mxu0 %v10135_v46  ;;  %3110 = vmatprep.subr.mxu1 %v10136_v57  ;;  %v10175_v46 = vld [vmem:[#allocation167_spill] sm:$0xff] }
 0xa4f   :  { %3040 = vmatpush1.msra.mxu0 %v10137_v19  ;;  %3111 = vmatpush1.msra.mxu1 %v10138_v16  ;;  %v2861_v57 = vadd.f32 %v2857_v45, %v10175_v46  ;;  %v7728_v45 = vld [vmem:[#allocation7 + $0x168] sm:$0xff] }
 0xa50   :  { %3041 = vmatprep.subr.mxu0 %v10139_v52  ;;  %3112 = vmatprep.subr.mxu1 %v10140_v47  ;;  %v2863_v47 = vadd.f32 %v2859_v13, %v9852_v33  ;;  %v7734_v13 = vld [vmem:[#allocation7 + $0x160] sm:$0xff] }
 0xa51   :  { %3042 = vmatpush1.msra.mxu0 %v10141_v62  ;;  %3113 = vmatpush1.msra.mxu1 %v10142_v28  ;;  %v2858_v28 = vmul.f32 %v2854_v8, %v5694_v58  ;;  %v7722_v8 = vld [vmem:[#allocation7 + $0x180] sm:$0xff] }
 0xa52   :  { %3043 = vmatprep.subr.mxu0 %v10143_v18  ;;  %3114 = vmatprep.subr.mxu1 %v10144_v22 }
 0xa53   :  { %3044 = vmatpush1.msra.mxu0 %v10145_v9  ;;  %3115 = vmatpush1.msra.mxu1 %v10146_v21  ;;  %v2862_v18 = vadd.f32 %v2858_v28, %v5697_v50  ;;  %v7764_v28 = vld [vmem:[#allocation7 + $0x108] sm:$0xff] }
 0xa54   :  { %3045 = vmatprep.subr.mxu0 %v10147_v23  ;;  %3116 = vmatprep.subr.mxu1 %v10148_v15 }
 0xa55   :  { %3046 = vmatpush1.msra.mxu0 %v10149_v26  ;;  %3117 = vmatpush1.msra.mxu1 %v10150_v31 }
 0xa56   :  { %3047 = vmatprep.subr.mxu0 %v10151_v30  ;;  %3118 = vmatprep.subr.mxu1 %v10152_v55 }
 0xa57   :  { %3048 = vmatpush1.msra.mxu0 %v10153_v32  ;;  %3119 = vmatpush1.msra.mxu1 %v10154_v56 }
 0xa58   :  { %3049 = vmatprep.subr.mxu0 %v10155_v4  ;;  %3120 = vmatprep.subr.mxu1 %v10156_v14 }
 0xa59   :  { %3050 = vmatpush1.msra.mxu0 %v10157_v1  ;;  %3121 = vmatpush1.msra.mxu1 %v10158_v39 }
 0xa5a   :  { %3051 = vmatprep.subr.mxu0 %v10159_v42  ;;  %3122 = vmatprep.subr.mxu1 %v10160_v51  ;;  %v7686_v51 = vld [vmem:[#allocation7 + $0x1e0] sm:$0xff] }
 0xa5b   :  { %3052 = vmatpush1.msra.mxu0 %v10161_v3  ;;  %3123 = vmatpush1.msra.mxu1 %v10162_v60  ;;  %v7692_v3 = vld [vmem:[#allocation7 + $0x1c8] sm:$0xff]  ;;  %v7695_v60 = vld [vmem:[#allocation7 + $0x1d8] sm:$0xff] }
 0xa5c   :  { %3053 = vmatprep.subr.mxu0 %v10163_v24  ;;  %3124 = vmatprep.subr.mxu1 %v10164_v53  ;;  %v7698_v24 = vld [vmem:[#allocation7 + $0x1c0] sm:$0xff]  ;;  %v7701_v53 = vld [vmem:[#allocation7 + $0x1d0] sm:$0xff] }
 0xa5d   :  { %3054 = vmatpush1.msra.mxu0 %v10165_v2  ;;  %3125 = vmatpush1.msra.mxu1 %v10166_v17  ;;  %v7704_v2 = vld [vmem:[#allocation7 + $0x1a8] sm:$0xff]  ;;  %v7707_v17 = vld [vmem:[#allocation7 + $0x1b8] sm:$0xff] }
 0xa5e   :  { %3055 = vmatprep.subr.mxu0 %v10167_v5  ;;  %3126 = vmatprep.subr.mxu1 %v10168_v36  ;;  %v7710_v5 = vld [vmem:[#allocation7 + $0x1a0] sm:$0xff]  ;;  %v7713_v36 = vld [vmem:[#allocation7 + $0x1b0] sm:$0xff] }
 0xa5f   :  { %3056 = vmatpush1.msra.mxu0 %v10169_v59  ;;  %3089 = vmatprep.mubr.f32.mxu0 %v9387_v25  ;;  %v7716_v59 = vld [vmem:[#allocation7 + $0x188] sm:$0xff] }
 0xa60   :  { %3127 = vmatpush1.msra.mxu1 %v10170_v12  ;;  %3160 = vmatprep.mubr.f32.mxu1 %v9387_v25  ;;  %v7719_v12 = vld [vmem:[#allocation7 + $0x198] sm:$0xff] }
 0xa61   :  { %3182 = vmatprep.subr.mxu0 %v7656_v20  ;;  %3253 = vmatprep.subr.mxu1 %v7659_v10 }
 0xade   :  { %v7662_v27 = vpop.f32.mrf.mxu0  ;;  %v7664_v29 = vpop.f32.mrf.mxu1 }
 0xae0   :  { %v7668_v48 = vpop.f32.mrf.mxu0  ;;  %v7670_v7 = vpop.f32.mrf.mxu1 }
 0xaff   :  { %v2930_v44 = vpop.f32.mrf.mxu0  ;;  %v3001_v61 = vpop.f32.mrf.mxu1 }
 0xb00   :  { %v3006_v43 = vadd.f32 %v2930_v44, %v2860_v63  ;;  %v3008_v22 = vadd.f32 %v3001_v61, %v2862_v18  ;;  %v7731_v63 = vld [vmem:[#allocation7 + $0x178] sm:$0xff]  ;;  %v7737_v44 = vld [vmem:[#allocation7 + $0x170] sm:$0xff]  ;;  %v7740_v61 = vld [vmem:[#allocation7 + $0x148] sm:$0xff] }
 0xb01   :  { %v2932_v19 = vpop.f32.mrf.mxu0  ;;  %v3003_v16 = vpop.f32.mrf.mxu1  ;;  %v7767_v18 = vld [vmem:[#allocation7 + $0x118] sm:$0xff] }
 0xb02   :  { %4278 = vtanh.f32 %v3006_v43  ;;  %v3007_v52 = vadd.f32 %v2932_v19, %v2861_v57  ;;  %v3009_v62 = vadd.f32 %v3003_v16, %v2863_v47  ;;  %v7743_v43 = vld [vmem:[#allocation7 + $0x158] sm:$0xff]  ;;  %v7746_v57 = vld [vmem:[#allocation7 + $0x140] sm:$0xff]  ;;  %v7749_v19 = vld [vmem:[#allocation7 + $0x150] sm:$0xff] }
 0xb03   :  { %v7752_v16 = vld [vmem:[#allocation7 + $0x128] sm:$0xff]  ;;  %v7758_v47 = vld [vmem:[#allocation7 + $0x120] sm:$0xff] }
 0xb04   :  { %4280 = vtanh.f32 %v3007_v52  ;;  %v7755_v52 = vld [vmem:[#allocation7 + $0x138] sm:$0xff] }
 0xb05   :  { %4282 = vtanh.f32 %v3009_v62  ;;  %v7761_v62 = vld [vmem:[#allocation7 + $0x130] sm:$0xff] }
 0xb06   :  { %4284 = vtanh.f32 %v3008_v22  ;;  %v7770_v22 = vld [vmem:[#allocation7 + $0x100] sm:$0xff] }
 0xb07   :  { %10176 = vst [vmem:[#allocation12_spill] sm:$0xff] %v7770_v22 }
 0xb0f   :  { %v4279_v9 = vpop.eup %4278 }
 0xb10   :  { %v3013_v21 = vmul.f32 0.5, %v4279_v9  ;;  %v7773_v9 = vld [vmem:[#allocation7 + $0x110] sm:$0xff] }
 0xb11   :  { %v4281_v23 = vpop.eup %4280  ;;  %10177 = vst [vmem:[#allocation13_spill] sm:$0xff] %v7773_v9 }
 0xb12   :  { %v3016_v15 = vadd.f32 0.5, %v3013_v21  ;;  %v3014_v26 = vmul.f32 0.5, %v4281_v23  ;;  %v4283_v30 = vpop.eup %4282  ;;  %v7776_v21 = vld [vmem:[#allocation7 + $0xe8] sm:$0xff]  ;;  %v7779_v23 = vld [vmem:[#allocation7 + $0xf8] sm:$0xff] }
 0xb13   :  { %v4285_v4 = vpop.eup %4284  ;;  %10178 = vst [vmem:[#allocation14_spill] sm:$0xff] %v7776_v21  ;;  %10179 = vst [vmem:[#allocation15_spill] sm:$0xff] %v7779_v23 }
 0xb14   :  { %v3017_v31 = vadd.f32 0.5, %v3014_v26  ;;  %v3021_v32 = vmul.f32 %v4283_v30, %v3016_v15  ;;  %v3015_v14 = vmul.f32 0.5, %v4285_v4  ;;  %v7782_v15 = vld [vmem:[#allocation7 + $0xe0] sm:$0xff]  ;;  %v7785_v26 = vld [vmem:[#allocation7 + $0xf0] sm:$0xff]  ;;  %v7791_v30 = vld [vmem:[#allocation7 + $0xd8] sm:$0xff] }
 0xb15   :  { %10180 = vst [vmem:[#allocation16_spill] sm:$0xff] %v7782_v15  ;;  %10181 = vst [vmem:[#allocation17_spill] sm:$0xff] %v7785_v26  ;;  %v7800_v4 = vld [vmem:[#allocation7 + $0xa8] sm:$0xff] }
 0xb16   :  { %v3020_v55 = vmul.f32 %v3017_v31, %v7439_v49  ;;  %v3018_v1 = vadd.f32 0.5, %v3015_v14  ;;  %v7689_v49 = vld [vmem:[#allocation7 + $0x1f0] sm:$0xff]  ;;  %v7788_v31 = vld [vmem:[#allocation7 + $0xc8] sm:$0xff]  ;;  %10183 = vst [vmem:[#allocation19_spill] sm:$0xff] %v7791_v30  ;;  %10186 = vst [vmem:[#allocation22_spill] sm:$0xff] %v7800_v4 }
 0xb17   :  { %10182 = vst [vmem:[#allocation18_spill] sm:$0xff] %v7788_v31  ;;  %v7803_v14 = vld [vmem:[#allocation7 + $0xb8] sm:$0xff] }
 0xb18   :  { %v7679_v56 = vadd.f32 %v3021_v32, %v3020_v55  ;;  %v7794_v55 = vld [vmem:[#allocation7 + $0xc0] sm:$0xff]  ;;  %v7797_v32 = vld [vmem:[#allocation7 + $0xd0] sm:$0xff]  ;;  %10187 = vst [vmem:[#allocation23_spill] sm:$0xff] %v7803_v14 }
 0xb19   :  { %10184 = vst [vmem:[#allocation20_spill] sm:$0xff] %v7794_v55  ;;  %10185 = vst [vmem:[#allocation21_spill] sm:$0xff] %v7797_v32 }
 0xb1a   :  { %4286 = vtanh.f32 %v7679_v56 }
 0xb27   :  { %v4287_v39 = vpop.eup %4286 }
 0xb28   :  { %v7682_v42 = vmul.f32 %v4287_v39, %v3018_v1  ;;  %v7806_v1 = vld [vmem:[#allocation7 + $0xa0] sm:$0xff]  ;;  %v7809_v39 = vld [vmem:[#allocation7 + $0xb0] sm:$0xff] }
 0xb29   :  { %10188 = vst [vmem:[#allocation24_spill] sm:$0xff] %v7806_v1  ;;  %10189 = vst [vmem:[#allocation25_spill] sm:$0xff] %v7809_v39 }
 0xb2a   :  { %3090 = vmatmul.mubr.f32.vlgmr.msra.gmra.mxu0 %v7682_v42  ;;  %3161 = vmatmul.mubr.f32.vlgmr.msra.gmra.mxu1 %v7682_v42 }
 0xb2b   :  { %3183 = vmatpush1.msra.mxu0 %v7686_v51  ;;  %3254 = vmatpush1.msra.mxu1 %v7689_v49 }
 0xb2c   :  { %3184 = vmatprep.subr.mxu0 %v7692_v3  ;;  %3255 = vmatprep.subr.mxu1 %v7695_v60 }
 0xb2d   :  { %3185 = vmatpush1.msra.mxu0 %v7698_v24  ;;  %3256 = vmatpush1.msra.mxu1 %v7701_v53 }
 0xb2e   :  { %3186 = vmatprep.subr.mxu0 %v7704_v2  ;;  %3257 = vmatprep.subr.mxu1 %v7707_v17 }
 0xb2f   :  { %3187 = vmatpush1.msra.mxu0 %v7710_v5  ;;  %3258 = vmatpush1.msra.mxu1 %v7713_v36 }
 0xb30   :  { %3188 = vmatprep.subr.mxu0 %v7716_v59  ;;  %3259 = vmatprep.subr.mxu1 %v7719_v12 }
 0xb31   :  { %3189 = vmatpush1.msra.mxu0 %v7722_v8  ;;  %3260 = vmatpush1.msra.mxu1 %v7725_v11 }
 0xb32   :  { %3190 = vmatprep.subr.mxu0 %v7728_v45  ;;  %3261 = vmatprep.subr.mxu1 %v7731_v63 }
 0xb33   :  { %3191 = vmatpush1.msra.mxu0 %v7734_v13  ;;  %3262 = vmatpush1.msra.mxu1 %v7737_v44 }
 0xb34   :  { %3192 = vmatprep.subr.mxu0 %v7740_v61  ;;  %3263 = vmatprep.subr.mxu1 %v7743_v43 }
 0xb35   :  { %3193 = vmatpush1.msra.mxu0 %v7746_v57  ;;  %3264 = vmatpush1.msra.mxu1 %v7749_v19 }
 0xb36   :  { %3194 = vmatprep.subr.mxu0 %v7752_v16  ;;  %3265 = vmatprep.subr.mxu1 %v7755_v52 }
 0xb37   :  { %3195 = vmatpush1.msra.mxu0 %v7758_v47  ;;  %3266 = vmatpush1.msra.mxu1 %v7761_v62 }
 0xb38   :  { %3196 = vmatprep.subr.mxu0 %v7764_v28  ;;  %3267 = vmatprep.subr.mxu1 %v7767_v18 }
 0xb39   :  { %3197 = vmatpush1.msra.mxu0 %v7770_v22  ;;  %3268 = vmatpush1.msra.mxu1 %v7773_v9 }
 0xb3a   :  { %3198 = vmatprep.subr.mxu0 %v7776_v21  ;;  %3269 = vmatprep.subr.mxu1 %v7779_v23 }
 0xb3b   :  { %3199 = vmatpush1.msra.mxu0 %v7782_v15  ;;  %3270 = vmatpush1.msra.mxu1 %v7785_v26 }
 0xb3c   :  { %3200 = vmatprep.subr.mxu0 %v7788_v31  ;;  %3271 = vmatprep.subr.mxu1 %v7791_v30  ;;  %v2847_v30 = vadd.f32 %v7670_v7, %v5784_v34 }
 0xb3d   :  { %3201 = vmatpush1.msra.mxu0 %v7794_v55  ;;  %3272 = vmatpush1.msra.mxu1 %v7797_v32  ;;  %v7812_v55 = vld [vmem:[#allocation7 + $0x88] sm:$0xff]  ;;  %v7815_v32 = vld [vmem:[#allocation7 + $0x98] sm:$0xff] }
 0xb3e   :  { %3202 = vmatprep.subr.mxu0 %v7800_v4  ;;  %3273 = vmatprep.subr.mxu1 %v7803_v14  ;;  %10190 = vst [vmem:[#allocation26_spill] sm:$0xff] %v7812_v55  ;;  %10191 = vst [vmem:[#allocation27_spill] sm:$0xff] %v7815_v32  ;;  %v7818_v4 = vld [vmem:[#allocation7 + $0x80] sm:$0xff]  ;;  %v7821_v14 = vld [vmem:[#allocation7 + $0x90] sm:$0xff] }
 0xb3f   :  { %3203 = vmatpush1.msra.mxu0 %v7806_v1  ;;  %3274 = vmatpush1.msra.mxu1 %v7809_v39  ;;  %10192 = vst [vmem:[#allocation28_spill] sm:$0xff] %v7818_v4  ;;  %10193 = vst [vmem:[#allocation29_spill] sm:$0xff] %v7821_v14  ;;  %v7824_v1 = vld [vmem:[#allocation7 + $0x68] sm:$0xff]  ;;  %v7827_v39 = vld [vmem:[#allocation7 + $0x78] sm:$0xff] }
 0xb40   :  { %3204 = vmatprep.subr.mxu0 %v7812_v55  ;;  %3275 = vmatprep.subr.mxu1 %v7815_v32  ;;  %10194 = vst [vmem:[#allocation30_spill] sm:$0xff] %v7824_v1  ;;  %10195 = vst [vmem:[#allocation31_spill] sm:$0xff] %v7827_v39  ;;  %v7830_v55 = vld [vmem:[#allocation7 + $0x60] sm:$0xff]  ;;  %v7833_v32 = vld [vmem:[#allocation7 + $0x70] sm:$0xff] }
 0xb41   :  { %3205 = vmatpush1.msra.mxu0 %v7818_v4  ;;  %3276 = vmatpush1.msra.mxu1 %v7821_v14  ;;  %10196 = vst [vmem:[#allocation158_spill] sm:$0xff] %v7830_v55  ;;  %10197 = vst [vmem:[#allocation159_spill] sm:$0xff] %v7833_v32  ;;  %v7836_v4 = vld [vmem:[#allocation7 + $0x48] sm:$0xff]  ;;  %v7839_v14 = vld [vmem:[#allocation7 + $0x58] sm:$0xff] }
 0xb42   :  { %3206 = vmatprep.subr.mxu0 %v7824_v1  ;;  %3277 = vmatprep.subr.mxu1 %v7827_v39  ;;  %10198 = vst [vmem:[#allocation161_spill] sm:$0xff] %v7836_v4  ;;  %10199 = vst [vmem:[#allocation165_spill] sm:$0xff] %v7839_v14  ;;  %v7842_v1 = vld [vmem:[#allocation7 + $0x40] sm:$0xff]  ;;  %v7845_v39 = vld [vmem:[#allocation7 + $0x50] sm:$0xff] }
 0xb43   :  { %3207 = vmatpush1.msra.mxu0 %v7830_v55  ;;  %3278 = vmatpush1.msra.mxu1 %v7833_v32  ;;  %10200 = vst [vmem:[#allocation169_spill] sm:$0xff] %v7842_v1  ;;  %10201 = vst [vmem:[#allocation170_spill] sm:$0xff] %v7845_v39  ;;  %v7848_v55 = vld [vmem:[#allocation7 + $0x28] sm:$0xff]  ;;  %v7851_v32 = vld [vmem:[#allocation7 + $0x38] sm:$0xff] }
 0xb44   :  { %3208 = vmatprep.subr.mxu0 %v7836_v4  ;;  %3279 = vmatprep.subr.mxu1 %v7839_v14  ;;  %10202 = vst [vmem:[#allocation166_spill] sm:$0xff] %v7848_v55  ;;  %10203 = vst [vmem:[#allocation32_spill] sm:$0xff] %v7851_v32  ;;  %v7854_v4 = vld [vmem:[#allocation7 + $0x20] sm:$0xff]  ;;  %v7857_v14 = vld [vmem:[#allocation7 + $0x30] sm:$0xff] }
 0xb45   :  { %3209 = vmatpush1.msra.mxu0 %v7842_v1  ;;  %3280 = vmatpush1.msra.mxu1 %v7845_v39  ;;  %10204 = vst [vmem:[#allocation33_spill] sm:$0xff] %v7854_v4  ;;  %10205 = vst [vmem:[#allocation34_spill] sm:$0xff] %v7857_v14  ;;  %v7860_v1 = vld [vmem:[#allocation7 + $0x8] sm:$0xff]  ;;  %v7863_v39 = vld [vmem:[#allocation7 + $0x18] sm:$0xff] }
 0xb46   :  { %3210 = vmatprep.subr.mxu0 %v7848_v55  ;;  %3281 = vmatprep.subr.mxu1 %v7851_v32  ;;  %10206 = vst [vmem:[#allocation35_spill] sm:$0xff] %v7860_v1  ;;  %10207 = vst [vmem:[#allocation36_spill] sm:$0xff] %v7863_v39  ;;  %v7866_v55 = vld [vmem:[#allocation7] sm:$0xff]  ;;  %v7869_v32 = vld [vmem:[#allocation7 + $0x10] sm:$0xff] }
 0xb47   :  { %3211 = vmatpush1.msra.mxu0 %v7854_v4  ;;  %3282 = vmatpush1.msra.mxu1 %v7857_v14  ;;  %10208 = vst [vmem:[#allocation37_spill] sm:$0xff] %v7866_v55  ;;  %10209 = vst [vmem:[#allocation38_spill] sm:$0xff] %v7869_v32  ;;  %v7874_v14 = vld [vmem:[#allocation3 + $0x1e8] sm:$0xff] }
 0xb48   :  { %3212 = vmatprep.subr.mxu0 %v7860_v1  ;;  %3283 = vmatprep.subr.mxu1 %v7863_v39  ;;  %10210 = vst [vmem:[#allocation39_spill] sm:$0xff] %v7874_v14  ;;  %v7877_v1 = vld [vmem:[#allocation3 + $0x1f8] sm:$0xff]  ;;  %v2774_v39 = vadd.f32 %v7662_v27, %v10047_v40 }
 0xb49   :  { %3213 = vmatpush1.msra.mxu0 %v7866_v55  ;;  %3284 = vmatpush1.msra.mxu1 %v7869_v32  ;;  %10211 = vst [vmem:[#allocation40_spill] sm:$0xff] %v7877_v1  ;;  %v2776_v32 = vadd.f32 %v7668_v48, %v10048_v41 }
 0xb4a   :  { %3246 = vmatprep.mubr.f32.mxu0 %v9387_v25  ;;  %3317 = vmatprep.mubr.f32.mxu1 %v9387_v25 }
 0xb4b   :  { %3339 = vmatprep.subr.mxu0 %v7874_v14  ;;  %3410 = vmatprep.subr.mxu1 %v7877_v1  ;;  %v2845_v1 = vadd.f32 %v7664_v29, %v5793_v54 }
 0xbea   :  { %v3091_v55 = vpop.f32.mrf.mxu0  ;;  %v3162_v4 = vpop.f32.mrf.mxu1 }
 0xbeb   :  { %v3092_v31 = vadd.f32 %v3091_v55, %v2774_v39  ;;  %v3163_v27 = vadd.f32 %v3162_v4, %v2845_v1  ;;  %v7913_v4 = vld [vmem:[#allocation3 + $0x1b8] sm:$0xff]  ;;  %v7919_v1 = vld [vmem:[#allocation3 + $0x1b0] sm:$0xff] }
 0xbec   :  { %v3093_v26 = vpop.f32.mrf.mxu0  ;;  %v3164_v15 = vpop.f32.mrf.mxu1  ;;  %10215 = vst [vmem:[#allocation44_spill] sm:$0xff] %v7913_v4  ;;  %10217 = vst [vmem:[#allocation46_spill] sm:$0xff] %v7919_v1 }
 0xbed   :  { %4288 = vtanh.f32 %v3092_v31  ;;  %v3094_v14 = vadd.f32 %v3093_v26, %v2776_v32  ;;  %v3165_v23 = vadd.f32 %v3164_v15, %v2847_v30  ;;  %v7910_v32 = vld [vmem:[#allocation3 + $0x1a8] sm:$0xff] }
 0xbee   :  { %10214 = vst [vmem:[#allocation43_spill] sm:$0xff] %v7910_v32 }
 0xbef   :  { %4290 = vtanh.f32 %v3094_v14  ;;  %v7916_v14 = vld [vmem:[#allocation3 + $0x1a0] sm:$0xff] }
 0xbf0   :  { %4292 = vtanh.f32 %v3165_v23  ;;  %10216 = vst [vmem:[#allocation45_spill] sm:$0xff] %v7916_v14 }
 0xbf1   :  { %4294 = vtanh.f32 %v3163_v27  ;;  %v7922_v27 = vld [vmem:[#allocation3 + $0x188] sm:$0xff] }
 0xbf2   :  { %10218 = vst [vmem:[#allocation47_spill] sm:$0xff] %v7922_v27 }
 0xbfa   :  { %v4289_v40 = vpop.eup %4288 }
 0xbfb   :  { %v3170_v21 = vmul.f32 0.5, %v4289_v40  ;;  %v7892_v40 = vld [vmem:[#allocation3 + $0x1e0] sm:$0xff] }
 0xbfc   :  { %v4291_v9 = vpop.eup %4290 }
 0xbfd   :  { %v3173_v22 = vadd.f32 0.5, %v3170_v21  ;;  %v3171_v48 = vmul.f32 0.5, %v4291_v9  ;;  %v4293_v41 = vpop.eup %4292  ;;  %v7895_v9 = vld [vmem:[#allocation3 + $0x1f0] sm:$0xff] }
 0xbfe   :  { %v4295_v23 = vpop.eup %4294  ;;  %v7907_v21 = vld [vmem:[#allocation3 + $0x1d0] sm:$0xff] }
 0xbff   :  { %v3174_v7 = vadd.f32 0.5, %v3171_v48  ;;  %v3178_v55 = vmul.f32 %v4293_v41, %v3173_v22  ;;  %v3172_v15 = vmul.f32 0.5, %v4295_v23  ;;  %v7898_v41 = vld [vmem:[#allocation3 + $0x1c8] sm:$0xff]  ;;  %v7904_v22 = vld [vmem:[#allocation3 + $0x1c0] sm:$0xff]  ;;  %10213 = vst [vmem:[#allocation42_spill] sm:$0xff] %v7907_v21  ;;  %v7925_v48 = vld [vmem:[#allocation3 + $0x198] sm:$0xff] }
 0xc00   :  { %10212 = vst [vmem:[#allocation41_spill] sm:$0xff] %v7904_v22  ;;  %10219 = vst [vmem:[#allocation48_spill] sm:$0xff] %v7925_v48  ;;  %v7937_v23 = vld [vmem:[#allocation3 + $0x178] sm:$0xff] }
 0xc01   :  { %v3177_v39 = vmul.f32 %v3174_v7, %v7521_v35  ;;  %v3175_v26 = vadd.f32 0.5, %v3172_v15  ;;  %v7901_v35 = vld [vmem:[#allocation3 + $0x1d8] sm:$0xff]  ;;  %v7928_v7 = vld [vmem:[#allocation3 + $0x180] sm:$0xff]  ;;  %10223 = vst [vmem:[#allocation52_spill] sm:$0xff] %v7937_v23 }
 0xc02   :  { %10220 = vst [vmem:[#allocation49_spill] sm:$0xff] %v7928_v7  ;;  %v7940_v15 = vld [vmem:[#allocation3 + $0x160] sm:$0xff] }
 0xc03   :  { %v7889_v31 = vadd.f32 %v3178_v55, %v3177_v39  ;;  %v7931_v55 = vld [vmem:[#allocation3 + $0x190] sm:$0xff]  ;;  %v7934_v39 = vld [vmem:[#allocation3 + $0x168] sm:$0xff]  ;;  %10224 = vst [vmem:[#allocation53_spill] sm:$0xff] %v7940_v15 }
 0xc04   :  { %10221 = vst [vmem:[#allocation50_spill] sm:$0xff] %v7931_v55  ;;  %10222 = vst [vmem:[#allocation51_spill] sm:$0xff] %v7934_v39 }
 0xc05   :  { %4296 = vtanh.f32 %v7889_v31 }
 0xc12   :  { %v4297_v29 = vpop.eup %4296 }
 0xc13   :  { %v3181_v30 = vmul.f32 %v4297_v29, %v3175_v26  ;;  %v7943_v26 = vld [vmem:[#allocation3 + $0x170] sm:$0xff]  ;;  %v7946_v29 = vld [vmem:[#allocation3 + $0x148] sm:$0xff] }
 0xc14   :  { %10225 = vst [vmem:[#allocation54_spill] sm:$0xff] %v7943_v26  ;;  %10226 = vst [vmem:[#allocation55_spill] sm:$0xff] %v7946_v29 }
 0xc15   :  { %3247 = vmatmul.mubr.f32.vlgmr.msra.gmra.mxu0 %v3181_v30  ;;  %3318 = vmatmul.mubr.f32.vlgmr.msra.gmra.mxu1 %v3181_v30  ;;  %v7949_v30 = vld [vmem:[#allocation3 + $0x158] sm:$0xff] }
 0xc16   :  { %3340 = vmatpush1.msra.mxu0 %v7892_v40  ;;  %3411 = vmatpush1.msra.mxu1 %v7895_v9  ;;  %10227 = vst [vmem:[#allocation56_spill] sm:$0xff] %v7949_v30 }
 0xc17   :  { %3341 = vmatprep.subr.mxu0 %v7898_v41  ;;  %3412 = vmatprep.subr.mxu1 %v7901_v35 }
 0xc18   :  { %3342 = vmatpush1.msra.mxu0 %v7904_v22  ;;  %3413 = vmatpush1.msra.mxu1 %v7907_v21 }
 0xc19   :  { %3343 = vmatprep.subr.mxu0 %v7910_v32  ;;  %3414 = vmatprep.subr.mxu1 %v7913_v4 }
 0xc1a   :  { %3344 = vmatpush1.msra.mxu0 %v7916_v14  ;;  %3415 = vmatpush1.msra.mxu1 %v7919_v1 }
 0xc1b   :  { %3345 = vmatprep.subr.mxu0 %v7922_v27  ;;  %3416 = vmatprep.subr.mxu1 %v7925_v48 }
 0xc1c   :  { %3346 = vmatpush1.msra.mxu0 %v7928_v7  ;;  %3417 = vmatpush1.msra.mxu1 %v7931_v55 }
 0xc1d   :  { %3347 = vmatprep.subr.mxu0 %v7934_v39  ;;  %3418 = vmatprep.subr.mxu1 %v7937_v23  ;;  %v7952_v39 = vld [vmem:[#allocation3 + $0x140] sm:$0xff]  ;;  %v7955_v23 = vld [vmem:[#allocation3 + $0x150] sm:$0xff] }
 0xc1e   :  { %3348 = vmatpush1.msra.mxu0 %v7940_v15  ;;  %3419 = vmatpush1.msra.mxu1 %v7943_v26  ;;  %10228 = vst [vmem:[#allocation57_spill] sm:$0xff] %v7952_v39  ;;  %10229 = vst [vmem:[#allocation58_spill] sm:$0xff] %v7955_v23  ;;  %v7958_v15 = vld [vmem:[#allocation3 + $0x128] sm:$0xff]  ;;  %v7961_v26 = vld [vmem:[#allocation3 + $0x138] sm:$0xff] }
 0xc1f   :  { %3349 = vmatprep.subr.mxu0 %v7946_v29  ;;  %3420 = vmatprep.subr.mxu1 %v7949_v30  ;;  %10230 = vst [vmem:[#allocation59_spill] sm:$0xff] %v7958_v15  ;;  %10231 = vst [vmem:[#allocation60_spill] sm:$0xff] %v7961_v26  ;;  %v7964_v29 = vld [vmem:[#allocation3 + $0x120] sm:$0xff]  ;;  %v7967_v30 = vld [vmem:[#allocation3 + $0x130] sm:$0xff] }
 0xc20   :  { %3350 = vmatpush1.msra.mxu0 %v7952_v39  ;;  %3421 = vmatpush1.msra.mxu1 %v7955_v23  ;;  %10232 = vst [vmem:[#allocation61_spill] sm:$0xff] %v7964_v29  ;;  %10233 = vst [vmem:[#allocation62_spill] sm:$0xff] %v7967_v30  ;;  %v7970_v39 = vld [vmem:[#allocation3 + $0x108] sm:$0xff]  ;;  %v7973_v23 = vld [vmem:[#allocation3 + $0x118] sm:$0xff] }
 0xc21   :  { %3351 = vmatprep.subr.mxu0 %v7958_v15  ;;  %3422 = vmatprep.subr.mxu1 %v7961_v26  ;;  %10234 = vst [vmem:[#allocation63_spill] sm:$0xff] %v7970_v39  ;;  %10235 = vst [vmem:[#allocation64_spill] sm:$0xff] %v7973_v23  ;;  %v7976_v15 = vld [vmem:[#allocation3 + $0x100] sm:$0xff]  ;;  %v7979_v26 = vld [vmem:[#allocation3 + $0x110] sm:$0xff] }
 0xc22   :  { %3352 = vmatpush1.msra.mxu0 %v7964_v29  ;;  %3423 = vmatpush1.msra.mxu1 %v7967_v30  ;;  %10236 = vst [vmem:[#allocation65_spill] sm:$0xff] %v7976_v15  ;;  %10237 = vst [vmem:[#allocation66_spill] sm:$0xff] %v7979_v26  ;;  %v7982_v29 = vld [vmem:[#allocation3 + $0xe8] sm:$0xff]  ;;  %v7985_v30 = vld [vmem:[#allocation3 + $0xf8] sm:$0xff] }
 0xc23   :  { %3353 = vmatprep.subr.mxu0 %v7970_v39  ;;  %3424 = vmatprep.subr.mxu1 %v7973_v23  ;;  %10238 = vst [vmem:[#allocation67_spill] sm:$0xff] %v7982_v29  ;;  %10239 = vst [vmem:[#allocation68_spill] sm:$0xff] %v7985_v30  ;;  %v7988_v39 = vld [vmem:[#allocation3 + $0xe0] sm:$0xff]  ;;  %v7991_v23 = vld [vmem:[#allocation3 + $0xf0] sm:$0xff] }
 0xc24   :  { %3354 = vmatpush1.msra.mxu0 %v7976_v15  ;;  %3425 = vmatpush1.msra.mxu1 %v7979_v26  ;;  %10240 = vst [vmem:[#allocation69_spill] sm:$0xff] %v7988_v39  ;;  %10241 = vst [vmem:[#allocation70_spill] sm:$0xff] %v7991_v23  ;;  %v7994_v15 = vld [vmem:[#allocation3 + $0xc8] sm:$0xff]  ;;  %v7997_v26 = vld [vmem:[#allocation3 + $0xd8] sm:$0xff] }
 0xc25   :  { %3355 = vmatprep.subr.mxu0 %v7982_v29  ;;  %3426 = vmatprep.subr.mxu1 %v7985_v30  ;;  %10242 = vst [vmem:[#allocation71_spill] sm:$0xff] %v7994_v15  ;;  %10243 = vst [vmem:[#allocation72_spill] sm:$0xff] %v7997_v26  ;;  %v8000_v29 = vld [vmem:[#allocation3 + $0xc0] sm:$0xff]  ;;  %v8003_v30 = vld [vmem:[#allocation3 + $0xd0] sm:$0xff] }
 0xc26   :  { %3356 = vmatpush1.msra.mxu0 %v7988_v39  ;;  %3427 = vmatpush1.msra.mxu1 %v7991_v23  ;;  %10244 = vst [vmem:[#allocation73_spill] sm:$0xff] %v8000_v29  ;;  %10245 = vst [vmem:[#allocation74_spill] sm:$0xff] %v8003_v30  ;;  %v8006_v39 = vld [vmem:[#allocation3 + $0xa8] sm:$0xff]  ;;  %v8009_v23 = vld [vmem:[#allocation3 + $0xb8] sm:$0xff] }
 0xc27   :  { %3357 = vmatprep.subr.mxu0 %v7994_v15  ;;  %3428 = vmatprep.subr.mxu1 %v7997_v26  ;;  %10246 = vst [vmem:[#allocation75_spill] sm:$0xff] %v8006_v39  ;;  %10247 = vst [vmem:[#allocation76_spill] sm:$0xff] %v8009_v23  ;;  %v8012_v15 = vld [vmem:[#allocation3 + $0xa0] sm:$0xff]  ;;  %v8015_v26 = vld [vmem:[#allocation3 + $0xb0] sm:$0xff] }
 0xc28   :  { %3358 = vmatpush1.msra.mxu0 %v8000_v29  ;;  %3429 = vmatpush1.msra.mxu1 %v8003_v30  ;;  %10248 = vst [vmem:[#allocation77_spill] sm:$0xff] %v8012_v15  ;;  %10249 = vst [vmem:[#allocation78_spill] sm:$0xff] %v8015_v26  ;;  %v8018_v29 = vld [vmem:[#allocation3 + $0x88] sm:$0xff]  ;;  %v8021_v30 = vld [vmem:[#allocation3 + $0x98] sm:$0xff] }
 0xc29   :  { %3359 = vmatprep.subr.mxu0 %v8006_v39  ;;  %3430 = vmatprep.subr.mxu1 %v8009_v23  ;;  %10250 = vst [vmem:[#allocation79_spill] sm:$0xff] %v8018_v29  ;;  %10251 = vst [vmem:[#allocation80_spill] sm:$0xff] %v8021_v30  ;;  %v8024_v39 = vld [vmem:[#allocation3 + $0x80] sm:$0xff]  ;;  %v8027_v23 = vld [vmem:[#allocation3 + $0x90] sm:$0xff] }
 0xc2a   :  { %3360 = vmatpush1.msra.mxu0 %v8012_v15  ;;  %3431 = vmatpush1.msra.mxu1 %v8015_v26  ;;  %10252 = vst [vmem:[#allocation81_spill] sm:$0xff] %v8024_v39  ;;  %10253 = vst [vmem:[#allocation82_spill] sm:$0xff] %v8027_v23  ;;  %v8030_v15 = vld [vmem:[#allocation3 + $0x68] sm:$0xff]  ;;  %v8033_v26 = vld [vmem:[#allocation3 + $0x78] sm:$0xff] }
 0xc2b   :  { %3361 = vmatprep.subr.mxu0 %v8018_v29  ;;  %3432 = vmatprep.subr.mxu1 %v8021_v30  ;;  %10254 = vst [vmem:[#allocation83_spill] sm:$0xff] %v8030_v15  ;;  %10255 = vst [vmem:[#allocation84_spill] sm:$0xff] %v8033_v26  ;;  %v8036_v29 = vld [vmem:[#allocation3 + $0x60] sm:$0xff]  ;;  %v8039_v30 = vld [vmem:[#allocation3 + $0x70] sm:$0xff] }
 0xc2c   :  { %3362 = vmatpush1.msra.mxu0 %v8024_v39  ;;  %3433 = vmatpush1.msra.mxu1 %v8027_v23  ;;  %10256 = vst [vmem:[#allocation85_spill] sm:$0xff] %v8036_v29  ;;  %10257 = vst [vmem:[#allocation86_spill] sm:$0xff] %v8039_v30  ;;  %v8042_v39 = vld [vmem:[#allocation3 + $0x48] sm:$0xff]  ;;  %v8045_v23 = vld [vmem:[#allocation3 + $0x58] sm:$0xff] }
 0xc2d   :  { %3363 = vmatprep.subr.mxu0 %v8030_v15  ;;  %3434 = vmatprep.subr.mxu1 %v8033_v26  ;;  %10258 = vst [vmem:[#allocation87_spill] sm:$0xff] %v8042_v39  ;;  %10259 = vst [vmem:[#allocation88_spill] sm:$0xff] %v8045_v23  ;;  %v8048_v15 = vld [vmem:[#allocation3 + $0x40] sm:$0xff]  ;;  %v8051_v26 = vld [vmem:[#allocation3 + $0x50] sm:$0xff] }
 0xc2e   :  { %3364 = vmatpush1.msra.mxu0 %v8036_v29  ;;  %3435 = vmatpush1.msra.mxu1 %v8039_v30  ;;  %10260 = vst [vmem:[#allocation89_spill] sm:$0xff] %v8048_v15  ;;  %10261 = vst [vmem:[#allocation90_spill] sm:$0xff] %v8051_v26  ;;  %v8054_v29 = vld [vmem:[#allocation3 + $0x28] sm:$0xff]  ;;  %v8057_v30 = vld [vmem:[#allocation3 + $0x38] sm:$0xff] }
 0xc2f   :  { %3365 = vmatprep.subr.mxu0 %v8042_v39  ;;  %3436 = vmatprep.subr.mxu1 %v8045_v23  ;;  %10262 = vst [vmem:[#allocation91_spill] sm:$0xff] %v8054_v29  ;;  %10263 = vst [vmem:[#allocation92_spill] sm:$0xff] %v8057_v30  ;;  %v8060_v39 = vld [vmem:[#allocation3 + $0x20] sm:$0xff]  ;;  %v8063_v23 = vld [vmem:[#allocation3 + $0x30] sm:$0xff] }
 0xc30   :  { %3366 = vmatpush1.msra.mxu0 %v8048_v15  ;;  %3437 = vmatpush1.msra.mxu1 %v8051_v26  ;;  %10264 = vst [vmem:[#allocation93_spill] sm:$0xff] %v8060_v39  ;;  %10265 = vst [vmem:[#allocation94_spill] sm:$0xff] %v8063_v23  ;;  %v8066_v15 = vld [vmem:[#allocation3 + $0x8] sm:$0xff]  ;;  %v8069_v26 = vld [vmem:[#allocation3 + $0x18] sm:$0xff] }
 0xc31   :  { %3367 = vmatprep.subr.mxu0 %v8054_v29  ;;  %3438 = vmatprep.subr.mxu1 %v8057_v30  ;;  %10266 = vst [vmem:[#allocation95_spill] sm:$0xff] %v8066_v15  ;;  %10267 = vst [vmem:[#allocation96_spill] sm:$0xff] %v8069_v26  ;;  %v8072_v29 = vld [vmem:[#allocation3] sm:$0xff]  ;;  %v8076_v30 = vld [vmem:[#allocation3 + $0x10] sm:$0xff] }
 0xc32   :  { %3368 = vmatpush1.msra.mxu0 %v8060_v39  ;;  %3439 = vmatpush1.msra.mxu1 %v8063_v23  ;;  %10268 = vst [vmem:[#allocation97_spill] sm:$0xff] %v8072_v29  ;;  %10269 = vst [vmem:[#allocation98_spill] sm:$0xff] %v8076_v30  ;;  %v8091_v23 = vld [vmem:[#allocation5 + $0x1f0] sm:$0xff] }
 0xc33   :  { %3369 = vmatprep.subr.mxu0 %v8066_v15  ;;  %3440 = vmatprep.subr.mxu1 %v8069_v26  ;;  %v8082_v15 = vld [vmem:[#allocation5 + $0x1e8] sm:$0xff]  ;;  %v8085_v26 = vld [vmem:[#allocation5 + $0x1f8] sm:$0xff]  ;;  %10273 = vst [vmem:[#allocation102_spill] sm:$0xff] %v8091_v23 }
 0xc34   :  { %3370 = vmatpush1.msra.mxu0 %v8072_v29  ;;  %3403 = vmatprep.mubr.f32.mxu0 %v9387_v25  ;;  %10270 = vst [vmem:[#allocation99_spill] sm:$0xff] %v8082_v15  ;;  %10271 = vst [vmem:[#allocation100_spill] sm:$0xff] %v8085_v26  ;;  %v8088_v29 = vld [vmem:[#allocation5 + $0x1e0] sm:$0xff] }
 0xc35   :  { %3441 = vmatpush1.msra.mxu1 %v8076_v30  ;;  %3474 = vmatprep.mubr.f32.mxu1 %v9387_v25  ;;  %10272 = vst [vmem:[#allocation101_spill] sm:$0xff] %v8088_v29  ;;  %v8094_v30 = vld [vmem:[#allocation5 + $0x1c8] sm:$0xff] }
 0xc36   :  { %3404 = vmatmul.mubr.f32.vlgmr.msra.gmra.mxu0 %v7682_v42  ;;  %3475 = vmatmul.mubr.f32.vlgmr.msra.gmra.mxu1 %v7682_v42  ;;  %10274 = vst [vmem:[#allocation103_spill] sm:$0xff] %v8094_v30  ;;  %v8097_v42 = vld [vmem:[#allocation5 + $0x1d8] sm:$0xff] }
 0xc37   :  { %3500 = vmatprep.subr.mxu0 %v8082_v15  ;;  %3571 = vmatprep.subr.mxu1 %v8085_v26  ;;  %10275 = vst [vmem:[#allocation104_spill] sm:$0xff] %v8097_v42  ;;  %v8100_v15 = vld [vmem:[#allocation5 + $0x1c0] sm:$0xff]  ;;  %v8103_v26 = vld [vmem:[#allocation5 + $0x1d0] sm:$0xff] }
 0xc38   :  { %3501 = vmatpush1.msra.mxu0 %v8088_v29  ;;  %3572 = vmatpush1.msra.mxu1 %v8091_v23  ;;  %10276 = vst [vmem:[#allocation105_spill] sm:$0xff] %v8100_v15  ;;  %10277 = vst [vmem:[#allocation106_spill] sm:$0xff] %v8103_v26  ;;  %v8106_v29 = vld [vmem:[#allocation5 + $0x1a8] sm:$0xff]  ;;  %v8109_v23 = vld [vmem:[#allocation5 + $0x1b8] sm:$0xff] }
 0xc39   :  { %3502 = vmatprep.subr.mxu0 %v8094_v30  ;;  %3573 = vmatprep.subr.mxu1 %v8097_v42  ;;  %10278 = vst [vmem:[#allocation107_spill] sm:$0xff] %v8106_v29  ;;  %10279 = vst [vmem:[#allocation108_spill] sm:$0xff] %v8109_v23  ;;  %v8112_v30 = vld [vmem:[#allocation5 + $0x1a0] sm:$0xff]  ;;  %v8115_v42 = vld [vmem:[#allocation5 + $0x1b0] sm:$0xff] }
 0xc3a   :  { %3503 = vmatpush1.msra.mxu0 %v8100_v15  ;;  %3574 = vmatpush1.msra.mxu1 %v8103_v26  ;;  %10280 = vst [vmem:[#allocation109_spill] sm:$0xff] %v8112_v30  ;;  %10281 = vst [vmem:[#allocation110_spill] sm:$0xff] %v8115_v42  ;;  %v8118_v15 = vld [vmem:[#allocation5 + $0x188] sm:$0xff]  ;;  %v8121_v26 = vld [vmem:[#allocation5 + $0x198] sm:$0xff] }
 0xc3b   :  { %3504 = vmatprep.subr.mxu0 %v8106_v29  ;;  %3575 = vmatprep.subr.mxu1 %v8109_v23  ;;  %10282 = vst [vmem:[#allocation111_spill] sm:$0xff] %v8118_v15  ;;  %10283 = vst [vmem:[#allocation112_spill] sm:$0xff] %v8121_v26  ;;  %v8124_v29 = vld [vmem:[#allocation5 + $0x180] sm:$0xff]  ;;  %v8127_v23 = vld [vmem:[#allocation5 + $0x190] sm:$0xff] }
 0xc3c   :  { %3505 = vmatpush1.msra.mxu0 %v8112_v30  ;;  %3576 = vmatpush1.msra.mxu1 %v8115_v42  ;;  %10284 = vst [vmem:[#allocation113_spill] sm:$0xff] %v8124_v29  ;;  %10285 = vst [vmem:[#allocation114_spill] sm:$0xff] %v8127_v23  ;;  %v8130_v30 = vld [vmem:[#allocation5 + $0x168] sm:$0xff]  ;;  %v8133_v42 = vld [vmem:[#allocation5 + $0x178] sm:$0xff] }
 0xc3d   :  { %3506 = vmatprep.subr.mxu0 %v8118_v15  ;;  %3577 = vmatprep.subr.mxu1 %v8121_v26  ;;  %10286 = vst [vmem:[#allocation115_spill] sm:$0xff] %v8130_v30  ;;  %10287 = vst [vmem:[#allocation116_spill] sm:$0xff] %v8133_v42  ;;  %v8136_v15 = vld [vmem:[#allocation5 + $0x160] sm:$0xff]  ;;  %v8139_v26 = vld [vmem:[#allocation5 + $0x170] sm:$0xff] }
 0xc3e   :  { %3507 = vmatpush1.msra.mxu0 %v8124_v29  ;;  %3578 = vmatpush1.msra.mxu1 %v8127_v23  ;;  %10288 = vst [vmem:[#allocation117_spill] sm:$0xff] %v8136_v15  ;;  %10289 = vst [vmem:[#allocation118_spill] sm:$0xff] %v8139_v26  ;;  %v8142_v29 = vld [vmem:[#allocation5 + $0x148] sm:$0xff]  ;;  %v8145_v23 = vld [vmem:[#allocation5 + $0x158] sm:$0xff] }
 0xc3f   :  { %3508 = vmatprep.subr.mxu0 %v8130_v30  ;;  %3579 = vmatprep.subr.mxu1 %v8133_v42  ;;  %10290 = vst [vmem:[#allocation119_spill] sm:$0xff] %v8142_v29  ;;  %10291 = vst [vmem:[#allocation120_spill] sm:$0xff] %v8145_v23  ;;  %v8148_v30 = vld [vmem:[#allocation5 + $0x140] sm:$0xff]  ;;  %v8151_v42 = vld [vmem:[#allocation5 + $0x150] sm:$0xff] }
 0xc40   :  { %3509 = vmatpush1.msra.mxu0 %v8136_v15  ;;  %3580 = vmatpush1.msra.mxu1 %v8139_v26  ;;  %10292 = vst [vmem:[#allocation121_spill] sm:$0xff] %v8148_v30  ;;  %10293 = vst [vmem:[#allocation122_spill] sm:$0xff] %v8151_v42  ;;  %v8154_v15 = vld [vmem:[#allocation5 + $0x128] sm:$0xff]  ;;  %v8157_v26 = vld [vmem:[#allocation5 + $0x138] sm:$0xff] }
 0xc41   :  { %3510 = vmatprep.subr.mxu0 %v8142_v29  ;;  %3581 = vmatprep.subr.mxu1 %v8145_v23  ;;  %10294 = vst [vmem:[#allocation123_spill] sm:$0xff] %v8154_v15  ;;  %10295 = vst [vmem:[#allocation124_spill] sm:$0xff] %v8157_v26  ;;  %v8160_v29 = vld [vmem:[#allocation5 + $0x120] sm:$0xff]  ;;  %v8163_v23 = vld [vmem:[#allocation5 + $0x130] sm:$0xff] }
 0xc42   :  { %3511 = vmatpush1.msra.mxu0 %v8148_v30  ;;  %3582 = vmatpush1.msra.mxu1 %v8151_v42  ;;  %10296 = vst [vmem:[#allocation125_spill] sm:$0xff] %v8160_v29  ;;  %10297 = vst [vmem:[#allocation126_spill] sm:$0xff] %v8163_v23  ;;  %v8166_v30 = vld [vmem:[#allocation5 + $0x108] sm:$0xff]  ;;  %v8169_v42 = vld [vmem:[#allocation5 + $0x118] sm:$0xff] }
 0xc43   :  { %3512 = vmatprep.subr.mxu0 %v8154_v15  ;;  %3583 = vmatprep.subr.mxu1 %v8157_v26  ;;  %10298 = vst [vmem:[#allocation127_spill] sm:$0xff] %v8166_v30  ;;  %10299 = vst [vmem:[#allocation128_spill] sm:$0xff] %v8169_v42  ;;  %v8172_v15 = vld [vmem:[#allocation5 + $0x100] sm:$0xff]  ;;  %v8175_v26 = vld [vmem:[#allocation5 + $0x110] sm:$0xff] }
 0xc44   :  { %3513 = vmatpush1.msra.mxu0 %v8160_v29  ;;  %3584 = vmatpush1.msra.mxu1 %v8163_v23  ;;  %10300 = vst [vmem:[#allocation129_spill] sm:$0xff] %v8172_v15  ;;  %10301 = vst [vmem:[#allocation130_spill] sm:$0xff] %v8175_v26  ;;  %v8178_v29 = vld [vmem:[#allocation5 + $0xe8] sm:$0xff]  ;;  %v8181_v23 = vld [vmem:[#allocation5 + $0xf8] sm:$0xff] }
 0xc45   :  { %3514 = vmatprep.subr.mxu0 %v8166_v30  ;;  %3585 = vmatprep.subr.mxu1 %v8169_v42  ;;  %10302 = vst [vmem:[#allocation131_spill] sm:$0xff] %v8178_v29  ;;  %10303 = vst [vmem:[#allocation132_spill] sm:$0xff] %v8181_v23  ;;  %v8184_v30 = vld [vmem:[#allocation5 + $0xe0] sm:$0xff]  ;;  %v8187_v42 = vld [vmem:[#allocation5 + $0xf0] sm:$0xff] }
 0xc46   :  { %3515 = vmatpush1.msra.mxu0 %v8172_v15  ;;  %3586 = vmatpush1.msra.mxu1 %v8175_v26  ;;  %10304 = vst [vmem:[#allocation133_spill] sm:$0xff] %v8184_v30  ;;  %10305 = vst [vmem:[#allocation134_spill] sm:$0xff] %v8187_v42  ;;  %v8190_v15 = vld [vmem:[#allocation5 + $0xc8] sm:$0xff]  ;;  %v8193_v26 = vld [vmem:[#allocation5 + $0xd8] sm:$0xff] }
 0xc47   :  { %3516 = vmatprep.subr.mxu0 %v8178_v29  ;;  %3587 = vmatprep.subr.mxu1 %v8181_v23  ;;  %10306 = vst [vmem:[#allocation135_spill] sm:$0xff] %v8190_v15  ;;  %10307 = vst [vmem:[#allocation136_spill] sm:$0xff] %v8193_v26  ;;  %v8196_v29 = vld [vmem:[#allocation5 + $0xc0] sm:$0xff]  ;;  %v8199_v23 = vld [vmem:[#allocation5 + $0xd0] sm:$0xff] }
 0xc48   :  { %3517 = vmatpush1.msra.mxu0 %v8184_v30  ;;  %3588 = vmatpush1.msra.mxu1 %v8187_v42  ;;  %10308 = vst [vmem:[#allocation137_spill] sm:$0xff] %v8196_v29  ;;  %10309 = vst [vmem:[#allocation138_spill] sm:$0xff] %v8199_v23  ;;  %v8202_v30 = vld [vmem:[#allocation5 + $0xa8] sm:$0xff]  ;;  %v8205_v42 = vld [vmem:[#allocation5 + $0xb8] sm:$0xff] }
 0xc49   :  { %3518 = vmatprep.subr.mxu0 %v8190_v15  ;;  %3589 = vmatprep.subr.mxu1 %v8193_v26  ;;  %10310 = vst [vmem:[#allocation139_spill] sm:$0xff] %v8202_v30  ;;  %10311 = vst [vmem:[#allocation140_spill] sm:$0xff] %v8205_v42  ;;  %v8208_v15 = vld [vmem:[#allocation5 + $0xa0] sm:$0xff]  ;;  %v8211_v26 = vld [vmem:[#allocation5 + $0xb0] sm:$0xff] }
 0xc4a   :  { %3519 = vmatpush1.msra.mxu0 %v8196_v29  ;;  %3590 = vmatpush1.msra.mxu1 %v8199_v23  ;;  %10312 = vst [vmem:[#allocation141_spill] sm:$0xff] %v8208_v15  ;;  %10313 = vst [vmem:[#allocation142_spill] sm:$0xff] %v8211_v26  ;;  %v8214_v29 = vld [vmem:[#allocation5 + $0x88] sm:$0xff]  ;;  %v8217_v23 = vld [vmem:[#allocation5 + $0x98] sm:$0xff] }
 0xc4b   :  { %3520 = vmatprep.subr.mxu0 %v8202_v30  ;;  %3591 = vmatprep.subr.mxu1 %v8205_v42  ;;  %10314 = vst [vmem:[#allocation143_spill] sm:$0xff] %v8214_v29  ;;  %10315 = vst [vmem:[#allocation144_spill] sm:$0xff] %v8217_v23  ;;  %v8220_v30 = vld [vmem:[#allocation5 + $0x80] sm:$0xff]  ;;  %v8223_v42 = vld [vmem:[#allocation5 + $0x90] sm:$0xff] }
 0xc4c   :  { %3521 = vmatpush1.msra.mxu0 %v8208_v15  ;;  %3592 = vmatpush1.msra.mxu1 %v8211_v26  ;;  %10316 = vst [vmem:[#allocation145_spill] sm:$0xff] %v8220_v30  ;;  %10317 = vst [vmem:[#allocation146_spill] sm:$0xff] %v8223_v42  ;;  %v8226_v15 = vld [vmem:[#allocation5 + $0x68] sm:$0xff]  ;;  %v8229_v26 = vld [vmem:[#allocation5 + $0x78] sm:$0xff] }
 0xc4d   :  { %3522 = vmatprep.subr.mxu0 %v8214_v29  ;;  %3593 = vmatprep.subr.mxu1 %v8217_v23  ;;  %10318 = vst [vmem:[#allocation147_spill] sm:$0xff] %v8226_v15  ;;  %10319 = vst [vmem:[#allocation148_spill] sm:$0xff] %v8229_v26  ;;  %v8232_v29 = vld [vmem:[#allocation5 + $0x60] sm:$0xff]  ;;  %v8235_v23 = vld [vmem:[#allocation5 + $0x70] sm:$0xff] }
 0xc4e   :  { %3523 = vmatpush1.msra.mxu0 %v8220_v30  ;;  %3594 = vmatpush1.msra.mxu1 %v8223_v42  ;;  %10320 = vst [vmem:[#allocation149_spill] sm:$0xff] %v8232_v29  ;;  %10321 = vst [vmem:[#allocation150_spill] sm:$0xff] %v8235_v23  ;;  %v8238_v30 = vld [vmem:[#allocation5 + $0x48] sm:$0xff]  ;;  %v8241_v42 = vld [vmem:[#allocation5 + $0x58] sm:$0xff] }
 0xc4f   :  { %3524 = vmatprep.subr.mxu0 %v8226_v15  ;;  %3595 = vmatprep.subr.mxu1 %v8229_v26  ;;  %10322 = vst [vmem:[#allocation151_spill] sm:$0xff] %v8238_v30  ;;  %10323 = vst [vmem:[#allocation152_spill] sm:$0xff] %v8241_v42  ;;  %v8244_v15 = vld [vmem:[#allocation5 + $0x40] sm:$0xff]  ;;  %v8247_v26 = vld [vmem:[#allocation5 + $0x50] sm:$0xff] }
 0xc50   :  { %3525 = vmatpush1.msra.mxu0 %v8232_v29  ;;  %3596 = vmatpush1.msra.mxu1 %v8235_v23  ;;  %10324 = vst [vmem:[#allocation153_spill] sm:$0xff] %v8244_v15  ;;  %10325 = vst [vmem:[#allocation154_spill] sm:$0xff] %v8247_v26  ;;  %v8250_v29 = vld [vmem:[#allocation5 + $0x28] sm:$0xff]  ;;  %v8253_v23 = vld [vmem:[#allocation5 + $0x38] sm:$0xff] }
 0xc51   :  { %3526 = vmatprep.subr.mxu0 %v8238_v30  ;;  %3597 = vmatprep.subr.mxu1 %v8241_v42  ;;  %10326 = vst [vmem:[#allocation155_spill] sm:$0xff] %v8250_v29  ;;  %10327 = vst [vmem:[#allocation156_spill] sm:$0xff] %v8253_v23  ;;  %v8256_v30 = vld [vmem:[#allocation5 + $0x20] sm:$0xff]  ;;  %v8259_v42 = vld [vmem:[#allocation5 + $0x30] sm:$0xff] }
 0xc52   :  { %3527 = vmatpush1.msra.mxu0 %v8244_v15  ;;  %3598 = vmatpush1.msra.mxu1 %v8247_v26  ;;  %10328 = vst [vmem:[#allocation157_spill] sm:$0xff] %v8256_v30  ;;  %10329 = vst [vmem:[#allocation171_spill] sm:$0xff] %v8259_v42  ;;  %v8262_v15 = vld [vmem:[#allocation5 + $0x8] sm:$0xff]  ;;  %v8265_v26 = vld [vmem:[#allocation5 + $0x18] sm:$0xff] }
 0xc53   :  { %3528 = vmatprep.subr.mxu0 %v8250_v29  ;;  %3599 = vmatprep.subr.mxu1 %v8253_v23  ;;  %10330 = vst [vmem:[#allocation172_spill] sm:$0xff] %v8262_v15  ;;  %10331 = vst [vmem:[#allocation173_spill] sm:$0xff] %v8265_v26  ;;  %v8268_v29 = vld [vmem:[#allocation5] sm:$0xff]  ;;  %v8272_v23 = vld [vmem:[#allocation5 + $0x10] sm:$0xff] }
 0xc54   :  { %3529 = vmatpush1.msra.mxu0 %v8256_v30  ;;  %3600 = vmatpush1.msra.mxu1 %v8259_v42  ;;  %10332 = vst [vmem:[#allocation174_spill] sm:$0xff] %v8268_v29  ;;  %10333 = vst [vmem:[#allocation168_spill] sm:$0xff] %v8272_v23 }
 0xc55   :  { %3530 = vmatprep.subr.mxu0 %v8262_v15  ;;  %3601 = vmatprep.subr.mxu1 %v8265_v26  ;;  %v3329_v15 = vpop.permute.xlu0 %3328 }
 0xc56   :  { %3531 = vmatpush1.msra.mxu0 %v8268_v29  ;;  %3564 = vmatprep.mubr.f32.mxu0 %v9387_v25  ;;  %v3331_v30 = vmul.f32 %v3329_v15, %v10171_v6  ;;  %v3332_v29 = vmul.f32 %v3329_v15, %v10172_v38  ;;  %v3334_v7 = vmul.f32 %v3329_v15, %v10174_v37 }
 0xc57   :  { %3602 = vmatpush1.msra.mxu1 %v8272_v23  ;;  %3635 = vmatprep.mubr.f32.mxu1 %v9387_v25  ;;  %v3333_v32 = vmul.f32 %v3329_v15, %v5694_v58  ;;  %v10369_v15 = vld [vmem:[#allocation40_spill] sm:$0xff] }
 0xc58   :  { %3657 = vmatprep.subr.mxu0 %v7656_v20  ;;  %3728 = vmatprep.subr.mxu1 %v7659_v10  ;;  %v3335_v23 = vadd.f32 %v3331_v30, %v10173_v0  ;;  %v3336_v27 = vadd.f32 %v3332_v29, %v10175_v46  ;;  %v3338_v6 = vadd.f32 %v3334_v7, %v9852_v33 }
 0xc59   :  { %v3337_v30 = vadd.f32 %v3333_v32, %v5697_v50 }
 0xcd5   :  { %v8278_v42 = vpop.f32.mrf.mxu0  ;;  %v8280_v26 = vpop.f32.mrf.mxu1 }
 0xcd7   :  { %v8284_v39 = vpop.f32.mrf.mxu0  ;;  %v8286_v55 = vpop.f32.mrf.mxu1 }
 0xcf6   :  { %v3405_v20 = vpop.f32.mrf.mxu0  ;;  %v3476_v48 = vpop.f32.mrf.mxu1 }
 0xcf7   :  { %v3481_v10 = vadd.f32 %v3405_v20, %v3335_v23  ;;  %v3483_v0 = vadd.f32 %v3476_v48, %v3337_v30  ;;  %v10368_v48 = vld [vmem:[#allocation39_spill] sm:$0xff] }
 0xcf8   :  { %v3407_v1 = vpop.f32.mrf.mxu0  ;;  %v3478_v14 = vpop.f32.mrf.mxu1 }
 0xcf9   :  { %4298 = vtanh.f32 %v3481_v10  ;;  %v3482_v4 = vadd.f32 %v3407_v1, %v3336_v27  ;;  %v3484_v38 = vadd.f32 %v3478_v14, %v3338_v6  ;;  %v10370_v10 = vld [vmem:[#allocation10_spill] sm:$0xff] }
 0xcfa   :  { %v3249_v30 = vadd.f32 %v8278_v42, %v10370_v10 }
 0xcfb   :  { %4300 = vtanh.f32 %v3482_v4 }
 0xcfc   :  { %4302 = vtanh.f32 %v3484_v38 }
 0xcfd   :  { %4304 = vtanh.f32 %v3483_v0  ;;  %v10334_v0 = vld [vmem:[#allocation12_spill] sm:$0xff] }
 0xd06   :  { %v4299_v37 = vpop.eup %4298 }
 0xd07   :  { %v3488_v21 = vmul.f32 0.5, %v4299_v37  ;;  %v10335_v37 = vld [vmem:[#allocation13_spill] sm:$0xff] }
 0xd08   :  { %v4301_v22 = vpop.eup %4300 }
 0xd09   :  { %v3491_v23 = vadd.f32 0.5, %v3488_v21  ;;  %v3489_v29 = vmul.f32 0.5, %v4301_v22  ;;  %v4303_v46 = vpop.eup %4302  ;;  %v10366_v22 = vld [vmem:[#allocation37_spill] sm:$0xff]  ;;  %v10367_v21 = vld [vmem:[#allocation38_spill] sm:$0xff] }
 0xd0a   :  { %v4305_v6 = vpop.eup %4304 }
 0xd0b   :  { %v3492_v20 = vadd.f32 0.5, %v3489_v29  ;;  %v3496_v27 = vmul.f32 %v4303_v46, %v3491_v23  ;;  %v3490_v38 = vmul.f32 0.5, %v4305_v6  ;;  %v10336_v46 = vld [vmem:[#allocation14_spill] sm:$0xff] }
 0xd0d   :  { %v3495_v1 = vmul.f32 %v3492_v20, %v7679_v56  ;;  %v3493_v4 = vadd.f32 0.5, %v3490_v38  ;;  %v10337_v56 = vld [vmem:[#allocation15_spill] sm:$0xff] }
 0xd0e   :  { %v10371_v20 = vld [vmem:[#allocation11_spill] sm:$0xff] }
 0xd0f   :  { %v8295_v7 = vadd.f32 %v3496_v27, %v3495_v1  ;;  %v3251_v1 = vadd.f32 %v8284_v39, %v10371_v20  ;;  %v3322_v27 = vadd.f32 %v8286_v55, %v5784_v34 }
 0xd11   :  { %4306 = vtanh.f32 %v8295_v7 }
 0xd1e   :  { %v4307_v32 = vpop.eup %4306 }
 0xd1f   :  { %v8298_v14 = vmul.f32 %v4307_v32, %v3493_v4 }
 0xd21   :  { %3565 = vmatmul.mubr.f32.vlgmr.msra.gmra.mxu0 %v8298_v14  ;;  %3636 = vmatmul.mubr.f32.vlgmr.msra.gmra.mxu1 %v8298_v14 }
 0xd22   :  { %3658 = vmatpush1.msra.mxu0 %v7686_v51  ;;  %3729 = vmatpush1.msra.mxu1 %v7689_v49  ;;  %v10338_v51 = vld [vmem:[#allocation16_spill] sm:$0xff]  ;;  %v10339_v49 = vld [vmem:[#allocation17_spill] sm:$0xff] }
 0xd23   :  { %3659 = vmatprep.subr.mxu0 %v7692_v3  ;;  %3730 = vmatprep.subr.mxu1 %v7695_v60  ;;  %v10340_v3 = vld [vmem:[#allocation18_spill] sm:$0xff]  ;;  %v10341_v60 = vld [vmem:[#allocation19_spill] sm:$0xff] }
 0xd24   :  { %3660 = vmatpush1.msra.mxu0 %v7698_v24  ;;  %3731 = vmatpush1.msra.mxu1 %v7701_v53  ;;  %v10342_v24 = vld [vmem:[#allocation20_spill] sm:$0xff]  ;;  %v10343_v53 = vld [vmem:[#allocation21_spill] sm:$0xff] }
 0xd25   :  { %3661 = vmatprep.subr.mxu0 %v7704_v2  ;;  %3732 = vmatprep.subr.mxu1 %v7707_v17  ;;  %v10344_v2 = vld [vmem:[#allocation22_spill] sm:$0xff]  ;;  %v10345_v17 = vld [vmem:[#allocation23_spill] sm:$0xff] }
 0xd26   :  { %3662 = vmatpush1.msra.mxu0 %v7710_v5  ;;  %3733 = vmatpush1.msra.mxu1 %v7713_v36  ;;  %v10346_v5 = vld [vmem:[#allocation24_spill] sm:$0xff]  ;;  %v10347_v36 = vld [vmem:[#allocation25_spill] sm:$0xff] }
 0xd27   :  { %3663 = vmatprep.subr.mxu0 %v7716_v59  ;;  %3734 = vmatprep.subr.mxu1 %v7719_v12  ;;  %v10348_v59 = vld [vmem:[#allocation26_spill] sm:$0xff]  ;;  %v10349_v12 = vld [vmem:[#allocation27_spill] sm:$0xff] }
 0xd28   :  { %3664 = vmatpush1.msra.mxu0 %v7722_v8  ;;  %3735 = vmatpush1.msra.mxu1 %v7725_v11  ;;  %v10350_v8 = vld [vmem:[#allocation28_spill] sm:$0xff]  ;;  %v10351_v11 = vld [vmem:[#allocation29_spill] sm:$0xff] }
 0xd29   :  { %3665 = vmatprep.subr.mxu0 %v7728_v45  ;;  %3736 = vmatprep.subr.mxu1 %v7731_v63  ;;  %v10352_v45 = vld [vmem:[#allocation30_spill] sm:$0xff]  ;;  %v10353_v63 = vld [vmem:[#allocation31_spill] sm:$0xff] }
 0xd2a   :  { %3666 = vmatpush1.msra.mxu0 %v7734_v13  ;;  %3737 = vmatpush1.msra.mxu1 %v7737_v44  ;;  %v10354_v13 = vld [vmem:[#allocation158_spill] sm:$0xff]  ;;  %v10355_v44 = vld [vmem:[#allocation159_spill] sm:$0xff] }
 0xd2b   :  { %3667 = vmatprep.subr.mxu0 %v7740_v61  ;;  %3738 = vmatprep.subr.mxu1 %v7743_v43  ;;  %v10356_v61 = vld [vmem:[#allocation161_spill] sm:$0xff] }
 0xd2c   :  { %3668 = vmatpush1.msra.mxu0 %v7746_v57  ;;  %3739 = vmatpush1.msra.mxu1 %v7749_v19  ;;  %v10357_v43 = vld [vmem:[#allocation165_spill] sm:$0xff]  ;;  %v10359_v19 = vld [vmem:[#allocation170_spill] sm:$0xff] }
 0xd2d   :  { %3669 = vmatprep.subr.mxu0 %v7752_v16  ;;  %3740 = vmatprep.subr.mxu1 %v7755_v52  ;;  %v10358_v57 = vld [vmem:[#allocation169_spill] sm:$0xff]  ;;  %v10360_v16 = vld [vmem:[#allocation166_spill] sm:$0xff]  ;;  %v10361_v52 = vld [vmem:[#allocation32_spill] sm:$0xff] }
 0xd2e   :  { %3670 = vmatpush1.msra.mxu0 %v7758_v47  ;;  %3741 = vmatpush1.msra.mxu1 %v7761_v62  ;;  %v10362_v47 = vld [vmem:[#allocation33_spill] sm:$0xff]  ;;  %v10363_v62 = vld [vmem:[#allocation34_spill] sm:$0xff] }
 0xd2f   :  { %3671 = vmatprep.subr.mxu0 %v7764_v28  ;;  %3742 = vmatprep.subr.mxu1 %v7767_v18  ;;  %v10364_v28 = vld [vmem:[#allocation35_spill] sm:$0xff]  ;;  %v10365_v18 = vld [vmem:[#allocation36_spill] sm:$0xff] }
 0xd30   :  { %3672 = vmatpush1.msra.mxu0 %v10334_v0  ;;  %3743 = vmatpush1.msra.mxu1 %v10335_v37  ;;  %v3320_v37 = vadd.f32 %v8280_v26, %v5793_v54 }
 0xd31   :  { %3673 = vmatprep.subr.mxu0 %v10336_v46  ;;  %3744 = vmatprep.subr.mxu1 %v10337_v56 }
 0xd32   :  { %3674 = vmatpush1.msra.mxu0 %v10338_v51  ;;  %3745 = vmatpush1.msra.mxu1 %v10339_v49 }
 0xd33   :  { %3675 = vmatprep.subr.mxu0 %v10340_v3  ;;  %3746 = vmatprep.subr.mxu1 %v10341_v60 }
 0xd34   :  { %3676 = vmatpush1.msra.mxu0 %v10342_v24  ;;  %3747 = vmatpush1.msra.mxu1 %v10343_v53 }
 0xd35   :  { %3677 = vmatprep.subr.mxu0 %v10344_v2  ;;  %3748 = vmatprep.subr.mxu1 %v10345_v17 }
 0xd36   :  { %3678 = vmatpush1.msra.mxu0 %v10346_v5  ;;  %3749 = vmatpush1.msra.mxu1 %v10347_v36 }
 0xd37   :  { %3679 = vmatprep.subr.mxu0 %v10348_v59  ;;  %3750 = vmatprep.subr.mxu1 %v10349_v12  ;;  %v10373_v59 = vld [vmem:[#allocation42_spill] sm:$0xff]  ;;  %v10374_v12 = vld [vmem:[#allocation43_spill] sm:$0xff] }
 0xd38   :  { %3680 = vmatpush1.msra.mxu0 %v10350_v8  ;;  %3751 = vmatpush1.msra.mxu1 %v10351_v11  ;;  %v10375_v8 = vld [vmem:[#allocation44_spill] sm:$0xff]  ;;  %v10376_v11 = vld [vmem:[#allocation45_spill] sm:$0xff] }
 0xd39   :  { %3681 = vmatprep.subr.mxu0 %v10352_v45  ;;  %3752 = vmatprep.subr.mxu1 %v10353_v63  ;;  %v10377_v45 = vld [vmem:[#allocation46_spill] sm:$0xff]  ;;  %v10378_v63 = vld [vmem:[#allocation47_spill] sm:$0xff] }
 0xd3a   :  { %3682 = vmatpush1.msra.mxu0 %v10354_v13  ;;  %3753 = vmatpush1.msra.mxu1 %v10355_v44  ;;  %v10383_v13 = vld [vmem:[#allocation52_spill] sm:$0xff]  ;;  %v10384_v44 = vld [vmem:[#allocation53_spill] sm:$0xff] }
 0xd3b   :  { %3683 = vmatprep.subr.mxu0 %v10356_v61  ;;  %3754 = vmatprep.subr.mxu1 %v10357_v43  ;;  %v10385_v61 = vld [vmem:[#allocation54_spill] sm:$0xff]  ;;  %v10386_v43 = vld [vmem:[#allocation55_spill] sm:$0xff] }
 0xd3c   :  { %3684 = vmatpush1.msra.mxu0 %v10358_v57  ;;  %3755 = vmatpush1.msra.mxu1 %v10359_v19  ;;  %v10387_v57 = vld [vmem:[#allocation56_spill] sm:$0xff]  ;;  %v10388_v19 = vld [vmem:[#allocation57_spill] sm:$0xff] }
 0xd3d   :  { %3685 = vmatprep.subr.mxu0 %v10360_v16  ;;  %3756 = vmatprep.subr.mxu1 %v10361_v52  ;;  %v10389_v16 = vld [vmem:[#allocation58_spill] sm:$0xff]  ;;  %v10390_v52 = vld [vmem:[#allocation59_spill] sm:$0xff] }
 0xd3e   :  { %3686 = vmatpush1.msra.mxu0 %v10362_v47  ;;  %3757 = vmatpush1.msra.mxu1 %v10363_v62  ;;  %v10391_v47 = vld [vmem:[#allocation60_spill] sm:$0xff]  ;;  %v10392_v62 = vld [vmem:[#allocation61_spill] sm:$0xff] }
 0xd3f   :  { %3687 = vmatprep.subr.mxu0 %v10364_v28  ;;  %3758 = vmatprep.subr.mxu1 %v10365_v18  ;;  %v10393_v28 = vld [vmem:[#allocation62_spill] sm:$0xff]  ;;  %v10394_v18 = vld [vmem:[#allocation63_spill] sm:$0xff] }
 0xd40   :  { %3688 = vmatpush1.msra.mxu0 %v10366_v22  ;;  %3759 = vmatpush1.msra.mxu1 %v10367_v21  ;;  %v10395_v22 = vld [vmem:[#allocation64_spill] sm:$0xff]  ;;  %v10396_v21 = vld [vmem:[#allocation65_spill] sm:$0xff] }
 0xd41   :  { %3721 = vmatprep.mubr.f32.mxu0 %v9387_v25  ;;  %3792 = vmatprep.mubr.f32.mxu1 %v9387_v25 }
 0xd42   :  { %3814 = vmatprep.subr.mxu0 %v10368_v48  ;;  %3885 = vmatprep.subr.mxu1 %v10369_v15  ;;  %v10397_v48 = vld [vmem:[#allocation66_spill] sm:$0xff]  ;;  %v10398_v15 = vld [vmem:[#allocation67_spill] sm:$0xff] }
 0xde1   :  { %v3566_v23 = vpop.f32.mrf.mxu0  ;;  %v3637_v29 = vpop.f32.mrf.mxu1 }
 0xde2   :  { %v3567_v6 = vadd.f32 %v3566_v23, %v3249_v30  ;;  %v3638_v42 = vadd.f32 %v3637_v29, %v3320_v37  ;;  %v10399_v30 = vld [vmem:[#allocation68_spill] sm:$0xff]  ;;  %v10400_v23 = vld [vmem:[#allocation69_spill] sm:$0xff]  ;;  %v10401_v29 = vld [vmem:[#allocation70_spill] sm:$0xff] }
 0xde3   :  { %v3568_v38 = vpop.f32.mrf.mxu0  ;;  %v3639_v4 = vpop.f32.mrf.mxu1  ;;  %v10409_v37 = vld [vmem:[#allocation78_spill] sm:$0xff] }
 0xde4   :  { %4308 = vtanh.f32 %v3567_v6  ;;  %v3569_v32 = vadd.f32 %v3568_v38, %v3251_v1  ;;  %v3640_v0 = vadd.f32 %v3639_v4, %v3322_v27  ;;  %v10402_v1 = vld [vmem:[#allocation71_spill] sm:$0xff]  ;;  %v10403_v27 = vld [vmem:[#allocation72_spill] sm:$0xff]  ;;  %v10404_v6 = vld [vmem:[#allocation73_spill] sm:$0xff] }
 0xde5   :  { %v10405_v38 = vld [vmem:[#allocation74_spill] sm:$0xff]  ;;  %v10406_v4 = vld [vmem:[#allocation75_spill] sm:$0xff] }
 0xde6   :  { %4310 = vtanh.f32 %v3569_v32  ;;  %v10407_v32 = vld [vmem:[#allocation76_spill] sm:$0xff] }
 0xde7   :  { %4312 = vtanh.f32 %v3640_v0  ;;  %v10408_v0 = vld [vmem:[#allocation77_spill] sm:$0xff] }
 0xde8   :  { %4314 = vtanh.f32 %v3638_v42  ;;  %v10410_v42 = vld [vmem:[#allocation79_spill] sm:$0xff] }
 0xdf1   :  { %v4309_v46 = vpop.eup %4308 }
 0xdf2   :  { %v3645_v56 = vmul.f32 0.5, %v4309_v46  ;;  %v10411_v46 = vld [vmem:[#allocation80_spill] sm:$0xff] }
 0xdf3   :  { %v4311_v51 = vpop.eup %4310 }
 0xdf4   :  { %v3648_v49 = vadd.f32 0.5, %v3645_v56  ;;  %v3646_v39 = vmul.f32 0.5, %v4311_v51  ;;  %v4313_v3 = vpop.eup %4312  ;;  %v10412_v56 = vld [vmem:[#allocation81_spill] sm:$0xff]  ;;  %v10413_v51 = vld [vmem:[#allocation82_spill] sm:$0xff] }
 0xdf5   :  { %v4315_v2 = vpop.eup %4314 }
 0xdf6   :  { %v3649_v55 = vadd.f32 0.5, %v3646_v39  ;;  %v3653_v60 = vmul.f32 %v4313_v3, %v3648_v49  ;;  %v3647_v17 = vmul.f32 0.5, %v4315_v2  ;;  %v10414_v49 = vld [vmem:[#allocation83_spill] sm:$0xff]  ;;  %v10415_v39 = vld [vmem:[#allocation84_spill] sm:$0xff]  ;;  %v10416_v3 = vld [vmem:[#allocation85_spill] sm:$0xff] }
 0xdf7   :  { %v10420_v2 = vld [vmem:[#allocation89_spill] sm:$0xff] }
 0xdf8   :  { %v3652_v24 = vmul.f32 %v3649_v55, %v7889_v31  ;;  %v3650_v5 = vadd.f32 0.5, %v3647_v17  ;;  %v10372_v31 = vld [vmem:[#allocation41_spill] sm:$0xff]  ;;  %v10417_v55 = vld [vmem:[#allocation86_spill] sm:$0xff] }
 0xdf9   :  { %v10421_v17 = vld [vmem:[#allocation90_spill] sm:$0xff] }
 0xdfa   :  { %v8377_v53 = vadd.f32 %v3653_v60, %v3652_v24  ;;  %v10418_v60 = vld [vmem:[#allocation87_spill] sm:$0xff]  ;;  %v10419_v24 = vld [vmem:[#allocation88_spill] sm:$0xff] }
 0xdfc   :  { %4316 = vtanh.f32 %v8377_v53 }
 0xe09   :  { %v4317_v26 = vpop.eup %4316 }
 0xe0a   :  { %v3656_v36 = vmul.f32 %v4317_v26, %v3650_v5  ;;  %v10422_v5 = vld [vmem:[#allocation91_spill] sm:$0xff]  ;;  %v10423_v26 = vld [vmem:[#allocation92_spill] sm:$0xff] }
 0xe0c   :  { %3722 = vmatmul.mubr.f32.vlgmr.msra.gmra.mxu0 %v3656_v36  ;;  %3793 = vmatmul.mubr.f32.vlgmr.msra.gmra.mxu1 %v3656_v36  ;;  %v10424_v36 = vld [vmem:[#allocation93_spill] sm:$0xff] }
 0xe0d   :  { %3815 = vmatpush1.msra.mxu0 %v7892_v40  ;;  %3886 = vmatpush1.msra.mxu1 %v7895_v9  ;;  %v10379_v40 = vld [vmem:[#allocation48_spill] sm:$0xff]  ;;  %v10380_v9 = vld [vmem:[#allocation49_spill] sm:$0xff] }
 0xe0e   :  { %3816 = vmatprep.subr.mxu0 %v7898_v41  ;;  %3887 = vmatprep.subr.mxu1 %v7901_v35  ;;  %v10381_v41 = vld [vmem:[#allocation50_spill] sm:$0xff]  ;;  %v10382_v35 = vld [vmem:[#allocation51_spill] sm:$0xff] }
 0xe0f   :  { %3817 = vmatpush1.msra.mxu0 %v10372_v31  ;;  %3888 = vmatpush1.msra.mxu1 %v10373_v59  ;;  %v10425_v31 = vld [vmem:[#allocation94_spill] sm:$0xff]  ;;  %v10426_v59 = vld [vmem:[#allocation95_spill] sm:$0xff] }
 0xe10   :  { %3818 = vmatprep.subr.mxu0 %v10374_v12  ;;  %3889 = vmatprep.subr.mxu1 %v10375_v8  ;;  %v10427_v12 = vld [vmem:[#allocation96_spill] sm:$0xff]  ;;  %v10428_v8 = vld [vmem:[#allocation97_spill] sm:$0xff] }
 0xe11   :  { %3819 = vmatpush1.msra.mxu0 %v10376_v11  ;;  %3890 = vmatpush1.msra.mxu1 %v10377_v45  ;;  %v10429_v11 = vld [vmem:[#allocation98_spill] sm:$0xff]  ;;  %v10430_v45 = vld [vmem:[#allocation99_spill] sm:$0xff] }
 0xe12   :  { %3820 = vmatprep.subr.mxu0 %v10378_v63  ;;  %3891 = vmatprep.subr.mxu1 %v10379_v40  ;;  %v10431_v63 = vld [vmem:[#allocation100_spill] sm:$0xff]  ;;  %v10432_v40 = vld [vmem:[#allocation101_spill] sm:$0xff] }
 0xe13   :  { %3821 = vmatpush1.msra.mxu0 %v10380_v9  ;;  %3892 = vmatpush1.msra.mxu1 %v10381_v41  ;;  %v10433_v9 = vld [vmem:[#allocation102_spill] sm:$0xff]  ;;  %v10434_v41 = vld [vmem:[#allocation103_spill] sm:$0xff] }
 0xe14   :  { %3822 = vmatprep.subr.mxu0 %v10382_v35  ;;  %3893 = vmatprep.subr.mxu1 %v10383_v13  ;;  %v10435_v35 = vld [vmem:[#allocation104_spill] sm:$0xff]  ;;  %v10436_v13 = vld [vmem:[#allocation105_spill] sm:$0xff] }
 0xe15   :  { %3823 = vmatpush1.msra.mxu0 %v10384_v44  ;;  %3894 = vmatpush1.msra.mxu1 %v10385_v61  ;;  %v10437_v44 = vld [vmem:[#allocation106_spill] sm:$0xff]  ;;  %v10438_v61 = vld [vmem:[#allocation107_spill] sm:$0xff] }
 0xe16   :  { %3824 = vmatprep.subr.mxu0 %v10386_v43  ;;  %3895 = vmatprep.subr.mxu1 %v10387_v57  ;;  %v10439_v43 = vld [vmem:[#allocation108_spill] sm:$0xff]  ;;  %v10441_v57 = vld [vmem:[#allocation110_spill] sm:$0xff] }
 0xe17   :  { %3825 = vmatpush1.msra.mxu0 %v10388_v19  ;;  %3896 = vmatpush1.msra.mxu1 %v10389_v16  ;;  %v10442_v19 = vld [vmem:[#allocation111_spill] sm:$0xff]  ;;  %v10443_v16 = vld [vmem:[#allocation112_spill] sm:$0xff] }
 0xe18   :  { %3826 = vmatprep.subr.mxu0 %v10390_v52  ;;  %3897 = vmatprep.subr.mxu1 %v10391_v47  ;;  %v10444_v52 = vld [vmem:[#allocation113_spill] sm:$0xff]  ;;  %v10445_v47 = vld [vmem:[#allocation114_spill] sm:$0xff] }
 0xe19   :  { %3827 = vmatpush1.msra.mxu0 %v10392_v62  ;;  %3898 = vmatpush1.msra.mxu1 %v10393_v28  ;;  %v10446_v62 = vld [vmem:[#allocation115_spill] sm:$0xff]  ;;  %v10447_v28 = vld [vmem:[#allocation116_spill] sm:$0xff] }
 0xe1a   :  { %3828 = vmatprep.subr.mxu0 %v10394_v18  ;;  %3899 = vmatprep.subr.mxu1 %v10395_v22  ;;  %v10448_v18 = vld [vmem:[#allocation117_spill] sm:$0xff]  ;;  %v10449_v22 = vld [vmem:[#allocation118_spill] sm:$0xff] }
 0xe1b   :  { %3829 = vmatpush1.msra.mxu0 %v10396_v21  ;;  %3900 = vmatpush1.msra.mxu1 %v10397_v48  ;;  %v10450_v21 = vld [vmem:[#allocation119_spill] sm:$0xff]  ;;  %v10451_v48 = vld [vmem:[#allocation120_spill] sm:$0xff] }
 0xe1c   :  { %3830 = vmatprep.subr.mxu0 %v10398_v15  ;;  %3901 = vmatprep.subr.mxu1 %v10399_v30  ;;  %v10452_v15 = vld [vmem:[#allocation121_spill] sm:$0xff]  ;;  %v10453_v30 = vld [vmem:[#allocation122_spill] sm:$0xff] }
 0xe1d   :  { %3831 = vmatpush1.msra.mxu0 %v10400_v23  ;;  %3902 = vmatpush1.msra.mxu1 %v10401_v29  ;;  %v10454_v23 = vld [vmem:[#allocation123_spill] sm:$0xff]  ;;  %v10455_v29 = vld [vmem:[#allocation124_spill] sm:$0xff] }
 0xe1e   :  { %3832 = vmatprep.subr.mxu0 %v10402_v1  ;;  %3903 = vmatprep.subr.mxu1 %v10403_v27  ;;  %v10456_v1 = vld [vmem:[#allocation125_spill] sm:$0xff]  ;;  %v10457_v27 = vld [vmem:[#allocation126_spill] sm:$0xff] }
 0xe1f   :  { %3833 = vmatpush1.msra.mxu0 %v10404_v6  ;;  %3904 = vmatpush1.msra.mxu1 %v10405_v38  ;;  %v10458_v6 = vld [vmem:[#allocation127_spill] sm:$0xff]  ;;  %v10459_v38 = vld [vmem:[#allocation128_spill] sm:$0xff] }
 0xe20   :  { %3834 = vmatprep.subr.mxu0 %v10406_v4  ;;  %3905 = vmatprep.subr.mxu1 %v10407_v32  ;;  %v10460_v4 = vld [vmem:[#allocation129_spill] sm:$0xff]  ;;  %v10461_v32 = vld [vmem:[#allocation130_spill] sm:$0xff] }
 0xe21   :  { %3835 = vmatpush1.msra.mxu0 %v10408_v0  ;;  %3906 = vmatpush1.msra.mxu1 %v10409_v37  ;;  %v10462_v0 = vld [vmem:[#allocation131_spill] sm:$0xff]  ;;  %v10463_v37 = vld [vmem:[#allocation132_spill] sm:$0xff] }
 0xe22   :  { %3836 = vmatprep.subr.mxu0 %v10410_v42  ;;  %3907 = vmatprep.subr.mxu1 %v10411_v46  ;;  %v10464_v42 = vld [vmem:[#allocation133_spill] sm:$0xff]  ;;  %v10465_v46 = vld [vmem:[#allocation134_spill] sm:$0xff] }
 0xe23   :  { %3837 = vmatpush1.msra.mxu0 %v10412_v56  ;;  %3908 = vmatpush1.msra.mxu1 %v10413_v51  ;;  %v10466_v56 = vld [vmem:[#allocation135_spill] sm:$0xff]  ;;  %v10467_v51 = vld [vmem:[#allocation136_spill] sm:$0xff] }
 0xe24   :  { %3838 = vmatprep.subr.mxu0 %v10414_v49  ;;  %3909 = vmatprep.subr.mxu1 %v10415_v39  ;;  %v10468_v49 = vld [vmem:[#allocation137_spill] sm:$0xff]  ;;  %v10469_v39 = vld [vmem:[#allocation138_spill] sm:$0xff] }
 0xe25   :  { %3839 = vmatpush1.msra.mxu0 %v10416_v3  ;;  %3910 = vmatpush1.msra.mxu1 %v10417_v55  ;;  %v10470_v3 = vld [vmem:[#allocation139_spill] sm:$0xff]  ;;  %v10471_v55 = vld [vmem:[#allocation140_spill] sm:$0xff] }
 0xe26   :  { %3840 = vmatprep.subr.mxu0 %v10418_v60  ;;  %3911 = vmatprep.subr.mxu1 %v10419_v24  ;;  %v10472_v60 = vld [vmem:[#allocation141_spill] sm:$0xff]  ;;  %v10473_v24 = vld [vmem:[#allocation142_spill] sm:$0xff] }
 0xe27   :  { %3841 = vmatpush1.msra.mxu0 %v10420_v2  ;;  %3912 = vmatpush1.msra.mxu1 %v10421_v17  ;;  %v10474_v2 = vld [vmem:[#allocation143_spill] sm:$0xff]  ;;  %v10475_v17 = vld [vmem:[#allocation144_spill] sm:$0xff] }
 0xe28   :  { %3842 = vmatprep.subr.mxu0 %v10422_v5  ;;  %3913 = vmatprep.subr.mxu1 %v10423_v26  ;;  %v10476_v5 = vld [vmem:[#allocation145_spill] sm:$0xff]  ;;  %v10477_v26 = vld [vmem:[#allocation146_spill] sm:$0xff] }
 0xe29   :  { %3843 = vmatpush1.msra.mxu0 %v10424_v36  ;;  %3914 = vmatpush1.msra.mxu1 %v10425_v31  ;;  %v10478_v36 = vld [vmem:[#allocation147_spill] sm:$0xff]  ;;  %v10479_v31 = vld [vmem:[#allocation148_spill] sm:$0xff] }
 0xe2a   :  { %3844 = vmatprep.subr.mxu0 %v10426_v59  ;;  %3915 = vmatprep.subr.mxu1 %v10427_v12  ;;  %v10480_v59 = vld [vmem:[#allocation149_spill] sm:$0xff]  ;;  %v10481_v12 = vld [vmem:[#allocation150_spill] sm:$0xff] }
 0xe2b   :  { %3845 = vmatpush1.msra.mxu0 %v10428_v8  ;;  %3878 = vmatprep.mubr.f32.mxu0 %v9387_v25  ;;  %v10482_v8 = vld [vmem:[#allocation151_spill] sm:$0xff] }
 0xe2c   :  { %3916 = vmatpush1.msra.mxu1 %v10429_v11  ;;  %3949 = vmatprep.mubr.f32.mxu1 %v9387_v25  ;;  %v10483_v11 = vld [vmem:[#allocation152_spill] sm:$0xff] }
 0xe2d   :  { %3879 = vmatmul.mubr.f32.vlgmr.msra.gmra.mxu0 %v8298_v14  ;;  %3950 = vmatmul.mubr.f32.vlgmr.msra.gmra.mxu1 %v8298_v14  ;;  %v10440_v14 = vld [vmem:[#allocation109_spill] sm:$0xff] }
 0xe2e   :  { %3975 = vmatprep.subr.mxu0 %v10430_v45  ;;  %4046 = vmatprep.subr.mxu1 %v10431_v63  ;;  %v10484_v45 = vld [vmem:[#allocation153_spill] sm:$0xff]  ;;  %v10485_v63 = vld [vmem:[#allocation154_spill] sm:$0xff] }
 0xe2f   :  { %3976 = vmatpush1.msra.mxu0 %v10432_v40  ;;  %4047 = vmatpush1.msra.mxu1 %v10433_v9  ;;  %v10486_v40 = vld [vmem:[#allocation155_spill] sm:$0xff]  ;;  %v10487_v9 = vld [vmem:[#allocation156_spill] sm:$0xff] }
 0xe30   :  { %3977 = vmatprep.subr.mxu0 %v10434_v41  ;;  %4048 = vmatprep.subr.mxu1 %v10435_v35  ;;  %v10488_v41 = vld [vmem:[#allocation157_spill] sm:$0xff]  ;;  %v10489_v35 = vld [vmem:[#allocation171_spill] sm:$0xff] }
 0xe31   :  { %3978 = vmatpush1.msra.mxu0 %v10436_v13  ;;  %4049 = vmatpush1.msra.mxu1 %v10437_v44  ;;  %v10490_v13 = vld [vmem:[#allocation172_spill] sm:$0xff]  ;;  %v10491_v44 = vld [vmem:[#allocation173_spill] sm:$0xff] }
 0xe32   :  { %3979 = vmatprep.subr.mxu0 %v10438_v61  ;;  %4050 = vmatprep.subr.mxu1 %v10439_v43  ;;  %v10492_v61 = vld [vmem:[#allocation174_spill] sm:$0xff]  ;;  %v10493_v43 = vld [vmem:[#allocation168_spill] sm:$0xff] }
 0xe33   :  { %3980 = vmatpush1.msra.mxu0 %v10440_v14  ;;  %4051 = vmatpush1.msra.mxu1 %v10441_v57  ;;  %v3804_v14 = vpop.permute.xlu1 %3803 }
 0xe34   :  { %3981 = vmatprep.subr.mxu0 %v10442_v19  ;;  %4052 = vmatprep.subr.mxu1 %v10443_v16  ;;  %v10494_v16 = vld [vmem:[#allocation160_spill] sm:$0xff] }
 0xe35   :  { %3982 = vmatpush1.msra.mxu0 %v10444_v52  ;;  %4053 = vmatpush1.msra.mxu1 %v10445_v47  ;;  %v3806_v52 = vmul.f32 %v3804_v14, %v10494_v16  ;;  %v10495_v47 = vld [vmem:[#allocation162_spill] sm:$0xff] }
 0xe36   :  { %3983 = vmatprep.subr.mxu0 %v10446_v62  ;;  %4054 = vmatprep.subr.mxu1 %v10447_v28  ;;  %v3807_v62 = vmul.f32 %v3804_v14, %v10495_v47 }
 0xe37   :  { %3984 = vmatpush1.msra.mxu0 %v10448_v18  ;;  %4055 = vmatpush1.msra.mxu1 %v10449_v22  ;;  %v10496_v22 = vld [vmem:[#allocation164_spill] sm:$0xff] }
 0xe38   :  { %3985 = vmatprep.subr.mxu0 %v10450_v21  ;;  %4056 = vmatprep.subr.mxu1 %v10451_v48  ;;  %v3809_v21 = vmul.f32 %v3804_v14, %v10496_v22  ;;  %v10497_v48 = vld [vmem:[#allocation163_spill] sm:$0xff] }
 0xe39   :  { %3986 = vmatpush1.msra.mxu0 %v10452_v15  ;;  %4057 = vmatpush1.msra.mxu1 %v10453_v30  ;;  %v3810_v15 = vadd.f32 %v3806_v52, %v10497_v48 }
 0xe3a   :  { %3987 = vmatprep.subr.mxu0 %v10454_v23  ;;  %4058 = vmatprep.subr.mxu1 %v10455_v29 }
 0xe3b   :  { %3988 = vmatpush1.msra.mxu0 %v10456_v1  ;;  %4059 = vmatpush1.msra.mxu1 %v10457_v27  ;;  %v10498_v1 = vld [vmem:[#allocation167_spill] sm:$0xff] }
 0xe3c   :  { %3989 = vmatprep.subr.mxu0 %v10458_v6  ;;  %4060 = vmatprep.subr.mxu1 %v10459_v38  ;;  %v3811_v27 = vadd.f32 %v3807_v62, %v10498_v1 }
 0xe3d   :  { %3990 = vmatpush1.msra.mxu0 %v10460_v4  ;;  %4061 = vmatpush1.msra.mxu1 %v10461_v32  ;;  %v3813_v4 = vadd.f32 %v3809_v21, %v9852_v33 }
 0xe3e   :  { %3991 = vmatprep.subr.mxu0 %v10462_v0  ;;  %4062 = vmatprep.subr.mxu1 %v10463_v37  ;;  %v3808_v0 = vmul.f32 %v3804_v14, %v5694_v58 }
 0xe3f   :  { %3992 = vmatpush1.msra.mxu0 %v10464_v42  ;;  %4063 = vmatpush1.msra.mxu1 %v10465_v46 }
 0xe40   :  { %3993 = vmatprep.subr.mxu0 %v10466_v56  ;;  %4064 = vmatprep.subr.mxu1 %v10467_v51  ;;  %v3812_v37 = vadd.f32 %v3808_v0, %v5697_v50 }
 0xe41   :  { %3994 = vmatpush1.msra.mxu0 %v10468_v49  ;;  %4065 = vmatpush1.msra.mxu1 %v10469_v39 }
 0xe42   :  { %3995 = vmatprep.subr.mxu0 %v10470_v3  ;;  %4066 = vmatprep.subr.mxu1 %v10471_v55 }
 0xe43   :  { %3996 = vmatpush1.msra.mxu0 %v10472_v60  ;;  %4067 = vmatpush1.msra.mxu1 %v10473_v24 }
 0xe44   :  { %3997 = vmatprep.subr.mxu0 %v10474_v2  ;;  %4068 = vmatprep.subr.mxu1 %v10475_v17 }
 0xe45   :  { %3998 = vmatpush1.msra.mxu0 %v10476_v5  ;;  %4069 = vmatpush1.msra.mxu1 %v10477_v26 }
 0xe46   :  { %3999 = vmatprep.subr.mxu0 %v10478_v36  ;;  %4070 = vmatprep.subr.mxu1 %v10479_v31 }
 0xe47   :  { %4000 = vmatpush1.msra.mxu0 %v10480_v59  ;;  %4071 = vmatpush1.msra.mxu1 %v10481_v12 }
 0xe48   :  { %4001 = vmatprep.subr.mxu0 %v10482_v8  ;;  %4072 = vmatprep.subr.mxu1 %v10483_v11 }
 0xe49   :  { %4002 = vmatpush1.msra.mxu0 %v10484_v45  ;;  %4073 = vmatpush1.msra.mxu1 %v10485_v63 }
 0xe4a   :  { %4003 = vmatprep.subr.mxu0 %v10486_v40  ;;  %4074 = vmatprep.subr.mxu1 %v10487_v9 }
 0xe4b   :  { %4004 = vmatpush1.msra.mxu0 %v10488_v41  ;;  %4075 = vmatpush1.msra.mxu1 %v10489_v35 }
 0xe4c   :  { %4005 = vmatprep.subr.mxu0 %v10490_v13  ;;  %4076 = vmatprep.subr.mxu1 %v10491_v44 }
 0xe4d   :  { %4006 = vmatpush1.msra.mxu0 %v10492_v61  ;;  %4039 = vmatprep.mubr.f32.mxu0 %v9387_v25 }
 0xe4e   :  { %4077 = vmatpush1.msra.mxu1 %v10493_v43  ;;  %4110 = vmatprep.mubr.f32.mxu1 %v9387_v25 }
 0xecc   :  { %v3723_v57 = vpop.f32.mrf.mxu0  ;;  %v3794_v19 = vpop.f32.mrf.mxu1 }
 0xecd   :  { %v3724_v50 = vadd.f32 %v3723_v57, %v10370_v10  ;;  %v3795_v40 = vadd.f32 %v3794_v19, %v5793_v54  ;;  %v4167_v54 = vld [vmem:[%s8539_s7] ss:$0 sm:$0xff] }
 0xece   :  { %v3725_v28 = vpop.f32.mrf.mxu0  ;;  %v3796_v18 = vpop.f32.mrf.mxu1 }
 0xecf   :  { %v3726_v59 = vadd.f32 %v3725_v28, %v10371_v20  ;;  %v3797_v12 = vadd.f32 %v3796_v18, %v5784_v34  ;;  %v4168_v18 = vld [vmem:[#allocation2] ss:$0 sm:$0xff] }
 0xeed   :  { %v3880_v30 = vpop.f32.mrf.mxu0  ;;  %v3951_v23 = vpop.f32.mrf.mxu1 }
 0xeee   :  { %v3956_v29 = vadd.f32 %v3880_v30, %v3810_v15  ;;  %v3958_v42 = vadd.f32 %v3951_v23, %v3812_v37 }
 0xeef   :  { %v3882_v6 = vpop.f32.mrf.mxu0  ;;  %v3953_v25 = vpop.f32.mrf.mxu1 }
 0xef0   :  { %4318 = vtanh.f32 %v3956_v29  ;;  %v3957_v38 = vadd.f32 %v3882_v6, %v3811_v27  ;;  %v3959_v32 = vadd.f32 %v3953_v25, %v3813_v4 }
 0xef2   :  { %4320 = vtanh.f32 %v3957_v38 }
 0xef3   :  { %4322 = vtanh.f32 %v3959_v32 }
 0xef4   :  { %4324 = vtanh.f32 %v3958_v42 }
 0xefd   :  { %v4319_v46 = vpop.eup %4318 }
 0xefe   :  { %v3963_v56 = vmul.f32 0.5, %v4319_v46 }
 0xeff   :  { %v4321_v51 = vpop.eup %4320 }
 0xf00   :  { %v3966_v49 = vadd.f32 0.5, %v3963_v56  ;;  %v3964_v39 = vmul.f32 0.5, %v4321_v51  ;;  %v4323_v55 = vpop.eup %4322 }
 0xf01   :  { %v4325_v2 = vpop.eup %4324 }
 0xf02   :  { %v3967_v3 = vadd.f32 0.5, %v3964_v39  ;;  %v3971_v24 = vmul.f32 %v4323_v55, %v3966_v49  ;;  %v3965_v17 = vmul.f32 0.5, %v4325_v2 }
 0xf04   :  { %v3970_v60 = vmul.f32 %v3967_v3, %v8295_v7  ;;  %v3968_v58 = vadd.f32 0.5, %v3965_v17 }
 0xf06   :  { %v3972_v33 = vadd.f32 %v3971_v24, %v3970_v60 }
 0xf08   :  { %4326 = vtanh.f32 %v3972_v33 }
 0xf15   :  { %v4327_v5 = vpop.eup %4326 }
 0xf16   :  { %v3974_v26 = vmul.f32 %v4327_v5, %v3968_v58 }
 0xf18   :  { %4040 = vmatmul.mubr.f32.vlgmr.msra.gmra.mxu0 %v3974_v26  ;;  %4111 = vmatmul.mubr.f32.vlgmr.msra.gmra.mxu1 %v3974_v26 }
 0xfd8   :  { %v4041_v36 = vpop.f32.mrf.mxu0  ;;  %v4112_v31 = vpop.f32.mrf.mxu1 }
 0xfd9   :  { %v4042_v8 = vadd.f32 %v4041_v36, %v3724_v50  ;;  %v4113_v9 = vadd.f32 %v4112_v31, %v3795_v40 }
 0xfda   :  { %v4043_v7 = vpop.f32.mrf.mxu0  ;;  %v4114_v11 = vpop.f32.mrf.mxu1 }
 0xfdb   :  { %4328 = vtanh.f32 %v4042_v8  ;;  %v4044_v45 = vadd.f32 %v4043_v7, %v3726_v59  ;;  %v4115_v63 = vadd.f32 %v4114_v11, %v3797_v12 }
 0xfdd   :  { %4330 = vtanh.f32 %v4044_v45 }
 0xfde   :  { %4332 = vtanh.f32 %v4115_v63 }
 0xfdf   :  { %4334 = vtanh.f32 %v4113_v9 }
 0xfe8   :  { %v4329_v41 = vpop.eup %4328 }
 0xfe9   :  { %v4120_v35 = vmul.f32 0.5, %v4329_v41 }
 0xfea   :  { %v4331_v10 = vpop.eup %4330 }
 0xfeb   :  { %v4123_v13 = vadd.f32 0.5, %v4120_v35  ;;  %v4121_v44 = vmul.f32 0.5, %v4331_v10  ;;  %v4333_v20 = vpop.eup %4332 }
 0xfec   :  { %v4335_v57 = vpop.eup %4334 }
 0xfed   :  { %v4124_v61 = vadd.f32 0.5, %v4121_v44  ;;  %v4128_v34 = vmul.f32 %v4333_v20, %v4123_v13  ;;  %v4122_v16 = vmul.f32 0.5, %v4335_v57 }
 0xfef   :  { %v4127_v43 = vmul.f32 %v4124_v61, %v8377_v53  ;;  %v4125_v52 = vadd.f32 0.5, %v4122_v16 }
 0xff1   :  { %v4129_v14 = vadd.f32 %v4128_v34, %v4127_v43 }
 0xff3   :  { %4336 = vtanh.f32 %v4129_v14 }
0x1000   :  { %v4337_v47 = vpop.eup %4336 }
0x1001   :  { %v4131_v19 = vmul.f32 %v4337_v47, %v4125_v52 }
0x1003   :  { %v4139_v62 = vmul.f32 %v4167_v54, %v4131_v19 }
0x1005   :  { %v4141_v28 = vsel %vm4140_vm0, %v4139_v62, 0.0 }
0x1006   :  { %4142 = vadd.xlane.f32.xlu0 %v4141_v28 }
0x108f   :  { %v4143_v22 = vpop.xlane.xlu0 %4142 }
0x1090   :  { %v4151_v21 = vadd.f32 %v4168_v18, %v4143_v22 }
0x1092   :  { %4153 = vst.msk [vmem:[%s8541_s9] sm:$0x3] %vm4152_vm1, %v4151_v21 }
0x1093   :  { %4158 = vsyncpa [#allocation4], 1 }
0x1094   :  { %4159 = vsyncpa [#allocation6], 1 }

</bundles_post_ra>
